<compile_context>
chip_gen: v7x
topology: tpu7x:2x2x1
jax: 0.10.0
libtpu: 0.0.40
codegen_flags: <defaults>
</compile_context>

<pallas_src>
import itertools

import jax
import jax.numpy as jnp
from jax import lax
from jax.experimental import pallas as pl
from jax.experimental.pallas import tpu as pltpu

KVOL = 27  # 3*3*3 kernel volume


# ---------------------------------------------------------------------------
# Pallas kernels
# ---------------------------------------------------------------------------
def _conv_stats_kernel(g_ref, w_ref, conv_ref, psum_ref, psq_ref):
    """One fused matmul per row tile: (tile, 27*Cin) x (27*Cin, Cpad) with f32
    accumulation, plus per-tile partial sum / sum-of-squares for BatchNorm."""
    acc = jnp.dot(g_ref[...], w_ref[...], preferred_element_type=jnp.float32)
    conv_ref[...] = acc.astype(conv_ref.dtype)
    # padded rows gathered the all-zero feature row -> contribute exactly 0
    psum_ref[...] = jnp.sum(acc, axis=0, keepdims=True)[None]
    psq_ref[...] = jnp.sum(acc * acc, axis=0, keepdims=True)[None]


def _bn_relu_kernel(x_ref, scale_ref, shift_ref, o_ref):
    """Fused affine BatchNorm + ReLU on a lane-dense (rows, 128) view."""
    x = x_ref[...].astype(jnp.float32)
    o_ref[...] = jnp.maximum(x * scale_ref[...] + shift_ref[...], 0.0)


# ---------------------------------------------------------------------------
# Kernel-map construction: O(N log N) sorted-key lookup (plain-JAX glue)
# ---------------------------------------------------------------------------
def _build_kernel_map(coords, n):
    """nbr[i, k] = j such that coords[j] == coords[i] - offset[k] (same batch),
    or n (index of an appended all-zero feature row) if no such voxel exists.
    Mirrored offsets == transposed-conv kernel map at stride 1.
    Assumes unique voxels per batch and that the packed key fits int32
    (batch * (X+3)*(Y+3)*(Z+3) < 2**31) — fine for typical sparse-MVS grids."""
    offs = jnp.asarray(list(itertools.product((-1, 0, 1), repeat=3)),
                       jnp.int32)                                   # (27, 3)
    tgt_b = jnp.broadcast_to(coords[:, None, :1], (n, KVOL, 1))
    tgt_xyz = coords[:, None, 1:] - offs[None, :, :]                # (N,27,3)

    # collision-free integer key: shift spatial coords by +1 so -1 stays valid
    maxs = jnp.max(coords[:, 1:], axis=0) + 3                       # (3,)

    def encode(b, xyz):
        k = b[..., 0]
        for d in range(3):
            k = k * maxs[d] + (xyz[..., d] + 1)
        return k

    keys = encode(coords[:, :1], coords[:, 1:])                     # (N,)
    order = jnp.argsort(keys)
    skeys = keys[order]
    tkeys = encode(tgt_b, tgt_xyz)                                  # (N, 27)
    pos = jnp.minimum(jnp.searchsorted(skeys, tkeys), n - 1)
    found = skeys[pos] == tkeys
    return jnp.where(found, order[pos], n).astype(jnp.int32)        # (N, 27)


# ---------------------------------------------------------------------------
# Block forward: sparse transposed conv (stride=1) + BatchNorm + ReLU
# ---------------------------------------------------------------------------
def sparse_deconv_block(coords, feats, weight, gamma, beta, *,
                        eps=1e-5, tile=2048, bn_rows=2048,
                        compute_dtype=jnp.bfloat16):
    n, cin = feats.shape
    cout = weight.shape[2]
    assert cout <= 128, "only Cout <= 128 supported in this block"
    # pad Cout up to the next power of two (a divisor of 128) -> every store
    # in both kernels is lane-dense; padded channels are exactly zero.
    cpad = 1
    while cpad < cout:
        cpad *= 2
    tile = max(128, (tile // 128) * 128)
    kfull = KVOL * cin

    # ---- kernel map + row padding (padded rows hit the appended zero row) --
    nbr = _build_kernel_map(coords, n)                              # (N, 27)
    n_pad = pl.cdiv(n, tile) * tile
    ntiles = n_pad // tile
    nbr = jnp.pad(nbr, ((0, n_pad - n), (0, 0)), constant_values=n)

    # ---- single wrapper-side gather, directly in the compute dtype ---------
    feats_ext = jnp.concatenate(
        [feats.astype(compute_dtype), jnp.zeros((1, cin), compute_dtype)], 0)
    g = feats_ext[nbr].reshape(n_pad, kfull)            # (N_pad, 27*Cin) bf16

    w2 = jnp.zeros((kfull, cpad), compute_dtype)
    w2 = w2.at[:, :cout].set(weight.reshape(kfull, cout).astype(compute_dtype))

    cparams = pltpu.CompilerParams(dimension_semantics=("parallel",),
                                   vmem_limit_bytes=32 * 1024 * 1024)

    # ---- kernel 1: fused conv matmul + per-tile BN partial stats -----------
    conv, psum, psq = pl.pallas_call(
        _conv_stats_kernel,
        out_shape=(jax.ShapeDtypeStruct((n_pad, cpad), compute_dtype),
                   jax.ShapeDtypeStruct((ntiles, 1, cpad), jnp.float32),
                   jax.ShapeDtypeStruct((ntiles, 1, cpad), jnp.float32)),
        grid=(ntiles,),
        in_specs=[pl.BlockSpec((tile, kfull), lambda i: (i, 0)),
                  pl.BlockSpec((kfull, cpad), lambda i: (0, 0))],
        out_specs=[pl.BlockSpec((tile, cpad), lambda i: (i, 0)),
                   pl.BlockSpec((1, 1, cpad), lambda i: (i, 0, 0)),
                   pl.BlockSpec((1, 1, cpad), lambda i: (i, 0, 0))],
        compiler_params=cparams,
    )(g, w2)

    # ---- BatchNorm affine fold (tiny scalar math, plain JAX, f32) ----------
    csum = jnp.sum(psum.reshape(ntiles, cpad), axis=0)
    csq = jnp.sum(psq.reshape(ntiles, cpad), axis=0)
    mean = csum / n
    var = jnp.maximum(csq / n - mean * mean, 0.0)   # biased var (training BN)
    gamma_p = jnp.ones((cpad,), jnp.float32).at[:cout].set(
        gamma.astype(jnp.float32))
    beta_p = jnp.zeros((cpad,), jnp.float32).at[:cout].set(
        beta.astype(jnp.float32))
    scale = gamma_p / jnp.sqrt(var + eps)                           # (Cpad,)
    shift = beta_p - mean * scale                                   # (Cpad,)

    # ---- kernel 2: fused BatchNorm + ReLU on a lane-dense bitcast view -----
    rep = 128 // cpad
    rows = n_pad * cpad // 128                  # lane-dense row count
    tpr = tile * cpad // 128                    # lane-dense rows per conv tile
    grp = max(1, min(ntiles, max(1, bn_rows // tpr)))
    while ntiles % grp:                         # make the block divide exactly
        grp -= 1
    bt = tpr * grp

    xf = conv.reshape(rows, 128)                # row-major reshape == bitcast
    sc = jnp.tile(scale, rep).reshape(1, 128)   # lane j -> channel j % cpad
    sh = jnp.tile(shift, rep).reshape(1, 128)
    y = pl.pallas_call(
        _bn_relu_kernel,
        out_shape=jax.ShapeDtypeStruct((rows, 128), jnp.float32),
        grid=(rows // bt,),
        in_specs=[pl.BlockSpec((bt, 128), lambda i: (i, 0)),
                  pl.BlockSpec((1, 128), lambda i: (0, 0)),
                  pl.BlockSpec((1, 128), lambda i: (0, 0))],
        out_specs=pl.BlockSpec((bt, 128), lambda i: (i, 0)),
        compiler_params=cparams,
    )(xf, sc, sh)

    return y.reshape(n_pad, cpad)[:n, :cout]


# ---------------------------------------------------------------------------
# Pure-JAX reference (same transposed-conv / training-BN semantics)
# ---------------------------------------------------------------------------
def _reference(coords, feats, weight, gamma, beta, eps=1e-5):
    n = feats.shape[0]
    offs = jnp.asarray(list(itertools.product((-1, 0, 1), repeat=3)),
                       jnp.int32)
    tgt = jnp.concatenate(
        [jnp.broadcast_to(coords[:, None, :1], (n, KVOL, 1)),
         coords[:, None, 1:] - offs[None, :, :]], axis=-1)
    eq = jnp.all(tgt[:, :, None, :] == coords[None, None, :, :], axis=-1)
    valid = jnp.any(eq, axis=-1).astype(feats.dtype)
    idx = jnp.argmax(eq, axis=-1)
    gathered = feats[idx] * valid[..., None]                    # (N, 27, Cin)
    conv = jnp.einsum('nki,kio->no', gathered, weight,
                      precision=lax.Precision.HIGHEST)
    mean = conv.mean(0)
    var = ((conv - mean) ** 2).mean(0)                          # biased
    norm = (conv - mean) / jnp.sqrt(var + eps) * gamma + beta
    return jnp.maximum(norm, 0.0)


if __name__ == "__main__":
    # Shapes consistent with SparseCostRegNet(d_base=8) conv11: 16 -> 8 ch.
    inc, outc = 16, 8
    batch, grid_res, pts_per_batch = 2, 8, 200

    key = jax.random.PRNGKey(0)
    kc, kf, kw = jax.random.split(key, 3)

    # unique voxel coordinates per batch element
    coords_list = []
    for b, kk in enumerate(jax.random.split(kc, batch)):
        flat = jax.random.permutation(kk, grid_res ** 3)[:pts_per_batch]
        x = flat // (grid_res * grid_res)
        y = (flat // grid_res) % grid_res
        z = flat % grid_res
        coords_list.append(
            jnp.stack([jnp.full_like(flat, b), x, y, z], axis=-1))
    coords = jnp.concatenate(coords_list, axis=0).astype(jnp.int32)  # (400,4)
    n = coords.shape[0]

    feats = jax.random.normal(kf, (n, inc), jnp.float32)
    # spnn.Conv3d weight layout: [kernel_volume, inc, outc]
    weight = jax.random.normal(kw, (KVOL, inc, outc), jnp.float32) * 0.1
    gamma = jnp.ones((outc,), jnp.float32)   # nn.BatchNorm1d default weight
    beta = jnp.zeros((outc,), jnp.float32)   # nn.BatchNorm1d default bias

    ref = _reference(coords, feats, weight, gamma, beta)

    # f32 compute path: tight semantic check
    out32 = sparse_deconv_block(coords, feats, weight, gamma, beta,
                                compute_dtype=jnp.float32)
    out32 = jax.block_until_ready(out32)
    assert out32.shape == (n, outc)
    assert jnp.max(jnp.abs(out32 - ref)) < 5e-3, "f32 path mismatch"

    # bf16 compute path (default, MXU / HBM optimized): looser tolerance
    # (bf16 gather + bf16 conv intermediate)
    out16 = sparse_deconv_block(coords, feats, weight, gamma, beta)
    out16 = jax.block_until_ready(out16)
    assert out16.shape == (n, outc)
    assert jnp.max(jnp.abs(out16 - ref)) < 6e-2, "bf16 path mismatch"

    print("KERNEL_OK")
</pallas_src>

<mosaic_0001>
module attributes {stable_mosaic.version = 11 : i64} {
  func.func @_conv_stats_kernel(%arg0: i32, %arg1: memref<2048x432xf32, #tpu.memory_space<vmem>>, %arg2: memref<432x8xf32, #tpu.memory_space<vmem>>, %arg3: memref<2048x8xf32, #tpu.memory_space<vmem>>, %arg4: memref<1x1x8xf32, #tpu.memory_space<vmem>>, %arg5: memref<1x1x8xf32, #tpu.memory_space<vmem>>) attributes {dimension_semantics = [#tpu.dimension_semantics<parallel>], iteration_bounds = array<i64: 1>, scalar_prefetch = 0 : i64, scratch_operands = 0 : i64, tpu.core_type = #tpu.core_type<tc>, window_params = [{transform_indices = @transform_0, window_bounds = array<i64: 2048, 432>}, {pipeline_mode = #tpu.pipeline_mode<synchronous>, transform_indices = @transform_1, window_bounds = array<i64: 432, 8>}, {transform_indices = @transform_2, window_bounds = array<i64: 2048, 8>}, {transform_indices = @transform_3, window_bounds = array<i64: 1, 1, 8>}, {transform_indices = @transform_4, window_bounds = array<i64: 1, 1, 8>}]} {
    %c0 = arith.constant 0 : index
    %c0_0 = arith.constant 0 : index
    %0 = vector.load %arg1[%c0, %c0_0] : memref<2048x432xf32, #tpu.memory_space<vmem>>, vector<2048x432xf32>
    %c0_1 = arith.constant 0 : index
    %c0_2 = arith.constant 0 : index
    %1 = vector.load %arg2[%c0_1, %c0_2] : memref<432x8xf32, #tpu.memory_space<vmem>>, vector<432x8xf32>
    %cst = arith.constant dense<0.000000e+00> : vector<2048x8xf32>
    %2 = tpu.matmul %0, %1, %cst {dimension_numbers = #tpu.dot_dimension_numbers<[1], [0], [0], [1], [0, 0, 1, 1], [], []>} : vector<2048x432xf32>, vector<432x8xf32>, vector<2048x8xf32> -> vector<2048x8xf32>
    %c0_3 = arith.constant 0 : index
    %c0_4 = arith.constant 0 : index
    %3 = vector.load %arg3[%c0_3, %c0_4] : memref<2048x8xf32, #tpu.memory_space<vmem>>, vector<2048x8xf32>
    tpu.vector_store %arg3[%c0_3, %c0_4], %2 {strides = array<i32>} : memref<2048x8xf32, #tpu.memory_space<vmem>>, vector<2048x8xf32>,
    %cst_5 = arith.constant dense<0.000000e+00> : vector<8xf32>
    %4 = vector.multi_reduction <add>, %2, %cst_5 [0] : vector<2048x8xf32> to vector<8xf32>
    %5 = vector.shape_cast %4 : vector<8xf32> to vector<1x8xf32>
    %6 = vector.shape_cast %5 : vector<1x8xf32> to vector<1x1x8xf32>
    %c0_6 = arith.constant 0 : index
    %c0_7 = arith.constant 0 : index
    %c0_8 = arith.constant 0 : index
    %7 = vector.load %arg4[%c0_6, %c0_7, %c0_8] : memref<1x1x8xf32, #tpu.memory_space<vmem>>, vector<1x1x8xf32>
    tpu.vector_store %arg4[%c0_6, %c0_7, %c0_8], %6 {strides = array<i32>} : memref<1x1x8xf32, #tpu.memory_space<vmem>>, vector<1x1x8xf32>,
    %8 = arith.mulf %2, %2 : vector<2048x8xf32>
    %cst_9 = arith.constant dense<0.000000e+00> : vector<8xf32>
    %9 = vector.multi_reduction <add>, %8, %cst_9 [0] : vector<2048x8xf32> to vector<8xf32>
    %10 = vector.shape_cast %9 : vector<8xf32> to vector<1x8xf32>
    %11 = vector.shape_cast %10 : vector<1x8xf32> to vector<1x1x8xf32>
    %c0_10 = arith.constant 0 : index
    %c0_11 = arith.constant 0 : index
    %c0_12 = arith.constant 0 : index
    %12 = vector.load %arg5[%c0_10, %c0_11, %c0_12] : memref<1x1x8xf32, #tpu.memory_space<vmem>>, vector<1x1x8xf32>
    tpu.vector_store %arg5[%c0_10, %c0_11, %c0_12], %11 {strides = array<i32>} : memref<1x1x8xf32, #tpu.memory_space<vmem>>, vector<1x1x8xf32>,
    return
  }
  func.func @transform_0(%arg0: i32) -> (i32, i32) {
    %c0_i32 = arith.constant 0 : i32
    %c0_i32_0 = arith.constant 0 : i32
    return %arg0, %c0_i32 : i32, i32
  }
  func.func @transform_1(%arg0: i32) -> (i32, i32) {
    %c0_i32 = arith.constant 0 : i32
    %c0_i32_0 = arith.constant 0 : i32
    %c0_i32_1 = arith.constant 0 : i32
    return %c0_i32, %c0_i32_0 : i32, i32
  }
  func.func @transform_2(%arg0: i32) -> (i32, i32) {
    %c0_i32 = arith.constant 0 : i32
    %c0_i32_0 = arith.constant 0 : i32
    return %arg0, %c0_i32 : i32, i32
  }
  func.func @transform_3(%arg0: i32) -> (i32, i32, i32) {
    %c0_i32 = arith.constant 0 : i32
    %c0_i32_0 = arith.constant 0 : i32
    %c0_i32_1 = arith.constant 0 : i32
    return %arg0, %c0_i32, %c0_i32_0 : i32, i32, i32
  }
  func.func @transform_4(%arg0: i32) -> (i32, i32, i32) {
    %c0_i32 = arith.constant 0 : i32
    %c0_i32_0 = arith.constant 0 : i32
    %c0_i32_1 = arith.constant 0 : i32
    return %arg0, %c0_i32, %c0_i32_0 : i32, i32, i32
  }
}

</mosaic_0001>

<bundles_post_ra>
// kernel: tpu_custom_call.1
= control target key start
LH: loop header
LB: loop body
LE: loop exit
PB: predicated region body
PF: predicated region fallthrough
CT: control target
= control target key end

     0   :  { %10 = vsyncpa [#allocation3], 0  ;;  %v6779_v3 = vmov 0.0|0.0   ;;  %vm1094_vm0 = vcmask 392192   ;;  %s12494_s0 = inlined_call_operand.vmem [shape: f32[2048,432], index: 0, kind: input, shape index: {}]   ;;  %s12495_s1 = inlined_call_operand.vmem [shape: f32[432,8], index: 1, kind: input, shape index: {}]   ;;  %s12496_s2 = inlined_call_operand.vmem [shape: f32[2048,8], index: 2, kind: output, shape index: {0}]   ;;  %s12497_s3 = inlined_call_operand.hbm [shape: f32[1,1,8], index: 3, kind: output, shape index: {1}]   ;;  %s12498_s4 = inlined_call_operand.hbm [shape: f32[1,1,8], index: 4, kind: output, shape index: {2}]  }
   0x1   :  { %v1040_v0 = vld [vmem:[%s12495_s1] sm:$0xff]  ;;  %v1041_v1 = vld [vmem:[%s12495_s1 + $0x8] sm:$0xff]  ;;  %v1042_v2 = vld [vmem:[%s12495_s1 + $0x10] sm:$0xff]  ;;  %6391 = vmatprep.subr.bf16.mxu1 %v6779_v3  ;;  %6439 = vmatprep.subr.bf16.mxu0 %v6779_v3 }
   0x2   :  { %v6392_v4 = vpack.c.bf16 %v1041_v1, %v1040_v0  ;;  %v1043_v5 = vld [vmem:[%s12495_s1 + $0x18] sm:$0xff]  ;;  %v1072_v7 = vld [vmem:[%s12495_s1 + $0x100] sm:$0xff]  ;;  %v1073_v8 = vld [vmem:[%s12495_s1 + $0x108] sm:$0xff] }
   0x3   :  { %v6395_v6 = vpack.c.bf16 %v1043_v5, %v1042_v2  ;;  %v1044_v9 = vld [vmem:[%s12495_s1 + $0x20] sm:$0xff]  ;;  %v1045_v10 = vld [vmem:[%s12495_s1 + $0x28] sm:$0xff]  ;;  %v6440_v11 = vpack.c.bf16 %v1073_v8, %v1072_v7  ;;  %v1074_v12 = vld [vmem:[%s12495_s1 + $0x110] sm:$0xff] }
   0x4   :  { %6393 = vmatpush1.bf16.msra.mxu1 %v6392_v4  ;;  %v1075_v13 = vld [vmem:[%s12495_s1 + $0x118] sm:$0xff]  ;;  %v6398_v15 = vpack.c.bf16 %v1045_v10, %v1044_v9  ;;  %v1076_v16 = vld [vmem:[%s12495_s1 + $0x120] sm:$0xff]  ;;  %v1077_v17 = vld [vmem:[%s12495_s1 + $0x128] sm:$0xff] }
   0x5   :  { %6394 = vmatprep.subr.bf16.mxu1 %v6779_v3  ;;  %6441 = vmatpush1.bf16.msra.mxu0 %v6440_v11  ;;  %v6443_v14 = vpack.c.bf16 %v1075_v13, %v1074_v12  ;;  %v1046_v18 = vld [vmem:[%s12495_s1 + $0x30] sm:$0xff]  ;;  %v1047_v19 = vld [vmem:[%s12495_s1 + $0x38] sm:$0xff]  ;;  %v6446_v20 = vpack.c.bf16 %v1077_v17, %v1076_v16  ;;  %v1048_v24 = vld [vmem:[%s12495_s1 + $0x40] sm:$0xff] }
   0x6   :  { %6442 = vmatprep.subr.bf16.mxu0 %v6779_v3  ;;  %v6401_v21 = vpack.c.bf16 %v1047_v19, %v1046_v18  ;;  %v1078_v22 = vld [vmem:[%s12495_s1 + $0x130] sm:$0xff]  ;;  %v1079_v23 = vld [vmem:[%s12495_s1 + $0x138] sm:$0xff]  ;;  %v1049_v25 = vld [vmem:[%s12495_s1 + $0x48] sm:$0xff] }
   0x7   :  { %v6449_v26 = vpack.c.bf16 %v1079_v23, %v1078_v22  ;;  %v6404_v27 = vpack.c.bf16 %v1049_v25, %v1048_v24  ;;  %v1080_v28 = vld [vmem:[%s12495_s1 + $0x140] sm:$0xff]  ;;  %v1081_v29 = vld [vmem:[%s12495_s1 + $0x148] sm:$0xff]  ;;  %v1050_v30 = vld [vmem:[%s12495_s1 + $0x50] sm:$0xff] }
   0x8   :  { %6396 = vmatpush1.bf16.msra.mxu1 %v6395_v6  ;;  %v1051_v31 = vld [vmem:[%s12495_s1 + $0x58] sm:$0xff]  ;;  %v6452_v32 = vpack.c.bf16 %v1081_v29, %v1080_v28  ;;  %v17_v34 = vld [vmem:[%s12494_s0 + $0x8] sm:$0xff]  ;;  %v1082_v36 = vld [vmem:[%s12495_s1 + $0x150] sm:$0xff] }
   0x9   :  { %6397 = vmatprep.subr.bf16.mxu1 %v6779_v3  ;;  %6444 = vmatpush1.bf16.msra.mxu0 %v6443_v14  ;;  %v19_v33 = vld [vmem:[%s12494_s0 + $0x18] sm:$0xff]  ;;  %v6407_v35 = vpack.c.bf16 %v1051_v31, %v1050_v30  ;;  %v1052_v38 = vld [vmem:[%s12495_s1 + $0x60] sm:$0xff]  ;;  %v1053_v39 = vld [vmem:[%s12495_s1 + $0x68] sm:$0xff] }
   0xa   :  { %6445 = vmatprep.subr.bf16.mxu0 %v6779_v3  ;;  %v1083_v37 = vld [vmem:[%s12495_s1 + $0x158] sm:$0xff]  ;;  %6135 = vmatprep.mubr.msk.f32.mxu0 %vm1094_vm0, %v19_v33  ;;  %v6410_v41 = vpack.c.bf16 %v1053_v39, %v1052_v38  ;;  %v1084_v42 = vld [vmem:[%s12495_s1 + $0x160] sm:$0xff]  ;;  %v1085_v43 = vld [vmem:[%s12495_s1 + $0x168] sm:$0xff] }
   0xb   :  { %1927 = vmatprep.mubr.f32.mxu1 %v17_v34  ;;  %v6455_v40 = vpack.c.bf16 %v1083_v37, %v1082_v36  ;;  %v1054_v44 = vld [vmem:[%s12495_s1 + $0x70] sm:$0xff]  ;;  %v1055_v45 = vld [vmem:[%s12495_s1 + $0x78] sm:$0xff]  ;;  %v6458_v46 = vpack.c.bf16 %v1085_v43, %v1084_v42  ;;  %v1056_v50 = vld [vmem:[%s12495_s1 + $0x80] sm:$0xff] }
   0xc   :  { %6399 = vmatpush1.bf16.msra.mxu1 %v6398_v15  ;;  %v6413_v47 = vpack.c.bf16 %v1055_v45, %v1054_v44  ;;  %v1086_v48 = vld [vmem:[%s12495_s1 + $0x170] sm:$0xff]  ;;  %v1087_v49 = vld [vmem:[%s12495_s1 + $0x178] sm:$0xff]  ;;  %v1057_v51 = vld [vmem:[%s12495_s1 + $0x88] sm:$0xff] }
   0xd   :  { %6400 = vmatprep.subr.bf16.mxu1 %v6779_v3  ;;  %6447 = vmatpush1.bf16.msra.mxu0 %v6446_v20  ;;  %v6461_v52 = vpack.c.bf16 %v1087_v49, %v1086_v48  ;;  %v6416_v53 = vpack.c.bf16 %v1057_v51, %v1056_v50  ;;  %v1088_v54 = vld [vmem:[%s12495_s1 + $0x180] sm:$0xff]  ;;  %v1089_v55 = vld [vmem:[%s12495_s1 + $0x188] sm:$0xff]  ;;  %v1058_v56 = vld [vmem:[%s12495_s1 + $0x90] sm:$0xff] }
   0xe   :  { %6448 = vmatprep.subr.bf16.mxu0 %v6779_v3  ;;  %v1059_v57 = vld [vmem:[%s12495_s1 + $0x98] sm:$0xff]  ;;  %v6464_v58 = vpack.c.bf16 %v1089_v55, %v1088_v54  ;;  %v1090_v60 = vld [vmem:[%s12495_s1 + $0x190] sm:$0xff]  ;;  %v1060_v62 = vld [vmem:[%s12495_s1 + $0xa0] sm:$0xff] }
   0xf   :  { %v6419_v59 = vpack.c.bf16 %v1059_v57, %v1058_v56  ;;  %v1091_v61 = vld [vmem:[%s12495_s1 + $0x198] sm:$0xff]  ;;  %v1061_v63 = vld [vmem:[%s12495_s1 + $0xa8] sm:$0xff]  ;;  %v1092_v2 = vld [vmem:[%s12495_s1 + $0x1a0] sm:$0xff] }
  0x10   :  { %6402 = vmatpush1.bf16.msra.mxu1 %v6401_v21  ;;  %v6467_v0 = vpack.c.bf16 %v1091_v61, %v1090_v60  ;;  %v6422_v1 = vpack.c.bf16 %v1061_v63, %v1060_v62  ;;  %v1093_v4 = vld [vmem:[%s12495_s1 + $0x1a8] sm:$0xff]  ;;  %v1062_v5 = vld [vmem:[%s12495_s1 + $0xb0] sm:$0xff]  ;;  %v1063_v6 = vld [vmem:[%s12495_s1 + $0xb8] sm:$0xff] }
  0x11   :  { %6403 = vmatprep.subr.bf16.mxu1 %v6779_v3  ;;  %6450 = vmatpush1.bf16.msra.mxu0 %v6449_v26  ;;  %v6470_v7 = vpack.c.bf16 %v1093_v4, %v1092_v2  ;;  %v6425_v8 = vpack.c.bf16 %v1063_v6, %v1062_v5  ;;  %v1064_v9 = vld [vmem:[%s12495_s1 + $0xc0] sm:$0xff]  ;;  %v1065_v10 = vld [vmem:[%s12495_s1 + $0xc8] sm:$0xff]  ;;  %v18_v11 = vld [vmem:[%s12494_s0 + $0x10] sm:$0xff] }
  0x12   :  { %6451 = vmatprep.subr.bf16.mxu0 %v6779_v3  ;;  %v6428_v12 = vpack.c.bf16 %v1065_v10, %v1064_v9  ;;  %v23_v13 = vld [vmem:[%s12494_s0 + $0x38] sm:$0xff]  ;;  %v1066_v14 = vld [vmem:[%s12495_s1 + $0xd0] sm:$0xff]  ;;  %v1068_v19 = vld [vmem:[%s12495_s1 + $0xe0] sm:$0xff] }
  0x13   :  { %v1067_v15 = vld [vmem:[%s12495_s1 + $0xd8] sm:$0xff]  ;;  %v22_v16 = vld [vmem:[%s12494_s0 + $0x30] sm:$0xff]  ;;  %v1069_v20 = vld [vmem:[%s12495_s1 + $0xe8] sm:$0xff] }
  0x14   :  { %6405 = vmatpush1.bf16.msra.mxu1 %v6404_v27  ;;  %v6431_v17 = vpack.c.bf16 %v1067_v15, %v1066_v14  ;;  %v27_v18 = vld [vmem:[%s12494_s0 + $0x58] sm:$0xff]  ;;  %v26_v21 = vld [vmem:[%s12494_s0 + $0x50] sm:$0xff]  ;;  %v6434_v22 = vpack.c.bf16 %v1069_v20, %v1068_v19 }
  0x15   :  { %6406 = vmatprep.subr.bf16.mxu1 %v6779_v3  ;;  %6453 = vmatpush1.bf16.msra.mxu0 %v6452_v32  ;;  %v31_v23 = vld [vmem:[%s12494_s0 + $0x78] sm:$0xff]  ;;  %v1070_v24 = vld [vmem:[%s12495_s1 + $0xf0] sm:$0xff] }
  0x16   :  { %6454 = vmatprep.subr.bf16.mxu0 %v6779_v3  ;;  %v1071_v25 = vld [vmem:[%s12495_s1 + $0xf8] sm:$0xff]  ;;  %v30_v26 = vld [vmem:[%s12494_s0 + $0x70] sm:$0xff] }
  0x17   :  { %v6437_v27 = vpack.c.bf16 %v1071_v25, %v1070_v24  ;;  %v35_v28 = vld [vmem:[%s12494_s0 + $0x98] sm:$0xff] }
  0x18   :  { %6408 = vmatpush1.bf16.msra.mxu1 %v6407_v35 }
  0x19   :  { %6409 = vmatprep.subr.bf16.mxu1 %v6779_v3  ;;  %6456 = vmatpush1.bf16.msra.mxu0 %v6455_v40 }
  0x1a   :  { %6457 = vmatprep.subr.bf16.mxu0 %v6779_v3 }
  0x1c   :  { %6411 = vmatpush1.bf16.msra.mxu1 %v6410_v41 }
  0x1d   :  { %6412 = vmatprep.subr.bf16.mxu1 %v6779_v3  ;;  %6459 = vmatpush1.bf16.msra.mxu0 %v6458_v46 }
  0x1e   :  { %6460 = vmatprep.subr.bf16.mxu0 %v6779_v3 }
  0x20   :  { %6414 = vmatpush1.bf16.msra.mxu1 %v6413_v47 }
  0x21   :  { %6415 = vmatprep.subr.bf16.mxu1 %v6779_v3  ;;  %6462 = vmatpush1.bf16.msra.mxu0 %v6461_v52 }
  0x22   :  { %6463 = vmatprep.subr.bf16.mxu0 %v6779_v3 }
  0x24   :  { %6417 = vmatpush1.bf16.msra.mxu1 %v6416_v53 }
  0x25   :  { %6418 = vmatprep.subr.bf16.mxu1 %v6779_v3  ;;  %6465 = vmatpush1.bf16.msra.mxu0 %v6464_v58 }
  0x26   :  { %6466 = vmatprep.subr.bf16.mxu0 %v6779_v3 }
  0x28   :  { %6420 = vmatpush1.bf16.msra.mxu1 %v6419_v59 }
  0x29   :  { %6421 = vmatprep.subr.bf16.mxu1 %v6779_v3  ;;  %6468 = vmatpush1.bf16.msra.mxu0 %v6467_v0 }
  0x2a   :  { %6469 = vmatprep.subr.bf16.mxu0 %v6779_v3 }
  0x2c   :  { %6423 = vmatpush1.bf16.msra.mxu1 %v6422_v1 }
  0x2d   :  { %6424 = vmatprep.subr.bf16.mxu1 %v6779_v3  ;;  %6471 = vmatpush1.bf16.msra.mxu0 %v6470_v7 }
  0x30   :  { %6426 = vmatpush1.bf16.msra.mxu1 %v6425_v8  ;;  %3273 = vmatmul.mubr.f32.vlgmr.msra.gmra.mrb[0].mxu0 %v18_v11 }
  0x31   :  { %6427 = vmatprep.subr.bf16.mxu1 %v6779_v3  ;;  %6136 = vmatprep.mubr.msk.f32.mxu0 %vm1094_vm0, %v23_v13 }
  0x34   :  { %6429 = vmatpush1.bf16.msra.mxu1 %v6428_v12  ;;  %3278 = vmatmul.mubr.f32.gmra.mrb[2].mxu0 %v22_v16 }
  0x35   :  { %6430 = vmatprep.subr.bf16.mxu1 %v6779_v3  ;;  %6137 = vmatprep.mubr.msk.f32.mxu0 %vm1094_vm0, %v27_v18 }
  0x38   :  { %6432 = vmatpush1.bf16.msra.mxu1 %v6431_v17  ;;  %3283 = vmatmul.mubr.f32.gmra.mrb[4].mxu0 %v26_v21 }
  0x39   :  { %6433 = vmatprep.subr.bf16.mxu1 %v6779_v3  ;;  %6138 = vmatprep.mubr.msk.f32.mxu0 %vm1094_vm0, %v31_v23 }
  0x3c   :  { %6435 = vmatpush1.bf16.msra.mxu1 %v6434_v22 }
  0x3d   :  { %6436 = vmatprep.subr.bf16.mxu1 %v6779_v3 }
  0x3e   :  { %11 = vsyncpa [#allocation5], 0  ;;  %3288 = vmatmul.mubr.f32.gmra.mrb[6].mxu0 %v30_v26  ;;  %v34_v29 = vld [vmem:[%s12494_s0 + $0x90] sm:$0xff]  ;;  %v16_v30 = vld [vmem:[%s12494_s0] sm:$0xff]  ;;  %vm4553_vm1 = vcmask 64512   ;;  %s6780_s11 = smov [#allocation2]  }
  0x3f   :  { %6139 = vmatprep.mubr.msk.f32.mxu0 %vm1094_vm0, %v35_v28  ;;  %v39_v31 = vld [vmem:[%s12494_s0 + $0xb8] sm:$0xff]  ;;  %v21_v3 = vld [vmem:[%s12494_s0 + $0x28] sm:$0xff]  ;;  %v38_v32 = vld [vmem:[%s12494_s0 + $0xb0] sm:$0xff]  ;;  %s6111_s12 = sshll.u32 %s6780_s11, 4  ;;  %vm5327_vm2 = vcmask 57344   ;;  %s6112_s12 = int_to_ptr.vmem [resolvable:$true] %s6111_s12 }
  0x40   :  { %6438 = vmatpush1.bf16.msra.mxu1 %v6437_v27  ;;  %v20_v33 = vld [vmem:[%s12494_s0 + $0x20] sm:$0xff]  ;;  %v43_v34 = vld [vmem:[%s12494_s0 + $0xd8] sm:$0xff]  ;;  %v25_v35 = vld [vmem:[%s12494_s0 + $0x48] sm:$0xff]  ;;  %s6731_s13 = scalar_lea.vmem %s6112_s12, 16  ;;  %p6736_p1 = scmp.lt.s32.totalorder %s6112_s12, %s6112_s12 }
  0x41   :  { %v42_v36 = vld [vmem:[%s12494_s0 + $0xd0] sm:$0xff]  ;;  %v24_v37 = vld [vmem:[%s12494_s0 + $0x40] sm:$0xff]  ;;  %v47_v38 = vld [vmem:[%s12494_s0 + $0xf8] sm:$0xff]  ;;  %p6732_p0 = scmp.ne.s32.totalorder %s6112_s12, %s6731_s13 }
  0x42   :  { %3293 = vmatmul.mubr.f32.gmra.mrb[8].mxu0 %v34_v29  ;;  %v29_v39 = vld [vmem:[%s12494_s0 + $0x68] sm:$0xff]  ;;  %v46_v40 = vld [vmem:[%s12494_s0 + $0xf0] sm:$0xff]  ;;  %v28_v41 = vld [vmem:[%s12494_s0 + $0x60] sm:$0xff] }
  0x43   :  { %1928 = vmatmul.mubr.f32.vlgmr.msra.gmra.mrb[0].mxu1 %v16_v30  ;;  %6140 = vmatprep.mubr.msk.f32.mxu0 %vm1094_vm0, %v39_v31  ;;  %v51_v42 = vld [vmem:[%s12494_s0 + $0x118] sm:$0xff]  ;;  %v33_v43 = vld [vmem:[%s12494_s0 + $0x88] sm:$0xff]  ;;  %v50_v44 = vld [vmem:[%s12494_s0 + $0x110] sm:$0xff] }
  0x44   :  { %1932 = vmatprep.mubr.f32.mxu1 %v21_v3  ;;  %v32_v45 = vld [vmem:[%s12494_s0 + $0x80] sm:$0xff]  ;;  %v55_v46 = vld [vmem:[%s12494_s0 + $0x138] sm:$0xff]  ;;  %v37_v47 = vld [vmem:[%s12494_s0 + $0xa8] sm:$0xff] }
  0x45   :  { %v54_v48 = vld [vmem:[%s12494_s0 + $0x130] sm:$0xff]  ;;  %v36_v49 = vld [vmem:[%s12494_s0 + $0xa0] sm:$0xff]  ;;  %v59_v50 = vld [vmem:[%s12494_s0 + $0x158] sm:$0xff] }
  0x46   :  { %3298 = vmatmul.mubr.f32.gmra.mrb[10].mxu0 %v38_v32  ;;  %v41_v51 = vld [vmem:[%s12494_s0 + $0xc8] sm:$0xff]  ;;  %v58_v52 = vld [vmem:[%s12494_s0 + $0x150] sm:$0xff]  ;;  %v40_v53 = vld [vmem:[%s12494_s0 + $0xc0] sm:$0xff] }
  0x47   :  { %1933 = vmatmul.mubr.f32.gmra.mrb[2].mxu1 %v20_v33  ;;  %6141 = vmatprep.mubr.msk.f32.mxu0 %vm1094_vm0, %v43_v34  ;;  %v63_v54 = vld [vmem:[%s12494_s0 + $0x178] sm:$0xff]  ;;  %v45_v55 = vld [vmem:[%s12494_s0 + $0xe8] sm:$0xff]  ;;  %v62_v56 = vld [vmem:[%s12494_s0 + $0x170] sm:$0xff] }
  0x48   :  { %1937 = vmatprep.mubr.f32.mxu1 %v25_v35  ;;  %v44_v57 = vld [vmem:[%s12494_s0 + $0xe0] sm:$0xff]  ;;  %v67_v58 = vld [vmem:[%s12494_s0 + $0x198] sm:$0xff]  ;;  %v49_v59 = vld [vmem:[%s12494_s0 + $0x108] sm:$0xff] }
  0x49   :  { %v66_v60 = vld [vmem:[%s12494_s0 + $0x190] sm:$0xff]  ;;  %v48_v61 = vld [vmem:[%s12494_s0 + $0x100] sm:$0xff]  ;;  %v71_v62 = vld [vmem:[%s12494_s0 + $0x1b8] sm:$0xff] }
  0x4a   :  { %3303 = vmatmul.mubr.f32.gmra.mrb[12].mxu0 %v42_v36  ;;  %v53_v63 = vld [vmem:[%s12494_s0 + $0x128] sm:$0xff]  ;;  %v70_v0 = vld [vmem:[%s12494_s0 + $0x1b0] sm:$0xff]  ;;  %v52_v1 = vld [vmem:[%s12494_s0 + $0x120] sm:$0xff] }
  0x4b   :  { %1938 = vmatmul.mubr.f32.gmra.mrb[4].mxu1 %v24_v37  ;;  %6142 = vmatprep.mubr.msk.f32.mxu0 %vm1094_vm0, %v47_v38  ;;  %v75_v2 = vld [vmem:[%s12494_s0 + $0x1d8] sm:$0xff]  ;;  %v57_v4 = vld [vmem:[%s12494_s0 + $0x148] sm:$0xff]  ;;  %v74_v5 = vld [vmem:[%s12494_s0 + $0x1d0] sm:$0xff] }
  0x4c   :  { %1942 = vmatprep.mubr.f32.mxu1 %v29_v39  ;;  %v56_v6 = vld [vmem:[%s12494_s0 + $0x140] sm:$0xff]  ;;  %v79_v7 = vld [vmem:[%s12494_s0 + $0x1f8] sm:$0xff]  ;;  %v61_v8 = vld [vmem:[%s12494_s0 + $0x168] sm:$0xff] }
  0x4d   :  { %v78_v9 = vld [vmem:[%s12494_s0 + $0x1f0] sm:$0xff]  ;;  %v60_v10 = vld [vmem:[%s12494_s0 + $0x160] sm:$0xff]  ;;  %v83_v11 = vld [vmem:[%s12494_s0 + $0x218] sm:$0xff] }
  0x4e   :  { %3308 = vmatmul.mubr.f32.gmra.mrb[14].mxu0 %v46_v40  ;;  %v65_v12 = vld [vmem:[%s12494_s0 + $0x188] sm:$0xff]  ;;  %v82_v13 = vld [vmem:[%s12494_s0 + $0x210] sm:$0xff]  ;;  %v64_v14 = vld [vmem:[%s12494_s0 + $0x180] sm:$0xff] }
  0x4f   :  { %1943 = vmatmul.mubr.f32.gmra.mrb[6].mxu1 %v28_v41  ;;  %6143 = vmatprep.mubr.msk.f32.mxu0 %vm1094_vm0, %v51_v42  ;;  %v87_v15 = vld [vmem:[%s12494_s0 + $0x238] sm:$0xff]  ;;  %v69_v16 = vld [vmem:[%s12494_s0 + $0x1a8] sm:$0xff]  ;;  %v86_v17 = vld [vmem:[%s12494_s0 + $0x230] sm:$0xff] }
  0x50   :  { %1947 = vmatprep.mubr.f32.mxu1 %v33_v43  ;;  %v68_v18 = vld [vmem:[%s12494_s0 + $0x1a0] sm:$0xff]  ;;  %v91_v19 = vld [vmem:[%s12494_s0 + $0x258] sm:$0xff]  ;;  %v73_v20 = vld [vmem:[%s12494_s0 + $0x1c8] sm:$0xff] }
  0x51   :  { %v90_v21 = vld [vmem:[%s12494_s0 + $0x250] sm:$0xff]  ;;  %v72_v22 = vld [vmem:[%s12494_s0 + $0x1c0] sm:$0xff]  ;;  %v95_v23 = vld [vmem:[%s12494_s0 + $0x278] sm:$0xff] }
  0x52   :  { %3313 = vmatmul.mubr.f32.gmra.mrb[16].mxu0 %v50_v44  ;;  %v77_v24 = vld [vmem:[%s12494_s0 + $0x1e8] sm:$0xff]  ;;  %v94_v25 = vld [vmem:[%s12494_s0 + $0x270] sm:$0xff]  ;;  %v76_v26 = vld [vmem:[%s12494_s0 + $0x1e0] sm:$0xff] }
  0x53   :  { %1948 = vmatmul.mubr.f32.gmra.mrb[8].mxu1 %v32_v45  ;;  %6144 = vmatprep.mubr.msk.f32.mxu0 %vm1094_vm0, %v55_v46  ;;  %v99_v27 = vld [vmem:[%s12494_s0 + $0x298] sm:$0xff]  ;;  %v81_v28 = vld [vmem:[%s12494_s0 + $0x208] sm:$0xff]  ;;  %v98_v29 = vld [vmem:[%s12494_s0 + $0x290] sm:$0xff] }
  0x54   :  { %1952 = vmatprep.mubr.f32.mxu1 %v37_v47  ;;  %v80_v30 = vld [vmem:[%s12494_s0 + $0x200] sm:$0xff]  ;;  %v103_v31 = vld [vmem:[%s12494_s0 + $0x2b8] sm:$0xff]  ;;  %v85_v3 = vld [vmem:[%s12494_s0 + $0x228] sm:$0xff] }
  0x55   :  { %v102_v32 = vld [vmem:[%s12494_s0 + $0x2b0] sm:$0xff]  ;;  %v84_v33 = vld [vmem:[%s12494_s0 + $0x220] sm:$0xff]  ;;  %v107_v34 = vld [vmem:[%s12494_s0 + $0x2d8] sm:$0xff] }
  0x56   :  { %3318 = vmatmul.mubr.f32.gmra.mrb[18].mxu0 %v54_v48  ;;  %v89_v35 = vld [vmem:[%s12494_s0 + $0x248] sm:$0xff]  ;;  %v106_v36 = vld [vmem:[%s12494_s0 + $0x2d0] sm:$0xff]  ;;  %v88_v37 = vld [vmem:[%s12494_s0 + $0x240] sm:$0xff] }
  0x57   :  { %1953 = vmatmul.mubr.f32.gmra.mrb[10].mxu1 %v36_v49  ;;  %6145 = vmatprep.mubr.msk.f32.mxu0 %vm1094_vm0, %v59_v50  ;;  %v111_v38 = vld [vmem:[%s12494_s0 + $0x2f8] sm:$0xff]  ;;  %v93_v39 = vld [vmem:[%s12494_s0 + $0x268] sm:$0xff]  ;;  %v110_v40 = vld [vmem:[%s12494_s0 + $0x2f0] sm:$0xff] }
  0x58   :  { %1957 = vmatprep.mubr.f32.mxu1 %v41_v51  ;;  %v92_v41 = vld [vmem:[%s12494_s0 + $0x260] sm:$0xff]  ;;  %v115_v42 = vld [vmem:[%s12494_s0 + $0x318] sm:$0xff]  ;;  %v97_v43 = vld [vmem:[%s12494_s0 + $0x288] sm:$0xff] }
  0x59   :  { %v114_v44 = vld [vmem:[%s12494_s0 + $0x310] sm:$0xff]  ;;  %v96_v45 = vld [vmem:[%s12494_s0 + $0x280] sm:$0xff]  ;;  %v119_v46 = vld [vmem:[%s12494_s0 + $0x338] sm:$0xff] }
  0x5a   :  { %3323 = vmatmul.mubr.f32.gmra.mrb[20].mxu0 %v58_v52  ;;  %v101_v47 = vld [vmem:[%s12494_s0 + $0x2a8] sm:$0xff]  ;;  %v118_v48 = vld [vmem:[%s12494_s0 + $0x330] sm:$0xff]  ;;  %v100_v49 = vld [vmem:[%s12494_s0 + $0x2a0] sm:$0xff] }
  0x5b   :  { %1958 = vmatmul.mubr.f32.gmra.mrb[12].mxu1 %v40_v53  ;;  %6146 = vmatprep.mubr.msk.f32.mxu0 %vm1094_vm0, %v63_v54  ;;  %v123_v50 = vld [vmem:[%s12494_s0 + $0x358] sm:$0xff]  ;;  %v105_v51 = vld [vmem:[%s12494_s0 + $0x2c8] sm:$0xff]  ;;  %v122_v52 = vld [vmem:[%s12494_s0 + $0x350] sm:$0xff] }
  0x5c   :  { %1962 = vmatprep.mubr.f32.mxu1 %v45_v55  ;;  %v104_v53 = vld [vmem:[%s12494_s0 + $0x2c0] sm:$0xff]  ;;  %v127_v54 = vld [vmem:[%s12494_s0 + $0x378] sm:$0xff]  ;;  %v109_v55 = vld [vmem:[%s12494_s0 + $0x2e8] sm:$0xff] }
  0x5e   :  { %3328 = vmatmul.mubr.f32.gmra.mrb[22].mxu0 %v62_v56  ;;  %v126_v56 = vld [vmem:[%s12494_s0 + $0x370] sm:$0xff] }
  0x5f   :  { %1963 = vmatmul.mubr.f32.gmra.mrb[14].mxu1 %v44_v57  ;;  %6147 = vmatprep.mubr.msk.f32.mxu0 %vm1094_vm0, %v67_v58  ;;  %v108_v57 = vld [vmem:[%s12494_s0 + $0x2e0] sm:$0xff]  ;;  %v131_v58 = vld [vmem:[%s12494_s0 + $0x398] sm:$0xff] }
  0x60   :  { %1967 = vmatprep.mubr.f32.mxu1 %v49_v59  ;;  %v113_v59 = vld [vmem:[%s12494_s0 + $0x308] sm:$0xff] }
  0x62   :  { %3333 = vmatmul.mubr.f32.gmra.mrb[24].mxu0 %v66_v60  ;;  %v130_v60 = vld [vmem:[%s12494_s0 + $0x390] sm:$0xff] }
  0x63   :  { %1968 = vmatmul.mubr.f32.gmra.mrb[16].mxu1 %v48_v61  ;;  %6148 = vmatprep.mubr.msk.f32.mxu0 %vm1094_vm0, %v71_v62  ;;  %v112_v61 = vld [vmem:[%s12494_s0 + $0x300] sm:$0xff]  ;;  %v135_v62 = vld [vmem:[%s12494_s0 + $0x3b8] sm:$0xff] }
  0x64   :  { %1972 = vmatprep.mubr.f32.mxu1 %v53_v63  ;;  %v117_v63 = vld [vmem:[%s12494_s0 + $0x328] sm:$0xff] }
  0x66   :  { %3338 = vmatmul.mubr.f32.gmra.mrb[26].mxu0 %v70_v0  ;;  %v134_v0 = vld [vmem:[%s12494_s0 + $0x3b0] sm:$0xff] }
  0x67   :  { %1973 = vmatmul.mubr.f32.gmra.mrb[18].mxu1 %v52_v1  ;;  %6149 = vmatprep.mubr.msk.f32.mxu0 %vm1094_vm0, %v75_v2  ;;  %v116_v1 = vld [vmem:[%s12494_s0 + $0x320] sm:$0xff]  ;;  %v139_v2 = vld [vmem:[%s12494_s0 + $0x3d8] sm:$0xff] }
  0x68   :  { %1977 = vmatprep.mubr.f32.mxu1 %v57_v4  ;;  %v121_v4 = vld [vmem:[%s12494_s0 + $0x348] sm:$0xff] }
  0x6a   :  { %3343 = vmatmul.mubr.f32.gmra.mrb[28].mxu0 %v74_v5  ;;  %v138_v5 = vld [vmem:[%s12494_s0 + $0x3d0] sm:$0xff] }
  0x6b   :  { %1978 = vmatmul.mubr.f32.gmra.mrb[20].mxu1 %v56_v6  ;;  %6150 = vmatprep.mubr.msk.f32.mxu0 %vm1094_vm0, %v79_v7  ;;  %v120_v6 = vld [vmem:[%s12494_s0 + $0x340] sm:$0xff]  ;;  %v143_v7 = vld [vmem:[%s12494_s0 + $0x3f8] sm:$0xff] }
  0x6c   :  { %1982 = vmatprep.mubr.f32.mxu1 %v61_v8  ;;  %v125_v8 = vld [vmem:[%s12494_s0 + $0x368] sm:$0xff] }
  0x6e   :  { %3348 = vmatmul.mubr.f32.gmra.mrb[30].mxu0 %v78_v9  ;;  %v142_v9 = vld [vmem:[%s12494_s0 + $0x3f0] sm:$0xff] }
  0x6f   :  { %1983 = vmatmul.mubr.f32.gmra.mrb[22].mxu1 %v60_v10  ;;  %6151 = vmatprep.mubr.msk.f32.mxu0 %vm1094_vm0, %v83_v11  ;;  %v124_v10 = vld [vmem:[%s12494_s0 + $0x360] sm:$0xff]  ;;  %v147_v11 = vld [vmem:[%s12494_s0 + $0x418] sm:$0xff] }
  0x70   :  { %1987 = vmatprep.mubr.f32.mxu1 %v65_v12  ;;  %v129_v12 = vld [vmem:[%s12494_s0 + $0x388] sm:$0xff] }
  0x72   :  { %3353 = vmatmul.mubr.f32.gmra.mrb[32].mxu0 %v82_v13  ;;  %v146_v13 = vld [vmem:[%s12494_s0 + $0x410] sm:$0xff] }
  0x73   :  { %1988 = vmatmul.mubr.f32.gmra.mrb[24].mxu1 %v64_v14  ;;  %6152 = vmatprep.mubr.msk.f32.mxu0 %vm1094_vm0, %v87_v15  ;;  %v128_v14 = vld [vmem:[%s12494_s0 + $0x380] sm:$0xff]  ;;  %v151_v15 = vld [vmem:[%s12494_s0 + $0x438] sm:$0xff] }
  0x74   :  { %1992 = vmatprep.mubr.f32.mxu1 %v69_v16  ;;  %v133_v16 = vld [vmem:[%s12494_s0 + $0x3a8] sm:$0xff] }
  0x76   :  { %3358 = vmatmul.mubr.f32.gmra.mrb[34].mxu0 %v86_v17  ;;  %v150_v17 = vld [vmem:[%s12494_s0 + $0x430] sm:$0xff] }
  0x77   :  { %1993 = vmatmul.mubr.f32.gmra.mrb[26].mxu1 %v68_v18  ;;  %6153 = vmatprep.mubr.msk.f32.mxu0 %vm1094_vm0, %v91_v19  ;;  %v132_v18 = vld [vmem:[%s12494_s0 + $0x3a0] sm:$0xff]  ;;  %v155_v19 = vld [vmem:[%s12494_s0 + $0x458] sm:$0xff] }
  0x78   :  { %1997 = vmatprep.mubr.f32.mxu1 %v73_v20  ;;  %v137_v20 = vld [vmem:[%s12494_s0 + $0x3c8] sm:$0xff] }
  0x7a   :  { %3363 = vmatmul.mubr.f32.gmra.mrb[36].mxu0 %v90_v21  ;;  %v154_v21 = vld [vmem:[%s12494_s0 + $0x450] sm:$0xff] }
  0x7b   :  { %1998 = vmatmul.mubr.f32.gmra.mrb[28].mxu1 %v72_v22  ;;  %6154 = vmatprep.mubr.msk.f32.mxu0 %vm1094_vm0, %v95_v23  ;;  %v136_v22 = vld [vmem:[%s12494_s0 + $0x3c0] sm:$0xff]  ;;  %v159_v23 = vld [vmem:[%s12494_s0 + $0x478] sm:$0xff] }
  0x7c   :  { %2002 = vmatprep.mubr.f32.mxu1 %v77_v24  ;;  %v141_v24 = vld [vmem:[%s12494_s0 + $0x3e8] sm:$0xff] }
  0x7e   :  { %3368 = vmatmul.mubr.f32.gmra.mrb[38].mxu0 %v94_v25  ;;  %v158_v25 = vld [vmem:[%s12494_s0 + $0x470] sm:$0xff] }
  0x7f   :  { %2003 = vmatmul.mubr.f32.gmra.mrb[30].mxu1 %v76_v26  ;;  %6155 = vmatprep.mubr.msk.f32.mxu0 %vm1094_vm0, %v99_v27  ;;  %v140_v26 = vld [vmem:[%s12494_s0 + $0x3e0] sm:$0xff]  ;;  %v163_v27 = vld [vmem:[%s12494_s0 + $0x498] sm:$0xff] }
  0x80   :  { %2007 = vmatprep.mubr.f32.mxu1 %v81_v28  ;;  %v145_v28 = vld [vmem:[%s12494_s0 + $0x408] sm:$0xff] }
  0x82   :  { %3373 = vmatmul.mubr.f32.gmra.mrb[40].mxu0 %v98_v29  ;;  %v162_v29 = vld [vmem:[%s12494_s0 + $0x490] sm:$0xff] }
  0x83   :  { %2008 = vmatmul.mubr.f32.gmra.mrb[32].mxu1 %v80_v30  ;;  %6156 = vmatprep.mubr.msk.f32.mxu0 %vm1094_vm0, %v103_v31  ;;  %v144_v30 = vld [vmem:[%s12494_s0 + $0x400] sm:$0xff]  ;;  %v167_v31 = vld [vmem:[%s12494_s0 + $0x4b8] sm:$0xff] }
  0x84   :  { %2012 = vmatprep.mubr.f32.mxu1 %v85_v3  ;;  %v149_v3 = vld [vmem:[%s12494_s0 + $0x428] sm:$0xff] }
  0x86   :  { %3378 = vmatmul.mubr.f32.gmra.mrb[42].mxu0 %v102_v32  ;;  %v166_v32 = vld [vmem:[%s12494_s0 + $0x4b0] sm:$0xff] }
  0x87   :  { %2013 = vmatmul.mubr.f32.gmra.mrb[34].mxu1 %v84_v33  ;;  %6157 = vmatprep.mubr.msk.f32.mxu0 %vm1094_vm0, %v107_v34  ;;  %v148_v33 = vld [vmem:[%s12494_s0 + $0x420] sm:$0xff]  ;;  %v171_v34 = vld [vmem:[%s12494_s0 + $0x4d8] sm:$0xff] }
  0x88   :  { %2017 = vmatprep.mubr.f32.mxu1 %v89_v35  ;;  %v153_v35 = vld [vmem:[%s12494_s0 + $0x448] sm:$0xff] }
  0x8a   :  { %3383 = vmatmul.mubr.f32.gmra.mrb[44].mxu0 %v106_v36  ;;  %v170_v36 = vld [vmem:[%s12494_s0 + $0x4d0] sm:$0xff] }
  0x8b   :  { %2018 = vmatmul.mubr.f32.gmra.mrb[36].mxu1 %v88_v37  ;;  %6158 = vmatprep.mubr.msk.f32.mxu0 %vm1094_vm0, %v111_v38  ;;  %v152_v37 = vld [vmem:[%s12494_s0 + $0x440] sm:$0xff]  ;;  %v175_v38 = vld [vmem:[%s12494_s0 + $0x4f8] sm:$0xff] }
  0x8c   :  { %2022 = vmatprep.mubr.f32.mxu1 %v93_v39  ;;  %v157_v39 = vld [vmem:[%s12494_s0 + $0x468] sm:$0xff] }
  0x8e   :  { %3388 = vmatmul.mubr.f32.gmra.mrb[46].mxu0 %v110_v40  ;;  %v174_v40 = vld [vmem:[%s12494_s0 + $0x4f0] sm:$0xff] }
  0x8f   :  { %2023 = vmatmul.mubr.f32.gmra.mrb[38].mxu1 %v92_v41  ;;  %6159 = vmatprep.mubr.msk.f32.mxu0 %vm1094_vm0, %v115_v42  ;;  %v156_v41 = vld [vmem:[%s12494_s0 + $0x460] sm:$0xff]  ;;  %v179_v42 = vld [vmem:[%s12494_s0 + $0x518] sm:$0xff] }
  0x90   :  { %2027 = vmatprep.mubr.f32.mxu1 %v97_v43  ;;  %v161_v43 = vld [vmem:[%s12494_s0 + $0x488] sm:$0xff] }
  0x92   :  { %3393 = vmatmul.mubr.f32.gmra.mrb[48].mxu0 %v114_v44  ;;  %v178_v44 = vld [vmem:[%s12494_s0 + $0x510] sm:$0xff] }
  0x93   :  { %2028 = vmatmul.mubr.f32.gmra.mrb[40].mxu1 %v96_v45  ;;  %6160 = vmatprep.mubr.msk.f32.mxu0 %vm1094_vm0, %v119_v46  ;;  %v160_v45 = vld [vmem:[%s12494_s0 + $0x480] sm:$0xff]  ;;  %v183_v46 = vld [vmem:[%s12494_s0 + $0x538] sm:$0xff] }
  0x94   :  { %2032 = vmatprep.mubr.f32.mxu1 %v101_v47  ;;  %v165_v47 = vld [vmem:[%s12494_s0 + $0x4a8] sm:$0xff] }
  0x96   :  { %3398 = vmatmul.mubr.f32.gmra.mrb[50].mxu0 %v118_v48  ;;  %v182_v48 = vld [vmem:[%s12494_s0 + $0x530] sm:$0xff] }
  0x97   :  { %2033 = vmatmul.mubr.f32.gmra.mrb[42].mxu1 %v100_v49  ;;  %6161 = vmatprep.mubr.msk.f32.mxu0 %vm1094_vm0, %v123_v50  ;;  %v164_v49 = vld [vmem:[%s12494_s0 + $0x4a0] sm:$0xff]  ;;  %v187_v50 = vld [vmem:[%s12494_s0 + $0x558] sm:$0xff] }
  0x98   :  { %2037 = vmatprep.mubr.f32.mxu1 %v105_v51  ;;  %v169_v51 = vld [vmem:[%s12494_s0 + $0x4c8] sm:$0xff] }
  0x9a   :  { %3403 = vmatmul.mubr.f32.gmra.mrb[52].mxu0 %v122_v52  ;;  %v186_v52 = vld [vmem:[%s12494_s0 + $0x550] sm:$0xff] }
  0x9b   :  { %2038 = vmatmul.mubr.f32.gmra.mrb[44].mxu1 %v104_v53  ;;  %6162 = vmatprep.mubr.msk.f32.mxu0 %vm1094_vm0, %v127_v54  ;;  %v168_v53 = vld [vmem:[%s12494_s0 + $0x4c0] sm:$0xff]  ;;  %v191_v54 = vld [vmem:[%s12494_s0 + $0x578] sm:$0xff] }
  0x9c   :  { %2042 = vmatprep.mubr.f32.mxu1 %v109_v55  ;;  %v173_v55 = vld [vmem:[%s12494_s0 + $0x4e8] sm:$0xff] }
  0x9e   :  { %3408 = vmatmul.mubr.f32.gmra.mrb[54].mxu0 %v126_v56  ;;  %v190_v56 = vld [vmem:[%s12494_s0 + $0x570] sm:$0xff] }
  0x9f   :  { %2043 = vmatmul.mubr.f32.gmra.mrb[46].mxu1 %v108_v57  ;;  %6163 = vmatprep.mubr.msk.f32.mxu0 %vm1094_vm0, %v131_v58  ;;  %v172_v57 = vld [vmem:[%s12494_s0 + $0x4e0] sm:$0xff]  ;;  %v195_v58 = vld [vmem:[%s12494_s0 + $0x598] sm:$0xff] }
  0xa0   :  { %2047 = vmatprep.mubr.f32.mxu1 %v113_v59  ;;  %v177_v59 = vld [vmem:[%s12494_s0 + $0x508] sm:$0xff] }
  0xa2   :  { %3413 = vmatmul.mubr.f32.gmra.mrb[56].mxu0 %v130_v60  ;;  %v194_v60 = vld [vmem:[%s12494_s0 + $0x590] sm:$0xff] }
  0xa3   :  { %2048 = vmatmul.mubr.f32.gmra.mrb[48].mxu1 %v112_v61  ;;  %6164 = vmatprep.mubr.msk.f32.mxu0 %vm1094_vm0, %v135_v62  ;;  %v176_v61 = vld [vmem:[%s12494_s0 + $0x500] sm:$0xff]  ;;  %v199_v62 = vld [vmem:[%s12494_s0 + $0x5b8] sm:$0xff] }
  0xa4   :  { %2052 = vmatprep.mubr.f32.mxu1 %v117_v63  ;;  %v181_v63 = vld [vmem:[%s12494_s0 + $0x528] sm:$0xff] }
  0xa6   :  { %3418 = vmatmul.mubr.f32.gmra.mrb[58].mxu0 %v134_v0  ;;  %v198_v0 = vld [vmem:[%s12494_s0 + $0x5b0] sm:$0xff] }
  0xa7   :  { %2053 = vmatmul.mubr.f32.gmra.mrb[50].mxu1 %v116_v1  ;;  %6165 = vmatprep.mubr.msk.f32.mxu0 %vm1094_vm0, %v139_v2  ;;  %v180_v1 = vld [vmem:[%s12494_s0 + $0x520] sm:$0xff]  ;;  %v203_v2 = vld [vmem:[%s12494_s0 + $0x5d8] sm:$0xff] }
  0xa8   :  { %2057 = vmatprep.mubr.f32.mxu1 %v121_v4  ;;  %v185_v4 = vld [vmem:[%s12494_s0 + $0x548] sm:$0xff] }
  0xaa   :  { %3423 = vmatmul.mubr.f32.gmra.mrb[60].mxu0 %v138_v5  ;;  %v202_v5 = vld [vmem:[%s12494_s0 + $0x5d0] sm:$0xff] }
  0xab   :  { %2058 = vmatmul.mubr.f32.gmra.mrb[52].mxu1 %v120_v6  ;;  %6166 = vmatprep.mubr.msk.f32.mxu0 %vm1094_vm0, %v143_v7  ;;  %v184_v6 = vld [vmem:[%s12494_s0 + $0x540] sm:$0xff]  ;;  %v207_v7 = vld [vmem:[%s12494_s0 + $0x5f8] sm:$0xff] }
  0xac   :  { %2062 = vmatprep.mubr.f32.mxu1 %v125_v8  ;;  %v189_v8 = vld [vmem:[%s12494_s0 + $0x568] sm:$0xff] }
  0xae   :  { %3428 = vmatmul.mubr.f32.gmra.mrb[62].mxu0 %v142_v9  ;;  %v206_v9 = vld [vmem:[%s12494_s0 + $0x5f0] sm:$0xff] }
  0xaf   :  { %2063 = vmatmul.mubr.f32.gmra.mrb[54].mxu1 %v124_v10  ;;  %6167 = vmatprep.mubr.msk.f32.mxu0 %vm1094_vm0, %v147_v11  ;;  %v188_v10 = vld [vmem:[%s12494_s0 + $0x560] sm:$0xff]  ;;  %v211_v11 = vld [vmem:[%s12494_s0 + $0x618] sm:$0xff] }
  0xb0   :  { %2067 = vmatprep.mubr.f32.mxu1 %v129_v12  ;;  %v193_v12 = vld [vmem:[%s12494_s0 + $0x588] sm:$0xff] }
  0xb2   :  { %3433 = vmatmul.mubr.f32.gmra.mrb[64].mxu0 %v146_v13  ;;  %v210_v13 = vld [vmem:[%s12494_s0 + $0x610] sm:$0xff] }
  0xb3   :  { %2068 = vmatmul.mubr.f32.gmra.mrb[56].mxu1 %v128_v14  ;;  %6168 = vmatprep.mubr.msk.f32.mxu0 %vm1094_vm0, %v151_v15  ;;  %v192_v14 = vld [vmem:[%s12494_s0 + $0x580] sm:$0xff]  ;;  %v215_v15 = vld [vmem:[%s12494_s0 + $0x638] sm:$0xff] }
  0xb4   :  { %2072 = vmatprep.mubr.f32.mxu1 %v133_v16  ;;  %v197_v16 = vld [vmem:[%s12494_s0 + $0x5a8] sm:$0xff] }
  0xb6   :  { %3438 = vmatmul.mubr.f32.gmra.mrb[66].mxu0 %v150_v17  ;;  %v214_v17 = vld [vmem:[%s12494_s0 + $0x630] sm:$0xff] }
  0xb7   :  { %2073 = vmatmul.mubr.f32.gmra.mrb[58].mxu1 %v132_v18  ;;  %6169 = vmatprep.mubr.msk.f32.mxu0 %vm1094_vm0, %v155_v19  ;;  %v196_v18 = vld [vmem:[%s12494_s0 + $0x5a0] sm:$0xff]  ;;  %v219_v19 = vld [vmem:[%s12494_s0 + $0x658] sm:$0xff] }
  0xb8   :  { %2077 = vmatprep.mubr.f32.mxu1 %v137_v20  ;;  %v201_v20 = vld [vmem:[%s12494_s0 + $0x5c8] sm:$0xff] }
  0xba   :  { %3443 = vmatmul.mubr.f32.gmra.mrb[68].mxu0 %v154_v21  ;;  %v218_v21 = vld [vmem:[%s12494_s0 + $0x650] sm:$0xff] }
  0xbb   :  { %2078 = vmatmul.mubr.f32.gmra.mrb[60].mxu1 %v136_v22  ;;  %6170 = vmatprep.mubr.msk.f32.mxu0 %vm1094_vm0, %v159_v23  ;;  %v200_v22 = vld [vmem:[%s12494_s0 + $0x5c0] sm:$0xff]  ;;  %v223_v23 = vld [vmem:[%s12494_s0 + $0x678] sm:$0xff] }
  0xbc   :  { %2082 = vmatprep.mubr.f32.mxu1 %v141_v24  ;;  %v205_v24 = vld [vmem:[%s12494_s0 + $0x5e8] sm:$0xff] }
  0xbe   :  { %3448 = vmatmul.mubr.f32.gmra.mrb[70].mxu0 %v158_v25  ;;  %v222_v25 = vld [vmem:[%s12494_s0 + $0x670] sm:$0xff] }
  0xbf   :  { %2083 = vmatmul.mubr.f32.gmra.mrb[62].mxu1 %v140_v26  ;;  %6171 = vmatprep.mubr.msk.f32.mxu0 %vm1094_vm0, %v163_v27  ;;  %v204_v26 = vld [vmem:[%s12494_s0 + $0x5e0] sm:$0xff]  ;;  %v227_v27 = vld [vmem:[%s12494_s0 + $0x698] sm:$0xff] }
  0xc0   :  { %2087 = vmatprep.mubr.f32.mxu1 %v145_v28  ;;  %v209_v28 = vld [vmem:[%s12494_s0 + $0x608] sm:$0xff] }
  0xc2   :  { %3453 = vmatmul.mubr.f32.gmra.mrb[72].mxu0 %v162_v29  ;;  %v226_v29 = vld [vmem:[%s12494_s0 + $0x690] sm:$0xff] }
  0xc3   :  { %2088 = vmatmul.mubr.f32.gmra.mrb[64].mxu1 %v144_v30  ;;  %6172 = vmatprep.mubr.msk.f32.mxu0 %vm1094_vm0, %v167_v31  ;;  %v208_v30 = vld [vmem:[%s12494_s0 + $0x600] sm:$0xff]  ;;  %v231_v31 = vld [vmem:[%s12494_s0 + $0x6b8] sm:$0xff] }
  0xc4   :  { %2092 = vmatprep.mubr.f32.mxu1 %v149_v3  ;;  %v213_v3 = vld [vmem:[%s12494_s0 + $0x628] sm:$0xff] }
  0xc6   :  { %3458 = vmatmul.mubr.f32.gmra.mrb[74].mxu0 %v166_v32  ;;  %v230_v32 = vld [vmem:[%s12494_s0 + $0x6b0] sm:$0xff] }
  0xc7   :  { %2093 = vmatmul.mubr.f32.gmra.mrb[66].mxu1 %v148_v33  ;;  %6173 = vmatprep.mubr.msk.f32.mxu0 %vm1094_vm0, %v171_v34  ;;  %v212_v33 = vld [vmem:[%s12494_s0 + $0x620] sm:$0xff]  ;;  %v235_v34 = vld [vmem:[%s12494_s0 + $0x6d8] sm:$0xff] }
  0xc8   :  { %2097 = vmatprep.mubr.f32.mxu1 %v153_v35  ;;  %v217_v35 = vld [vmem:[%s12494_s0 + $0x648] sm:$0xff] }
  0xca   :  { %3463 = vmatmul.mubr.f32.gmra.mrb[76].mxu0 %v170_v36 }
  0xcb   :  { %2098 = vmatmul.mubr.f32.gmra.mrb[68].mxu1 %v152_v37  ;;  %6174 = vmatprep.mubr.msk.f32.mxu0 %vm1094_vm0, %v175_v38  ;;  %v234_v38 = vld [vmem:[%s12494_s0 + $0x6d0] sm:$0xff] }
  0xcc   :  { %2102 = vmatprep.mubr.f32.mxu1 %v157_v39  ;;  %v216_v39 = vld [vmem:[%s12494_s0 + $0x640] sm:$0xff] }
  0xce   :  { %3468 = vmatmul.mubr.f32.gmra.mrb[78].mxu0 %v174_v40  ;;  %v239_v40 = vld [vmem:[%s12494_s0 + $0x6f8] sm:$0xff] }
  0xcf   :  { %2103 = vmatmul.mubr.f32.gmra.mrb[70].mxu1 %v156_v41  ;;  %6175 = vmatprep.mubr.msk.f32.mxu0 %vm1094_vm0, %v179_v42  ;;  %v221_v41 = vld [vmem:[%s12494_s0 + $0x668] sm:$0xff] }
  0xd0   :  { %2107 = vmatprep.mubr.f32.mxu1 %v161_v43 }
  0xd2   :  { %3473 = vmatmul.mubr.f32.gmra.mrb[80].mxu0 %v178_v44  ;;  %v238_v44 = vld [vmem:[%s12494_s0 + $0x6f0] sm:$0xff] }
  0xd3   :  { %2108 = vmatmul.mubr.f32.gmra.mrb[72].mxu1 %v160_v45  ;;  %6176 = vmatprep.mubr.msk.f32.mxu0 %vm1094_vm0, %v183_v46  ;;  %v220_v45 = vld [vmem:[%s12494_s0 + $0x660] sm:$0xff]  ;;  %v243_v46 = vld [vmem:[%s12494_s0 + $0x718] sm:$0xff] }
  0xd4   :  { %2112 = vmatprep.mubr.f32.mxu1 %v165_v47  ;;  %v225_v47 = vld [vmem:[%s12494_s0 + $0x688] sm:$0xff] }
  0xd6   :  { %3478 = vmatmul.mubr.f32.gmra.mrb[82].mxu0 %v182_v48 }
  0xd7   :  { %2113 = vmatmul.mubr.f32.gmra.mrb[74].mxu1 %v164_v49  ;;  %6177 = vmatprep.mubr.msk.f32.mxu0 %vm1094_vm0, %v187_v50  ;;  %v242_v50 = vld [vmem:[%s12494_s0 + $0x710] sm:$0xff] }
  0xd8   :  { %2117 = vmatprep.mubr.f32.mxu1 %v169_v51  ;;  %v224_v51 = vld [vmem:[%s12494_s0 + $0x680] sm:$0xff] }
  0xda   :  { %3483 = vmatmul.mubr.f32.gmra.mrb[84].mxu0 %v186_v52  ;;  %v247_v52 = vld [vmem:[%s12494_s0 + $0x738] sm:$0xff] }
  0xdb   :  { %2118 = vmatmul.mubr.f32.gmra.mrb[76].mxu1 %v168_v53  ;;  %6178 = vmatprep.mubr.msk.f32.mxu0 %vm1094_vm0, %v191_v54  ;;  %v229_v53 = vld [vmem:[%s12494_s0 + $0x6a8] sm:$0xff] }
  0xdc   :  { %2122 = vmatprep.mubr.f32.mxu1 %v173_v55 }
  0xde   :  { %3488 = vmatmul.mubr.f32.gmra.mrb[86].mxu0 %v190_v56  ;;  %v246_v56 = vld [vmem:[%s12494_s0 + $0x730] sm:$0xff] }
  0xdf   :  { %2123 = vmatmul.mubr.f32.gmra.mrb[78].mxu1 %v172_v57  ;;  %6179 = vmatprep.mubr.msk.f32.mxu0 %vm1094_vm0, %v195_v58  ;;  %v228_v57 = vld [vmem:[%s12494_s0 + $0x6a0] sm:$0xff]  ;;  %v251_v58 = vld [vmem:[%s12494_s0 + $0x758] sm:$0xff] }
  0xe0   :  { %2127 = vmatprep.mubr.f32.mxu1 %v177_v59  ;;  %v233_v59 = vld [vmem:[%s12494_s0 + $0x6c8] sm:$0xff] }
  0xe2   :  { %3493 = vmatmul.mubr.f32.gmra.mrb[88].mxu0 %v194_v60 }
  0xe3   :  { %2128 = vmatmul.mubr.f32.gmra.mrb[80].mxu1 %v176_v61  ;;  %6180 = vmatprep.mubr.msk.f32.mxu0 %vm1094_vm0, %v199_v62 }
  0xe4   :  { %2132 = vmatprep.mubr.f32.mxu1 %v181_v63 }
  0xe6   :  { %3498 = vmatmul.mubr.f32.gmra.mrb[90].mxu0 %v198_v0 }
  0xe7   :  { %2133 = vmatmul.mubr.f32.gmra.mrb[82].mxu1 %v180_v1  ;;  %6181 = vmatprep.mubr.msk.f32.mxu0 %vm1094_vm0, %v203_v2  ;;  %v250_v1 = vld [vmem:[%s12494_s0 + $0x750] sm:$0xff]  ;;  %v232_v2 = vld [vmem:[%s12494_s0 + $0x6c0] sm:$0xff] }
  0xe8   :  { %2137 = vmatprep.mubr.f32.mxu1 %v185_v4  ;;  %v255_v4 = vld [vmem:[%s12494_s0 + $0x778] sm:$0xff] }
  0xea   :  { %3503 = vmatmul.mubr.f32.gmra.mrb[92].mxu0 %v202_v5  ;;  %v237_v5 = vld [vmem:[%s12494_s0 + $0x6e8] sm:$0xff] }
  0xeb   :  { %2138 = vmatmul.mubr.f32.gmra.mrb[84].mxu1 %v184_v6  ;;  %6182 = vmatprep.mubr.msk.f32.mxu0 %vm1094_vm0, %v207_v7 }
  0xec   :  { %2142 = vmatprep.mubr.f32.mxu1 %v189_v8 }
  0xee   :  { %3508 = vmatmul.mubr.f32.gmra.mrb[94].mxu0 %v206_v9 }
  0xef   :  { %2143 = vmatmul.mubr.f32.gmra.mrb[86].mxu1 %v188_v10  ;;  %6183 = vmatprep.mubr.msk.f32.mxu0 %vm1094_vm0, %v211_v11 }
  0xf0   :  { %2147 = vmatprep.mubr.f32.mxu1 %v193_v12  ;;  %v254_v12 = vld [vmem:[%s12494_s0 + $0x770] sm:$0xff] }
  0xf2   :  { %3513 = vmatmul.mubr.f32.gmra.mrb[96].mxu0 %v210_v13  ;;  %v236_v13 = vld [vmem:[%s12494_s0 + $0x6e0] sm:$0xff] }
  0xf3   :  { %2148 = vmatmul.mubr.f32.gmra.mrb[88].mxu1 %v192_v14  ;;  %6184 = vmatprep.mubr.msk.f32.mxu0 %vm1094_vm0, %v215_v15  ;;  %v259_v14 = vld [vmem:[%s12494_s0 + $0x798] sm:$0xff] }
  0xf4   :  { %2152 = vmatprep.mubr.f32.mxu1 %v197_v16 }
  0xf6   :  { %3518 = vmatmul.mubr.f32.gmra.mrb[98].mxu0 %v214_v17 }
  0xf7   :  { %2153 = vmatmul.mubr.f32.gmra.mrb[90].mxu1 %v196_v18  ;;  %6185 = vmatprep.mubr.msk.f32.mxu0 %vm1094_vm0, %v219_v19  ;;  %v241_v18 = vld [vmem:[%s12494_s0 + $0x708] sm:$0xff] }
  0xf8   :  { %2157 = vmatprep.mubr.f32.mxu1 %v201_v20 }
  0xfa   :  { %3523 = vmatmul.mubr.f32.gmra.mrb[100].mxu0 %v218_v21 }
  0xfb   :  { %2158 = vmatmul.mubr.f32.gmra.mrb[92].mxu1 %v200_v22  ;;  %6186 = vmatprep.mubr.msk.f32.mxu0 %vm1094_vm0, %v223_v23 }
  0xfc   :  { %2162 = vmatprep.mubr.f32.mxu1 %v205_v24 }
  0xfe   :  { %3528 = vmatmul.mubr.f32.gmra.mrb[102].mxu0 %v222_v25 }
  0xff   :  { %2163 = vmatmul.mubr.f32.gmra.mrb[94].mxu1 %v204_v26  ;;  %6187 = vmatprep.mubr.msk.f32.mxu0 %vm1094_vm0, %v227_v27  ;;  %v258_v27 = vld [vmem:[%s12494_s0 + $0x790] sm:$0xff] }
 0x100   :  { %2167 = vmatprep.mubr.f32.mxu1 %v209_v28 }
 0x102   :  { %3533 = vmatmul.mubr.f32.gmra.mrb[104].mxu0 %v226_v29  ;;  %v240_v29 = vld [vmem:[%s12494_s0 + $0x700] sm:$0xff] }
 0x103   :  { %2168 = vmatmul.mubr.f32.gmra.mrb[96].mxu1 %v208_v30  ;;  %6188 = vmatprep.mubr.msk.f32.mxu0 %vm1094_vm0, %v231_v31  ;;  %v3274_v36 = vpop.f32.mrb[0].mxu0  ;;  %v263_v30 = vld [vmem:[%s12494_s0 + $0x7b8] sm:$0xff] }
 0x104   :  { %2172 = vmatprep.mubr.f32.mxu1 %v213_v3  ;;  %v3276_v37 = vpop.f32.mrb[1].mxu0 }
 0x106   :  { %3538 = vmatmul.mubr.f32.gmra.mrb[106].mxu0 %v230_v32  ;;  %v245_v32 = vld [vmem:[%s12494_s0 + $0x728] sm:$0xff] }
 0x107   :  { %2173 = vmatmul.mubr.f32.gmra.mrb[98].mxu1 %v212_v33  ;;  %6189 = vmatprep.mubr.msk.f32.mxu0 %vm1094_vm0, %v235_v34  ;;  %v3279_v42 = vpop.f32.mrb[2].mxu0 }
 0x108   :  { %2177 = vmatprep.mubr.f32.mxu1 %v217_v35  ;;  %v3281_v43 = vpop.f32.mrb[3].mxu0 }
 0x109   :  { %v267_v43 = vld [vmem:[%s12494_s0 + $0x7d8] sm:$0xff] }
 0x10a   :  { %3543 = vmatmul.mubr.f32.gmra.mrb[108].mxu0 %v234_v38 }
 0x10b   :  { %2178 = vmatmul.mubr.f32.gmra.mrb[100].mxu1 %v216_v39  ;;  %6190 = vmatprep.mubr.msk.f32.mxu0 %vm1094_vm0, %v239_v40  ;;  %v3284_v48 = vpop.f32.mrb[4].mxu0  ;;  %v262_v40 = vld [vmem:[%s12494_s0 + $0x7b0] sm:$0xff] }
 0x10c   :  { %2182 = vmatprep.mubr.f32.mxu1 %v221_v41  ;;  %v3286_v49 = vpop.f32.mrb[5].mxu0 }
 0x10e   :  { %3548 = vmatmul.mubr.f32.gmra.mrb[110].mxu0 %v238_v44 }
 0x10f   :  { %2183 = vmatmul.mubr.f32.gmra.mrb[102].mxu1 %v220_v45  ;;  %6191 = vmatprep.mubr.msk.f32.mxu0 %vm1094_vm0, %v243_v46  ;;  %v249_v46 = vld [vmem:[%s12494_s0 + $0x748] sm:$0xff] }
 0x110   :  { %2187 = vmatprep.mubr.f32.mxu1 %v225_v47 }
 0x111   :  { %v7719_v54 = vpop.f32.mrb[6].mxu0 }
 0x112   :  { %v3291_v55 = vpop.f32.mrb[7].mxu0  ;;  %3553 = vmatmul.mubr.f32.gmra.mrb[112].mxu0 %v242_v50 }
 0x113   :  { %2188 = vmatmul.mubr.f32.gmra.mrb[104].mxu1 %v224_v51  ;;  %6192 = vmatprep.mubr.msk.f32.mxu0 %vm1094_vm0, %v247_v52 }
 0x114   :  { %2192 = vmatprep.mubr.f32.mxu1 %v229_v53 }
 0x115   :  { %v7734_v60 = vpop.f32.mrb[8].mxu0 }
 0x116   :  { %v1929_v61 = vpop.f32.mrb[0].mxu1  ;;  %v3296_v62 = vpop.f32.mrb[9].mxu0  ;;  %3558 = vmatmul.mubr.f32.gmra.mrb[114].mxu0 %v246_v56  ;;  %v248_v56 = vld [vmem:[%s12494_s0 + $0x740] sm:$0xff] }
 0x117   :  { %v3275_v63 = vadd.f32 %v3274_v36, %v1929_v61  ;;  %v1931_v0 = vpop.f32.mrb[1].mxu1  ;;  %2193 = vmatmul.mubr.f32.gmra.mrb[106].mxu1 %v228_v57  ;;  %6193 = vmatprep.mubr.msk.f32.mxu0 %vm1094_vm0, %v251_v58  ;;  %v271_v57 = vld [vmem:[%s12494_s0 + $0x7f8] sm:$0xff] }
 0x118   :  { %2197 = vmatprep.mubr.f32.mxu1 %v233_v59 }
 0x119   :  { %4554 = vst.msk [vmem:[%s12496_s2] sm:$0xff] %vm4553_vm1, %v3275_v63  ;;  %v7753_v6 = vpop.f32.mrb[10].mxu0  ;;  %v5329_v9 = vmul.f32 %v3275_v63, %v3275_v63  ;;  %v4810_v15 = vsel %vm4553_vm1, %v3275_v63, 0.0 }
 0x11a   :  { %v1934_v7 = vpop.f32.mrb[2].mxu1  ;;  %v3301_v8 = vpop.f32.mrb[11].mxu0  ;;  %3563 = vmatmul.mubr.f32.gmra.mrb[116].mxu0 %v250_v1 }
 0x11b   :  { %v3280_v10 = vadd.f32 %v3279_v42, %v1934_v7  ;;  %v1936_v11 = vpop.f32.mrb[3].mxu1  ;;  %2198 = vmatmul.mubr.f32.gmra.mrb[108].mxu1 %v232_v2  ;;  %6194 = vmatprep.mubr.msk.f32.mxu0 %vm1094_vm0, %v255_v4  ;;  %v5585_v23 = vsel %vm4553_vm1, %v5329_v9, 0.0  ;;  %v244_v42 = vld [vmem:[%s12494_s0 + $0x720] sm:$0xff]  ;;  %v275_v9 = vld [vmem:[%s12494_s0 + $0x818] sm:$0xff] }
 0x11c   :  { %2202 = vmatprep.mubr.f32.mxu1 %v237_v5  ;;  %v270_v5 = vld [vmem:[%s12494_s0 + $0x7f0] sm:$0xff]  ;;  %v252_v8 = vld [vmem:[%s12494_s0 + $0x760] sm:$0xff]  ;;  %v257_v11 = vld [vmem:[%s12494_s0 + $0x788] sm:$0xff] }
 0x11d   :  { %4555 = vst.msk [vmem:[%s12496_s2 + $0x8] sm:$0xff] %vm4553_vm1, %v3280_v10  ;;  %v4811_v16 = vsel %vm4553_vm1, %v3280_v10, 0.0  ;;  %v5330_v17 = vmul.f32 %v3280_v10, %v3280_v10  ;;  %v7774_v19 = vpop.f32.mrb[12].mxu0 }
 0x11e   :  { %v4812_v20 = vadd.f32 %v4811_v16, %v4810_v15  ;;  %v1939_v21 = vpop.f32.mrb[4].mxu1  ;;  %v3306_v22 = vpop.f32.mrb[13].mxu0  ;;  %3568 = vmatmul.mubr.f32.gmra.mrb[118].mxu0 %v254_v12 }
 0x11f   :  { %v5586_v24 = vsel %vm4553_vm1, %v5330_v17, 0.0  ;;  %v3285_v25 = vadd.f32 %v3284_v48, %v1939_v21  ;;  %v1941_v26 = vpop.f32.mrb[5].mxu1  ;;  %2203 = vmatmul.mubr.f32.gmra.mrb[110].mxu1 %v236_v13  ;;  %6195 = vmatprep.mubr.msk.f32.mxu0 %vm1094_vm0, %v259_v14  ;;  %v256_v22 = vld [vmem:[%s12494_s0 + $0x780] sm:$0xff] }
 0x120   :  { %v5587_v28 = vadd.f32 %v5586_v24, %v5585_v23  ;;  %2207 = vmatprep.mubr.f32.mxu1 %v241_v18  ;;  %v279_v23 = vld [vmem:[%s12494_s0 + $0x838] sm:$0xff] }
 0x121   :  { %4556 = vst.msk [vmem:[%s12496_s2 + $0x10] sm:$0xff] %vm4553_vm1, %v3285_v25  ;;  %v4813_v31 = vsel %vm4553_vm1, %v3285_v25, 0.0  ;;  %v5331_v3 = vmul.f32 %v3285_v25, %v3285_v25  ;;  %v7796_v33 = vpop.f32.mrb[14].mxu0  ;;  %v261_v25 = vld [vmem:[%s12494_s0 + $0x7a8] sm:$0xff] }
 0x122   :  { %v4814_v34 = vadd.f32 %v4813_v31, %v4812_v20  ;;  %v1944_v35 = vpop.f32.mrb[6].mxu1  ;;  %v3311_v36 = vpop.f32.mrb[15].mxu0  ;;  %3573 = vmatmul.mubr.f32.gmra.mrb[120].mxu0 %v258_v27  ;;  %v274_v20 = vld [vmem:[%s12494_s0 + $0x810] sm:$0xff] }
 0x123   :  { %v5588_v37 = vsel %vm4553_vm1, %v5331_v3, 0.0  ;;  %v3290_v38 = vadd.f32 %v7719_v54, %v1944_v35  ;;  %v1946_v39 = vpop.f32.mrb[7].mxu1  ;;  %2208 = vmatmul.mubr.f32.gmra.mrb[112].mxu1 %v240_v29  ;;  %6196 = vmatprep.mubr.msk.f32.mxu0 %vm1094_vm0, %v263_v30  ;;  %v266_v54 = vld [vmem:[%s12494_s0 + $0x7d0] sm:$0xff]  ;;  %v260_v35 = vld [vmem:[%s12494_s0 + $0x7a0] sm:$0xff]  ;;  %v283_v36 = vld [vmem:[%s12494_s0 + $0x858] sm:$0xff] }
 0x124   :  { %v5589_v41 = vadd.f32 %v5588_v37, %v5587_v28  ;;  %2212 = vmatprep.mubr.f32.mxu1 %v245_v32  ;;  %v278_v32 = vld [vmem:[%s12494_s0 + $0x830] sm:$0xff] }
 0x125   :  { %4557 = vst.msk [vmem:[%s12496_s2 + $0x18] sm:$0xff] %vm4553_vm1, %v3290_v38  ;;  %v4815_v44 = vsel %vm4553_vm1, %v3290_v38, 0.0  ;;  %v5332_v45 = vmul.f32 %v3290_v38, %v3290_v38  ;;  %v7818_v47 = vpop.f32.mrb[16].mxu0  ;;  %v265_v38 = vld [vmem:[%s12494_s0 + $0x7c8] sm:$0xff] }
 0x126   :  { %v4816_v48 = vadd.f32 %v4815_v44, %v4814_v34  ;;  %v1949_v49 = vpop.f32.mrb[8].mxu1  ;;  %v3316_v50 = vpop.f32.mrb[17].mxu0  ;;  %3578 = vmatmul.mubr.f32.gmra.mrb[122].mxu0 %v262_v40 }
 0x127   :  { %v5590_v51 = vsel %vm4553_vm1, %v5332_v45, 0.0  ;;  %v3295_v52 = vadd.f32 %v7734_v60, %v1949_v49  ;;  %v1951_v53 = vpop.f32.mrb[9].mxu1  ;;  %2213 = vmatmul.mubr.f32.gmra.mrb[114].mxu1 %v244_v42  ;;  %6197 = vmatprep.mubr.msk.f32.mxu0 %vm1094_vm0, %v267_v43  ;;  %v253_v60 = vld [vmem:[%s12494_s0 + $0x768] sm:$0xff]  ;;  %v264_v49 = vld [vmem:[%s12494_s0 + $0x7c0] sm:$0xff]  ;;  %v287_v50 = vld [vmem:[%s12494_s0 + $0x878] sm:$0xff] }
 0x128   :  { %v5591_v55 = vadd.f32 %v5590_v51, %v5589_v41  ;;  %2217 = vmatprep.mubr.f32.mxu1 %v249_v46  ;;  %v282_v46 = vld [vmem:[%s12494_s0 + $0x850] sm:$0xff] }
 0x129   :  { %4558 = vst.msk [vmem:[%s12496_s2 + $0x20] sm:$0xff] %vm4553_vm1, %v3295_v52  ;;  %v4817_v58 = vsel %vm4553_vm1, %v3295_v52, 0.0  ;;  %v5333_v59 = vmul.f32 %v3295_v52, %v3295_v52  ;;  %v7840_v61 = vpop.f32.mrb[18].mxu0  ;;  %v269_v52 = vld [vmem:[%s12494_s0 + $0x7e8] sm:$0xff] }
 0x12a   :  { %v4818_v62 = vadd.f32 %v4817_v58, %v4816_v48  ;;  %v1954_v63 = vpop.f32.mrb[10].mxu1  ;;  %v3321_v0 = vpop.f32.mrb[19].mxu0  ;;  %3583 = vmatmul.mubr.f32.gmra.mrb[124].mxu0 %v266_v54 }
 0x12b   :  { %v5592_v1 = vsel %vm4553_vm1, %v5333_v59, 0.0  ;;  %v3300_v2 = vadd.f32 %v7753_v6, %v1954_v63  ;;  %v1956_v4 = vpop.f32.mrb[11].mxu1  ;;  %2218 = vmatmul.mubr.f32.gmra.mrb[116].mxu1 %v248_v56  ;;  %6198 = vmatprep.mubr.msk.f32.mxu0 %vm1094_vm0, %v271_v57  ;;  %v268_v63 = vld [vmem:[%s12494_s0 + $0x7e0] sm:$0xff]  ;;  %v291_v0 = vld [vmem:[%s12494_s0 + $0x898] sm:$0xff] }
 0x12c   :  { %v5593_v7 = vadd.f32 %v5592_v1, %v5591_v55  ;;  %2222 = vmatprep.mubr.f32.mxu1 %v253_v60  ;;  %v286_v60 = vld [vmem:[%s12494_s0 + $0x870] sm:$0xff] }
 0x12d   :  { %4559 = vst.msk [vmem:[%s12496_s2 + $0x28] sm:$0xff] %vm4553_vm1, %v3300_v2  ;;  %v4819_v6 = vsel %vm4553_vm1, %v3300_v2, 0.0  ;;  %v5334_v10 = vmul.f32 %v3300_v2, %v3300_v2  ;;  %v7862_v12 = vpop.f32.mrb[20].mxu0  ;;  %v273_v2 = vld [vmem:[%s12494_s0 + $0x808] sm:$0xff] }
 0x12e   :  { %v4820_v13 = vadd.f32 %v4819_v6, %v4818_v62  ;;  %v1959_v14 = vpop.f32.mrb[12].mxu1  ;;  %v3326_v15 = vpop.f32.mrb[21].mxu0  ;;  %3588 = vmatmul.mubr.f32.gmra.mrb[126].mxu0 %v270_v5 }
 0x12f   :  { %v5594_v16 = vsel %vm4553_vm1, %v5334_v10, 0.0  ;;  %v3305_v17 = vadd.f32 %v7774_v19, %v1959_v14  ;;  %v1961_v18 = vpop.f32.mrb[13].mxu1  ;;  %2223 = vmatmul.mubr.f32.gmra.mrb[118].mxu1 %v252_v8  ;;  %6199 = vmatprep.mubr.msk.f32.mxu0 %vm1094_vm0, %v275_v9  ;;  %v272_v14 = vld [vmem:[%s12494_s0 + $0x800] sm:$0xff]  ;;  %v295_v15 = vld [vmem:[%s12494_s0 + $0x8b8] sm:$0xff] }
 0x130   :  { %v5595_v21 = vadd.f32 %v5594_v16, %v5593_v7  ;;  %2227 = vmatprep.mubr.f32.mxu1 %v257_v11  ;;  %v290_v11 = vld [vmem:[%s12494_s0 + $0x890] sm:$0xff] }
 0x131   :  { %4560 = vst.msk [vmem:[%s12496_s2 + $0x30] sm:$0xff] %vm4553_vm1, %v3305_v17  ;;  %v4821_v19 = vsel %vm4553_vm1, %v3305_v17, 0.0  ;;  %v5335_v24 = vmul.f32 %v3305_v17, %v3305_v17  ;;  %v7884_v26 = vpop.f32.mrb[22].mxu0  ;;  %v277_v17 = vld [vmem:[%s12494_s0 + $0x828] sm:$0xff] }
 0x132   :  { %v4822_v27 = vadd.f32 %v4821_v19, %v4820_v13  ;;  %v1964_v28 = vpop.f32.mrb[14].mxu1  ;;  %v3331_v29 = vpop.f32.mrb[23].mxu0  ;;  %3593 = vmatmul.mubr.f32.gmra.mrb[128].mxu0 %v274_v20 }
 0x133   :  { %v5596_v30 = vsel %vm4553_vm1, %v5335_v24, 0.0  ;;  %v3310_v31 = vadd.f32 %v7796_v33, %v1964_v28  ;;  %v1966_v3 = vpop.f32.mrb[15].mxu1  ;;  %2228 = vmatmul.mubr.f32.gmra.mrb[120].mxu1 %v256_v22  ;;  %6200 = vmatprep.mubr.msk.f32.mxu0 %vm1094_vm0, %v279_v23  ;;  %v276_v28 = vld [vmem:[%s12494_s0 + $0x820] sm:$0xff]  ;;  %v299_v29 = vld [vmem:[%s12494_s0 + $0x8d8] sm:$0xff] }
 0x134   :  { %v5597_v34 = vadd.f32 %v5596_v30, %v5595_v21  ;;  %2232 = vmatprep.mubr.f32.mxu1 %v261_v25  ;;  %v294_v25 = vld [vmem:[%s12494_s0 + $0x8b0] sm:$0xff] }
 0x135   :  { %4561 = vst.msk [vmem:[%s12496_s2 + $0x38] sm:$0xff] %vm4553_vm1, %v3310_v31  ;;  %v4823_v33 = vsel %vm4553_vm1, %v3310_v31, 0.0  ;;  %v5336_v37 = vmul.f32 %v3310_v31, %v3310_v31  ;;  %v7906_v39 = vpop.f32.mrb[24].mxu0  ;;  %v281_v31 = vld [vmem:[%s12494_s0 + $0x848] sm:$0xff] }
 0x136   :  { %v4824_v40 = vadd.f32 %v4823_v33, %v4822_v27  ;;  %v1969_v41 = vpop.f32.mrb[16].mxu1  ;;  %v3336_v42 = vpop.f32.mrb[25].mxu0  ;;  %3598 = vmatmul.mubr.f32.gmra.mrb[130].mxu0 %v278_v32 }
 0x137   :  { %v5598_v43 = vsel %vm4553_vm1, %v5336_v37, 0.0  ;;  %v3315_v44 = vadd.f32 %v7818_v47, %v1969_v41  ;;  %v1971_v45 = vpop.f32.mrb[17].mxu1  ;;  %2233 = vmatmul.mubr.f32.gmra.mrb[122].mxu1 %v260_v35  ;;  %6201 = vmatprep.mubr.msk.f32.mxu0 %vm1094_vm0, %v283_v36  ;;  %v280_v41 = vld [vmem:[%s12494_s0 + $0x840] sm:$0xff]  ;;  %v303_v42 = vld [vmem:[%s12494_s0 + $0x8f8] sm:$0xff] }
 0x138   :  { %v5599_v48 = vadd.f32 %v5598_v43, %v5597_v34  ;;  %2237 = vmatprep.mubr.f32.mxu1 %v265_v38  ;;  %v298_v38 = vld [vmem:[%s12494_s0 + $0x8d0] sm:$0xff] }
 0x139   :  { %4562 = vst.msk [vmem:[%s12496_s2 + $0x40] sm:$0xff] %vm4553_vm1, %v3315_v44  ;;  %v4825_v47 = vsel %vm4553_vm1, %v3315_v44, 0.0  ;;  %v5337_v51 = vmul.f32 %v3315_v44, %v3315_v44  ;;  %v7928_v53 = vpop.f32.mrb[26].mxu0  ;;  %v285_v44 = vld [vmem:[%s12494_s0 + $0x868] sm:$0xff] }
 0x13a   :  { %v4826_v54 = vadd.f32 %v4825_v47, %v4824_v40  ;;  %v1974_v55 = vpop.f32.mrb[18].mxu1  ;;  %v3341_v56 = vpop.f32.mrb[27].mxu0  ;;  %3603 = vmatmul.mubr.f32.gmra.mrb[132].mxu0 %v282_v46 }
 0x13b   :  { %v5600_v57 = vsel %vm4553_vm1, %v5337_v51, 0.0  ;;  %v3320_v58 = vadd.f32 %v7840_v61, %v1974_v55  ;;  %v1976_v59 = vpop.f32.mrb[19].mxu1  ;;  %2238 = vmatmul.mubr.f32.gmra.mrb[124].mxu1 %v264_v49  ;;  %6202 = vmatprep.mubr.msk.f32.mxu0 %vm1094_vm0, %v287_v50  ;;  %v284_v55 = vld [vmem:[%s12494_s0 + $0x860] sm:$0xff]  ;;  %v307_v56 = vld [vmem:[%s12494_s0 + $0x918] sm:$0xff] }
 0x13c   :  { %v5601_v62 = vadd.f32 %v5600_v57, %v5599_v48  ;;  %2242 = vmatprep.mubr.f32.mxu1 %v269_v52  ;;  %v302_v52 = vld [vmem:[%s12494_s0 + $0x8f0] sm:$0xff] }
 0x13d   :  { %4563 = vst.msk [vmem:[%s12496_s2 + $0x48] sm:$0xff] %vm4553_vm1, %v3320_v58  ;;  %v4827_v61 = vsel %vm4553_vm1, %v3320_v58, 0.0  ;;  %v5338_v1 = vmul.f32 %v3320_v58, %v3320_v58  ;;  %v7950_v4 = vpop.f32.mrb[28].mxu0  ;;  %v289_v58 = vld [vmem:[%s12494_s0 + $0x888] sm:$0xff] }
 0x13e   :  { %v4828_v5 = vadd.f32 %v4827_v61, %v4826_v54  ;;  %v1979_v7 = vpop.f32.mrb[20].mxu1  ;;  %v3346_v8 = vpop.f32.mrb[29].mxu0  ;;  %3608 = vmatmul.mubr.f32.gmra.mrb[134].mxu0 %v286_v60 }
 0x13f   :  { %v5602_v9 = vsel %vm4553_vm1, %v5338_v1, 0.0  ;;  %v3325_v6 = vadd.f32 %v7862_v12, %v1979_v7  ;;  %v1981_v10 = vpop.f32.mrb[21].mxu1  ;;  %2243 = vmatmul.mubr.f32.gmra.mrb[126].mxu1 %v268_v63  ;;  %6203 = vmatprep.mubr.msk.f32.mxu0 %vm1094_vm0, %v291_v0  ;;  %v288_v7 = vld [vmem:[%s12494_s0 + $0x880] sm:$0xff]  ;;  %v311_v8 = vld [vmem:[%s12494_s0 + $0x938] sm:$0xff] }
 0x140   :  { %v5603_v13 = vadd.f32 %v5602_v9, %v5601_v62  ;;  %2247 = vmatprep.mubr.f32.mxu1 %v273_v2  ;;  %v306_v2 = vld [vmem:[%s12494_s0 + $0x910] sm:$0xff] }
 0x141   :  { %4564 = vst.msk [vmem:[%s12496_s2 + $0x50] sm:$0xff] %vm4553_vm1, %v3325_v6  ;;  %v4829_v12 = vsel %vm4553_vm1, %v3325_v6, 0.0  ;;  %v5339_v16 = vmul.f32 %v3325_v6, %v3325_v6  ;;  %v7972_v18 = vpop.f32.mrb[30].mxu0  ;;  %v293_v6 = vld [vmem:[%s12494_s0 + $0x8a8] sm:$0xff] }
 0x142   :  { %v4830_v20 = vadd.f32 %v4829_v12, %v4828_v5  ;;  %v1984_v21 = vpop.f32.mrb[22].mxu1  ;;  %v3351_v22 = vpop.f32.mrb[31].mxu0  ;;  %3613 = vmatmul.mubr.f32.gmra.mrb[136].mxu0 %v290_v11 }
 0x143   :  { %v5604_v23 = vsel %vm4553_vm1, %v5339_v16, 0.0  ;;  %v3330_v19 = vadd.f32 %v7884_v26, %v1984_v21  ;;  %v1986_v24 = vpop.f32.mrb[23].mxu1  ;;  %2248 = vmatmul.mubr.f32.gmra.mrb[128].mxu1 %v272_v14  ;;  %6204 = vmatprep.mubr.msk.f32.mxu0 %vm1094_vm0, %v295_v15  ;;  %v292_v21 = vld [vmem:[%s12494_s0 + $0x8a0] sm:$0xff]  ;;  %v315_v22 = vld [vmem:[%s12494_s0 + $0x958] sm:$0xff] }
 0x144   :  { %v5605_v27 = vadd.f32 %v5604_v23, %v5603_v13  ;;  %2252 = vmatprep.mubr.f32.mxu1 %v277_v17  ;;  %v310_v17 = vld [vmem:[%s12494_s0 + $0x930] sm:$0xff] }
 0x145   :  { %4565 = vst.msk [vmem:[%s12496_s2 + $0x58] sm:$0xff] %vm4553_vm1, %v3330_v19  ;;  %v4831_v26 = vsel %vm4553_vm1, %v3330_v19, 0.0  ;;  %v5340_v30 = vmul.f32 %v3330_v19, %v3330_v19  ;;  %v7994_v3 = vpop.f32.mrb[32].mxu0  ;;  %v297_v19 = vld [vmem:[%s12494_s0 + $0x8c8] sm:$0xff] }
 0x146   :  { %v4832_v32 = vadd.f32 %v4831_v26, %v4830_v20  ;;  %v1989_v34 = vpop.f32.mrb[24].mxu1  ;;  %v3356_v35 = vpop.f32.mrb[33].mxu0  ;;  %3618 = vmatmul.mubr.f32.gmra.mrb[138].mxu0 %v294_v25 }
 0x147   :  { %v5606_v36 = vsel %vm4553_vm1, %v5340_v30, 0.0  ;;  %v3335_v33 = vadd.f32 %v7906_v39, %v1989_v34  ;;  %v1991_v37 = vpop.f32.mrb[25].mxu1  ;;  %2253 = vmatmul.mubr.f32.gmra.mrb[130].mxu1 %v276_v28  ;;  %6205 = vmatprep.mubr.msk.f32.mxu0 %vm1094_vm0, %v299_v29  ;;  %v296_v34 = vld [vmem:[%s12494_s0 + $0x8c0] sm:$0xff]  ;;  %v319_v35 = vld [vmem:[%s12494_s0 + $0x978] sm:$0xff] }
 0x148   :  { %v5607_v40 = vadd.f32 %v5606_v36, %v5605_v27  ;;  %2257 = vmatprep.mubr.f32.mxu1 %v281_v31  ;;  %v314_v31 = vld [vmem:[%s12494_s0 + $0x950] sm:$0xff] }
 0x149   :  { %4566 = vst.msk [vmem:[%s12496_s2 + $0x60] sm:$0xff] %vm4553_vm1, %v3335_v33  ;;  %v4833_v39 = vsel %vm4553_vm1, %v3335_v33, 0.0  ;;  %v5341_v43 = vmul.f32 %v3335_v33, %v3335_v33  ;;  %v8016_v45 = vpop.f32.mrb[34].mxu0  ;;  %v301_v33 = vld [vmem:[%s12494_s0 + $0x8e8] sm:$0xff] }
 0x14a   :  { %v4834_v46 = vadd.f32 %v4833_v39, %v4832_v32  ;;  %v1994_v48 = vpop.f32.mrb[26].mxu1  ;;  %v3361_v49 = vpop.f32.mrb[35].mxu0  ;;  %3623 = vmatmul.mubr.f32.gmra.mrb[140].mxu0 %v298_v38 }
 0x14b   :  { %v5608_v50 = vsel %vm4553_vm1, %v5341_v43, 0.0  ;;  %v3340_v47 = vadd.f32 %v7928_v53, %v1994_v48  ;;  %v1996_v51 = vpop.f32.mrb[27].mxu1  ;;  %2258 = vmatmul.mubr.f32.gmra.mrb[132].mxu1 %v280_v41  ;;  %6206 = vmatprep.mubr.msk.f32.mxu0 %vm1094_vm0, %v303_v42  ;;  %v300_v48 = vld [vmem:[%s12494_s0 + $0x8e0] sm:$0xff]  ;;  %v323_v49 = vld [vmem:[%s12494_s0 + $0x998] sm:$0xff] }
 0x14c   :  { %v5609_v54 = vadd.f32 %v5608_v50, %v5607_v40  ;;  %2262 = vmatprep.mubr.f32.mxu1 %v285_v44  ;;  %v318_v44 = vld [vmem:[%s12494_s0 + $0x970] sm:$0xff] }
 0x14d   :  { %4567 = vst.msk [vmem:[%s12496_s2 + $0x68] sm:$0xff] %vm4553_vm1, %v3340_v47  ;;  %v4835_v53 = vsel %vm4553_vm1, %v3340_v47, 0.0  ;;  %v5342_v57 = vmul.f32 %v3340_v47, %v3340_v47  ;;  %v8038_v59 = vpop.f32.mrb[36].mxu0  ;;  %v305_v47 = vld [vmem:[%s12494_s0 + $0x908] sm:$0xff] }
 0x14e   :  { %v4836_v60 = vadd.f32 %v4835_v53, %v4834_v46  ;;  %v1999_v62 = vpop.f32.mrb[28].mxu1  ;;  %v3366_v63 = vpop.f32.mrb[37].mxu0  ;;  %3628 = vmatmul.mubr.f32.gmra.mrb[142].mxu0 %v302_v52 }
 0x14f   :  { %v5610_v0 = vsel %vm4553_vm1, %v5342_v57, 0.0  ;;  %v3345_v61 = vadd.f32 %v7950_v4, %v1999_v62  ;;  %v2001_v1 = vpop.f32.mrb[29].mxu1  ;;  %2263 = vmatmul.mubr.f32.gmra.mrb[134].mxu1 %v284_v55  ;;  %6207 = vmatprep.mubr.msk.f32.mxu0 %vm1094_vm0, %v307_v56  ;;  %v304_v62 = vld [vmem:[%s12494_s0 + $0x900] sm:$0xff]  ;;  %v327_v63 = vld [vmem:[%s12494_s0 + $0x9b8] sm:$0xff] }
 0x150   :  { %v5611_v5 = vadd.f32 %v5610_v0, %v5609_v54  ;;  %2267 = vmatprep.mubr.f32.mxu1 %v289_v58  ;;  %v322_v58 = vld [vmem:[%s12494_s0 + $0x990] sm:$0xff] }
 0x151   :  { %4568 = vst.msk [vmem:[%s12496_s2 + $0x70] sm:$0xff] %vm4553_vm1, %v3345_v61  ;;  %v4837_v4 = vsel %vm4553_vm1, %v3345_v61, 0.0  ;;  %v5343_v9 = vmul.f32 %v3345_v61, %v3345_v61  ;;  %v8060_v10 = vpop.f32.mrb[38].mxu0  ;;  %v309_v61 = vld [vmem:[%s12494_s0 + $0x928] sm:$0xff] }
 0x152   :  { %v4838_v11 = vadd.f32 %v4837_v4, %v4836_v60  ;;  %v2004_v13 = vpop.f32.mrb[30].mxu1  ;;  %v3371_v14 = vpop.f32.mrb[39].mxu0  ;;  %3633 = vmatmul.mubr.f32.gmra.mrb[144].mxu0 %v306_v2 }
 0x153   :  { %v5612_v15 = vsel %vm4553_vm1, %v5343_v9, 0.0  ;;  %v3350_v12 = vadd.f32 %v7972_v18, %v2004_v13  ;;  %v2006_v16 = vpop.f32.mrb[31].mxu1  ;;  %2268 = vmatmul.mubr.f32.gmra.mrb[136].mxu1 %v288_v7  ;;  %6208 = vmatprep.mubr.msk.f32.mxu0 %vm1094_vm0, %v311_v8  ;;  %v308_v13 = vld [vmem:[%s12494_s0 + $0x920] sm:$0xff]  ;;  %v331_v14 = vld [vmem:[%s12494_s0 + $0x9d8] sm:$0xff] }
 0x154   :  { %v5613_v20 = vadd.f32 %v5612_v15, %v5611_v5  ;;  %2272 = vmatprep.mubr.f32.mxu1 %v293_v6  ;;  %v326_v6 = vld [vmem:[%s12494_s0 + $0x9b0] sm:$0xff] }
 0x155   :  { %4569 = vst.msk [vmem:[%s12496_s2 + $0x78] sm:$0xff] %vm4553_vm1, %v3350_v12  ;;  %v4839_v18 = vsel %vm4553_vm1, %v3350_v12, 0.0  ;;  %v5344_v23 = vmul.f32 %v3350_v12, %v3350_v12  ;;  %v8082_v24 = vpop.f32.mrb[40].mxu0  ;;  %v313_v12 = vld [vmem:[%s12494_s0 + $0x948] sm:$0xff] }
 0x156   :  { %v4840_v25 = vadd.f32 %v4839_v18, %v4838_v11  ;;  %v2009_v27 = vpop.f32.mrb[32].mxu1  ;;  %v3376_v28 = vpop.f32.mrb[41].mxu0  ;;  %3638 = vmatmul.mubr.f32.gmra.mrb[146].mxu0 %v310_v17 }
 0x157   :  { %v5614_v29 = vsel %vm4553_vm1, %v5344_v23, 0.0  ;;  %v3355_v26 = vadd.f32 %v7994_v3, %v2009_v27  ;;  %v2011_v30 = vpop.f32.mrb[33].mxu1  ;;  %2273 = vmatmul.mubr.f32.gmra.mrb[138].mxu1 %v292_v21  ;;  %6209 = vmatprep.mubr.msk.f32.mxu0 %vm1094_vm0, %v315_v22  ;;  %v312_v27 = vld [vmem:[%s12494_s0 + $0x940] sm:$0xff]  ;;  %v335_v28 = vld [vmem:[%s12494_s0 + $0x9f8] sm:$0xff] }
 0x158   :  { %v5615_v32 = vadd.f32 %v5614_v29, %v5613_v20  ;;  %2277 = vmatprep.mubr.f32.mxu1 %v297_v19  ;;  %v330_v19 = vld [vmem:[%s12494_s0 + $0x9d0] sm:$0xff] }
 0x159   :  { %4570 = vst.msk [vmem:[%s12496_s2 + $0x80] sm:$0xff] %vm4553_vm1, %v3355_v26  ;;  %v4841_v3 = vsel %vm4553_vm1, %v3355_v26, 0.0  ;;  %v5345_v36 = vmul.f32 %v3355_v26, %v3355_v26  ;;  %v8104_v37 = vpop.f32.mrb[42].mxu0  ;;  %v317_v26 = vld [vmem:[%s12494_s0 + $0x968] sm:$0xff] }
 0x15a   :  { %v4842_v38 = vadd.f32 %v4841_v3, %v4840_v25  ;;  %v2014_v40 = vpop.f32.mrb[34].mxu1  ;;  %v3381_v41 = vpop.f32.mrb[43].mxu0  ;;  %3643 = vmatmul.mubr.f32.gmra.mrb[148].mxu0 %v314_v31 }
 0x15b   :  { %v5616_v42 = vsel %vm4553_vm1, %v5345_v36, 0.0  ;;  %v3360_v39 = vadd.f32 %v8016_v45, %v2014_v40  ;;  %v2016_v43 = vpop.f32.mrb[35].mxu1  ;;  %2278 = vmatmul.mubr.f32.gmra.mrb[140].mxu1 %v296_v34  ;;  %6210 = vmatprep.mubr.msk.f32.mxu0 %vm1094_vm0, %v319_v35  ;;  %v316_v40 = vld [vmem:[%s12494_s0 + $0x960] sm:$0xff]  ;;  %v339_v41 = vld [vmem:[%s12494_s0 + $0xa18] sm:$0xff] }
 0x15c   :  { %v5617_v46 = vadd.f32 %v5616_v42, %v5615_v32  ;;  %2282 = vmatprep.mubr.f32.mxu1 %v301_v33  ;;  %v334_v33 = vld [vmem:[%s12494_s0 + $0x9f0] sm:$0xff] }
 0x15d   :  { %4571 = vst.msk [vmem:[%s12496_s2 + $0x88] sm:$0xff] %vm4553_vm1, %v3360_v39  ;;  %v4843_v45 = vsel %vm4553_vm1, %v3360_v39, 0.0  ;;  %v5346_v50 = vmul.f32 %v3360_v39, %v3360_v39  ;;  %v8126_v51 = vpop.f32.mrb[44].mxu0  ;;  %v321_v39 = vld [vmem:[%s12494_s0 + $0x988] sm:$0xff] }
 0x15e   :  { %v4844_v52 = vadd.f32 %v4843_v45, %v4842_v38  ;;  %v2019_v54 = vpop.f32.mrb[36].mxu1  ;;  %v3386_v55 = vpop.f32.mrb[45].mxu0  ;;  %3648 = vmatmul.mubr.f32.gmra.mrb[150].mxu0 %v318_v44 }
 0x15f   :  { %v5618_v56 = vsel %vm4553_vm1, %v5346_v50, 0.0  ;;  %v3365_v53 = vadd.f32 %v8038_v59, %v2019_v54  ;;  %v2021_v57 = vpop.f32.mrb[37].mxu1  ;;  %2283 = vmatmul.mubr.f32.gmra.mrb[142].mxu1 %v300_v48  ;;  %6211 = vmatprep.mubr.msk.f32.mxu0 %vm1094_vm0, %v323_v49  ;;  %v320_v54 = vld [vmem:[%s12494_s0 + $0x980] sm:$0xff]  ;;  %v343_v55 = vld [vmem:[%s12494_s0 + $0xa38] sm:$0xff] }
 0x160   :  { %v5619_v60 = vadd.f32 %v5618_v56, %v5617_v46  ;;  %2287 = vmatprep.mubr.f32.mxu1 %v305_v47  ;;  %v338_v47 = vld [vmem:[%s12494_s0 + $0xa10] sm:$0xff] }
 0x161   :  { %4572 = vst.msk [vmem:[%s12496_s2 + $0x90] sm:$0xff] %vm4553_vm1, %v3365_v53  ;;  %v4845_v59 = vsel %vm4553_vm1, %v3365_v53, 0.0  ;;  %v5347_v0 = vmul.f32 %v3365_v53, %v3365_v53  ;;  %v8148_v1 = vpop.f32.mrb[46].mxu0  ;;  %v325_v53 = vld [vmem:[%s12494_s0 + $0x9a8] sm:$0xff] }
 0x162   :  { %v4846_v2 = vadd.f32 %v4845_v59, %v4844_v52  ;;  %v2024_v5 = vpop.f32.mrb[38].mxu1  ;;  %v3391_v7 = vpop.f32.mrb[47].mxu0  ;;  %3653 = vmatmul.mubr.f32.gmra.mrb[152].mxu0 %v322_v58 }
 0x163   :  { %v5620_v8 = vsel %vm4553_vm1, %v5347_v0, 0.0  ;;  %v3370_v4 = vadd.f32 %v8060_v10, %v2024_v5  ;;  %v2026_v9 = vpop.f32.mrb[39].mxu1  ;;  %2288 = vmatmul.mubr.f32.gmra.mrb[144].mxu1 %v304_v62  ;;  %6212 = vmatprep.mubr.msk.f32.mxu0 %vm1094_vm0, %v327_v63  ;;  %v324_v5 = vld [vmem:[%s12494_s0 + $0x9a0] sm:$0xff]  ;;  %v347_v7 = vld [vmem:[%s12494_s0 + $0xa58] sm:$0xff] }
 0x164   :  { %v5621_v11 = vadd.f32 %v5620_v8, %v5619_v60  ;;  %2292 = vmatprep.mubr.f32.mxu1 %v309_v61  ;;  %v342_v61 = vld [vmem:[%s12494_s0 + $0xa30] sm:$0xff] }
 0x165   :  { %4573 = vst.msk [vmem:[%s12496_s2 + $0x98] sm:$0xff] %vm4553_vm1, %v3370_v4  ;;  %v4847_v10 = vsel %vm4553_vm1, %v3370_v4, 0.0  ;;  %v5348_v15 = vmul.f32 %v3370_v4, %v3370_v4  ;;  %v8170_v16 = vpop.f32.mrb[48].mxu0  ;;  %v329_v4 = vld [vmem:[%s12494_s0 + $0x9c8] sm:$0xff] }
 0x166   :  { %v4848_v17 = vadd.f32 %v4847_v10, %v4846_v2  ;;  %v2029_v20 = vpop.f32.mrb[40].mxu1  ;;  %v3396_v21 = vpop.f32.mrb[49].mxu0  ;;  %3658 = vmatmul.mubr.f32.gmra.mrb[154].mxu0 %v326_v6 }
 0x167   :  { %v5622_v22 = vsel %vm4553_vm1, %v5348_v15, 0.0  ;;  %v3375_v18 = vadd.f32 %v8082_v24, %v2029_v20  ;;  %v2031_v23 = vpop.f32.mrb[41].mxu1  ;;  %2293 = vmatmul.mubr.f32.gmra.mrb[146].mxu1 %v308_v13  ;;  %6213 = vmatprep.mubr.msk.f32.mxu0 %vm1094_vm0, %v331_v14  ;;  %v328_v20 = vld [vmem:[%s12494_s0 + $0x9c0] sm:$0xff]  ;;  %v351_v21 = vld [vmem:[%s12494_s0 + $0xa78] sm:$0xff] }
 0x168   :  { %v5623_v25 = vadd.f32 %v5622_v22, %v5621_v11  ;;  %2297 = vmatprep.mubr.f32.mxu1 %v313_v12  ;;  %v346_v12 = vld [vmem:[%s12494_s0 + $0xa50] sm:$0xff] }
 0x169   :  { %4574 = vst.msk [vmem:[%s12496_s2 + $0xa0] sm:$0xff] %vm4553_vm1, %v3375_v18  ;;  %v4849_v24 = vsel %vm4553_vm1, %v3375_v18, 0.0  ;;  %v5349_v29 = vmul.f32 %v3375_v18, %v3375_v18  ;;  %v8192_v30 = vpop.f32.mrb[50].mxu0  ;;  %v333_v18 = vld [vmem:[%s12494_s0 + $0x9e8] sm:$0xff] }
 0x16a   :  { %v4850_v31 = vadd.f32 %v4849_v24, %v4848_v17  ;;  %v2034_v32 = vpop.f32.mrb[42].mxu1  ;;  %v3401_v34 = vpop.f32.mrb[51].mxu0  ;;  %3663 = vmatmul.mubr.f32.gmra.mrb[156].mxu0 %v330_v19 }
 0x16b   :  { %v5624_v35 = vsel %vm4553_vm1, %v5349_v29, 0.0  ;;  %v3380_v3 = vadd.f32 %v8104_v37, %v2034_v32  ;;  %v2036_v36 = vpop.f32.mrb[43].mxu1  ;;  %2298 = vmatmul.mubr.f32.gmra.mrb[148].mxu1 %v312_v27  ;;  %6214 = vmatprep.mubr.msk.f32.mxu0 %vm1094_vm0, %v335_v28  ;;  %v332_v32 = vld [vmem:[%s12494_s0 + $0x9e0] sm:$0xff]  ;;  %v355_v34 = vld [vmem:[%s12494_s0 + $0xa98] sm:$0xff] }
 0x16c   :  { %v5625_v38 = vadd.f32 %v5624_v35, %v5623_v25  ;;  %2302 = vmatprep.mubr.f32.mxu1 %v317_v26  ;;  %v350_v26 = vld [vmem:[%s12494_s0 + $0xa70] sm:$0xff] }
 0x16d   :  { %4575 = vst.msk [vmem:[%s12496_s2 + $0xa8] sm:$0xff] %vm4553_vm1, %v3380_v3  ;;  %v4851_v37 = vsel %vm4553_vm1, %v3380_v3, 0.0  ;;  %v5350_v42 = vmul.f32 %v3380_v3, %v3380_v3  ;;  %v8214_v43 = vpop.f32.mrb[52].mxu0  ;;  %v337_v3 = vld [vmem:[%s12494_s0 + $0xa08] sm:$0xff] }
 0x16e   :  { %v4852_v44 = vadd.f32 %v4851_v37, %v4850_v31  ;;  %v2039_v46 = vpop.f32.mrb[44].mxu1  ;;  %v3406_v48 = vpop.f32.mrb[53].mxu0  ;;  %3668 = vmatmul.mubr.f32.gmra.mrb[158].mxu0 %v334_v33 }
 0x16f   :  { %v5626_v49 = vsel %vm4553_vm1, %v5350_v42, 0.0  ;;  %v3385_v45 = vadd.f32 %v8126_v51, %v2039_v46  ;;  %v2041_v50 = vpop.f32.mrb[45].mxu1  ;;  %2303 = vmatmul.mubr.f32.gmra.mrb[150].mxu1 %v316_v40  ;;  %6215 = vmatprep.mubr.msk.f32.mxu0 %vm1094_vm0, %v339_v41  ;;  %v336_v46 = vld [vmem:[%s12494_s0 + $0xa00] sm:$0xff]  ;;  %v359_v48 = vld [vmem:[%s12494_s0 + $0xab8] sm:$0xff] }
 0x170   :  { %v5627_v52 = vadd.f32 %v5626_v49, %v5625_v38  ;;  %2307 = vmatprep.mubr.f32.mxu1 %v321_v39  ;;  %v354_v39 = vld [vmem:[%s12494_s0 + $0xa90] sm:$0xff] }
 0x171   :  { %4576 = vst.msk [vmem:[%s12496_s2 + $0xb0] sm:$0xff] %vm4553_vm1, %v3385_v45  ;;  %v4853_v51 = vsel %vm4553_vm1, %v3385_v45, 0.0  ;;  %v5351_v56 = vmul.f32 %v3385_v45, %v3385_v45  ;;  %v8236_v57 = vpop.f32.mrb[54].mxu0  ;;  %v341_v45 = vld [vmem:[%s12494_s0 + $0xa28] sm:$0xff] }
 0x172   :  { %v4854_v58 = vadd.f32 %v4853_v51, %v4852_v44  ;;  %v2044_v60 = vpop.f32.mrb[46].mxu1  ;;  %v3411_v62 = vpop.f32.mrb[55].mxu0  ;;  %3673 = vmatmul.mubr.f32.gmra.mrb[160].mxu0 %v338_v47 }
 0x173   :  { %v5628_v63 = vsel %vm4553_vm1, %v5351_v56, 0.0  ;;  %v3390_v59 = vadd.f32 %v8148_v1, %v2044_v60  ;;  %v2046_v0 = vpop.f32.mrb[47].mxu1  ;;  %2308 = vmatmul.mubr.f32.gmra.mrb[152].mxu1 %v320_v54  ;;  %6216 = vmatprep.mubr.msk.f32.mxu0 %vm1094_vm0, %v343_v55  ;;  %v340_v60 = vld [vmem:[%s12494_s0 + $0xa20] sm:$0xff]  ;;  %v363_v62 = vld [vmem:[%s12494_s0 + $0xad8] sm:$0xff] }
 0x174   :  { %v5629_v2 = vadd.f32 %v5628_v63, %v5627_v52  ;;  %2312 = vmatprep.mubr.f32.mxu1 %v325_v53  ;;  %v358_v53 = vld [vmem:[%s12494_s0 + $0xab0] sm:$0xff] }
 0x175   :  { %4577 = vst.msk [vmem:[%s12496_s2 + $0xb8] sm:$0xff] %vm4553_vm1, %v3390_v59  ;;  %v4855_v1 = vsel %vm4553_vm1, %v3390_v59, 0.0  ;;  %v5352_v8 = vmul.f32 %v3390_v59, %v3390_v59  ;;  %v8258_v9 = vpop.f32.mrb[56].mxu0  ;;  %v345_v59 = vld [vmem:[%s12494_s0 + $0xa48] sm:$0xff] }
 0x176   :  { %v4856_v6 = vadd.f32 %v4855_v1, %v4854_v58  ;;  %v2049_v11 = vpop.f32.mrb[48].mxu1  ;;  %v3416_v13 = vpop.f32.mrb[57].mxu0  ;;  %3678 = vmatmul.mubr.f32.gmra.mrb[162].mxu0 %v342_v61 }
 0x177   :  { %v5630_v14 = vsel %vm4553_vm1, %v5352_v8, 0.0  ;;  %v3395_v10 = vadd.f32 %v8170_v16, %v2049_v11  ;;  %v2051_v15 = vpop.f32.mrb[49].mxu1  ;;  %2313 = vmatmul.mubr.f32.gmra.mrb[154].mxu1 %v324_v5  ;;  %6217 = vmatprep.mubr.msk.f32.mxu0 %vm1094_vm0, %v347_v7  ;;  %v344_v11 = vld [vmem:[%s12494_s0 + $0xa40] sm:$0xff]  ;;  %v367_v13 = vld [vmem:[%s12494_s0 + $0xaf8] sm:$0xff] }
 0x178   :  { %v5631_v17 = vadd.f32 %v5630_v14, %v5629_v2  ;;  %2317 = vmatprep.mubr.f32.mxu1 %v329_v4  ;;  %v362_v4 = vld [vmem:[%s12494_s0 + $0xad0] sm:$0xff] }
 0x179   :  { %4578 = vst.msk [vmem:[%s12496_s2 + $0xc0] sm:$0xff] %vm4553_vm1, %v3395_v10  ;;  %v4857_v16 = vsel %vm4553_vm1, %v3395_v10, 0.0  ;;  %v5353_v22 = vmul.f32 %v3395_v10, %v3395_v10  ;;  %v8280_v23 = vpop.f32.mrb[58].mxu0  ;;  %v349_v10 = vld [vmem:[%s12494_s0 + $0xa68] sm:$0xff] }
 0x17a   :  { %v4858_v19 = vadd.f32 %v4857_v16, %v4856_v6  ;;  %v2054_v25 = vpop.f32.mrb[50].mxu1  ;;  %v3421_v27 = vpop.f32.mrb[59].mxu0  ;;  %3683 = vmatmul.mubr.f32.gmra.mrb[164].mxu0 %v346_v12 }
 0x17b   :  { %v5632_v28 = vsel %vm4553_vm1, %v5353_v22, 0.0  ;;  %v3400_v24 = vadd.f32 %v8192_v30, %v2054_v25  ;;  %v2056_v29 = vpop.f32.mrb[51].mxu1  ;;  %2318 = vmatmul.mubr.f32.gmra.mrb[156].mxu1 %v328_v20  ;;  %6218 = vmatprep.mubr.msk.f32.mxu0 %vm1094_vm0, %v351_v21  ;;  %v348_v25 = vld [vmem:[%s12494_s0 + $0xa60] sm:$0xff]  ;;  %v371_v27 = vld [vmem:[%s12494_s0 + $0xb18] sm:$0xff] }
 0x17c   :  { %v5633_v31 = vadd.f32 %v5632_v28, %v5631_v17  ;;  %2322 = vmatprep.mubr.f32.mxu1 %v333_v18  ;;  %v366_v18 = vld [vmem:[%s12494_s0 + $0xaf0] sm:$0xff] }
 0x17d   :  { %4579 = vst.msk [vmem:[%s12496_s2 + $0xc8] sm:$0xff] %vm4553_vm1, %v3400_v24  ;;  %v4859_v30 = vsel %vm4553_vm1, %v3400_v24, 0.0  ;;  %v5354_v35 = vmul.f32 %v3400_v24, %v3400_v24  ;;  %v8302_v36 = vpop.f32.mrb[60].mxu0  ;;  %v353_v24 = vld [vmem:[%s12494_s0 + $0xa88] sm:$0xff] }
 0x17e   :  { %v4860_v33 = vadd.f32 %v4859_v30, %v4858_v19  ;;  %v2059_v38 = vpop.f32.mrb[52].mxu1  ;;  %v3426_v40 = vpop.f32.mrb[61].mxu0  ;;  %3688 = vmatmul.mubr.f32.gmra.mrb[166].mxu0 %v350_v26 }
 0x17f   :  { %v5634_v41 = vsel %vm4553_vm1, %v5354_v35, 0.0  ;;  %v3405_v37 = vadd.f32 %v8214_v43, %v2059_v38  ;;  %v2061_v42 = vpop.f32.mrb[53].mxu1  ;;  %2323 = vmatmul.mubr.f32.gmra.mrb[158].mxu1 %v332_v32  ;;  %6219 = vmatprep.mubr.msk.f32.mxu0 %vm1094_vm0, %v355_v34  ;;  %v352_v38 = vld [vmem:[%s12494_s0 + $0xa80] sm:$0xff]  ;;  %v375_v40 = vld [vmem:[%s12494_s0 + $0xb38] sm:$0xff] }
 0x180   :  { %v5635_v44 = vadd.f32 %v5634_v41, %v5633_v31  ;;  %2327 = vmatprep.mubr.f32.mxu1 %v337_v3  ;;  %v370_v3 = vld [vmem:[%s12494_s0 + $0xb10] sm:$0xff] }
 0x181   :  { %4580 = vst.msk [vmem:[%s12496_s2 + $0xd0] sm:$0xff] %vm4553_vm1, %v3405_v37  ;;  %v4861_v43 = vsel %vm4553_vm1, %v3405_v37, 0.0  ;;  %v5355_v49 = vmul.f32 %v3405_v37, %v3405_v37  ;;  %v8324_v50 = vpop.f32.mrb[62].mxu0  ;;  %v357_v37 = vld [vmem:[%s12494_s0 + $0xaa8] sm:$0xff] }
 0x182   :  { %v4862_v47 = vadd.f32 %v4861_v43, %v4860_v33  ;;  %v2064_v52 = vpop.f32.mrb[54].mxu1  ;;  %v3431_v54 = vpop.f32.mrb[63].mxu0  ;;  %3693 = vmatmul.mubr.f32.gmra.mrb[168].mxu0 %v354_v39 }
 0x183   :  { %v5636_v55 = vsel %vm4553_vm1, %v5355_v49, 0.0  ;;  %v3410_v51 = vadd.f32 %v8236_v57, %v2064_v52  ;;  %v2066_v56 = vpop.f32.mrb[55].mxu1  ;;  %2328 = vmatmul.mubr.f32.gmra.mrb[160].mxu1 %v336_v46  ;;  %6220 = vmatprep.mubr.msk.f32.mxu0 %vm1094_vm0, %v359_v48  ;;  %v356_v52 = vld [vmem:[%s12494_s0 + $0xaa0] sm:$0xff]  ;;  %v379_v54 = vld [vmem:[%s12494_s0 + $0xb58] sm:$0xff] }
 0x184   :  { %v5637_v58 = vadd.f32 %v5636_v55, %v5635_v44  ;;  %2332 = vmatprep.mubr.f32.mxu1 %v341_v45  ;;  %v374_v45 = vld [vmem:[%s12494_s0 + $0xb30] sm:$0xff] }
 0x185   :  { %4581 = vst.msk [vmem:[%s12496_s2 + $0xd8] sm:$0xff] %vm4553_vm1, %v3410_v51  ;;  %v4863_v57 = vsel %vm4553_vm1, %v3410_v51, 0.0  ;;  %v5356_v63 = vmul.f32 %v3410_v51, %v3410_v51  ;;  %v8346_v0 = vpop.f32.mrb[64].mxu0  ;;  %v361_v51 = vld [vmem:[%s12494_s0 + $0xac8] sm:$0xff] }
 0x186   :  { %v4864_v61 = vadd.f32 %v4863_v57, %v4862_v47  ;;  %v2069_v2 = vpop.f32.mrb[56].mxu1  ;;  %v3436_v5 = vpop.f32.mrb[65].mxu0  ;;  %3698 = vmatmul.mubr.f32.gmra.mrb[170].mxu0 %v358_v53 }
 0x187   :  { %v5638_v7 = vsel %vm4553_vm1, %v5356_v63, 0.0  ;;  %v3415_v1 = vadd.f32 %v8258_v9, %v2069_v2  ;;  %v2071_v8 = vpop.f32.mrb[57].mxu1  ;;  %2333 = vmatmul.mubr.f32.gmra.mrb[162].mxu1 %v340_v60  ;;  %6221 = vmatprep.mubr.msk.f32.mxu0 %vm1094_vm0, %v363_v62  ;;  %v360_v2 = vld [vmem:[%s12494_s0 + $0xac0] sm:$0xff]  ;;  %v383_v5 = vld [vmem:[%s12494_s0 + $0xb78] sm:$0xff] }
 0x188   :  { %v5639_v6 = vadd.f32 %v5638_v7, %v5637_v58  ;;  %2337 = vmatprep.mubr.f32.mxu1 %v345_v59  ;;  %v378_v59 = vld [vmem:[%s12494_s0 + $0xb50] sm:$0xff] }
 0x189   :  { %4582 = vst.msk [vmem:[%s12496_s2 + $0xe0] sm:$0xff] %vm4553_vm1, %v3415_v1  ;;  %v4865_v9 = vsel %vm4553_vm1, %v3415_v1, 0.0  ;;  %v5357_v14 = vmul.f32 %v3415_v1, %v3415_v1  ;;  %v8368_v15 = vpop.f32.mrb[66].mxu0  ;;  %v365_v1 = vld [vmem:[%s12494_s0 + $0xae8] sm:$0xff] }
 0x18a   :  { %v4866_v12 = vadd.f32 %v4865_v9, %v4864_v61  ;;  %v2074_v17 = vpop.f32.mrb[58].mxu1  ;;  %v3441_v20 = vpop.f32.mrb[67].mxu0  ;;  %3703 = vmatmul.mubr.f32.gmra.mrb[172].mxu0 %v362_v4 }
 0x18b   :  { %v5640_v21 = vsel %vm4553_vm1, %v5357_v14, 0.0  ;;  %v3420_v16 = vadd.f32 %v8280_v23, %v2074_v17  ;;  %v2076_v22 = vpop.f32.mrb[59].mxu1  ;;  %2338 = vmatmul.mubr.f32.gmra.mrb[164].mxu1 %v344_v11  ;;  %6222 = vmatprep.mubr.msk.f32.mxu0 %vm1094_vm0, %v367_v13  ;;  %v364_v17 = vld [vmem:[%s12494_s0 + $0xae0] sm:$0xff]  ;;  %v387_v20 = vld [vmem:[%s12494_s0 + $0xb98] sm:$0xff] }
 0x18c   :  { %v5641_v19 = vadd.f32 %v5640_v21, %v5639_v6  ;;  %2342 = vmatprep.mubr.f32.mxu1 %v349_v10  ;;  %v382_v10 = vld [vmem:[%s12494_s0 + $0xb70] sm:$0xff] }
 0x18d   :  { %4583 = vst.msk [vmem:[%s12496_s2 + $0xe8] sm:$0xff] %vm4553_vm1, %v3420_v16  ;;  %v4867_v23 = vsel %vm4553_vm1, %v3420_v16, 0.0  ;;  %v5358_v28 = vmul.f32 %v3420_v16, %v3420_v16  ;;  %v8390_v29 = vpop.f32.mrb[68].mxu0  ;;  %v369_v16 = vld [vmem:[%s12494_s0 + $0xb08] sm:$0xff] }
 0x18e   :  { %v4868_v26 = vadd.f32 %v4867_v23, %v4866_v12  ;;  %v2079_v31 = vpop.f32.mrb[60].mxu1  ;;  %v3446_v32 = vpop.f32.mrb[69].mxu0  ;;  %3708 = vmatmul.mubr.f32.gmra.mrb[174].mxu0 %v366_v18 }
 0x18f   :  { %v5642_v34 = vsel %vm4553_vm1, %v5358_v28, 0.0  ;;  %v3425_v30 = vadd.f32 %v8302_v36, %v2079_v31  ;;  %v2081_v35 = vpop.f32.mrb[61].mxu1  ;;  %2343 = vmatmul.mubr.f32.gmra.mrb[166].mxu1 %v348_v25  ;;  %6223 = vmatprep.mubr.msk.f32.mxu0 %vm1094_vm0, %v371_v27  ;;  %v368_v31 = vld [vmem:[%s12494_s0 + $0xb00] sm:$0xff]  ;;  %v391_v32 = vld [vmem:[%s12494_s0 + $0xbb8] sm:$0xff] }
 0x190   :  { %v5643_v33 = vadd.f32 %v5642_v34, %v5641_v19  ;;  %2347 = vmatprep.mubr.f32.mxu1 %v353_v24  ;;  %v386_v24 = vld [vmem:[%s12494_s0 + $0xb90] sm:$0xff] }
 0x191   :  { %4584 = vst.msk [vmem:[%s12496_s2 + $0xf0] sm:$0xff] %vm4553_vm1, %v3425_v30  ;;  %v4869_v36 = vsel %vm4553_vm1, %v3425_v30, 0.0  ;;  %v5359_v41 = vmul.f32 %v3425_v30, %v3425_v30  ;;  %v8412_v42 = vpop.f32.mrb[70].mxu0  ;;  %v373_v30 = vld [vmem:[%s12494_s0 + $0xb28] sm:$0xff] }
 0x192   :  { %v4870_v39 = vadd.f32 %v4869_v36, %v4868_v26  ;;  %v2084_v44 = vpop.f32.mrb[62].mxu1  ;;  %v3451_v46 = vpop.f32.mrb[71].mxu0  ;;  %3713 = vmatmul.mubr.f32.gmra.mrb[176].mxu0 %v370_v3 }
 0x193   :  { %v5644_v48 = vsel %vm4553_vm1, %v5359_v41, 0.0  ;;  %v3430_v43 = vadd.f32 %v8324_v50, %v2084_v44  ;;  %v2086_v49 = vpop.f32.mrb[63].mxu1  ;;  %2348 = vmatmul.mubr.f32.gmra.mrb[168].mxu1 %v352_v38  ;;  %6224 = vmatprep.mubr.msk.f32.mxu0 %vm1094_vm0, %v375_v40  ;;  %v372_v44 = vld [vmem:[%s12494_s0 + $0xb20] sm:$0xff]  ;;  %v395_v46 = vld [vmem:[%s12494_s0 + $0xbd8] sm:$0xff] }
 0x194   :  { %v5645_v47 = vadd.f32 %v5644_v48, %v5643_v33  ;;  %2352 = vmatprep.mubr.f32.mxu1 %v357_v37  ;;  %v390_v37 = vld [vmem:[%s12494_s0 + $0xbb0] sm:$0xff] }
 0x195   :  { %4585 = vst.msk [vmem:[%s12496_s2 + $0xf8] sm:$0xff] %vm4553_vm1, %v3430_v43  ;;  %v4871_v50 = vsel %vm4553_vm1, %v3430_v43, 0.0  ;;  %v5360_v55 = vmul.f32 %v3430_v43, %v3430_v43  ;;  %v8434_v56 = vpop.f32.mrb[72].mxu0  ;;  %v377_v43 = vld [vmem:[%s12494_s0 + $0xb48] sm:$0xff] }
 0x196   :  { %v4872_v53 = vadd.f32 %v4871_v50, %v4870_v39  ;;  %v2089_v58 = vpop.f32.mrb[64].mxu1  ;;  %v3456_v60 = vpop.f32.mrb[73].mxu0  ;;  %3718 = vmatmul.mubr.f32.gmra.mrb[178].mxu0 %v374_v45 }
 0x197   :  { %v5646_v62 = vsel %vm4553_vm1, %v5360_v55, 0.0  ;;  %v3435_v57 = vadd.f32 %v8346_v0, %v2089_v58  ;;  %v2091_v63 = vpop.f32.mrb[65].mxu1  ;;  %2353 = vmatmul.mubr.f32.gmra.mrb[170].mxu1 %v356_v52  ;;  %6225 = vmatprep.mubr.msk.f32.mxu0 %vm1094_vm0, %v379_v54  ;;  %v376_v58 = vld [vmem:[%s12494_s0 + $0xb40] sm:$0xff]  ;;  %v399_v60 = vld [vmem:[%s12494_s0 + $0xbf8] sm:$0xff] }
 0x198   :  { %v5647_v61 = vadd.f32 %v5646_v62, %v5645_v47  ;;  %2357 = vmatprep.mubr.f32.mxu1 %v361_v51  ;;  %v394_v51 = vld [vmem:[%s12494_s0 + $0xbd0] sm:$0xff] }
 0x199   :  { %4586 = vst.msk [vmem:[%s12496_s2 + $0x100] sm:$0xff] %vm4553_vm1, %v3435_v57  ;;  %v4873_v0 = vsel %vm4553_vm1, %v3435_v57, 0.0  ;;  %v5361_v7 = vmul.f32 %v3435_v57, %v3435_v57  ;;  %v8456_v8 = vpop.f32.mrb[74].mxu0  ;;  %v381_v57 = vld [vmem:[%s12494_s0 + $0xb68] sm:$0xff] }
 0x19a   :  { %v4874_v4 = vadd.f32 %v4873_v0, %v4872_v53  ;;  %v2094_v6 = vpop.f32.mrb[66].mxu1  ;;  %v3461_v11 = vpop.f32.mrb[75].mxu0  ;;  %3723 = vmatmul.mubr.f32.gmra.mrb[180].mxu0 %v378_v59 }
 0x19b   :  { %v5648_v13 = vsel %vm4553_vm1, %v5361_v7, 0.0  ;;  %v3440_v9 = vadd.f32 %v8368_v15, %v2094_v6  ;;  %v2096_v14 = vpop.f32.mrb[67].mxu1  ;;  %2358 = vmatmul.mubr.f32.gmra.mrb[172].mxu1 %v360_v2  ;;  %6226 = vmatprep.mubr.msk.f32.mxu0 %vm1094_vm0, %v383_v5  ;;  %v380_v6 = vld [vmem:[%s12494_s0 + $0xb60] sm:$0xff]  ;;  %v403_v11 = vld [vmem:[%s12494_s0 + $0xc18] sm:$0xff] }
 0x19c   :  { %v5649_v12 = vadd.f32 %v5648_v13, %v5647_v61  ;;  %2362 = vmatprep.mubr.f32.mxu1 %v365_v1  ;;  %v398_v1 = vld [vmem:[%s12494_s0 + $0xbf0] sm:$0xff] }
 0x19d   :  { %4587 = vst.msk [vmem:[%s12496_s2 + $0x108] sm:$0xff] %vm4553_vm1, %v3440_v9  ;;  %v4875_v15 = vsel %vm4553_vm1, %v3440_v9, 0.0  ;;  %v5362_v21 = vmul.f32 %v3440_v9, %v3440_v9  ;;  %v8478_v22 = vpop.f32.mrb[76].mxu0  ;;  %v385_v9 = vld [vmem:[%s12494_s0 + $0xb88] sm:$0xff] }
 0x19e   :  { %v4876_v18 = vadd.f32 %v4875_v15, %v4874_v4  ;;  %v2099_v19 = vpop.f32.mrb[68].mxu1  ;;  %v3466_v25 = vpop.f32.mrb[77].mxu0  ;;  %3728 = vmatmul.mubr.f32.gmra.mrb[182].mxu0 %v382_v10 }
 0x19f   :  { %v5650_v27 = vsel %vm4553_vm1, %v5362_v21, 0.0  ;;  %v3445_v23 = vadd.f32 %v8390_v29, %v2099_v19  ;;  %v2101_v28 = vpop.f32.mrb[69].mxu1  ;;  %2363 = vmatmul.mubr.f32.gmra.mrb[174].mxu1 %v364_v17  ;;  %6227 = vmatprep.mubr.msk.f32.mxu0 %vm1094_vm0, %v387_v20  ;;  %v384_v19 = vld [vmem:[%s12494_s0 + $0xb80] sm:$0xff]  ;;  %v407_v25 = vld [vmem:[%s12494_s0 + $0xc38] sm:$0xff] }
 0x1a0   :  { %v5651_v26 = vadd.f32 %v5650_v27, %v5649_v12  ;;  %2367 = vmatprep.mubr.f32.mxu1 %v369_v16  ;;  %v402_v16 = vld [vmem:[%s12494_s0 + $0xc10] sm:$0xff] }
 0x1a1   :  { %4588 = vst.msk [vmem:[%s12496_s2 + $0x110] sm:$0xff] %vm4553_vm1, %v3445_v23  ;;  %v4877_v29 = vsel %vm4553_vm1, %v3445_v23, 0.0  ;;  %v5363_v34 = vmul.f32 %v3445_v23, %v3445_v23  ;;  %v8500_v35 = vpop.f32.mrb[78].mxu0  ;;  %v389_v23 = vld [vmem:[%s12494_s0 + $0xba8] sm:$0xff] }
 0x1a2   :  { %v4878_v3 = vadd.f32 %v4877_v29, %v4876_v18  ;;  %v2104_v33 = vpop.f32.mrb[70].mxu1  ;;  %v3471_v38 = vpop.f32.mrb[79].mxu0  ;;  %3733 = vmatmul.mubr.f32.gmra.mrb[184].mxu0 %v386_v24 }
 0x1a3   :  { %v5652_v40 = vsel %vm4553_vm1, %v5363_v34, 0.0  ;;  %v3450_v36 = vadd.f32 %v8412_v42, %v2104_v33  ;;  %v2106_v41 = vpop.f32.mrb[71].mxu1  ;;  %2368 = vmatmul.mubr.f32.gmra.mrb[176].mxu1 %v368_v31  ;;  %6228 = vmatprep.mubr.msk.f32.mxu0 %vm1094_vm0, %v391_v32  ;;  %v388_v33 = vld [vmem:[%s12494_s0 + $0xba0] sm:$0xff]  ;;  %v411_v38 = vld [vmem:[%s12494_s0 + $0xc58] sm:$0xff] }
 0x1a4   :  { %v5653_v39 = vadd.f32 %v5652_v40, %v5651_v26  ;;  %2372 = vmatprep.mubr.f32.mxu1 %v373_v30  ;;  %v406_v30 = vld [vmem:[%s12494_s0 + $0xc30] sm:$0xff] }
 0x1a5   :  { %4589 = vst.msk [vmem:[%s12496_s2 + $0x118] sm:$0xff] %vm4553_vm1, %v3450_v36  ;;  %v4879_v42 = vsel %vm4553_vm1, %v3450_v36, 0.0  ;;  %v5364_v48 = vmul.f32 %v3450_v36, %v3450_v36  ;;  %v8522_v49 = vpop.f32.mrb[80].mxu0  ;;  %v393_v36 = vld [vmem:[%s12494_s0 + $0xbc8] sm:$0xff] }
 0x1a6   :  { %v4880_v45 = vadd.f32 %v4879_v42, %v4878_v3  ;;  %v2109_v47 = vpop.f32.mrb[72].mxu1  ;;  %v3476_v52 = vpop.f32.mrb[81].mxu0  ;;  %3738 = vmatmul.mubr.f32.gmra.mrb[186].mxu0 %v390_v37 }
 0x1a7   :  { %v5654_v54 = vsel %vm4553_vm1, %v5364_v48, 0.0  ;;  %v3455_v50 = vadd.f32 %v8434_v56, %v2109_v47  ;;  %v2111_v55 = vpop.f32.mrb[73].mxu1  ;;  %2373 = vmatmul.mubr.f32.gmra.mrb[178].mxu1 %v372_v44  ;;  %6229 = vmatprep.mubr.msk.f32.mxu0 %vm1094_vm0, %v395_v46  ;;  %v392_v47 = vld [vmem:[%s12494_s0 + $0xbc0] sm:$0xff]  ;;  %v415_v52 = vld [vmem:[%s12494_s0 + $0xc78] sm:$0xff] }
 0x1a8   :  { %v5655_v53 = vadd.f32 %v5654_v54, %v5653_v39  ;;  %2377 = vmatprep.mubr.f32.mxu1 %v377_v43  ;;  %v410_v43 = vld [vmem:[%s12494_s0 + $0xc50] sm:$0xff] }
 0x1a9   :  { %4590 = vst.msk [vmem:[%s12496_s2 + $0x120] sm:$0xff] %vm4553_vm1, %v3455_v50  ;;  %v4881_v56 = vsel %vm4553_vm1, %v3455_v50, 0.0  ;;  %v5365_v62 = vmul.f32 %v3455_v50, %v3455_v50  ;;  %v8544_v63 = vpop.f32.mrb[82].mxu0  ;;  %v397_v50 = vld [vmem:[%s12494_s0 + $0xbe8] sm:$0xff] }
 0x1aa   :  { %v4882_v59 = vadd.f32 %v4881_v56, %v4880_v45  ;;  %v2114_v61 = vpop.f32.mrb[74].mxu1  ;;  %v3481_v2 = vpop.f32.mrb[83].mxu0  ;;  %3743 = vmatmul.mubr.f32.gmra.mrb[188].mxu0 %v394_v51 }
 0x1ab   :  { %v5656_v5 = vsel %vm4553_vm1, %v5365_v62, 0.0  ;;  %v3460_v0 = vadd.f32 %v8456_v8, %v2114_v61  ;;  %v2116_v7 = vpop.f32.mrb[75].mxu1  ;;  %2378 = vmatmul.mubr.f32.gmra.mrb[180].mxu1 %v376_v58  ;;  %6230 = vmatprep.mubr.msk.f32.mxu0 %vm1094_vm0, %v399_v60  ;;  %v396_v61 = vld [vmem:[%s12494_s0 + $0xbe0] sm:$0xff]  ;;  %v419_v2 = vld [vmem:[%s12494_s0 + $0xc98] sm:$0xff] }
 0x1ac   :  { %v5657_v4 = vadd.f32 %v5656_v5, %v5655_v53  ;;  %2382 = vmatprep.mubr.f32.mxu1 %v381_v57  ;;  %v414_v57 = vld [vmem:[%s12494_s0 + $0xc70] sm:$0xff] }
 0x1ad   :  { %4591 = vst.msk [vmem:[%s12496_s2 + $0x128] sm:$0xff] %vm4553_vm1, %v3460_v0  ;;  %v4883_v8 = vsel %vm4553_vm1, %v3460_v0, 0.0  ;;  %v5366_v13 = vmul.f32 %v3460_v0, %v3460_v0  ;;  %v8566_v14 = vpop.f32.mrb[84].mxu0  ;;  %v401_v0 = vld [vmem:[%s12494_s0 + $0xc08] sm:$0xff] }
 0x1ae   :  { %v4884_v10 = vadd.f32 %v4883_v8, %v4882_v59  ;;  %v2119_v12 = vpop.f32.mrb[76].mxu1  ;;  %v3486_v17 = vpop.f32.mrb[85].mxu0  ;;  %3748 = vmatmul.mubr.f32.gmra.mrb[190].mxu0 %v398_v1 }
 0x1af   :  { %v5658_v20 = vsel %vm4553_vm1, %v5366_v13, 0.0  ;;  %v3465_v15 = vadd.f32 %v8478_v22, %v2119_v12  ;;  %v2121_v21 = vpop.f32.mrb[77].mxu1  ;;  %2383 = vmatmul.mubr.f32.gmra.mrb[182].mxu1 %v380_v6  ;;  %6231 = vmatprep.mubr.msk.f32.mxu0 %vm1094_vm0, %v403_v11  ;;  %v400_v12 = vld [vmem:[%s12494_s0 + $0xc00] sm:$0xff]  ;;  %v423_v17 = vld [vmem:[%s12494_s0 + $0xcb8] sm:$0xff] }
 0x1b0   :  { %v5659_v18 = vadd.f32 %v5658_v20, %v5657_v4  ;;  %2387 = vmatprep.mubr.f32.mxu1 %v385_v9  ;;  %v418_v9 = vld [vmem:[%s12494_s0 + $0xc90] sm:$0xff] }
 0x1b1   :  { %4592 = vst.msk [vmem:[%s12496_s2 + $0x130] sm:$0xff] %vm4553_vm1, %v3465_v15  ;;  %v4885_v22 = vsel %vm4553_vm1, %v3465_v15, 0.0  ;;  %v5367_v27 = vmul.f32 %v3465_v15, %v3465_v15  ;;  %v8588_v28 = vpop.f32.mrb[86].mxu0  ;;  %v405_v15 = vld [vmem:[%s12494_s0 + $0xc28] sm:$0xff] }
 0x1b2   :  { %v4886_v24 = vadd.f32 %v4885_v22, %v4884_v10  ;;  %v2124_v26 = vpop.f32.mrb[78].mxu1  ;;  %v3491_v31 = vpop.f32.mrb[87].mxu0  ;;  %3753 = vmatmul.mubr.f32.gmra.mrb[192].mxu0 %v402_v16 }
 0x1b3   :  { %v5660_v32 = vsel %vm4553_vm1, %v5367_v27, 0.0  ;;  %v3470_v29 = vadd.f32 %v8500_v35, %v2124_v26  ;;  %v2126_v34 = vpop.f32.mrb[79].mxu1  ;;  %2388 = vmatmul.mubr.f32.gmra.mrb[184].mxu1 %v384_v19  ;;  %6232 = vmatprep.mubr.msk.f32.mxu0 %vm1094_vm0, %v407_v25  ;;  %v404_v26 = vld [vmem:[%s12494_s0 + $0xc20] sm:$0xff]  ;;  %v427_v31 = vld [vmem:[%s12494_s0 + $0xcd8] sm:$0xff] }
 0x1b4   :  { %v5661_v3 = vadd.f32 %v5660_v32, %v5659_v18  ;;  %2392 = vmatprep.mubr.f32.mxu1 %v389_v23  ;;  %v422_v23 = vld [vmem:[%s12494_s0 + $0xcb0] sm:$0xff] }
 0x1b5   :  { %4593 = vst.msk [vmem:[%s12496_s2 + $0x138] sm:$0xff] %vm4553_vm1, %v3470_v29  ;;  %v4887_v35 = vsel %vm4553_vm1, %v3470_v29, 0.0  ;;  %v5368_v40 = vmul.f32 %v3470_v29, %v3470_v29  ;;  %v8610_v41 = vpop.f32.mrb[88].mxu0  ;;  %v409_v29 = vld [vmem:[%s12494_s0 + $0xc48] sm:$0xff] }
 0x1b6   :  { %v4888_v37 = vadd.f32 %v4887_v35, %v4886_v24  ;;  %v2129_v39 = vpop.f32.mrb[80].mxu1  ;;  %v3496_v44 = vpop.f32.mrb[89].mxu0  ;;  %3758 = vmatmul.mubr.f32.gmra.mrb[194].mxu0 %v406_v30 }
 0x1b7   :  { %v5662_v46 = vsel %vm4553_vm1, %v5368_v40, 0.0  ;;  %v3475_v42 = vadd.f32 %v8522_v49, %v2129_v39  ;;  %v2131_v48 = vpop.f32.mrb[81].mxu1  ;;  %2393 = vmatmul.mubr.f32.gmra.mrb[186].mxu1 %v388_v33  ;;  %6233 = vmatprep.mubr.msk.f32.mxu0 %vm1094_vm0, %v411_v38  ;;  %v408_v39 = vld [vmem:[%s12494_s0 + $0xc40] sm:$0xff]  ;;  %v431_v44 = vld [vmem:[%s12494_s0 + $0xcf8] sm:$0xff] }
 0x1b8   :  { %v5663_v45 = vadd.f32 %v5662_v46, %v5661_v3  ;;  %2397 = vmatprep.mubr.f32.mxu1 %v393_v36  ;;  %v426_v36 = vld [vmem:[%s12494_s0 + $0xcd0] sm:$0xff] }
 0x1b9   :  { %4594 = vst.msk [vmem:[%s12496_s2 + $0x140] sm:$0xff] %vm4553_vm1, %v3475_v42  ;;  %v4889_v49 = vsel %vm4553_vm1, %v3475_v42, 0.0  ;;  %v5369_v54 = vmul.f32 %v3475_v42, %v3475_v42  ;;  %v8632_v55 = vpop.f32.mrb[90].mxu0  ;;  %v413_v42 = vld [vmem:[%s12494_s0 + $0xc68] sm:$0xff] }
 0x1ba   :  { %v4890_v51 = vadd.f32 %v4889_v49, %v4888_v37  ;;  %v2134_v53 = vpop.f32.mrb[82].mxu1  ;;  %v3501_v58 = vpop.f32.mrb[91].mxu0  ;;  %3763 = vmatmul.mubr.f32.gmra.mrb[196].mxu0 %v410_v43 }
 0x1bb   :  { %v5664_v60 = vsel %vm4553_vm1, %v5369_v54, 0.0  ;;  %v3480_v56 = vadd.f32 %v8544_v63, %v2134_v53  ;;  %v2136_v62 = vpop.f32.mrb[83].mxu1  ;;  %2398 = vmatmul.mubr.f32.gmra.mrb[188].mxu1 %v392_v47  ;;  %6234 = vmatprep.mubr.msk.f32.mxu0 %vm1094_vm0, %v415_v52  ;;  %v412_v53 = vld [vmem:[%s12494_s0 + $0xc60] sm:$0xff]  ;;  %v435_v58 = vld [vmem:[%s12494_s0 + $0xd18] sm:$0xff] }
 0x1bc   :  { %v5665_v59 = vadd.f32 %v5664_v60, %v5663_v45  ;;  %2402 = vmatprep.mubr.f32.mxu1 %v397_v50  ;;  %v430_v50 = vld [vmem:[%s12494_s0 + $0xcf0] sm:$0xff] }
 0x1bd   :  { %4595 = vst.msk [vmem:[%s12496_s2 + $0x148] sm:$0xff] %vm4553_vm1, %v3480_v56  ;;  %v4891_v63 = vsel %vm4553_vm1, %v3480_v56, 0.0  ;;  %v5370_v5 = vmul.f32 %v3480_v56, %v3480_v56  ;;  %v8654_v7 = vpop.f32.mrb[92].mxu0  ;;  %v417_v56 = vld [vmem:[%s12494_s0 + $0xc88] sm:$0xff] }
 0x1be   :  { %v4892_v1 = vadd.f32 %v4891_v63, %v4890_v51  ;;  %v2139_v4 = vpop.f32.mrb[84].mxu1  ;;  %v3506_v6 = vpop.f32.mrb[93].mxu0  ;;  %3768 = vmatmul.mubr.f32.gmra.mrb[198].mxu0 %v414_v57 }
 0x1bf   :  { %v5666_v11 = vsel %vm4553_vm1, %v5370_v5, 0.0  ;;  %v3485_v8 = vadd.f32 %v8566_v14, %v2139_v4  ;;  %v2141_v13 = vpop.f32.mrb[85].mxu1  ;;  %2403 = vmatmul.mubr.f32.gmra.mrb[190].mxu1 %v396_v61  ;;  %6235 = vmatprep.mubr.msk.f32.mxu0 %vm1094_vm0, %v419_v2  ;;  %v416_v4 = vld [vmem:[%s12494_s0 + $0xc80] sm:$0xff]  ;;  %v439_v6 = vld [vmem:[%s12494_s0 + $0xd38] sm:$0xff] }
 0x1c0   :  { %v5667_v10 = vadd.f32 %v5666_v11, %v5665_v59  ;;  %2407 = vmatprep.mubr.f32.mxu1 %v401_v0  ;;  %v434_v0 = vld [vmem:[%s12494_s0 + $0xd10] sm:$0xff] }
 0x1c1   :  { %4596 = vst.msk [vmem:[%s12496_s2 + $0x150] sm:$0xff] %vm4553_vm1, %v3485_v8  ;;  %v4893_v14 = vsel %vm4553_vm1, %v3485_v8, 0.0  ;;  %v5371_v20 = vmul.f32 %v3485_v8, %v3485_v8  ;;  %v8676_v21 = vpop.f32.mrb[94].mxu0  ;;  %v421_v8 = vld [vmem:[%s12494_s0 + $0xca8] sm:$0xff] }
 0x1c2   :  { %v4894_v16 = vadd.f32 %v4893_v14, %v4892_v1  ;;  %v2144_v18 = vpop.f32.mrb[86].mxu1  ;;  %v3511_v19 = vpop.f32.mrb[95].mxu0  ;;  %3773 = vmatmul.mubr.f32.gmra.mrb[200].mxu0 %v418_v9 }
 0x1c3   :  { %v5668_v25 = vsel %vm4553_vm1, %v5371_v20, 0.0  ;;  %v3490_v22 = vadd.f32 %v8588_v28, %v2144_v18  ;;  %v2146_v27 = vpop.f32.mrb[87].mxu1  ;;  %2408 = vmatmul.mubr.f32.gmra.mrb[192].mxu1 %v400_v12  ;;  %6236 = vmatprep.mubr.msk.f32.mxu0 %vm1094_vm0, %v423_v17  ;;  %v420_v18 = vld [vmem:[%s12494_s0 + $0xca0] sm:$0xff]  ;;  %v443_v19 = vld [vmem:[%s12494_s0 + $0xd58] sm:$0xff] }
 0x1c4   :  { %v5669_v24 = vadd.f32 %v5668_v25, %v5667_v10  ;;  %2412 = vmatprep.mubr.f32.mxu1 %v405_v15  ;;  %v438_v15 = vld [vmem:[%s12494_s0 + $0xd30] sm:$0xff] }
 0x1c5   :  { %4597 = vst.msk [vmem:[%s12496_s2 + $0x158] sm:$0xff] %vm4553_vm1, %v3490_v22  ;;  %v4895_v28 = vsel %vm4553_vm1, %v3490_v22, 0.0  ;;  %v5372_v32 = vmul.f32 %v3490_v22, %v3490_v22  ;;  %v8698_v34 = vpop.f32.mrb[96].mxu0  ;;  %v425_v22 = vld [vmem:[%s12494_s0 + $0xcc8] sm:$0xff] }
 0x1c6   :  { %v4896_v30 = vadd.f32 %v4895_v28, %v4894_v16  ;;  %v2149_v3 = vpop.f32.mrb[88].mxu1  ;;  %v3516_v33 = vpop.f32.mrb[97].mxu0  ;;  %3778 = vmatmul.mubr.f32.gmra.mrb[202].mxu0 %v422_v23 }
 0x1c7   :  { %v5670_v38 = vsel %vm4553_vm1, %v5372_v32, 0.0  ;;  %v3495_v35 = vadd.f32 %v8610_v41, %v2149_v3  ;;  %v2151_v40 = vpop.f32.mrb[89].mxu1  ;;  %2413 = vmatmul.mubr.f32.gmra.mrb[194].mxu1 %v404_v26  ;;  %6237 = vmatprep.mubr.msk.f32.mxu0 %vm1094_vm0, %v427_v31  ;;  %v424_v3 = vld [vmem:[%s12494_s0 + $0xcc0] sm:$0xff]  ;;  %v447_v33 = vld [vmem:[%s12494_s0 + $0xd78] sm:$0xff] }
 0x1c8   :  { %v5671_v37 = vadd.f32 %v5670_v38, %v5669_v24  ;;  %2417 = vmatprep.mubr.f32.mxu1 %v409_v29  ;;  %v442_v29 = vld [vmem:[%s12494_s0 + $0xd50] sm:$0xff] }
 0x1c9   :  { %4598 = vst.msk [vmem:[%s12496_s2 + $0x160] sm:$0xff] %vm4553_vm1, %v3495_v35  ;;  %v4897_v41 = vsel %vm4553_vm1, %v3495_v35, 0.0  ;;  %v5373_v46 = vmul.f32 %v3495_v35, %v3495_v35  ;;  %v8720_v48 = vpop.f32.mrb[98].mxu0  ;;  %v429_v35 = vld [vmem:[%s12494_s0 + $0xce8] sm:$0xff] }
 0x1ca   :  { %v4898_v43 = vadd.f32 %v4897_v41, %v4896_v30  ;;  %v2154_v45 = vpop.f32.mrb[90].mxu1  ;;  %v3521_v47 = vpop.f32.mrb[99].mxu0  ;;  %3783 = vmatmul.mubr.f32.gmra.mrb[204].mxu0 %v426_v36 }
 0x1cb   :  { %v5672_v52 = vsel %vm4553_vm1, %v5373_v46, 0.0  ;;  %v3500_v49 = vadd.f32 %v8632_v55, %v2154_v45  ;;  %v2156_v54 = vpop.f32.mrb[91].mxu1  ;;  %2418 = vmatmul.mubr.f32.gmra.mrb[196].mxu1 %v408_v39  ;;  %6238 = vmatprep.mubr.msk.f32.mxu0 %vm1094_vm0, %v431_v44  ;;  %v428_v45 = vld [vmem:[%s12494_s0 + $0xce0] sm:$0xff]  ;;  %v451_v47 = vld [vmem:[%s12494_s0 + $0xd98] sm:$0xff] }
 0x1cc   :  { %v5673_v51 = vadd.f32 %v5672_v52, %v5671_v37  ;;  %2422 = vmatprep.mubr.f32.mxu1 %v413_v42  ;;  %v446_v42 = vld [vmem:[%s12494_s0 + $0xd70] sm:$0xff] }
 0x1cd   :  { %4599 = vst.msk [vmem:[%s12496_s2 + $0x168] sm:$0xff] %vm4553_vm1, %v3500_v49  ;;  %v4899_v55 = vsel %vm4553_vm1, %v3500_v49, 0.0  ;;  %v5374_v60 = vmul.f32 %v3500_v49, %v3500_v49  ;;  %v8742_v62 = vpop.f32.mrb[100].mxu0  ;;  %v433_v49 = vld [vmem:[%s12494_s0 + $0xd08] sm:$0xff] }
 0x1ce   :  { %v4900_v57 = vadd.f32 %v4899_v55, %v4898_v43  ;;  %v2159_v59 = vpop.f32.mrb[92].mxu1  ;;  %v3526_v61 = vpop.f32.mrb[101].mxu0  ;;  %3788 = vmatmul.mubr.f32.gmra.mrb[206].mxu0 %v430_v50 }
 0x1cf   :  { %v5674_v2 = vsel %vm4553_vm1, %v5374_v60, 0.0  ;;  %v3505_v63 = vadd.f32 %v8654_v7, %v2159_v59  ;;  %v2161_v5 = vpop.f32.mrb[93].mxu1  ;;  %2423 = vmatmul.mubr.f32.gmra.mrb[198].mxu1 %v412_v53  ;;  %6239 = vmatprep.mubr.msk.f32.mxu0 %vm1094_vm0, %v435_v58  ;;  %v432_v59 = vld [vmem:[%s12494_s0 + $0xd00] sm:$0xff]  ;;  %v455_v61 = vld [vmem:[%s12494_s0 + $0xdb8] sm:$0xff] }
 0x1d0   :  { %v5675_v1 = vadd.f32 %v5674_v2, %v5673_v51  ;;  %2427 = vmatprep.mubr.f32.mxu1 %v417_v56  ;;  %v450_v56 = vld [vmem:[%s12494_s0 + $0xd90] sm:$0xff] }
 0x1d1   :  { %4600 = vst.msk [vmem:[%s12496_s2 + $0x170] sm:$0xff] %vm4553_vm1, %v3505_v63  ;;  %v4901_v7 = vsel %vm4553_vm1, %v3505_v63, 0.0  ;;  %v5375_v11 = vmul.f32 %v3505_v63, %v3505_v63  ;;  %v8764_v13 = vpop.f32.mrb[102].mxu0  ;;  %v437_v63 = vld [vmem:[%s12494_s0 + $0xd28] sm:$0xff] }
 0x1d2   :  { %v4902_v9 = vadd.f32 %v4901_v7, %v4900_v57  ;;  %v2164_v10 = vpop.f32.mrb[94].mxu1  ;;  %v3531_v12 = vpop.f32.mrb[103].mxu0  ;;  %3793 = vmatmul.mubr.f32.gmra.mrb[208].mxu0 %v434_v0 }
 0x1d3   :  { %v5676_v17 = vsel %vm4553_vm1, %v5375_v11, 0.0  ;;  %v3510_v14 = vadd.f32 %v8676_v21, %v2164_v10  ;;  %v2166_v20 = vpop.f32.mrb[95].mxu1  ;;  %2428 = vmatmul.mubr.f32.gmra.mrb[200].mxu1 %v416_v4  ;;  %6240 = vmatprep.mubr.msk.f32.mxu0 %vm1094_vm0, %v439_v6  ;;  %v436_v10 = vld [vmem:[%s12494_s0 + $0xd20] sm:$0xff]  ;;  %v459_v12 = vld [vmem:[%s12494_s0 + $0xdd8] sm:$0xff] }
 0x1d4   :  { %v5677_v16 = vadd.f32 %v5676_v17, %v5675_v1  ;;  %2432 = vmatprep.mubr.f32.mxu1 %v421_v8  ;;  %v454_v8 = vld [vmem:[%s12494_s0 + $0xdb0] sm:$0xff] }
 0x1d5   :  { %4601 = vst.msk [vmem:[%s12496_s2 + $0x178] sm:$0xff] %vm4553_vm1, %v3510_v14  ;;  %v4903_v21 = vsel %vm4553_vm1, %v3510_v14, 0.0  ;;  %v5376_v25 = vmul.f32 %v3510_v14, %v3510_v14  ;;  %v8786_v27 = vpop.f32.mrb[104].mxu0  ;;  %v441_v14 = vld [vmem:[%s12494_s0 + $0xd48] sm:$0xff] }
 0x1d6   :  { %v4904_v23 = vadd.f32 %v4903_v21, %v4902_v9  ;;  %v2169_v24 = vpop.f32.mrb[96].mxu1  ;;  %v3536_v26 = vpop.f32.mrb[105].mxu0  ;;  %3798 = vmatmul.mubr.f32.gmra.mrb[210].mxu0 %v438_v15 }
 0x1d7   :  { %v5678_v31 = vsel %vm4553_vm1, %v5376_v25, 0.0  ;;  %v3515_v28 = vadd.f32 %v8698_v34, %v2169_v24  ;;  %v2171_v32 = vpop.f32.mrb[97].mxu1  ;;  %2433 = vmatmul.mubr.f32.gmra.mrb[202].mxu1 %v420_v18  ;;  %6241 = vmatprep.mubr.msk.f32.mxu0 %vm1094_vm0, %v443_v19  ;;  %v440_v24 = vld [vmem:[%s12494_s0 + $0xd40] sm:$0xff]  ;;  %v463_v26 = vld [vmem:[%s12494_s0 + $0xdf8] sm:$0xff] }
 0x1d8   :  { %v5679_v30 = vadd.f32 %v5678_v31, %v5677_v16  ;;  %2437 = vmatprep.mubr.f32.mxu1 %v425_v22  ;;  %v458_v22 = vld [vmem:[%s12494_s0 + $0xdd0] sm:$0xff] }
 0x1d9   :  { %4602 = vst.msk [vmem:[%s12496_s2 + $0x180] sm:$0xff] %vm4553_vm1, %v3515_v28  ;;  %v4905_v34 = vsel %vm4553_vm1, %v3515_v28, 0.0  ;;  %v5377_v38 = vmul.f32 %v3515_v28, %v3515_v28  ;;  %v8808_v40 = vpop.f32.mrb[106].mxu0  ;;  %v445_v28 = vld [vmem:[%s12494_s0 + $0xd68] sm:$0xff] }
 0x1da   :  { %v4906_v36 = vadd.f32 %v4905_v34, %v4904_v23  ;;  %v2174_v37 = vpop.f32.mrb[98].mxu1  ;;  %v3541_v39 = vpop.f32.mrb[107].mxu0  ;;  %3803 = vmatmul.mubr.f32.gmra.mrb[212].mxu0 %v442_v29 }
 0x1db   :  { %v5680_v44 = vsel %vm4553_vm1, %v5377_v38, 0.0  ;;  %v3520_v41 = vadd.f32 %v8720_v48, %v2174_v37  ;;  %v2176_v46 = vpop.f32.mrb[99].mxu1  ;;  %2438 = vmatmul.mubr.f32.gmra.mrb[204].mxu1 %v424_v3  ;;  %6242 = vmatprep.mubr.msk.f32.mxu0 %vm1094_vm0, %v447_v33  ;;  %v444_v37 = vld [vmem:[%s12494_s0 + $0xd60] sm:$0xff]  ;;  %v467_v39 = vld [vmem:[%s12494_s0 + $0xe18] sm:$0xff] }
 0x1dc   :  { %v5681_v43 = vadd.f32 %v5680_v44, %v5679_v30  ;;  %2442 = vmatprep.mubr.f32.mxu1 %v429_v35  ;;  %v462_v35 = vld [vmem:[%s12494_s0 + $0xdf0] sm:$0xff] }
 0x1dd   :  { %4603 = vst.msk [vmem:[%s12496_s2 + $0x188] sm:$0xff] %vm4553_vm1, %v3520_v41  ;;  %v4907_v48 = vsel %vm4553_vm1, %v3520_v41, 0.0  ;;  %v5378_v52 = vmul.f32 %v3520_v41, %v3520_v41  ;;  %v8830_v54 = vpop.f32.mrb[108].mxu0  ;;  %v449_v41 = vld [vmem:[%s12494_s0 + $0xd88] sm:$0xff] }
 0x1de   :  { %v4908_v50 = vadd.f32 %v4907_v48, %v4906_v36  ;;  %v2179_v51 = vpop.f32.mrb[100].mxu1  ;;  %v3546_v53 = vpop.f32.mrb[109].mxu0  ;;  %3808 = vmatmul.mubr.f32.gmra.mrb[214].mxu0 %v446_v42 }
 0x1df   :  { %v5682_v58 = vsel %vm4553_vm1, %v5378_v52, 0.0  ;;  %v3525_v55 = vadd.f32 %v8742_v62, %v2179_v51  ;;  %v2181_v60 = vpop.f32.mrb[101].mxu1  ;;  %2443 = vmatmul.mubr.f32.gmra.mrb[206].mxu1 %v428_v45  ;;  %6243 = vmatprep.mubr.msk.f32.mxu0 %vm1094_vm0, %v451_v47  ;;  %v448_v51 = vld [vmem:[%s12494_s0 + $0xd80] sm:$0xff]  ;;  %v471_v53 = vld [vmem:[%s12494_s0 + $0xe38] sm:$0xff] }
 0x1e0   :  { %v5683_v57 = vadd.f32 %v5682_v58, %v5681_v43  ;;  %2447 = vmatprep.mubr.f32.mxu1 %v433_v49  ;;  %v466_v49 = vld [vmem:[%s12494_s0 + $0xe10] sm:$0xff] }
 0x1e1   :  { %4604 = vst.msk [vmem:[%s12496_s2 + $0x190] sm:$0xff] %vm4553_vm1, %v3525_v55  ;;  %v4909_v62 = vsel %vm4553_vm1, %v3525_v55, 0.0  ;;  %v5379_v2 = vmul.f32 %v3525_v55, %v3525_v55  ;;  %v8852_v5 = vpop.f32.mrb[110].mxu0  ;;  %v453_v55 = vld [vmem:[%s12494_s0 + $0xda8] sm:$0xff] }
 0x1e2   :  { %v4910_v0 = vadd.f32 %v4909_v62, %v4908_v50  ;;  %v2184_v1 = vpop.f32.mrb[102].mxu1  ;;  %v3551_v4 = vpop.f32.mrb[111].mxu0  ;;  %3813 = vmatmul.mubr.f32.gmra.mrb[216].mxu0 %v450_v56 }
 0x1e3   :  { %v5684_v6 = vsel %vm4553_vm1, %v5379_v2, 0.0  ;;  %v3530_v7 = vadd.f32 %v8764_v13, %v2184_v1  ;;  %v2186_v11 = vpop.f32.mrb[103].mxu1  ;;  %2448 = vmatmul.mubr.f32.gmra.mrb[208].mxu1 %v432_v59  ;;  %6244 = vmatprep.mubr.msk.f32.mxu0 %vm1094_vm0, %v455_v61  ;;  %v452_v1 = vld [vmem:[%s12494_s0 + $0xda0] sm:$0xff]  ;;  %v475_v4 = vld [vmem:[%s12494_s0 + $0xe58] sm:$0xff] }
 0x1e4   :  { %v5685_v9 = vadd.f32 %v5684_v6, %v5683_v57  ;;  %2452 = vmatprep.mubr.f32.mxu1 %v437_v63  ;;  %v470_v63 = vld [vmem:[%s12494_s0 + $0xe30] sm:$0xff] }
 0x1e5   :  { %4605 = vst.msk [vmem:[%s12496_s2 + $0x198] sm:$0xff] %vm4553_vm1, %v3530_v7  ;;  %v4911_v13 = vsel %vm4553_vm1, %v3530_v7, 0.0  ;;  %v5380_v17 = vmul.f32 %v3530_v7, %v3530_v7  ;;  %v8874_v20 = vpop.f32.mrb[112].mxu0  ;;  %v457_v7 = vld [vmem:[%s12494_s0 + $0xdc8] sm:$0xff] }
 0x1e6   :  { %v4912_v15 = vadd.f32 %v4911_v13, %v4910_v0  ;;  %v2189_v16 = vpop.f32.mrb[104].mxu1  ;;  %v3556_v18 = vpop.f32.mrb[113].mxu0  ;;  %3818 = vmatmul.mubr.f32.gmra.mrb[218].mxu0 %v454_v8 }
 0x1e7   :  { %v5686_v19 = vsel %vm4553_vm1, %v5380_v17, 0.0  ;;  %v3535_v21 = vadd.f32 %v8786_v27, %v2189_v16  ;;  %v2191_v25 = vpop.f32.mrb[105].mxu1  ;;  %2453 = vmatmul.mubr.f32.gmra.mrb[210].mxu1 %v436_v10  ;;  %6245 = vmatprep.mubr.msk.f32.mxu0 %vm1094_vm0, %v459_v12  ;;  %v456_v16 = vld [vmem:[%s12494_s0 + $0xdc0] sm:$0xff]  ;;  %v479_v18 = vld [vmem:[%s12494_s0 + $0xe78] sm:$0xff] }
 0x1e8   :  { %v5687_v23 = vadd.f32 %v5686_v19, %v5685_v9  ;;  %2457 = vmatprep.mubr.f32.mxu1 %v441_v14  ;;  %v474_v14 = vld [vmem:[%s12494_s0 + $0xe50] sm:$0xff] }
 0x1e9   :  { %4606 = vst.msk [vmem:[%s12496_s2 + $0x1a0] sm:$0xff] %vm4553_vm1, %v3535_v21  ;;  %v4913_v27 = vsel %vm4553_vm1, %v3535_v21, 0.0  ;;  %v5381_v31 = vmul.f32 %v3535_v21, %v3535_v21  ;;  %v8896_v32 = vpop.f32.mrb[114].mxu0  ;;  %v461_v21 = vld [vmem:[%s12494_s0 + $0xde8] sm:$0xff] }
 0x1ea   :  { %v4914_v29 = vadd.f32 %v4913_v27, %v4912_v15  ;;  %v2194_v30 = vpop.f32.mrb[106].mxu1  ;;  %v3561_v3 = vpop.f32.mrb[115].mxu0  ;;  %3823 = vmatmul.mubr.f32.gmra.mrb[220].mxu0 %v458_v22 }
 0x1eb   :  { %v5688_v33 = vsel %vm4553_vm1, %v5381_v31, 0.0  ;;  %v3540_v34 = vadd.f32 %v8808_v40, %v2194_v30  ;;  %v2196_v38 = vpop.f32.mrb[107].mxu1  ;;  %2458 = vmatmul.mubr.f32.gmra.mrb[212].mxu1 %v440_v24  ;;  %6246 = vmatprep.mubr.msk.f32.mxu0 %vm1094_vm0, %v463_v26  ;;  %v460_v30 = vld [vmem:[%s12494_s0 + $0xde0] sm:$0xff]  ;;  %v483_v3 = vld [vmem:[%s12494_s0 + $0xe98] sm:$0xff] }
 0x1ec   :  { %v5689_v36 = vadd.f32 %v5688_v33, %v5687_v23  ;;  %2462 = vmatprep.mubr.f32.mxu1 %v445_v28  ;;  %v478_v28 = vld [vmem:[%s12494_s0 + $0xe70] sm:$0xff] }
 0x1ed   :  { %4607 = vst.msk [vmem:[%s12496_s2 + $0x1a8] sm:$0xff] %vm4553_vm1, %v3540_v34  ;;  %v4915_v40 = vsel %vm4553_vm1, %v3540_v34, 0.0  ;;  %v5382_v44 = vmul.f32 %v3540_v34, %v3540_v34  ;;  %v8918_v46 = vpop.f32.mrb[116].mxu0  ;;  %v465_v34 = vld [vmem:[%s12494_s0 + $0xe08] sm:$0xff] }
 0x1ee   :  { %v4916_v42 = vadd.f32 %v4915_v40, %v4914_v29  ;;  %v2199_v43 = vpop.f32.mrb[108].mxu1  ;;  %v3566_v45 = vpop.f32.mrb[117].mxu0  ;;  %3828 = vmatmul.mubr.f32.gmra.mrb[222].mxu0 %v462_v35 }
 0x1ef   :  { %v5690_v47 = vsel %vm4553_vm1, %v5382_v44, 0.0  ;;  %v3545_v48 = vadd.f32 %v8830_v54, %v2199_v43  ;;  %v2201_v52 = vpop.f32.mrb[109].mxu1  ;;  %2463 = vmatmul.mubr.f32.gmra.mrb[214].mxu1 %v444_v37  ;;  %6247 = vmatprep.mubr.msk.f32.mxu0 %vm1094_vm0, %v467_v39  ;;  %v464_v43 = vld [vmem:[%s12494_s0 + $0xe00] sm:$0xff]  ;;  %v487_v45 = vld [vmem:[%s12494_s0 + $0xeb8] sm:$0xff] }
 0x1f0   :  { %v5691_v50 = vadd.f32 %v5690_v47, %v5689_v36  ;;  %2467 = vmatprep.mubr.f32.mxu1 %v449_v41  ;;  %v482_v41 = vld [vmem:[%s12494_s0 + $0xe90] sm:$0xff] }
 0x1f1   :  { %4608 = vst.msk [vmem:[%s12496_s2 + $0x1b0] sm:$0xff] %vm4553_vm1, %v3545_v48  ;;  %v4917_v54 = vsel %vm4553_vm1, %v3545_v48, 0.0  ;;  %v5383_v58 = vmul.f32 %v3545_v48, %v3545_v48  ;;  %v8940_v60 = vpop.f32.mrb[118].mxu0  ;;  %v469_v48 = vld [vmem:[%s12494_s0 + $0xe28] sm:$0xff] }
 0x1f2   :  { %v4918_v56 = vadd.f32 %v4917_v54, %v4916_v42  ;;  %v2204_v57 = vpop.f32.mrb[110].mxu1  ;;  %v3571_v59 = vpop.f32.mrb[119].mxu0  ;;  %3833 = vmatmul.mubr.f32.gmra.mrb[224].mxu0 %v466_v49 }
 0x1f3   :  { %v5692_v61 = vsel %vm4553_vm1, %v5383_v58, 0.0  ;;  %v3550_v62 = vadd.f32 %v8852_v5, %v2204_v57  ;;  %v2206_v2 = vpop.f32.mrb[111].mxu1  ;;  %2468 = vmatmul.mubr.f32.gmra.mrb[216].mxu1 %v448_v51  ;;  %6248 = vmatprep.mubr.msk.f32.mxu0 %vm1094_vm0, %v471_v53  ;;  %v468_v57 = vld [vmem:[%s12494_s0 + $0xe20] sm:$0xff]  ;;  %v491_v59 = vld [vmem:[%s12494_s0 + $0xed8] sm:$0xff] }
 0x1f4   :  { %v5693_v0 = vadd.f32 %v5692_v61, %v5691_v50  ;;  %2472 = vmatprep.mubr.f32.mxu1 %v453_v55  ;;  %v486_v55 = vld [vmem:[%s12494_s0 + $0xeb0] sm:$0xff] }
 0x1f5   :  { %4609 = vst.msk [vmem:[%s12496_s2 + $0x1b8] sm:$0xff] %vm4553_vm1, %v3550_v62  ;;  %v4919_v5 = vsel %vm4553_vm1, %v3550_v62, 0.0  ;;  %v5384_v6 = vmul.f32 %v3550_v62, %v3550_v62  ;;  %v8962_v11 = vpop.f32.mrb[120].mxu0  ;;  %v473_v62 = vld [vmem:[%s12494_s0 + $0xe48] sm:$0xff] }
 0x1f6   :  { %v4920_v8 = vadd.f32 %v4919_v5, %v4918_v56  ;;  %v2209_v9 = vpop.f32.mrb[112].mxu1  ;;  %v3576_v10 = vpop.f32.mrb[121].mxu0  ;;  %3838 = vmatmul.mubr.f32.gmra.mrb[226].mxu0 %v470_v63 }
 0x1f7   :  { %v5694_v12 = vsel %vm4553_vm1, %v5384_v6, 0.0  ;;  %v3555_v13 = vadd.f32 %v8874_v20, %v2209_v9  ;;  %v2211_v17 = vpop.f32.mrb[113].mxu1  ;;  %2473 = vmatmul.mubr.f32.gmra.mrb[218].mxu1 %v452_v1  ;;  %6249 = vmatprep.mubr.msk.f32.mxu0 %vm1094_vm0, %v475_v4  ;;  %v472_v9 = vld [vmem:[%s12494_s0 + $0xe40] sm:$0xff]  ;;  %v495_v10 = vld [vmem:[%s12494_s0 + $0xef8] sm:$0xff] }
 0x1f8   :  { %v5695_v15 = vadd.f32 %v5694_v12, %v5693_v0  ;;  %2477 = vmatprep.mubr.f32.mxu1 %v457_v7  ;;  %v490_v7 = vld [vmem:[%s12494_s0 + $0xed0] sm:$0xff] }
 0x1f9   :  { %4610 = vst.msk [vmem:[%s12496_s2 + $0x1c0] sm:$0xff] %vm4553_vm1, %v3555_v13  ;;  %v4921_v20 = vsel %vm4553_vm1, %v3555_v13, 0.0  ;;  %v5385_v19 = vmul.f32 %v3555_v13, %v3555_v13  ;;  %v8984_v25 = vpop.f32.mrb[122].mxu0  ;;  %v477_v13 = vld [vmem:[%s12494_s0 + $0xe68] sm:$0xff] }
 0x1fa   :  { %v4922_v22 = vadd.f32 %v4921_v20, %v4920_v8  ;;  %v2214_v23 = vpop.f32.mrb[114].mxu1  ;;  %v3581_v24 = vpop.f32.mrb[123].mxu0  ;;  %3843 = vmatmul.mubr.f32.gmra.mrb[228].mxu0 %v474_v14 }
 0x1fb   :  { %v5696_v26 = vsel %vm4553_vm1, %v5385_v19, 0.0  ;;  %v3560_v27 = vadd.f32 %v8896_v32, %v2214_v23  ;;  %v2216_v31 = vpop.f32.mrb[115].mxu1  ;;  %2478 = vmatmul.mubr.f32.gmra.mrb[220].mxu1 %v456_v16  ;;  %6250 = vmatprep.mubr.msk.f32.mxu0 %vm1094_vm0, %v479_v18  ;;  %v476_v23 = vld [vmem:[%s12494_s0 + $0xe60] sm:$0xff]  ;;  %v499_v24 = vld [vmem:[%s12494_s0 + $0xf18] sm:$0xff] }
 0x1fc   :  { %v5697_v29 = vadd.f32 %v5696_v26, %v5695_v15  ;;  %2482 = vmatprep.mubr.f32.mxu1 %v461_v21  ;;  %v494_v21 = vld [vmem:[%s12494_s0 + $0xef0] sm:$0xff] }
 0x1fd   :  { %4611 = vst.msk [vmem:[%s12496_s2 + $0x1c8] sm:$0xff] %vm4553_vm1, %v3560_v27  ;;  %v4923_v32 = vsel %vm4553_vm1, %v3560_v27, 0.0  ;;  %v5386_v33 = vmul.f32 %v3560_v27, %v3560_v27  ;;  %v9006_v38 = vpop.f32.mrb[124].mxu0  ;;  %v481_v27 = vld [vmem:[%s12494_s0 + $0xe88] sm:$0xff] }
 0x1fe   :  { %v4924_v35 = vadd.f32 %v4923_v32, %v4922_v22  ;;  %v2219_v36 = vpop.f32.mrb[116].mxu1  ;;  %v3586_v37 = vpop.f32.mrb[125].mxu0  ;;  %3848 = vmatmul.mubr.f32.gmra.mrb[230].mxu0 %v478_v28 }
 0x1ff   :  { %v5698_v39 = vsel %vm4553_vm1, %v5386_v33, 0.0  ;;  %v3565_v40 = vadd.f32 %v8918_v46, %v2219_v36  ;;  %v2221_v44 = vpop.f32.mrb[117].mxu1  ;;  %2483 = vmatmul.mubr.f32.gmra.mrb[222].mxu1 %v460_v30  ;;  %6251 = vmatprep.mubr.msk.f32.mxu0 %vm1094_vm0, %v483_v3  ;;  %v480_v36 = vld [vmem:[%s12494_s0 + $0xe80] sm:$0xff]  ;;  %v503_v37 = vld [vmem:[%s12494_s0 + $0xf38] sm:$0xff] }
 0x200   :  { %v5699_v42 = vadd.f32 %v5698_v39, %v5697_v29  ;;  %2487 = vmatprep.mubr.f32.mxu1 %v465_v34  ;;  %v498_v34 = vld [vmem:[%s12494_s0 + $0xf10] sm:$0xff] }
 0x201   :  { %4612 = vst.msk [vmem:[%s12496_s2 + $0x1d0] sm:$0xff] %vm4553_vm1, %v3565_v40  ;;  %v4925_v46 = vsel %vm4553_vm1, %v3565_v40, 0.0  ;;  %v5387_v47 = vmul.f32 %v3565_v40, %v3565_v40  ;;  %v9028_v52 = vpop.f32.mrb[126].mxu0  ;;  %v485_v40 = vld [vmem:[%s12494_s0 + $0xea8] sm:$0xff] }
 0x202   :  { %v4926_v49 = vadd.f32 %v4925_v46, %v4924_v35  ;;  %v2224_v50 = vpop.f32.mrb[118].mxu1  ;;  %v3591_v51 = vpop.f32.mrb[127].mxu0  ;;  %3853 = vmatmul.mubr.f32.gmra.mrb[232].mxu0 %v482_v41 }
 0x203   :  { %v5700_v53 = vsel %vm4553_vm1, %v5387_v47, 0.0  ;;  %v3570_v54 = vadd.f32 %v8940_v60, %v2224_v50  ;;  %v2226_v58 = vpop.f32.mrb[119].mxu1  ;;  %2488 = vmatmul.mubr.f32.gmra.mrb[224].mxu1 %v464_v43  ;;  %6252 = vmatprep.mubr.msk.f32.mxu0 %vm1094_vm0, %v487_v45  ;;  %v484_v50 = vld [vmem:[%s12494_s0 + $0xea0] sm:$0xff]  ;;  %v507_v51 = vld [vmem:[%s12494_s0 + $0xf58] sm:$0xff] }
 0x204   :  { %v5701_v56 = vadd.f32 %v5700_v53, %v5699_v42  ;;  %2492 = vmatprep.mubr.f32.mxu1 %v469_v48  ;;  %v502_v48 = vld [vmem:[%s12494_s0 + $0xf30] sm:$0xff] }
 0x205   :  { %4613 = vst.msk [vmem:[%s12496_s2 + $0x1d8] sm:$0xff] %vm4553_vm1, %v3570_v54  ;;  %v4927_v60 = vsel %vm4553_vm1, %v3570_v54, 0.0  ;;  %v5388_v61 = vmul.f32 %v3570_v54, %v3570_v54  ;;  %v9050_v2 = vpop.f32.mrb[128].mxu0  ;;  %v489_v54 = vld [vmem:[%s12494_s0 + $0xec8] sm:$0xff] }
 0x206   :  { %v4928_v63 = vadd.f32 %v4927_v60, %v4926_v49  ;;  %v2229_v0 = vpop.f32.mrb[120].mxu1  ;;  %v3596_v1 = vpop.f32.mrb[129].mxu0  ;;  %3858 = vmatmul.mubr.f32.gmra.mrb[234].mxu0 %v486_v55 }
 0x207   :  { %v5702_v4 = vsel %vm4553_vm1, %v5388_v61, 0.0  ;;  %v3575_v5 = vadd.f32 %v8962_v11, %v2229_v0  ;;  %v2231_v6 = vpop.f32.mrb[121].mxu1  ;;  %2493 = vmatmul.mubr.f32.gmra.mrb[226].mxu1 %v468_v57  ;;  %6253 = vmatprep.mubr.msk.f32.mxu0 %vm1094_vm0, %v491_v59  ;;  %v488_v0 = vld [vmem:[%s12494_s0 + $0xec0] sm:$0xff]  ;;  %v511_v1 = vld [vmem:[%s12494_s0 + $0xf78] sm:$0xff] }
 0x208   :  { %v5703_v8 = vadd.f32 %v5702_v4, %v5701_v56  ;;  %2497 = vmatprep.mubr.f32.mxu1 %v473_v62  ;;  %v506_v62 = vld [vmem:[%s12494_s0 + $0xf50] sm:$0xff] }
 0x209   :  { %4614 = vst.msk [vmem:[%s12496_s2 + $0x1e0] sm:$0xff] %vm4553_vm1, %v3575_v5  ;;  %v4929_v11 = vsel %vm4553_vm1, %v3575_v5, 0.0  ;;  %v5389_v12 = vmul.f32 %v3575_v5, %v3575_v5  ;;  %v9072_v17 = vpop.f32.mrb[130].mxu0  ;;  %v493_v5 = vld [vmem:[%s12494_s0 + $0xee8] sm:$0xff] }
 0x20a   :  { %v4930_v14 = vadd.f32 %v4929_v11, %v4928_v63  ;;  %v2234_v15 = vpop.f32.mrb[122].mxu1  ;;  %v3601_v16 = vpop.f32.mrb[131].mxu0  ;;  %3863 = vmatmul.mubr.f32.gmra.mrb[236].mxu0 %v490_v7 }
 0x20b   :  { %v5704_v18 = vsel %vm4553_vm1, %v5389_v12, 0.0  ;;  %v3580_v20 = vadd.f32 %v8984_v25, %v2234_v15  ;;  %v2236_v19 = vpop.f32.mrb[123].mxu1  ;;  %2498 = vmatmul.mubr.f32.gmra.mrb[228].mxu1 %v472_v9  ;;  %6254 = vmatprep.mubr.msk.f32.mxu0 %vm1094_vm0, %v495_v10  ;;  %v492_v15 = vld [vmem:[%s12494_s0 + $0xee0] sm:$0xff]  ;;  %v515_v16 = vld [vmem:[%s12494_s0 + $0xf98] sm:$0xff] }
 0x20c   :  { %v5705_v22 = vadd.f32 %v5704_v18, %v5703_v8  ;;  %2502 = vmatprep.mubr.f32.mxu1 %v477_v13  ;;  %v510_v13 = vld [vmem:[%s12494_s0 + $0xf70] sm:$0xff] }
 0x20d   :  { %4615 = vst.msk [vmem:[%s12496_s2 + $0x1e8] sm:$0xff] %vm4553_vm1, %v3580_v20  ;;  %v4931_v25 = vsel %vm4553_vm1, %v3580_v20, 0.0  ;;  %v5390_v26 = vmul.f32 %v3580_v20, %v3580_v20  ;;  %v9094_v31 = vpop.f32.mrb[132].mxu0  ;;  %v497_v20 = vld [vmem:[%s12494_s0 + $0xf08] sm:$0xff] }
 0x20e   :  { %v4932_v28 = vadd.f32 %v4931_v25, %v4930_v14  ;;  %v2239_v29 = vpop.f32.mrb[124].mxu1  ;;  %v3606_v30 = vpop.f32.mrb[133].mxu0  ;;  %3868 = vmatmul.mubr.f32.gmra.mrb[238].mxu0 %v494_v21 }
 0x20f   :  { %v5706_v3 = vsel %vm4553_vm1, %v5390_v26, 0.0  ;;  %v3585_v32 = vadd.f32 %v9006_v38, %v2239_v29  ;;  %v2241_v33 = vpop.f32.mrb[125].mxu1  ;;  %2503 = vmatmul.mubr.f32.gmra.mrb[230].mxu1 %v476_v23  ;;  %6255 = vmatprep.mubr.msk.f32.mxu0 %vm1094_vm0, %v499_v24  ;;  %v496_v29 = vld [vmem:[%s12494_s0 + $0xf00] sm:$0xff]  ;;  %v519_v30 = vld [vmem:[%s12494_s0 + $0xfb8] sm:$0xff] }
 0x210   :  { %v5707_v35 = vadd.f32 %v5706_v3, %v5705_v22  ;;  %2507 = vmatprep.mubr.f32.mxu1 %v481_v27  ;;  %v514_v27 = vld [vmem:[%s12494_s0 + $0xf90] sm:$0xff] }
 0x211   :  { %4616 = vst.msk [vmem:[%s12496_s2 + $0x1f0] sm:$0xff] %vm4553_vm1, %v3585_v32  ;;  %v4933_v38 = vsel %vm4553_vm1, %v3585_v32, 0.0  ;;  %v5391_v39 = vmul.f32 %v3585_v32, %v3585_v32  ;;  %v9116_v44 = vpop.f32.mrb[134].mxu0  ;;  %v501_v32 = vld [vmem:[%s12494_s0 + $0xf28] sm:$0xff] }
 0x212   :  { %v4934_v41 = vadd.f32 %v4933_v38, %v4932_v28  ;;  %v2244_v42 = vpop.f32.mrb[126].mxu1  ;;  %v3611_v43 = vpop.f32.mrb[135].mxu0  ;;  %3873 = vmatmul.mubr.f32.gmra.mrb[240].mxu0 %v498_v34 }
 0x213   :  { %v5708_v45 = vsel %vm4553_vm1, %v5391_v39, 0.0  ;;  %v3590_v46 = vadd.f32 %v9028_v52, %v2244_v42  ;;  %v2246_v47 = vpop.f32.mrb[127].mxu1  ;;  %2508 = vmatmul.mubr.f32.gmra.mrb[232].mxu1 %v480_v36  ;;  %6256 = vmatprep.mubr.msk.f32.mxu0 %vm1094_vm0, %v503_v37  ;;  %v500_v42 = vld [vmem:[%s12494_s0 + $0xf20] sm:$0xff]  ;;  %v523_v43 = vld [vmem:[%s12494_s0 + $0xfd8] sm:$0xff] }
 0x214   :  { %v5709_v49 = vadd.f32 %v5708_v45, %v5707_v35  ;;  %2512 = vmatprep.mubr.f32.mxu1 %v485_v40  ;;  %v518_v40 = vld [vmem:[%s12494_s0 + $0xfb0] sm:$0xff] }
 0x215   :  { %4617 = vst.msk [vmem:[%s12496_s2 + $0x1f8] sm:$0xff] %vm4553_vm1, %v3590_v46  ;;  %v4935_v52 = vsel %vm4553_vm1, %v3590_v46, 0.0  ;;  %v5392_v53 = vmul.f32 %v3590_v46, %v3590_v46  ;;  %v9138_v58 = vpop.f32.mrb[136].mxu0  ;;  %v505_v46 = vld [vmem:[%s12494_s0 + $0xf48] sm:$0xff] }
 0x216   :  { %v4936_v55 = vadd.f32 %v4935_v52, %v4934_v41  ;;  %v2249_v56 = vpop.f32.mrb[128].mxu1  ;;  %v3616_v57 = vpop.f32.mrb[137].mxu0  ;;  %3878 = vmatmul.mubr.f32.gmra.mrb[242].mxu0 %v502_v48 }
 0x217   :  { %v5710_v59 = vsel %vm4553_vm1, %v5392_v53, 0.0  ;;  %v3595_v60 = vadd.f32 %v9050_v2, %v2249_v56  ;;  %v2251_v61 = vpop.f32.mrb[129].mxu1  ;;  %2513 = vmatmul.mubr.f32.gmra.mrb[234].mxu1 %v484_v50  ;;  %6257 = vmatprep.mubr.msk.f32.mxu0 %vm1094_vm0, %v507_v51  ;;  %v504_v56 = vld [vmem:[%s12494_s0 + $0xf40] sm:$0xff]  ;;  %v527_v57 = vld [vmem:[%s12494_s0 + $0xff8] sm:$0xff] }
 0x218   :  { %v5711_v63 = vadd.f32 %v5710_v59, %v5709_v49  ;;  %2517 = vmatprep.mubr.f32.mxu1 %v489_v54  ;;  %v522_v54 = vld [vmem:[%s12494_s0 + $0xfd0] sm:$0xff] }
 0x219   :  { %4618 = vst.msk [vmem:[%s12496_s2 + $0x200] sm:$0xff] %vm4553_vm1, %v3595_v60  ;;  %v4937_v2 = vsel %vm4553_vm1, %v3595_v60, 0.0  ;;  %v5393_v4 = vmul.f32 %v3595_v60, %v3595_v60  ;;  %v9160_v6 = vpop.f32.mrb[138].mxu0  ;;  %v509_v60 = vld [vmem:[%s12494_s0 + $0xf68] sm:$0xff] }
 0x21a   :  { %v4938_v7 = vadd.f32 %v4937_v2, %v4936_v55  ;;  %v2254_v8 = vpop.f32.mrb[130].mxu1  ;;  %v3621_v9 = vpop.f32.mrb[139].mxu0  ;;  %3883 = vmatmul.mubr.f32.gmra.mrb[244].mxu0 %v506_v62 }
 0x21b   :  { %v5712_v10 = vsel %vm4553_vm1, %v5393_v4, 0.0  ;;  %v3600_v11 = vadd.f32 %v9072_v17, %v2254_v8  ;;  %v2256_v12 = vpop.f32.mrb[131].mxu1  ;;  %2518 = vmatmul.mubr.f32.gmra.mrb[236].mxu1 %v488_v0  ;;  %6258 = vmatprep.mubr.msk.f32.mxu0 %vm1094_vm0, %v511_v1  ;;  %v508_v8 = vld [vmem:[%s12494_s0 + $0xf60] sm:$0xff]  ;;  %v531_v9 = vld [vmem:[%s12494_s0 + $0x1018] sm:$0xff] }
 0x21c   :  { %v5713_v14 = vadd.f32 %v5712_v10, %v5711_v63  ;;  %2522 = vmatprep.mubr.f32.mxu1 %v493_v5  ;;  %v526_v5 = vld [vmem:[%s12494_s0 + $0xff0] sm:$0xff] }
 0x21d   :  { %4619 = vst.msk [vmem:[%s12496_s2 + $0x208] sm:$0xff] %vm4553_vm1, %v3600_v11  ;;  %v4939_v17 = vsel %vm4553_vm1, %v3600_v11, 0.0  ;;  %v5394_v18 = vmul.f32 %v3600_v11, %v3600_v11  ;;  %v9182_v19 = vpop.f32.mrb[140].mxu0  ;;  %v513_v11 = vld [vmem:[%s12494_s0 + $0xf88] sm:$0xff] }
 0x21e   :  { %v4940_v21 = vadd.f32 %v4939_v17, %v4938_v7  ;;  %v2259_v22 = vpop.f32.mrb[132].mxu1  ;;  %v3626_v23 = vpop.f32.mrb[141].mxu0  ;;  %3888 = vmatmul.mubr.f32.gmra.mrb[246].mxu0 %v510_v13 }
 0x21f   :  { %v5714_v24 = vsel %vm4553_vm1, %v5394_v18, 0.0  ;;  %v3605_v25 = vadd.f32 %v9094_v31, %v2259_v22  ;;  %v2261_v26 = vpop.f32.mrb[133].mxu1  ;;  %2523 = vmatmul.mubr.f32.gmra.mrb[238].mxu1 %v492_v15  ;;  %6259 = vmatprep.mubr.msk.f32.mxu0 %vm1094_vm0, %v515_v16  ;;  %v512_v22 = vld [vmem:[%s12494_s0 + $0xf80] sm:$0xff]  ;;  %v535_v23 = vld [vmem:[%s12494_s0 + $0x1038] sm:$0xff] }
 0x220   :  { %v5715_v28 = vadd.f32 %v5714_v24, %v5713_v14  ;;  %2527 = vmatprep.mubr.f32.mxu1 %v497_v20  ;;  %v530_v20 = vld [vmem:[%s12494_s0 + $0x1010] sm:$0xff] }
 0x221   :  { %4620 = vst.msk [vmem:[%s12496_s2 + $0x210] sm:$0xff] %vm4553_vm1, %v3605_v25  ;;  %v4941_v31 = vsel %vm4553_vm1, %v3605_v25, 0.0  ;;  %v5395_v3 = vmul.f32 %v3605_v25, %v3605_v25  ;;  %v9204_v33 = vpop.f32.mrb[142].mxu0  ;;  %v517_v25 = vld [vmem:[%s12494_s0 + $0xfa8] sm:$0xff] }
 0x222   :  { %v4942_v34 = vadd.f32 %v4941_v31, %v4940_v21  ;;  %v2264_v35 = vpop.f32.mrb[134].mxu1  ;;  %v3631_v36 = vpop.f32.mrb[143].mxu0  ;;  %3893 = vmatmul.mubr.f32.gmra.mrb[248].mxu0 %v514_v27 }
 0x223   :  { %v5716_v37 = vsel %vm4553_vm1, %v5395_v3, 0.0  ;;  %v3610_v38 = vadd.f32 %v9116_v44, %v2264_v35  ;;  %v2266_v39 = vpop.f32.mrb[135].mxu1  ;;  %2528 = vmatmul.mubr.f32.gmra.mrb[240].mxu1 %v496_v29  ;;  %6260 = vmatprep.mubr.msk.f32.mxu0 %vm1094_vm0, %v519_v30  ;;  %v516_v35 = vld [vmem:[%s12494_s0 + $0xfa0] sm:$0xff]  ;;  %v539_v36 = vld [vmem:[%s12494_s0 + $0x1058] sm:$0xff] }
 0x224   :  { %v5717_v41 = vadd.f32 %v5716_v37, %v5715_v28  ;;  %2532 = vmatprep.mubr.f32.mxu1 %v501_v32  ;;  %v534_v32 = vld [vmem:[%s12494_s0 + $0x1030] sm:$0xff] }
 0x225   :  { %4621 = vst.msk [vmem:[%s12496_s2 + $0x218] sm:$0xff] %vm4553_vm1, %v3610_v38  ;;  %v4943_v44 = vsel %vm4553_vm1, %v3610_v38, 0.0  ;;  %v5396_v45 = vmul.f32 %v3610_v38, %v3610_v38  ;;  %v9226_v47 = vpop.f32.mrb[144].mxu0  ;;  %v521_v38 = vld [vmem:[%s12494_s0 + $0xfc8] sm:$0xff] }
 0x226   :  { %v4944_v48 = vadd.f32 %v4943_v44, %v4942_v34  ;;  %v2269_v49 = vpop.f32.mrb[136].mxu1  ;;  %v3636_v50 = vpop.f32.mrb[145].mxu0  ;;  %3898 = vmatmul.mubr.f32.gmra.mrb[250].mxu0 %v518_v40 }
 0x227   :  { %v5718_v51 = vsel %vm4553_vm1, %v5396_v45, 0.0  ;;  %v3615_v52 = vadd.f32 %v9138_v58, %v2269_v49  ;;  %v2271_v53 = vpop.f32.mrb[137].mxu1  ;;  %2533 = vmatmul.mubr.f32.gmra.mrb[242].mxu1 %v500_v42  ;;  %6261 = vmatprep.mubr.msk.f32.mxu0 %vm1094_vm0, %v523_v43  ;;  %v520_v49 = vld [vmem:[%s12494_s0 + $0xfc0] sm:$0xff]  ;;  %v543_v50 = vld [vmem:[%s12494_s0 + $0x1078] sm:$0xff] }
 0x228   :  { %v5719_v55 = vadd.f32 %v5718_v51, %v5717_v41  ;;  %2537 = vmatprep.mubr.f32.mxu1 %v505_v46  ;;  %v538_v46 = vld [vmem:[%s12494_s0 + $0x1050] sm:$0xff] }
 0x229   :  { %4622 = vst.msk [vmem:[%s12496_s2 + $0x220] sm:$0xff] %vm4553_vm1, %v3615_v52  ;;  %v4945_v58 = vsel %vm4553_vm1, %v3615_v52, 0.0  ;;  %v5397_v59 = vmul.f32 %v3615_v52, %v3615_v52  ;;  %v9248_v61 = vpop.f32.mrb[146].mxu0  ;;  %v525_v52 = vld [vmem:[%s12494_s0 + $0xfe8] sm:$0xff] }
 0x22a   :  { %v4946_v62 = vadd.f32 %v4945_v58, %v4944_v48  ;;  %v2274_v63 = vpop.f32.mrb[138].mxu1  ;;  %v3641_v0 = vpop.f32.mrb[147].mxu0  ;;  %3903 = vmatmul.mubr.f32.gmra.mrb[252].mxu0 %v522_v54 }
 0x22b   :  { %v5720_v1 = vsel %vm4553_vm1, %v5397_v59, 0.0  ;;  %v3620_v2 = vadd.f32 %v9160_v6, %v2274_v63  ;;  %v2276_v4 = vpop.f32.mrb[139].mxu1  ;;  %2538 = vmatmul.mubr.f32.gmra.mrb[244].mxu1 %v504_v56  ;;  %6262 = vmatprep.mubr.msk.f32.mxu0 %vm1094_vm0, %v527_v57  ;;  %v524_v63 = vld [vmem:[%s12494_s0 + $0xfe0] sm:$0xff]  ;;  %v547_v0 = vld [vmem:[%s12494_s0 + $0x1098] sm:$0xff] }
 0x22c   :  { %v5721_v7 = vadd.f32 %v5720_v1, %v5719_v55  ;;  %2542 = vmatprep.mubr.f32.mxu1 %v509_v60  ;;  %v542_v60 = vld [vmem:[%s12494_s0 + $0x1070] sm:$0xff] }
 0x22d   :  { %4623 = vst.msk [vmem:[%s12496_s2 + $0x228] sm:$0xff] %vm4553_vm1, %v3620_v2  ;;  %v4947_v6 = vsel %vm4553_vm1, %v3620_v2, 0.0  ;;  %v5398_v10 = vmul.f32 %v3620_v2, %v3620_v2  ;;  %v9270_v12 = vpop.f32.mrb[148].mxu0  ;;  %v529_v2 = vld [vmem:[%s12494_s0 + $0x1008] sm:$0xff] }
 0x22e   :  { %v4948_v13 = vadd.f32 %v4947_v6, %v4946_v62  ;;  %v2279_v14 = vpop.f32.mrb[140].mxu1  ;;  %v3646_v15 = vpop.f32.mrb[149].mxu0  ;;  %3908 = vmatmul.mubr.f32.gmra.mrb[254].mxu0 %v526_v5 }
 0x22f   :  { %v5722_v16 = vsel %vm4553_vm1, %v5398_v10, 0.0  ;;  %v3625_v17 = vadd.f32 %v9182_v19, %v2279_v14  ;;  %v2281_v18 = vpop.f32.mrb[141].mxu1  ;;  %2543 = vmatmul.mubr.f32.gmra.mrb[246].mxu1 %v508_v8  ;;  %6263 = vmatprep.mubr.msk.f32.mxu0 %vm1094_vm0, %v531_v9  ;;  %v528_v14 = vld [vmem:[%s12494_s0 + $0x1000] sm:$0xff]  ;;  %v551_v15 = vld [vmem:[%s12494_s0 + $0x10b8] sm:$0xff] }
 0x230   :  { %v5723_v21 = vadd.f32 %v5722_v16, %v5721_v7  ;;  %2547 = vmatprep.mubr.f32.mxu1 %v513_v11  ;;  %v546_v11 = vld [vmem:[%s12494_s0 + $0x1090] sm:$0xff] }
 0x231   :  { %4624 = vst.msk [vmem:[%s12496_s2 + $0x230] sm:$0xff] %vm4553_vm1, %v3625_v17  ;;  %v4949_v19 = vsel %vm4553_vm1, %v3625_v17, 0.0  ;;  %v5399_v24 = vmul.f32 %v3625_v17, %v3625_v17  ;;  %v9292_v26 = vpop.f32.mrb[150].mxu0  ;;  %v533_v17 = vld [vmem:[%s12494_s0 + $0x1028] sm:$0xff] }
 0x232   :  { %v4950_v27 = vadd.f32 %v4949_v19, %v4948_v13  ;;  %v2284_v28 = vpop.f32.mrb[142].mxu1  ;;  %v3651_v29 = vpop.f32.mrb[151].mxu0  ;;  %3913 = vmatmul.mubr.f32.gmra.mrb[0].mxu0 %v530_v20 }
 0x233   :  { %v5724_v30 = vsel %vm4553_vm1, %v5399_v24, 0.0  ;;  %v3630_v31 = vadd.f32 %v9204_v33, %v2284_v28  ;;  %v2286_v3 = vpop.f32.mrb[143].mxu1  ;;  %2548 = vmatmul.mubr.f32.gmra.mrb[248].mxu1 %v512_v22  ;;  %6264 = vmatprep.mubr.msk.f32.mxu0 %vm1094_vm0, %v535_v23  ;;  %v532_v28 = vld [vmem:[%s12494_s0 + $0x1020] sm:$0xff]  ;;  %v555_v29 = vld [vmem:[%s12494_s0 + $0x10d8] sm:$0xff] }
 0x234   :  { %v5725_v34 = vadd.f32 %v5724_v30, %v5723_v21  ;;  %2552 = vmatprep.mubr.f32.mxu1 %v517_v25  ;;  %v550_v25 = vld [vmem:[%s12494_s0 + $0x10b0] sm:$0xff] }
 0x235   :  { %4625 = vst.msk [vmem:[%s12496_s2 + $0x238] sm:$0xff] %vm4553_vm1, %v3630_v31  ;;  %v4951_v33 = vsel %vm4553_vm1, %v3630_v31, 0.0  ;;  %v5400_v37 = vmul.f32 %v3630_v31, %v3630_v31  ;;  %v9314_v39 = vpop.f32.mrb[152].mxu0  ;;  %v537_v31 = vld [vmem:[%s12494_s0 + $0x1048] sm:$0xff] }
 0x236   :  { %v4952_v40 = vadd.f32 %v4951_v33, %v4950_v27  ;;  %v2289_v41 = vpop.f32.mrb[144].mxu1  ;;  %v3656_v42 = vpop.f32.mrb[153].mxu0  ;;  %3918 = vmatmul.mubr.f32.gmra.mrb[2].mxu0 %v534_v32 }
 0x237   :  { %v5726_v43 = vsel %vm4553_vm1, %v5400_v37, 0.0  ;;  %v3635_v44 = vadd.f32 %v9226_v47, %v2289_v41  ;;  %v2291_v45 = vpop.f32.mrb[145].mxu1  ;;  %2553 = vmatmul.mubr.f32.gmra.mrb[250].mxu1 %v516_v35  ;;  %6265 = vmatprep.mubr.msk.f32.mxu0 %vm1094_vm0, %v539_v36  ;;  %v536_v41 = vld [vmem:[%s12494_s0 + $0x1040] sm:$0xff]  ;;  %v559_v42 = vld [vmem:[%s12494_s0 + $0x10f8] sm:$0xff] }
 0x238   :  { %v5727_v48 = vadd.f32 %v5726_v43, %v5725_v34  ;;  %2557 = vmatprep.mubr.f32.mxu1 %v521_v38  ;;  %v554_v38 = vld [vmem:[%s12494_s0 + $0x10d0] sm:$0xff] }
 0x239   :  { %4626 = vst.msk [vmem:[%s12496_s2 + $0x240] sm:$0xff] %vm4553_vm1, %v3635_v44  ;;  %v4953_v47 = vsel %vm4553_vm1, %v3635_v44, 0.0  ;;  %v5401_v51 = vmul.f32 %v3635_v44, %v3635_v44  ;;  %v9336_v53 = vpop.f32.mrb[154].mxu0  ;;  %v541_v44 = vld [vmem:[%s12494_s0 + $0x1068] sm:$0xff] }
 0x23a   :  { %v4954_v54 = vadd.f32 %v4953_v47, %v4952_v40  ;;  %v2294_v55 = vpop.f32.mrb[146].mxu1  ;;  %v3661_v56 = vpop.f32.mrb[155].mxu0  ;;  %3923 = vmatmul.mubr.f32.gmra.mrb[4].mxu0 %v538_v46 }
 0x23b   :  { %v5728_v57 = vsel %vm4553_vm1, %v5401_v51, 0.0  ;;  %v3640_v58 = vadd.f32 %v9248_v61, %v2294_v55  ;;  %v2296_v59 = vpop.f32.mrb[147].mxu1  ;;  %2558 = vmatmul.mubr.f32.gmra.mrb[252].mxu1 %v520_v49  ;;  %6266 = vmatprep.mubr.msk.f32.mxu0 %vm1094_vm0, %v543_v50  ;;  %v540_v55 = vld [vmem:[%s12494_s0 + $0x1060] sm:$0xff]  ;;  %v563_v56 = vld [vmem:[%s12494_s0 + $0x1118] sm:$0xff] }
 0x23c   :  { %v5729_v62 = vadd.f32 %v5728_v57, %v5727_v48  ;;  %2562 = vmatprep.mubr.f32.mxu1 %v525_v52  ;;  %v558_v52 = vld [vmem:[%s12494_s0 + $0x10f0] sm:$0xff] }
 0x23d   :  { %4627 = vst.msk [vmem:[%s12496_s2 + $0x248] sm:$0xff] %vm4553_vm1, %v3640_v58  ;;  %v4955_v61 = vsel %vm4553_vm1, %v3640_v58, 0.0  ;;  %v5402_v1 = vmul.f32 %v3640_v58, %v3640_v58  ;;  %v9358_v4 = vpop.f32.mrb[156].mxu0  ;;  %v545_v58 = vld [vmem:[%s12494_s0 + $0x1088] sm:$0xff] }
 0x23e   :  { %v4956_v5 = vadd.f32 %v4955_v61, %v4954_v54  ;;  %v2299_v7 = vpop.f32.mrb[148].mxu1  ;;  %v3666_v8 = vpop.f32.mrb[157].mxu0  ;;  %3928 = vmatmul.mubr.f32.gmra.mrb[6].mxu0 %v542_v60 }
 0x23f   :  { %v5730_v9 = vsel %vm4553_vm1, %v5402_v1, 0.0  ;;  %v3645_v6 = vadd.f32 %v9270_v12, %v2299_v7  ;;  %v2301_v10 = vpop.f32.mrb[149].mxu1  ;;  %2563 = vmatmul.mubr.f32.gmra.mrb[254].mxu1 %v524_v63  ;;  %6267 = vmatprep.mubr.msk.f32.mxu0 %vm1094_vm0, %v547_v0  ;;  %v544_v7 = vld [vmem:[%s12494_s0 + $0x1080] sm:$0xff]  ;;  %v567_v8 = vld [vmem:[%s12494_s0 + $0x1138] sm:$0xff] }
 0x240   :  { %v5731_v13 = vadd.f32 %v5730_v9, %v5729_v62  ;;  %2567 = vmatprep.mubr.f32.mxu1 %v529_v2  ;;  %v562_v2 = vld [vmem:[%s12494_s0 + $0x1110] sm:$0xff] }
 0x241   :  { %4628 = vst.msk [vmem:[%s12496_s2 + $0x250] sm:$0xff] %vm4553_vm1, %v3645_v6  ;;  %v4957_v12 = vsel %vm4553_vm1, %v3645_v6, 0.0  ;;  %v5403_v16 = vmul.f32 %v3645_v6, %v3645_v6  ;;  %v9380_v18 = vpop.f32.mrb[158].mxu0  ;;  %v549_v6 = vld [vmem:[%s12494_s0 + $0x10a8] sm:$0xff] }
 0x242   :  { %v4958_v20 = vadd.f32 %v4957_v12, %v4956_v5  ;;  %v2304_v21 = vpop.f32.mrb[150].mxu1  ;;  %v3671_v22 = vpop.f32.mrb[159].mxu0  ;;  %3933 = vmatmul.mubr.f32.gmra.mrb[8].mxu0 %v546_v11 }
 0x243   :  { %v5732_v23 = vsel %vm4553_vm1, %v5403_v16, 0.0  ;;  %v3650_v19 = vadd.f32 %v9292_v26, %v2304_v21  ;;  %v2306_v24 = vpop.f32.mrb[151].mxu1  ;;  %2568 = vmatmul.mubr.f32.gmra.mrb[150].mxu1 %v528_v14  ;;  %6268 = vmatprep.mubr.msk.f32.mxu0 %vm1094_vm0, %v551_v15  ;;  %v548_v21 = vld [vmem:[%s12494_s0 + $0x10a0] sm:$0xff]  ;;  %v571_v22 = vld [vmem:[%s12494_s0 + $0x1158] sm:$0xff] }
 0x244   :  { %v5733_v27 = vadd.f32 %v5732_v23, %v5731_v13  ;;  %2572 = vmatprep.mubr.f32.mxu1 %v533_v17  ;;  %v566_v17 = vld [vmem:[%s12494_s0 + $0x1130] sm:$0xff] }
 0x245   :  { %4629 = vst.msk [vmem:[%s12496_s2 + $0x258] sm:$0xff] %vm4553_vm1, %v3650_v19  ;;  %v4959_v26 = vsel %vm4553_vm1, %v3650_v19, 0.0  ;;  %v5404_v30 = vmul.f32 %v3650_v19, %v3650_v19  ;;  %v9402_v3 = vpop.f32.mrb[160].mxu0  ;;  %v553_v19 = vld [vmem:[%s12494_s0 + $0x10c8] sm:$0xff] }
 0x246   :  { %v4960_v32 = vadd.f32 %v4959_v26, %v4958_v20  ;;  %v2309_v34 = vpop.f32.mrb[152].mxu1  ;;  %v3676_v35 = vpop.f32.mrb[161].mxu0  ;;  %3938 = vmatmul.mubr.f32.gmra.mrb[10].mxu0 %v550_v25 }
 0x247   :  { %v5734_v36 = vsel %vm4553_vm1, %v5404_v30, 0.0  ;;  %v3655_v33 = vadd.f32 %v9314_v39, %v2309_v34  ;;  %v2311_v37 = vpop.f32.mrb[153].mxu1  ;;  %2573 = vmatmul.mubr.f32.gmra.mrb[152].mxu1 %v532_v28  ;;  %6269 = vmatprep.mubr.msk.f32.mxu0 %vm1094_vm0, %v555_v29  ;;  %v552_v34 = vld [vmem:[%s12494_s0 + $0x10c0] sm:$0xff]  ;;  %v575_v35 = vld [vmem:[%s12494_s0 + $0x1178] sm:$0xff] }
 0x248   :  { %v5735_v40 = vadd.f32 %v5734_v36, %v5733_v27  ;;  %2577 = vmatprep.mubr.f32.mxu1 %v537_v31  ;;  %v570_v31 = vld [vmem:[%s12494_s0 + $0x1150] sm:$0xff] }
 0x249   :  { %4630 = vst.msk [vmem:[%s12496_s2 + $0x260] sm:$0xff] %vm4553_vm1, %v3655_v33  ;;  %v4961_v39 = vsel %vm4553_vm1, %v3655_v33, 0.0  ;;  %v5405_v43 = vmul.f32 %v3655_v33, %v3655_v33  ;;  %v9424_v45 = vpop.f32.mrb[162].mxu0  ;;  %v557_v33 = vld [vmem:[%s12494_s0 + $0x10e8] sm:$0xff] }
 0x24a   :  { %v4962_v46 = vadd.f32 %v4961_v39, %v4960_v32  ;;  %v2314_v48 = vpop.f32.mrb[154].mxu1  ;;  %v3681_v49 = vpop.f32.mrb[163].mxu0  ;;  %3943 = vmatmul.mubr.f32.gmra.mrb[12].mxu0 %v554_v38 }
 0x24b   :  { %v5736_v50 = vsel %vm4553_vm1, %v5405_v43, 0.0  ;;  %v3660_v47 = vadd.f32 %v9336_v53, %v2314_v48  ;;  %v2316_v51 = vpop.f32.mrb[155].mxu1  ;;  %2578 = vmatmul.mubr.f32.gmra.mrb[154].mxu1 %v536_v41  ;;  %6270 = vmatprep.mubr.msk.f32.mxu0 %vm1094_vm0, %v559_v42  ;;  %v556_v48 = vld [vmem:[%s12494_s0 + $0x10e0] sm:$0xff]  ;;  %v579_v49 = vld [vmem:[%s12494_s0 + $0x1198] sm:$0xff] }
 0x24c   :  { %v5737_v54 = vadd.f32 %v5736_v50, %v5735_v40  ;;  %2582 = vmatprep.mubr.f32.mxu1 %v541_v44  ;;  %v574_v44 = vld [vmem:[%s12494_s0 + $0x1170] sm:$0xff] }
 0x24d   :  { %4631 = vst.msk [vmem:[%s12496_s2 + $0x268] sm:$0xff] %vm4553_vm1, %v3660_v47  ;;  %v4963_v53 = vsel %vm4553_vm1, %v3660_v47, 0.0  ;;  %v5406_v57 = vmul.f32 %v3660_v47, %v3660_v47  ;;  %v9446_v59 = vpop.f32.mrb[164].mxu0  ;;  %v561_v47 = vld [vmem:[%s12494_s0 + $0x1108] sm:$0xff] }
 0x24e   :  { %v4964_v60 = vadd.f32 %v4963_v53, %v4962_v46  ;;  %v2319_v62 = vpop.f32.mrb[156].mxu1  ;;  %v3686_v63 = vpop.f32.mrb[165].mxu0  ;;  %3948 = vmatmul.mubr.f32.gmra.mrb[14].mxu0 %v558_v52 }
 0x24f   :  { %v5738_v0 = vsel %vm4553_vm1, %v5406_v57, 0.0  ;;  %v3665_v61 = vadd.f32 %v9358_v4, %v2319_v62  ;;  %v2321_v1 = vpop.f32.mrb[157].mxu1  ;;  %2583 = vmatmul.mubr.f32.gmra.mrb[156].mxu1 %v540_v55  ;;  %6271 = vmatprep.mubr.msk.f32.mxu0 %vm1094_vm0, %v563_v56  ;;  %v560_v62 = vld [vmem:[%s12494_s0 + $0x1100] sm:$0xff]  ;;  %v583_v63 = vld [vmem:[%s12494_s0 + $0x11b8] sm:$0xff] }
 0x250   :  { %v5739_v5 = vadd.f32 %v5738_v0, %v5737_v54  ;;  %2587 = vmatprep.mubr.f32.mxu1 %v545_v58  ;;  %v578_v58 = vld [vmem:[%s12494_s0 + $0x1190] sm:$0xff] }
 0x251   :  { %4632 = vst.msk [vmem:[%s12496_s2 + $0x270] sm:$0xff] %vm4553_vm1, %v3665_v61  ;;  %v4965_v4 = vsel %vm4553_vm1, %v3665_v61, 0.0  ;;  %v5407_v9 = vmul.f32 %v3665_v61, %v3665_v61  ;;  %v9468_v10 = vpop.f32.mrb[166].mxu0  ;;  %v565_v61 = vld [vmem:[%s12494_s0 + $0x1128] sm:$0xff] }
 0x252   :  { %v4966_v11 = vadd.f32 %v4965_v4, %v4964_v60  ;;  %v2324_v13 = vpop.f32.mrb[158].mxu1  ;;  %v3691_v14 = vpop.f32.mrb[167].mxu0  ;;  %3953 = vmatmul.mubr.f32.gmra.mrb[16].mxu0 %v562_v2 }
 0x253   :  { %v5740_v15 = vsel %vm4553_vm1, %v5407_v9, 0.0  ;;  %v3670_v12 = vadd.f32 %v9380_v18, %v2324_v13  ;;  %v2326_v16 = vpop.f32.mrb[159].mxu1  ;;  %2588 = vmatmul.mubr.f32.gmra.mrb[158].mxu1 %v544_v7  ;;  %6272 = vmatprep.mubr.msk.f32.mxu0 %vm1094_vm0, %v567_v8  ;;  %v564_v13 = vld [vmem:[%s12494_s0 + $0x1120] sm:$0xff]  ;;  %v587_v14 = vld [vmem:[%s12494_s0 + $0x11d8] sm:$0xff] }
 0x254   :  { %v5741_v20 = vadd.f32 %v5740_v15, %v5739_v5  ;;  %2592 = vmatprep.mubr.f32.mxu1 %v549_v6  ;;  %v582_v6 = vld [vmem:[%s12494_s0 + $0x11b0] sm:$0xff] }
 0x255   :  { %4633 = vst.msk [vmem:[%s12496_s2 + $0x278] sm:$0xff] %vm4553_vm1, %v3670_v12  ;;  %v4967_v18 = vsel %vm4553_vm1, %v3670_v12, 0.0  ;;  %v5408_v23 = vmul.f32 %v3670_v12, %v3670_v12  ;;  %v9490_v24 = vpop.f32.mrb[168].mxu0  ;;  %v569_v12 = vld [vmem:[%s12494_s0 + $0x1148] sm:$0xff] }
 0x256   :  { %v4968_v25 = vadd.f32 %v4967_v18, %v4966_v11  ;;  %v2329_v27 = vpop.f32.mrb[160].mxu1  ;;  %v3696_v28 = vpop.f32.mrb[169].mxu0  ;;  %3958 = vmatmul.mubr.f32.gmra.mrb[18].mxu0 %v566_v17 }
 0x257   :  { %v5742_v29 = vsel %vm4553_vm1, %v5408_v23, 0.0  ;;  %v3675_v26 = vadd.f32 %v9402_v3, %v2329_v27  ;;  %v2331_v30 = vpop.f32.mrb[161].mxu1  ;;  %2593 = vmatmul.mubr.f32.gmra.mrb[160].mxu1 %v548_v21  ;;  %6273 = vmatprep.mubr.msk.f32.mxu0 %vm1094_vm0, %v571_v22  ;;  %v568_v27 = vld [vmem:[%s12494_s0 + $0x1140] sm:$0xff]  ;;  %v591_v28 = vld [vmem:[%s12494_s0 + $0x11f8] sm:$0xff] }
 0x258   :  { %v5743_v32 = vadd.f32 %v5742_v29, %v5741_v20  ;;  %2597 = vmatprep.mubr.f32.mxu1 %v553_v19  ;;  %v586_v19 = vld [vmem:[%s12494_s0 + $0x11d0] sm:$0xff] }
 0x259   :  { %4634 = vst.msk [vmem:[%s12496_s2 + $0x280] sm:$0xff] %vm4553_vm1, %v3675_v26  ;;  %v4969_v3 = vsel %vm4553_vm1, %v3675_v26, 0.0  ;;  %v5409_v36 = vmul.f32 %v3675_v26, %v3675_v26  ;;  %v9512_v37 = vpop.f32.mrb[170].mxu0  ;;  %v573_v26 = vld [vmem:[%s12494_s0 + $0x1168] sm:$0xff] }
 0x25a   :  { %v4970_v38 = vadd.f32 %v4969_v3, %v4968_v25  ;;  %v2334_v40 = vpop.f32.mrb[162].mxu1  ;;  %v3701_v41 = vpop.f32.mrb[171].mxu0  ;;  %3963 = vmatmul.mubr.f32.gmra.mrb[20].mxu0 %v570_v31 }
 0x25b   :  { %v5744_v42 = vsel %vm4553_vm1, %v5409_v36, 0.0  ;;  %v3680_v39 = vadd.f32 %v9424_v45, %v2334_v40  ;;  %v2336_v43 = vpop.f32.mrb[163].mxu1  ;;  %2598 = vmatmul.mubr.f32.gmra.mrb[162].mxu1 %v552_v34  ;;  %6274 = vmatprep.mubr.msk.f32.mxu0 %vm1094_vm0, %v575_v35  ;;  %v572_v40 = vld [vmem:[%s12494_s0 + $0x1160] sm:$0xff]  ;;  %v595_v41 = vld [vmem:[%s12494_s0 + $0x1218] sm:$0xff] }
 0x25c   :  { %v5745_v46 = vadd.f32 %v5744_v42, %v5743_v32  ;;  %2602 = vmatprep.mubr.f32.mxu1 %v557_v33  ;;  %v590_v33 = vld [vmem:[%s12494_s0 + $0x11f0] sm:$0xff] }
 0x25d   :  { %4635 = vst.msk [vmem:[%s12496_s2 + $0x288] sm:$0xff] %vm4553_vm1, %v3680_v39  ;;  %v4971_v45 = vsel %vm4553_vm1, %v3680_v39, 0.0  ;;  %v5410_v50 = vmul.f32 %v3680_v39, %v3680_v39  ;;  %v9534_v51 = vpop.f32.mrb[172].mxu0  ;;  %v577_v39 = vld [vmem:[%s12494_s0 + $0x1188] sm:$0xff] }
 0x25e   :  { %v4972_v52 = vadd.f32 %v4971_v45, %v4970_v38  ;;  %v2339_v54 = vpop.f32.mrb[164].mxu1  ;;  %v3706_v55 = vpop.f32.mrb[173].mxu0  ;;  %3968 = vmatmul.mubr.f32.gmra.mrb[22].mxu0 %v574_v44 }
 0x25f   :  { %v5746_v56 = vsel %vm4553_vm1, %v5410_v50, 0.0  ;;  %v3685_v53 = vadd.f32 %v9446_v59, %v2339_v54  ;;  %v2341_v57 = vpop.f32.mrb[165].mxu1  ;;  %2603 = vmatmul.mubr.f32.gmra.mrb[164].mxu1 %v556_v48  ;;  %6275 = vmatprep.mubr.msk.f32.mxu0 %vm1094_vm0, %v579_v49  ;;  %v576_v54 = vld [vmem:[%s12494_s0 + $0x1180] sm:$0xff]  ;;  %v599_v55 = vld [vmem:[%s12494_s0 + $0x1238] sm:$0xff] }
 0x260   :  { %v5747_v60 = vadd.f32 %v5746_v56, %v5745_v46  ;;  %2607 = vmatprep.mubr.f32.mxu1 %v561_v47  ;;  %v594_v47 = vld [vmem:[%s12494_s0 + $0x1210] sm:$0xff] }
 0x261   :  { %4636 = vst.msk [vmem:[%s12496_s2 + $0x290] sm:$0xff] %vm4553_vm1, %v3685_v53  ;;  %v4973_v59 = vsel %vm4553_vm1, %v3685_v53, 0.0  ;;  %v5411_v0 = vmul.f32 %v3685_v53, %v3685_v53  ;;  %v9556_v1 = vpop.f32.mrb[174].mxu0  ;;  %v581_v53 = vld [vmem:[%s12494_s0 + $0x11a8] sm:$0xff] }
 0x262   :  { %v4974_v2 = vadd.f32 %v4973_v59, %v4972_v52  ;;  %v2344_v5 = vpop.f32.mrb[166].mxu1  ;;  %v3711_v7 = vpop.f32.mrb[175].mxu0  ;;  %3973 = vmatmul.mubr.f32.gmra.mrb[24].mxu0 %v578_v58 }
 0x263   :  { %v5748_v8 = vsel %vm4553_vm1, %v5411_v0, 0.0  ;;  %v3690_v4 = vadd.f32 %v9468_v10, %v2344_v5  ;;  %v2346_v9 = vpop.f32.mrb[167].mxu1  ;;  %2608 = vmatmul.mubr.f32.gmra.mrb[166].mxu1 %v560_v62  ;;  %6276 = vmatprep.mubr.msk.f32.mxu0 %vm1094_vm0, %v583_v63  ;;  %v580_v5 = vld [vmem:[%s12494_s0 + $0x11a0] sm:$0xff]  ;;  %v603_v7 = vld [vmem:[%s12494_s0 + $0x1258] sm:$0xff] }
 0x264   :  { %v5749_v11 = vadd.f32 %v5748_v8, %v5747_v60  ;;  %2612 = vmatprep.mubr.f32.mxu1 %v565_v61  ;;  %v598_v61 = vld [vmem:[%s12494_s0 + $0x1230] sm:$0xff] }
 0x265   :  { %4637 = vst.msk [vmem:[%s12496_s2 + $0x298] sm:$0xff] %vm4553_vm1, %v3690_v4  ;;  %v4975_v10 = vsel %vm4553_vm1, %v3690_v4, 0.0  ;;  %v5412_v15 = vmul.f32 %v3690_v4, %v3690_v4  ;;  %v9578_v16 = vpop.f32.mrb[176].mxu0  ;;  %v585_v4 = vld [vmem:[%s12494_s0 + $0x11c8] sm:$0xff] }
 0x266   :  { %v4976_v17 = vadd.f32 %v4975_v10, %v4974_v2  ;;  %v2349_v20 = vpop.f32.mrb[168].mxu1  ;;  %v3716_v21 = vpop.f32.mrb[177].mxu0  ;;  %3978 = vmatmul.mubr.f32.gmra.mrb[26].mxu0 %v582_v6 }
 0x267   :  { %v5750_v22 = vsel %vm4553_vm1, %v5412_v15, 0.0  ;;  %v3695_v18 = vadd.f32 %v9490_v24, %v2349_v20  ;;  %v2351_v23 = vpop.f32.mrb[169].mxu1  ;;  %2613 = vmatmul.mubr.f32.gmra.mrb[168].mxu1 %v564_v13  ;;  %6277 = vmatprep.mubr.msk.f32.mxu0 %vm1094_vm0, %v587_v14  ;;  %v584_v20 = vld [vmem:[%s12494_s0 + $0x11c0] sm:$0xff]  ;;  %v607_v21 = vld [vmem:[%s12494_s0 + $0x1278] sm:$0xff] }
 0x268   :  { %v5751_v25 = vadd.f32 %v5750_v22, %v5749_v11  ;;  %2617 = vmatprep.mubr.f32.mxu1 %v569_v12  ;;  %v602_v12 = vld [vmem:[%s12494_s0 + $0x1250] sm:$0xff] }
 0x269   :  { %4638 = vst.msk [vmem:[%s12496_s2 + $0x2a0] sm:$0xff] %vm4553_vm1, %v3695_v18  ;;  %v4977_v24 = vsel %vm4553_vm1, %v3695_v18, 0.0  ;;  %v5413_v29 = vmul.f32 %v3695_v18, %v3695_v18  ;;  %v9600_v30 = vpop.f32.mrb[178].mxu0  ;;  %v589_v18 = vld [vmem:[%s12494_s0 + $0x11e8] sm:$0xff] }
 0x26a   :  { %v4978_v31 = vadd.f32 %v4977_v24, %v4976_v17  ;;  %v2354_v32 = vpop.f32.mrb[170].mxu1  ;;  %v3721_v34 = vpop.f32.mrb[179].mxu0  ;;  %3983 = vmatmul.mubr.f32.gmra.mrb[28].mxu0 %v586_v19 }
 0x26b   :  { %v5752_v35 = vsel %vm4553_vm1, %v5413_v29, 0.0  ;;  %v3700_v3 = vadd.f32 %v9512_v37, %v2354_v32  ;;  %v2356_v36 = vpop.f32.mrb[171].mxu1  ;;  %2618 = vmatmul.mubr.f32.gmra.mrb[170].mxu1 %v568_v27  ;;  %6278 = vmatprep.mubr.msk.f32.mxu0 %vm1094_vm0, %v591_v28  ;;  %v588_v32 = vld [vmem:[%s12494_s0 + $0x11e0] sm:$0xff]  ;;  %v611_v34 = vld [vmem:[%s12494_s0 + $0x1298] sm:$0xff] }
 0x26c   :  { %v5753_v38 = vadd.f32 %v5752_v35, %v5751_v25  ;;  %2622 = vmatprep.mubr.f32.mxu1 %v573_v26  ;;  %v606_v26 = vld [vmem:[%s12494_s0 + $0x1270] sm:$0xff] }
 0x26d   :  { %4639 = vst.msk [vmem:[%s12496_s2 + $0x2a8] sm:$0xff] %vm4553_vm1, %v3700_v3  ;;  %v4979_v37 = vsel %vm4553_vm1, %v3700_v3, 0.0  ;;  %v5414_v42 = vmul.f32 %v3700_v3, %v3700_v3  ;;  %v9622_v43 = vpop.f32.mrb[180].mxu0  ;;  %v593_v3 = vld [vmem:[%s12494_s0 + $0x1208] sm:$0xff] }
 0x26e   :  { %v4980_v44 = vadd.f32 %v4979_v37, %v4978_v31  ;;  %v2359_v46 = vpop.f32.mrb[172].mxu1  ;;  %v3726_v48 = vpop.f32.mrb[181].mxu0  ;;  %3988 = vmatmul.mubr.f32.gmra.mrb[30].mxu0 %v590_v33 }
 0x26f   :  { %v5754_v49 = vsel %vm4553_vm1, %v5414_v42, 0.0  ;;  %v3705_v45 = vadd.f32 %v9534_v51, %v2359_v46  ;;  %v2361_v50 = vpop.f32.mrb[173].mxu1  ;;  %2623 = vmatmul.mubr.f32.gmra.mrb[172].mxu1 %v572_v40  ;;  %6279 = vmatprep.mubr.msk.f32.mxu0 %vm1094_vm0, %v595_v41  ;;  %v592_v46 = vld [vmem:[%s12494_s0 + $0x1200] sm:$0xff]  ;;  %v615_v48 = vld [vmem:[%s12494_s0 + $0x12b8] sm:$0xff] }
 0x270   :  { %v5755_v52 = vadd.f32 %v5754_v49, %v5753_v38  ;;  %2627 = vmatprep.mubr.f32.mxu1 %v577_v39  ;;  %v610_v39 = vld [vmem:[%s12494_s0 + $0x1290] sm:$0xff] }
 0x271   :  { %4640 = vst.msk [vmem:[%s12496_s2 + $0x2b0] sm:$0xff] %vm4553_vm1, %v3705_v45  ;;  %v4981_v51 = vsel %vm4553_vm1, %v3705_v45, 0.0  ;;  %v5415_v56 = vmul.f32 %v3705_v45, %v3705_v45  ;;  %v9644_v57 = vpop.f32.mrb[182].mxu0  ;;  %v597_v45 = vld [vmem:[%s12494_s0 + $0x1228] sm:$0xff] }
 0x272   :  { %v4982_v58 = vadd.f32 %v4981_v51, %v4980_v44  ;;  %v2364_v60 = vpop.f32.mrb[174].mxu1  ;;  %v3731_v62 = vpop.f32.mrb[183].mxu0  ;;  %3993 = vmatmul.mubr.f32.gmra.mrb[32].mxu0 %v594_v47 }
 0x273   :  { %v5756_v63 = vsel %vm4553_vm1, %v5415_v56, 0.0  ;;  %v3710_v59 = vadd.f32 %v9556_v1, %v2364_v60  ;;  %v2366_v0 = vpop.f32.mrb[175].mxu1  ;;  %2628 = vmatmul.mubr.f32.gmra.mrb[174].mxu1 %v576_v54  ;;  %6280 = vmatprep.mubr.msk.f32.mxu0 %vm1094_vm0, %v599_v55  ;;  %v596_v60 = vld [vmem:[%s12494_s0 + $0x1220] sm:$0xff]  ;;  %v619_v62 = vld [vmem:[%s12494_s0 + $0x12d8] sm:$0xff] }
 0x274   :  { %v5757_v2 = vadd.f32 %v5756_v63, %v5755_v52  ;;  %2632 = vmatprep.mubr.f32.mxu1 %v581_v53  ;;  %v614_v53 = vld [vmem:[%s12494_s0 + $0x12b0] sm:$0xff] }
 0x275   :  { %4641 = vst.msk [vmem:[%s12496_s2 + $0x2b8] sm:$0xff] %vm4553_vm1, %v3710_v59  ;;  %v4983_v1 = vsel %vm4553_vm1, %v3710_v59, 0.0  ;;  %v5416_v8 = vmul.f32 %v3710_v59, %v3710_v59  ;;  %v9666_v9 = vpop.f32.mrb[184].mxu0  ;;  %v601_v59 = vld [vmem:[%s12494_s0 + $0x1248] sm:$0xff] }
 0x276   :  { %v4984_v6 = vadd.f32 %v4983_v1, %v4982_v58  ;;  %v2369_v11 = vpop.f32.mrb[176].mxu1  ;;  %v3736_v13 = vpop.f32.mrb[185].mxu0  ;;  %3998 = vmatmul.mubr.f32.gmra.mrb[34].mxu0 %v598_v61 }
 0x277   :  { %v5758_v14 = vsel %vm4553_vm1, %v5416_v8, 0.0  ;;  %v3715_v10 = vadd.f32 %v9578_v16, %v2369_v11  ;;  %v2371_v15 = vpop.f32.mrb[177].mxu1  ;;  %2633 = vmatmul.mubr.f32.gmra.mrb[176].mxu1 %v580_v5  ;;  %6281 = vmatprep.mubr.msk.f32.mxu0 %vm1094_vm0, %v603_v7  ;;  %v600_v11 = vld [vmem:[%s12494_s0 + $0x1240] sm:$0xff]  ;;  %v623_v13 = vld [vmem:[%s12494_s0 + $0x12f8] sm:$0xff] }
 0x278   :  { %v5759_v17 = vadd.f32 %v5758_v14, %v5757_v2  ;;  %2637 = vmatprep.mubr.f32.mxu1 %v585_v4  ;;  %v618_v4 = vld [vmem:[%s12494_s0 + $0x12d0] sm:$0xff] }
 0x279   :  { %4642 = vst.msk [vmem:[%s12496_s2 + $0x2c0] sm:$0xff] %vm4553_vm1, %v3715_v10  ;;  %v4985_v16 = vsel %vm4553_vm1, %v3715_v10, 0.0  ;;  %v5417_v22 = vmul.f32 %v3715_v10, %v3715_v10  ;;  %v9688_v23 = vpop.f32.mrb[186].mxu0  ;;  %v605_v10 = vld [vmem:[%s12494_s0 + $0x1268] sm:$0xff] }
 0x27a   :  { %v4986_v19 = vadd.f32 %v4985_v16, %v4984_v6  ;;  %v2374_v25 = vpop.f32.mrb[178].mxu1  ;;  %v3741_v27 = vpop.f32.mrb[187].mxu0  ;;  %4003 = vmatmul.mubr.f32.gmra.mrb[36].mxu0 %v602_v12 }
 0x27b   :  { %v5760_v28 = vsel %vm4553_vm1, %v5417_v22, 0.0  ;;  %v3720_v24 = vadd.f32 %v9600_v30, %v2374_v25  ;;  %v2376_v29 = vpop.f32.mrb[179].mxu1  ;;  %2638 = vmatmul.mubr.f32.gmra.mrb[178].mxu1 %v584_v20  ;;  %6282 = vmatprep.mubr.msk.f32.mxu0 %vm1094_vm0, %v607_v21  ;;  %v604_v25 = vld [vmem:[%s12494_s0 + $0x1260] sm:$0xff]  ;;  %v627_v27 = vld [vmem:[%s12494_s0 + $0x1318] sm:$0xff] }
 0x27c   :  { %v5761_v31 = vadd.f32 %v5760_v28, %v5759_v17  ;;  %2642 = vmatprep.mubr.f32.mxu1 %v589_v18  ;;  %v622_v18 = vld [vmem:[%s12494_s0 + $0x12f0] sm:$0xff] }
 0x27d   :  { %4643 = vst.msk [vmem:[%s12496_s2 + $0x2c8] sm:$0xff] %vm4553_vm1, %v3720_v24  ;;  %v4987_v30 = vsel %vm4553_vm1, %v3720_v24, 0.0  ;;  %v5418_v35 = vmul.f32 %v3720_v24, %v3720_v24  ;;  %v9710_v36 = vpop.f32.mrb[188].mxu0  ;;  %v609_v24 = vld [vmem:[%s12494_s0 + $0x1288] sm:$0xff] }
 0x27e   :  { %v4988_v33 = vadd.f32 %v4987_v30, %v4986_v19  ;;  %v2379_v38 = vpop.f32.mrb[180].mxu1  ;;  %v3746_v40 = vpop.f32.mrb[189].mxu0  ;;  %4008 = vmatmul.mubr.f32.gmra.mrb[38].mxu0 %v606_v26 }
 0x27f   :  { %v5762_v41 = vsel %vm4553_vm1, %v5418_v35, 0.0  ;;  %v3725_v37 = vadd.f32 %v9622_v43, %v2379_v38  ;;  %v2381_v42 = vpop.f32.mrb[181].mxu1  ;;  %2643 = vmatmul.mubr.f32.gmra.mrb[180].mxu1 %v588_v32  ;;  %6283 = vmatprep.mubr.msk.f32.mxu0 %vm1094_vm0, %v611_v34  ;;  %v608_v38 = vld [vmem:[%s12494_s0 + $0x1280] sm:$0xff]  ;;  %v631_v40 = vld [vmem:[%s12494_s0 + $0x1338] sm:$0xff] }
 0x280   :  { %v5763_v44 = vadd.f32 %v5762_v41, %v5761_v31  ;;  %2647 = vmatprep.mubr.f32.mxu1 %v593_v3  ;;  %v626_v3 = vld [vmem:[%s12494_s0 + $0x1310] sm:$0xff] }
 0x281   :  { %4644 = vst.msk [vmem:[%s12496_s2 + $0x2d0] sm:$0xff] %vm4553_vm1, %v3725_v37  ;;  %v4989_v43 = vsel %vm4553_vm1, %v3725_v37, 0.0  ;;  %v5419_v49 = vmul.f32 %v3725_v37, %v3725_v37  ;;  %v9732_v50 = vpop.f32.mrb[190].mxu0  ;;  %v613_v37 = vld [vmem:[%s12494_s0 + $0x12a8] sm:$0xff] }
 0x282   :  { %v4990_v47 = vadd.f32 %v4989_v43, %v4988_v33  ;;  %v2384_v52 = vpop.f32.mrb[182].mxu1  ;;  %v3751_v54 = vpop.f32.mrb[191].mxu0  ;;  %4013 = vmatmul.mubr.f32.gmra.mrb[40].mxu0 %v610_v39 }
 0x283   :  { %v5764_v55 = vsel %vm4553_vm1, %v5419_v49, 0.0  ;;  %v3730_v51 = vadd.f32 %v9644_v57, %v2384_v52  ;;  %v2386_v56 = vpop.f32.mrb[183].mxu1  ;;  %2648 = vmatmul.mubr.f32.gmra.mrb[182].mxu1 %v592_v46  ;;  %6284 = vmatprep.mubr.msk.f32.mxu0 %vm1094_vm0, %v615_v48  ;;  %v612_v52 = vld [vmem:[%s12494_s0 + $0x12a0] sm:$0xff]  ;;  %v635_v54 = vld [vmem:[%s12494_s0 + $0x1358] sm:$0xff] }
 0x284   :  { %v5765_v58 = vadd.f32 %v5764_v55, %v5763_v44  ;;  %2652 = vmatprep.mubr.f32.mxu1 %v597_v45  ;;  %v630_v45 = vld [vmem:[%s12494_s0 + $0x1330] sm:$0xff] }
 0x285   :  { %4645 = vst.msk [vmem:[%s12496_s2 + $0x2d8] sm:$0xff] %vm4553_vm1, %v3730_v51  ;;  %v4991_v57 = vsel %vm4553_vm1, %v3730_v51, 0.0  ;;  %v5420_v63 = vmul.f32 %v3730_v51, %v3730_v51  ;;  %v9754_v0 = vpop.f32.mrb[192].mxu0  ;;  %v617_v51 = vld [vmem:[%s12494_s0 + $0x12c8] sm:$0xff] }
 0x286   :  { %v4992_v61 = vadd.f32 %v4991_v57, %v4990_v47  ;;  %v2389_v2 = vpop.f32.mrb[184].mxu1  ;;  %v3756_v5 = vpop.f32.mrb[193].mxu0  ;;  %4018 = vmatmul.mubr.f32.gmra.mrb[42].mxu0 %v614_v53 }
 0x287   :  { %v5766_v7 = vsel %vm4553_vm1, %v5420_v63, 0.0  ;;  %v3735_v1 = vadd.f32 %v9666_v9, %v2389_v2  ;;  %v2391_v8 = vpop.f32.mrb[185].mxu1  ;;  %2653 = vmatmul.mubr.f32.gmra.mrb[184].mxu1 %v596_v60  ;;  %6285 = vmatprep.mubr.msk.f32.mxu0 %vm1094_vm0, %v619_v62  ;;  %v616_v2 = vld [vmem:[%s12494_s0 + $0x12c0] sm:$0xff]  ;;  %v639_v5 = vld [vmem:[%s12494_s0 + $0x1378] sm:$0xff] }
 0x288   :  { %v5767_v6 = vadd.f32 %v5766_v7, %v5765_v58  ;;  %2657 = vmatprep.mubr.f32.mxu1 %v601_v59  ;;  %v634_v59 = vld [vmem:[%s12494_s0 + $0x1350] sm:$0xff] }
 0x289   :  { %4646 = vst.msk [vmem:[%s12496_s2 + $0x2e0] sm:$0xff] %vm4553_vm1, %v3735_v1  ;;  %v4993_v9 = vsel %vm4553_vm1, %v3735_v1, 0.0  ;;  %v5421_v14 = vmul.f32 %v3735_v1, %v3735_v1  ;;  %v9776_v15 = vpop.f32.mrb[194].mxu0  ;;  %v621_v1 = vld [vmem:[%s12494_s0 + $0x12e8] sm:$0xff] }
 0x28a   :  { %v4994_v12 = vadd.f32 %v4993_v9, %v4992_v61  ;;  %v2394_v17 = vpop.f32.mrb[186].mxu1  ;;  %v3761_v20 = vpop.f32.mrb[195].mxu0  ;;  %4023 = vmatmul.mubr.f32.gmra.mrb[44].mxu0 %v618_v4 }
 0x28b   :  { %v5768_v21 = vsel %vm4553_vm1, %v5421_v14, 0.0  ;;  %v3740_v16 = vadd.f32 %v9688_v23, %v2394_v17  ;;  %v2396_v22 = vpop.f32.mrb[187].mxu1  ;;  %2658 = vmatmul.mubr.f32.gmra.mrb[186].mxu1 %v600_v11  ;;  %6286 = vmatprep.mubr.msk.f32.mxu0 %vm1094_vm0, %v623_v13  ;;  %v620_v17 = vld [vmem:[%s12494_s0 + $0x12e0] sm:$0xff]  ;;  %v643_v20 = vld [vmem:[%s12494_s0 + $0x1398] sm:$0xff] }
 0x28c   :  { %v5769_v19 = vadd.f32 %v5768_v21, %v5767_v6  ;;  %2662 = vmatprep.mubr.f32.mxu1 %v605_v10  ;;  %v638_v10 = vld [vmem:[%s12494_s0 + $0x1370] sm:$0xff] }
 0x28d   :  { %4647 = vst.msk [vmem:[%s12496_s2 + $0x2e8] sm:$0xff] %vm4553_vm1, %v3740_v16  ;;  %v4995_v23 = vsel %vm4553_vm1, %v3740_v16, 0.0  ;;  %v5422_v28 = vmul.f32 %v3740_v16, %v3740_v16  ;;  %v9798_v29 = vpop.f32.mrb[196].mxu0  ;;  %v625_v16 = vld [vmem:[%s12494_s0 + $0x1308] sm:$0xff] }
 0x28e   :  { %v4996_v26 = vadd.f32 %v4995_v23, %v4994_v12  ;;  %v2399_v31 = vpop.f32.mrb[188].mxu1  ;;  %v3766_v32 = vpop.f32.mrb[197].mxu0  ;;  %4028 = vmatmul.mubr.f32.gmra.mrb[46].mxu0 %v622_v18 }
 0x28f   :  { %v5770_v34 = vsel %vm4553_vm1, %v5422_v28, 0.0  ;;  %v3745_v30 = vadd.f32 %v9710_v36, %v2399_v31  ;;  %v2401_v35 = vpop.f32.mrb[189].mxu1  ;;  %2663 = vmatmul.mubr.f32.gmra.mrb[188].mxu1 %v604_v25  ;;  %6287 = vmatprep.mubr.msk.f32.mxu0 %vm1094_vm0, %v627_v27  ;;  %v624_v31 = vld [vmem:[%s12494_s0 + $0x1300] sm:$0xff]  ;;  %v647_v32 = vld [vmem:[%s12494_s0 + $0x13b8] sm:$0xff] }
 0x290   :  { %v5771_v33 = vadd.f32 %v5770_v34, %v5769_v19  ;;  %2667 = vmatprep.mubr.f32.mxu1 %v609_v24  ;;  %v642_v24 = vld [vmem:[%s12494_s0 + $0x1390] sm:$0xff] }
 0x291   :  { %4648 = vst.msk [vmem:[%s12496_s2 + $0x2f0] sm:$0xff] %vm4553_vm1, %v3745_v30  ;;  %v4997_v36 = vsel %vm4553_vm1, %v3745_v30, 0.0  ;;  %v5423_v41 = vmul.f32 %v3745_v30, %v3745_v30  ;;  %v9820_v42 = vpop.f32.mrb[198].mxu0  ;;  %v629_v30 = vld [vmem:[%s12494_s0 + $0x1328] sm:$0xff] }
 0x292   :  { %v4998_v39 = vadd.f32 %v4997_v36, %v4996_v26  ;;  %v2404_v44 = vpop.f32.mrb[190].mxu1  ;;  %v3771_v46 = vpop.f32.mrb[199].mxu0  ;;  %4033 = vmatmul.mubr.f32.gmra.mrb[48].mxu0 %v626_v3 }
 0x293   :  { %v5772_v48 = vsel %vm4553_vm1, %v5423_v41, 0.0  ;;  %v3750_v43 = vadd.f32 %v9732_v50, %v2404_v44  ;;  %v2406_v49 = vpop.f32.mrb[191].mxu1  ;;  %2668 = vmatmul.mubr.f32.gmra.mrb[190].mxu1 %v608_v38  ;;  %6288 = vmatprep.mubr.msk.f32.mxu0 %vm1094_vm0, %v631_v40  ;;  %v628_v44 = vld [vmem:[%s12494_s0 + $0x1320] sm:$0xff]  ;;  %v651_v46 = vld [vmem:[%s12494_s0 + $0x13d8] sm:$0xff] }
 0x294   :  { %v5773_v47 = vadd.f32 %v5772_v48, %v5771_v33  ;;  %2672 = vmatprep.mubr.f32.mxu1 %v613_v37  ;;  %v646_v37 = vld [vmem:[%s12494_s0 + $0x13b0] sm:$0xff] }
 0x295   :  { %4649 = vst.msk [vmem:[%s12496_s2 + $0x2f8] sm:$0xff] %vm4553_vm1, %v3750_v43  ;;  %v4999_v50 = vsel %vm4553_vm1, %v3750_v43, 0.0  ;;  %v5424_v55 = vmul.f32 %v3750_v43, %v3750_v43  ;;  %v9842_v56 = vpop.f32.mrb[200].mxu0  ;;  %v633_v43 = vld [vmem:[%s12494_s0 + $0x1348] sm:$0xff] }
 0x296   :  { %v5000_v53 = vadd.f32 %v4999_v50, %v4998_v39  ;;  %v2409_v58 = vpop.f32.mrb[192].mxu1  ;;  %v3776_v60 = vpop.f32.mrb[201].mxu0  ;;  %4038 = vmatmul.mubr.f32.gmra.mrb[50].mxu0 %v630_v45 }
 0x297   :  { %v5774_v62 = vsel %vm4553_vm1, %v5424_v55, 0.0  ;;  %v3755_v57 = vadd.f32 %v9754_v0, %v2409_v58  ;;  %v2411_v63 = vpop.f32.mrb[193].mxu1  ;;  %2673 = vmatmul.mubr.f32.gmra.mrb[192].mxu1 %v612_v52  ;;  %6289 = vmatprep.mubr.msk.f32.mxu0 %vm1094_vm0, %v635_v54  ;;  %v632_v58 = vld [vmem:[%s12494_s0 + $0x1340] sm:$0xff]  ;;  %v655_v60 = vld [vmem:[%s12494_s0 + $0x13f8] sm:$0xff] }
 0x298   :  { %v5775_v61 = vadd.f32 %v5774_v62, %v5773_v47  ;;  %2677 = vmatprep.mubr.f32.mxu1 %v617_v51  ;;  %v650_v51 = vld [vmem:[%s12494_s0 + $0x13d0] sm:$0xff] }
 0x299   :  { %4650 = vst.msk [vmem:[%s12496_s2 + $0x300] sm:$0xff] %vm4553_vm1, %v3755_v57  ;;  %v5001_v0 = vsel %vm4553_vm1, %v3755_v57, 0.0  ;;  %v5425_v7 = vmul.f32 %v3755_v57, %v3755_v57  ;;  %v9864_v8 = vpop.f32.mrb[202].mxu0  ;;  %v637_v57 = vld [vmem:[%s12494_s0 + $0x1368] sm:$0xff] }
 0x29a   :  { %v5002_v4 = vadd.f32 %v5001_v0, %v5000_v53  ;;  %v2414_v6 = vpop.f32.mrb[194].mxu1  ;;  %v3781_v11 = vpop.f32.mrb[203].mxu0  ;;  %4043 = vmatmul.mubr.f32.gmra.mrb[52].mxu0 %v634_v59 }
 0x29b   :  { %v5776_v13 = vsel %vm4553_vm1, %v5425_v7, 0.0  ;;  %v3760_v9 = vadd.f32 %v9776_v15, %v2414_v6  ;;  %v2416_v14 = vpop.f32.mrb[195].mxu1  ;;  %2678 = vmatmul.mubr.f32.gmra.mrb[194].mxu1 %v616_v2  ;;  %6290 = vmatprep.mubr.msk.f32.mxu0 %vm1094_vm0, %v639_v5  ;;  %v636_v6 = vld [vmem:[%s12494_s0 + $0x1360] sm:$0xff]  ;;  %v659_v11 = vld [vmem:[%s12494_s0 + $0x1418] sm:$0xff] }
 0x29c   :  { %v5777_v12 = vadd.f32 %v5776_v13, %v5775_v61  ;;  %2682 = vmatprep.mubr.f32.mxu1 %v621_v1  ;;  %v654_v1 = vld [vmem:[%s12494_s0 + $0x13f0] sm:$0xff] }
 0x29d   :  { %4651 = vst.msk [vmem:[%s12496_s2 + $0x308] sm:$0xff] %vm4553_vm1, %v3760_v9  ;;  %v5003_v15 = vsel %vm4553_vm1, %v3760_v9, 0.0  ;;  %v5426_v21 = vmul.f32 %v3760_v9, %v3760_v9  ;;  %v9886_v22 = vpop.f32.mrb[204].mxu0  ;;  %v641_v9 = vld [vmem:[%s12494_s0 + $0x1388] sm:$0xff] }
 0x29e   :  { %v5004_v18 = vadd.f32 %v5003_v15, %v5002_v4  ;;  %v2419_v19 = vpop.f32.mrb[196].mxu1  ;;  %v3786_v25 = vpop.f32.mrb[205].mxu0  ;;  %4048 = vmatmul.mubr.f32.gmra.mrb[54].mxu0 %v638_v10 }
 0x29f   :  { %v5778_v27 = vsel %vm4553_vm1, %v5426_v21, 0.0  ;;  %v3765_v23 = vadd.f32 %v9798_v29, %v2419_v19  ;;  %v2421_v28 = vpop.f32.mrb[197].mxu1  ;;  %2683 = vmatmul.mubr.f32.gmra.mrb[196].mxu1 %v620_v17  ;;  %6291 = vmatprep.mubr.msk.f32.mxu0 %vm1094_vm0, %v643_v20  ;;  %v640_v19 = vld [vmem:[%s12494_s0 + $0x1380] sm:$0xff]  ;;  %v663_v25 = vld [vmem:[%s12494_s0 + $0x1438] sm:$0xff] }
 0x2a0   :  { %v5779_v26 = vadd.f32 %v5778_v27, %v5777_v12  ;;  %2687 = vmatprep.mubr.f32.mxu1 %v625_v16  ;;  %v658_v16 = vld [vmem:[%s12494_s0 + $0x1410] sm:$0xff] }
 0x2a1   :  { %4652 = vst.msk [vmem:[%s12496_s2 + $0x310] sm:$0xff] %vm4553_vm1, %v3765_v23  ;;  %v5005_v29 = vsel %vm4553_vm1, %v3765_v23, 0.0  ;;  %v5427_v34 = vmul.f32 %v3765_v23, %v3765_v23  ;;  %v9908_v35 = vpop.f32.mrb[206].mxu0  ;;  %v645_v23 = vld [vmem:[%s12494_s0 + $0x13a8] sm:$0xff] }
 0x2a2   :  { %v5006_v3 = vadd.f32 %v5005_v29, %v5004_v18  ;;  %v2424_v33 = vpop.f32.mrb[198].mxu1  ;;  %v3791_v38 = vpop.f32.mrb[207].mxu0  ;;  %4053 = vmatmul.mubr.f32.gmra.mrb[56].mxu0 %v642_v24 }
 0x2a3   :  { %v5780_v40 = vsel %vm4553_vm1, %v5427_v34, 0.0  ;;  %v3770_v36 = vadd.f32 %v9820_v42, %v2424_v33  ;;  %v2426_v41 = vpop.f32.mrb[199].mxu1  ;;  %2688 = vmatmul.mubr.f32.gmra.mrb[198].mxu1 %v624_v31  ;;  %6292 = vmatprep.mubr.msk.f32.mxu0 %vm1094_vm0, %v647_v32  ;;  %v644_v33 = vld [vmem:[%s12494_s0 + $0x13a0] sm:$0xff]  ;;  %v667_v38 = vld [vmem:[%s12494_s0 + $0x1458] sm:$0xff] }
 0x2a4   :  { %v5781_v39 = vadd.f32 %v5780_v40, %v5779_v26  ;;  %2692 = vmatprep.mubr.f32.mxu1 %v629_v30  ;;  %v662_v30 = vld [vmem:[%s12494_s0 + $0x1430] sm:$0xff] }
 0x2a5   :  { %4653 = vst.msk [vmem:[%s12496_s2 + $0x318] sm:$0xff] %vm4553_vm1, %v3770_v36  ;;  %v5007_v42 = vsel %vm4553_vm1, %v3770_v36, 0.0  ;;  %v5428_v48 = vmul.f32 %v3770_v36, %v3770_v36  ;;  %v9930_v49 = vpop.f32.mrb[208].mxu0  ;;  %v649_v36 = vld [vmem:[%s12494_s0 + $0x13c8] sm:$0xff] }
 0x2a6   :  { %v5008_v45 = vadd.f32 %v5007_v42, %v5006_v3  ;;  %v2429_v47 = vpop.f32.mrb[200].mxu1  ;;  %v3796_v52 = vpop.f32.mrb[209].mxu0  ;;  %4058 = vmatmul.mubr.f32.gmra.mrb[58].mxu0 %v646_v37 }
 0x2a7   :  { %v5782_v54 = vsel %vm4553_vm1, %v5428_v48, 0.0  ;;  %v3775_v50 = vadd.f32 %v9842_v56, %v2429_v47  ;;  %v2431_v55 = vpop.f32.mrb[201].mxu1  ;;  %2693 = vmatmul.mubr.f32.gmra.mrb[200].mxu1 %v628_v44  ;;  %6293 = vmatprep.mubr.msk.f32.mxu0 %vm1094_vm0, %v651_v46  ;;  %v648_v47 = vld [vmem:[%s12494_s0 + $0x13c0] sm:$0xff]  ;;  %v671_v52 = vld [vmem:[%s12494_s0 + $0x1478] sm:$0xff] }
 0x2a8   :  { %v5783_v53 = vadd.f32 %v5782_v54, %v5781_v39  ;;  %2697 = vmatprep.mubr.f32.mxu1 %v633_v43  ;;  %v666_v43 = vld [vmem:[%s12494_s0 + $0x1450] sm:$0xff] }
 0x2a9   :  { %4654 = vst.msk [vmem:[%s12496_s2 + $0x320] sm:$0xff] %vm4553_vm1, %v3775_v50  ;;  %v5009_v56 = vsel %vm4553_vm1, %v3775_v50, 0.0  ;;  %v5429_v62 = vmul.f32 %v3775_v50, %v3775_v50  ;;  %v9952_v63 = vpop.f32.mrb[210].mxu0  ;;  %v653_v50 = vld [vmem:[%s12494_s0 + $0x13e8] sm:$0xff] }
 0x2aa   :  { %v5010_v59 = vadd.f32 %v5009_v56, %v5008_v45  ;;  %v2434_v61 = vpop.f32.mrb[202].mxu1  ;;  %v3801_v2 = vpop.f32.mrb[211].mxu0  ;;  %4063 = vmatmul.mubr.f32.gmra.mrb[60].mxu0 %v650_v51 }
 0x2ab   :  { %v5784_v5 = vsel %vm4553_vm1, %v5429_v62, 0.0  ;;  %v3780_v0 = vadd.f32 %v9864_v8, %v2434_v61  ;;  %v2436_v7 = vpop.f32.mrb[203].mxu1  ;;  %2698 = vmatmul.mubr.f32.gmra.mrb[202].mxu1 %v632_v58  ;;  %6294 = vmatprep.mubr.msk.f32.mxu0 %vm1094_vm0, %v655_v60  ;;  %v652_v61 = vld [vmem:[%s12494_s0 + $0x13e0] sm:$0xff]  ;;  %v675_v2 = vld [vmem:[%s12494_s0 + $0x1498] sm:$0xff] }
 0x2ac   :  { %v5785_v4 = vadd.f32 %v5784_v5, %v5783_v53  ;;  %2702 = vmatprep.mubr.f32.mxu1 %v637_v57  ;;  %v670_v57 = vld [vmem:[%s12494_s0 + $0x1470] sm:$0xff] }
 0x2ad   :  { %4655 = vst.msk [vmem:[%s12496_s2 + $0x328] sm:$0xff] %vm4553_vm1, %v3780_v0  ;;  %v5011_v8 = vsel %vm4553_vm1, %v3780_v0, 0.0  ;;  %v5430_v13 = vmul.f32 %v3780_v0, %v3780_v0  ;;  %v9974_v14 = vpop.f32.mrb[212].mxu0  ;;  %v657_v0 = vld [vmem:[%s12494_s0 + $0x1408] sm:$0xff] }
 0x2ae   :  { %v5012_v10 = vadd.f32 %v5011_v8, %v5010_v59  ;;  %v2439_v12 = vpop.f32.mrb[204].mxu1  ;;  %v3806_v17 = vpop.f32.mrb[213].mxu0  ;;  %4068 = vmatmul.mubr.f32.gmra.mrb[62].mxu0 %v654_v1 }
 0x2af   :  { %v5786_v20 = vsel %vm4553_vm1, %v5430_v13, 0.0  ;;  %v3785_v15 = vadd.f32 %v9886_v22, %v2439_v12  ;;  %v2441_v21 = vpop.f32.mrb[205].mxu1  ;;  %2703 = vmatmul.mubr.f32.gmra.mrb[204].mxu1 %v636_v6  ;;  %6295 = vmatprep.mubr.msk.f32.mxu0 %vm1094_vm0, %v659_v11  ;;  %v656_v12 = vld [vmem:[%s12494_s0 + $0x1400] sm:$0xff]  ;;  %v679_v17 = vld [vmem:[%s12494_s0 + $0x14b8] sm:$0xff] }
 0x2b0   :  { %v5787_v18 = vadd.f32 %v5786_v20, %v5785_v4  ;;  %2707 = vmatprep.mubr.f32.mxu1 %v641_v9  ;;  %v674_v9 = vld [vmem:[%s12494_s0 + $0x1490] sm:$0xff] }
 0x2b1   :  { %4656 = vst.msk [vmem:[%s12496_s2 + $0x330] sm:$0xff] %vm4553_vm1, %v3785_v15  ;;  %v5013_v22 = vsel %vm4553_vm1, %v3785_v15, 0.0  ;;  %v5431_v27 = vmul.f32 %v3785_v15, %v3785_v15  ;;  %v9996_v28 = vpop.f32.mrb[214].mxu0  ;;  %v661_v15 = vld [vmem:[%s12494_s0 + $0x1428] sm:$0xff] }
 0x2b2   :  { %v5014_v24 = vadd.f32 %v5013_v22, %v5012_v10  ;;  %v2444_v26 = vpop.f32.mrb[206].mxu1  ;;  %v3811_v31 = vpop.f32.mrb[215].mxu0  ;;  %4073 = vmatmul.mubr.f32.gmra.mrb[64].mxu0 %v658_v16 }
 0x2b3   :  { %v5788_v32 = vsel %vm4553_vm1, %v5431_v27, 0.0  ;;  %v3790_v29 = vadd.f32 %v9908_v35, %v2444_v26  ;;  %v2446_v34 = vpop.f32.mrb[207].mxu1  ;;  %2708 = vmatmul.mubr.f32.gmra.mrb[206].mxu1 %v640_v19  ;;  %6296 = vmatprep.mubr.msk.f32.mxu0 %vm1094_vm0, %v663_v25  ;;  %v660_v26 = vld [vmem:[%s12494_s0 + $0x1420] sm:$0xff]  ;;  %v683_v31 = vld [vmem:[%s12494_s0 + $0x14d8] sm:$0xff] }
 0x2b4   :  { %v5789_v3 = vadd.f32 %v5788_v32, %v5787_v18  ;;  %2712 = vmatprep.mubr.f32.mxu1 %v645_v23  ;;  %v678_v23 = vld [vmem:[%s12494_s0 + $0x14b0] sm:$0xff] }
 0x2b5   :  { %4657 = vst.msk [vmem:[%s12496_s2 + $0x338] sm:$0xff] %vm4553_vm1, %v3790_v29  ;;  %v5015_v35 = vsel %vm4553_vm1, %v3790_v29, 0.0  ;;  %v5432_v40 = vmul.f32 %v3790_v29, %v3790_v29  ;;  %v10018_v41 = vpop.f32.mrb[216].mxu0  ;;  %v665_v29 = vld [vmem:[%s12494_s0 + $0x1448] sm:$0xff] }
 0x2b6   :  { %v5016_v37 = vadd.f32 %v5015_v35, %v5014_v24  ;;  %v2449_v39 = vpop.f32.mrb[208].mxu1  ;;  %v3816_v44 = vpop.f32.mrb[217].mxu0  ;;  %4078 = vmatmul.mubr.f32.gmra.mrb[66].mxu0 %v662_v30 }
 0x2b7   :  { %v5790_v46 = vsel %vm4553_vm1, %v5432_v40, 0.0  ;;  %v3795_v42 = vadd.f32 %v9930_v49, %v2449_v39  ;;  %v2451_v48 = vpop.f32.mrb[209].mxu1  ;;  %2713 = vmatmul.mubr.f32.gmra.mrb[208].mxu1 %v644_v33  ;;  %6297 = vmatprep.mubr.msk.f32.mxu0 %vm1094_vm0, %v667_v38  ;;  %v664_v39 = vld [vmem:[%s12494_s0 + $0x1440] sm:$0xff]  ;;  %v687_v44 = vld [vmem:[%s12494_s0 + $0x14f8] sm:$0xff] }
 0x2b8   :  { %v5791_v45 = vadd.f32 %v5790_v46, %v5789_v3  ;;  %2717 = vmatprep.mubr.f32.mxu1 %v649_v36  ;;  %v682_v36 = vld [vmem:[%s12494_s0 + $0x14d0] sm:$0xff] }
 0x2b9   :  { %4658 = vst.msk [vmem:[%s12496_s2 + $0x340] sm:$0xff] %vm4553_vm1, %v3795_v42  ;;  %v5017_v49 = vsel %vm4553_vm1, %v3795_v42, 0.0  ;;  %v5433_v54 = vmul.f32 %v3795_v42, %v3795_v42  ;;  %v10040_v55 = vpop.f32.mrb[218].mxu0  ;;  %v669_v42 = vld [vmem:[%s12494_s0 + $0x1468] sm:$0xff] }
 0x2ba   :  { %v5018_v51 = vadd.f32 %v5017_v49, %v5016_v37  ;;  %v2454_v53 = vpop.f32.mrb[210].mxu1  ;;  %v3821_v58 = vpop.f32.mrb[219].mxu0  ;;  %4083 = vmatmul.mubr.f32.gmra.mrb[68].mxu0 %v666_v43 }
 0x2bb   :  { %v5792_v60 = vsel %vm4553_vm1, %v5433_v54, 0.0  ;;  %v3800_v56 = vadd.f32 %v9952_v63, %v2454_v53  ;;  %v2456_v62 = vpop.f32.mrb[211].mxu1  ;;  %2718 = vmatmul.mubr.f32.gmra.mrb[210].mxu1 %v648_v47  ;;  %6298 = vmatprep.mubr.msk.f32.mxu0 %vm1094_vm0, %v671_v52  ;;  %v668_v53 = vld [vmem:[%s12494_s0 + $0x1460] sm:$0xff]  ;;  %v691_v58 = vld [vmem:[%s12494_s0 + $0x1518] sm:$0xff] }
 0x2bc   :  { %v5793_v59 = vadd.f32 %v5792_v60, %v5791_v45  ;;  %2722 = vmatprep.mubr.f32.mxu1 %v653_v50  ;;  %v686_v50 = vld [vmem:[%s12494_s0 + $0x14f0] sm:$0xff] }
 0x2bd   :  { %4659 = vst.msk [vmem:[%s12496_s2 + $0x348] sm:$0xff] %vm4553_vm1, %v3800_v56  ;;  %v5019_v63 = vsel %vm4553_vm1, %v3800_v56, 0.0  ;;  %v5434_v5 = vmul.f32 %v3800_v56, %v3800_v56  ;;  %v10062_v7 = vpop.f32.mrb[220].mxu0  ;;  %v673_v56 = vld [vmem:[%s12494_s0 + $0x1488] sm:$0xff] }
 0x2be   :  { %v5020_v1 = vadd.f32 %v5019_v63, %v5018_v51  ;;  %v2459_v4 = vpop.f32.mrb[212].mxu1  ;;  %v3826_v6 = vpop.f32.mrb[221].mxu0  ;;  %4088 = vmatmul.mubr.f32.gmra.mrb[70].mxu0 %v670_v57 }
 0x2bf   :  { %v5794_v11 = vsel %vm4553_vm1, %v5434_v5, 0.0  ;;  %v3805_v8 = vadd.f32 %v9974_v14, %v2459_v4  ;;  %v2461_v13 = vpop.f32.mrb[213].mxu1  ;;  %2723 = vmatmul.mubr.f32.gmra.mrb[212].mxu1 %v652_v61  ;;  %6299 = vmatprep.mubr.msk.f32.mxu0 %vm1094_vm0, %v675_v2  ;;  %v672_v4 = vld [vmem:[%s12494_s0 + $0x1480] sm:$0xff]  ;;  %v695_v6 = vld [vmem:[%s12494_s0 + $0x1538] sm:$0xff] }
 0x2c0   :  { %v5795_v10 = vadd.f32 %v5794_v11, %v5793_v59  ;;  %2727 = vmatprep.mubr.f32.mxu1 %v657_v0  ;;  %v690_v0 = vld [vmem:[%s12494_s0 + $0x1510] sm:$0xff] }
 0x2c1   :  { %4660 = vst.msk [vmem:[%s12496_s2 + $0x350] sm:$0xff] %vm4553_vm1, %v3805_v8  ;;  %v5021_v14 = vsel %vm4553_vm1, %v3805_v8, 0.0  ;;  %v5435_v20 = vmul.f32 %v3805_v8, %v3805_v8  ;;  %v10084_v21 = vpop.f32.mrb[222].mxu0  ;;  %v677_v8 = vld [vmem:[%s12494_s0 + $0x14a8] sm:$0xff] }
 0x2c2   :  { %v5022_v16 = vadd.f32 %v5021_v14, %v5020_v1  ;;  %v2464_v18 = vpop.f32.mrb[214].mxu1  ;;  %v3831_v19 = vpop.f32.mrb[223].mxu0  ;;  %4093 = vmatmul.mubr.f32.gmra.mrb[72].mxu0 %v674_v9 }
 0x2c3   :  { %v5796_v25 = vsel %vm4553_vm1, %v5435_v20, 0.0  ;;  %v3810_v22 = vadd.f32 %v9996_v28, %v2464_v18  ;;  %v2466_v27 = vpop.f32.mrb[215].mxu1  ;;  %2728 = vmatmul.mubr.f32.gmra.mrb[214].mxu1 %v656_v12  ;;  %6300 = vmatprep.mubr.msk.f32.mxu0 %vm1094_vm0, %v679_v17  ;;  %v676_v18 = vld [vmem:[%s12494_s0 + $0x14a0] sm:$0xff]  ;;  %v699_v19 = vld [vmem:[%s12494_s0 + $0x1558] sm:$0xff] }
 0x2c4   :  { %v5797_v24 = vadd.f32 %v5796_v25, %v5795_v10  ;;  %2732 = vmatprep.mubr.f32.mxu1 %v661_v15  ;;  %v694_v15 = vld [vmem:[%s12494_s0 + $0x1530] sm:$0xff] }
 0x2c5   :  { %4661 = vst.msk [vmem:[%s12496_s2 + $0x358] sm:$0xff] %vm4553_vm1, %v3810_v22  ;;  %v5023_v28 = vsel %vm4553_vm1, %v3810_v22, 0.0  ;;  %v5436_v32 = vmul.f32 %v3810_v22, %v3810_v22  ;;  %v10106_v34 = vpop.f32.mrb[224].mxu0  ;;  %v681_v22 = vld [vmem:[%s12494_s0 + $0x14c8] sm:$0xff] }
 0x2c6   :  { %v5024_v30 = vadd.f32 %v5023_v28, %v5022_v16  ;;  %v2469_v3 = vpop.f32.mrb[216].mxu1  ;;  %v3836_v33 = vpop.f32.mrb[225].mxu0  ;;  %4098 = vmatmul.mubr.f32.gmra.mrb[74].mxu0 %v678_v23 }
 0x2c7   :  { %v5798_v38 = vsel %vm4553_vm1, %v5436_v32, 0.0  ;;  %v3815_v35 = vadd.f32 %v10018_v41, %v2469_v3  ;;  %v2471_v40 = vpop.f32.mrb[217].mxu1  ;;  %2733 = vmatmul.mubr.f32.gmra.mrb[216].mxu1 %v660_v26  ;;  %6301 = vmatprep.mubr.msk.f32.mxu0 %vm1094_vm0, %v683_v31  ;;  %v680_v3 = vld [vmem:[%s12494_s0 + $0x14c0] sm:$0xff]  ;;  %v703_v33 = vld [vmem:[%s12494_s0 + $0x1578] sm:$0xff] }
 0x2c8   :  { %v5799_v37 = vadd.f32 %v5798_v38, %v5797_v24  ;;  %2737 = vmatprep.mubr.f32.mxu1 %v665_v29  ;;  %v698_v29 = vld [vmem:[%s12494_s0 + $0x1550] sm:$0xff] }
 0x2c9   :  { %4662 = vst.msk [vmem:[%s12496_s2 + $0x360] sm:$0xff] %vm4553_vm1, %v3815_v35  ;;  %v5025_v41 = vsel %vm4553_vm1, %v3815_v35, 0.0  ;;  %v5437_v46 = vmul.f32 %v3815_v35, %v3815_v35  ;;  %v10128_v48 = vpop.f32.mrb[226].mxu0  ;;  %v685_v35 = vld [vmem:[%s12494_s0 + $0x14e8] sm:$0xff] }
 0x2ca   :  { %v5026_v43 = vadd.f32 %v5025_v41, %v5024_v30  ;;  %v2474_v45 = vpop.f32.mrb[218].mxu1  ;;  %v3841_v47 = vpop.f32.mrb[227].mxu0  ;;  %4103 = vmatmul.mubr.f32.gmra.mrb[76].mxu0 %v682_v36 }
 0x2cb   :  { %v5800_v52 = vsel %vm4553_vm1, %v5437_v46, 0.0  ;;  %v3820_v49 = vadd.f32 %v10040_v55, %v2474_v45  ;;  %v2476_v54 = vpop.f32.mrb[219].mxu1  ;;  %2738 = vmatmul.mubr.f32.gmra.mrb[218].mxu1 %v664_v39  ;;  %6302 = vmatprep.mubr.msk.f32.mxu0 %vm1094_vm0, %v687_v44  ;;  %v684_v45 = vld [vmem:[%s12494_s0 + $0x14e0] sm:$0xff]  ;;  %v707_v47 = vld [vmem:[%s12494_s0 + $0x1598] sm:$0xff] }
 0x2cc   :  { %v5801_v51 = vadd.f32 %v5800_v52, %v5799_v37  ;;  %2742 = vmatprep.mubr.f32.mxu1 %v669_v42  ;;  %v702_v42 = vld [vmem:[%s12494_s0 + $0x1570] sm:$0xff] }
 0x2cd   :  { %4663 = vst.msk [vmem:[%s12496_s2 + $0x368] sm:$0xff] %vm4553_vm1, %v3820_v49  ;;  %v5027_v55 = vsel %vm4553_vm1, %v3820_v49, 0.0  ;;  %v5438_v60 = vmul.f32 %v3820_v49, %v3820_v49  ;;  %v10150_v62 = vpop.f32.mrb[228].mxu0  ;;  %v689_v49 = vld [vmem:[%s12494_s0 + $0x1508] sm:$0xff] }
 0x2ce   :  { %v5028_v57 = vadd.f32 %v5027_v55, %v5026_v43  ;;  %v2479_v59 = vpop.f32.mrb[220].mxu1  ;;  %v3846_v61 = vpop.f32.mrb[229].mxu0  ;;  %4108 = vmatmul.mubr.f32.gmra.mrb[78].mxu0 %v686_v50 }
 0x2cf   :  { %v5802_v2 = vsel %vm4553_vm1, %v5438_v60, 0.0  ;;  %v3825_v63 = vadd.f32 %v10062_v7, %v2479_v59  ;;  %v2481_v5 = vpop.f32.mrb[221].mxu1  ;;  %2743 = vmatmul.mubr.f32.gmra.mrb[220].mxu1 %v668_v53  ;;  %6303 = vmatprep.mubr.msk.f32.mxu0 %vm1094_vm0, %v691_v58  ;;  %v688_v59 = vld [vmem:[%s12494_s0 + $0x1500] sm:$0xff]  ;;  %v711_v61 = vld [vmem:[%s12494_s0 + $0x15b8] sm:$0xff] }
 0x2d0   :  { %v5803_v1 = vadd.f32 %v5802_v2, %v5801_v51  ;;  %2747 = vmatprep.mubr.f32.mxu1 %v673_v56  ;;  %v706_v56 = vld [vmem:[%s12494_s0 + $0x1590] sm:$0xff] }
 0x2d1   :  { %4664 = vst.msk [vmem:[%s12496_s2 + $0x370] sm:$0xff] %vm4553_vm1, %v3825_v63  ;;  %v5029_v7 = vsel %vm4553_vm1, %v3825_v63, 0.0  ;;  %v5439_v11 = vmul.f32 %v3825_v63, %v3825_v63  ;;  %v10172_v13 = vpop.f32.mrb[230].mxu0  ;;  %v693_v63 = vld [vmem:[%s12494_s0 + $0x1528] sm:$0xff] }
 0x2d2   :  { %v5030_v9 = vadd.f32 %v5029_v7, %v5028_v57  ;;  %v2484_v10 = vpop.f32.mrb[222].mxu1  ;;  %v3851_v12 = vpop.f32.mrb[231].mxu0  ;;  %4113 = vmatmul.mubr.f32.gmra.mrb[80].mxu0 %v690_v0 }
 0x2d3   :  { %v5804_v17 = vsel %vm4553_vm1, %v5439_v11, 0.0  ;;  %v3830_v14 = vadd.f32 %v10084_v21, %v2484_v10  ;;  %v2486_v20 = vpop.f32.mrb[223].mxu1  ;;  %2748 = vmatmul.mubr.f32.gmra.mrb[222].mxu1 %v672_v4  ;;  %6304 = vmatprep.mubr.msk.f32.mxu0 %vm1094_vm0, %v695_v6  ;;  %v692_v10 = vld [vmem:[%s12494_s0 + $0x1520] sm:$0xff]  ;;  %v715_v12 = vld [vmem:[%s12494_s0 + $0x15d8] sm:$0xff] }
 0x2d4   :  { %v5805_v16 = vadd.f32 %v5804_v17, %v5803_v1  ;;  %2752 = vmatprep.mubr.f32.mxu1 %v677_v8  ;;  %v710_v8 = vld [vmem:[%s12494_s0 + $0x15b0] sm:$0xff] }
 0x2d5   :  { %4665 = vst.msk [vmem:[%s12496_s2 + $0x378] sm:$0xff] %vm4553_vm1, %v3830_v14  ;;  %v5031_v21 = vsel %vm4553_vm1, %v3830_v14, 0.0  ;;  %v5440_v25 = vmul.f32 %v3830_v14, %v3830_v14  ;;  %v10194_v27 = vpop.f32.mrb[232].mxu0  ;;  %v697_v14 = vld [vmem:[%s12494_s0 + $0x1548] sm:$0xff] }
 0x2d6   :  { %v5032_v23 = vadd.f32 %v5031_v21, %v5030_v9  ;;  %v2489_v24 = vpop.f32.mrb[224].mxu1  ;;  %v3856_v26 = vpop.f32.mrb[233].mxu0  ;;  %4118 = vmatmul.mubr.f32.gmra.mrb[82].mxu0 %v694_v15 }
 0x2d7   :  { %v5806_v31 = vsel %vm4553_vm1, %v5440_v25, 0.0  ;;  %v3835_v28 = vadd.f32 %v10106_v34, %v2489_v24  ;;  %v2491_v32 = vpop.f32.mrb[225].mxu1  ;;  %2753 = vmatmul.mubr.f32.gmra.mrb[224].mxu1 %v676_v18  ;;  %6305 = vmatprep.mubr.msk.f32.mxu0 %vm1094_vm0, %v699_v19  ;;  %v696_v24 = vld [vmem:[%s12494_s0 + $0x1540] sm:$0xff]  ;;  %v719_v26 = vld [vmem:[%s12494_s0 + $0x15f8] sm:$0xff] }
 0x2d8   :  { %v5807_v30 = vadd.f32 %v5806_v31, %v5805_v16  ;;  %2757 = vmatprep.mubr.f32.mxu1 %v681_v22  ;;  %v714_v22 = vld [vmem:[%s12494_s0 + $0x15d0] sm:$0xff] }
 0x2d9   :  { %4666 = vst.msk [vmem:[%s12496_s2 + $0x380] sm:$0xff] %vm4553_vm1, %v3835_v28  ;;  %v5033_v34 = vsel %vm4553_vm1, %v3835_v28, 0.0  ;;  %v5441_v38 = vmul.f32 %v3835_v28, %v3835_v28  ;;  %v10216_v40 = vpop.f32.mrb[234].mxu0  ;;  %v701_v28 = vld [vmem:[%s12494_s0 + $0x1568] sm:$0xff] }
 0x2da   :  { %v5034_v36 = vadd.f32 %v5033_v34, %v5032_v23  ;;  %v2494_v37 = vpop.f32.mrb[226].mxu1  ;;  %v3861_v39 = vpop.f32.mrb[235].mxu0  ;;  %4123 = vmatmul.mubr.f32.gmra.mrb[84].mxu0 %v698_v29 }
 0x2db   :  { %v5808_v44 = vsel %vm4553_vm1, %v5441_v38, 0.0  ;;  %v3840_v41 = vadd.f32 %v10128_v48, %v2494_v37  ;;  %v2496_v46 = vpop.f32.mrb[227].mxu1  ;;  %2758 = vmatmul.mubr.f32.gmra.mrb[226].mxu1 %v680_v3  ;;  %6306 = vmatprep.mubr.msk.f32.mxu0 %vm1094_vm0, %v703_v33  ;;  %v700_v37 = vld [vmem:[%s12494_s0 + $0x1560] sm:$0xff]  ;;  %v723_v39 = vld [vmem:[%s12494_s0 + $0x1618] sm:$0xff] }
 0x2dc   :  { %v5809_v43 = vadd.f32 %v5808_v44, %v5807_v30  ;;  %2762 = vmatprep.mubr.f32.mxu1 %v685_v35  ;;  %v718_v35 = vld [vmem:[%s12494_s0 + $0x15f0] sm:$0xff] }
 0x2dd   :  { %4667 = vst.msk [vmem:[%s12496_s2 + $0x388] sm:$0xff] %vm4553_vm1, %v3840_v41  ;;  %v5035_v48 = vsel %vm4553_vm1, %v3840_v41, 0.0  ;;  %v5442_v52 = vmul.f32 %v3840_v41, %v3840_v41  ;;  %v10238_v54 = vpop.f32.mrb[236].mxu0  ;;  %v705_v41 = vld [vmem:[%s12494_s0 + $0x1588] sm:$0xff] }
 0x2de   :  { %v5036_v50 = vadd.f32 %v5035_v48, %v5034_v36  ;;  %v2499_v51 = vpop.f32.mrb[228].mxu1  ;;  %v3866_v53 = vpop.f32.mrb[237].mxu0  ;;  %4128 = vmatmul.mubr.f32.gmra.mrb[86].mxu0 %v702_v42 }
 0x2df   :  { %v5810_v58 = vsel %vm4553_vm1, %v5442_v52, 0.0  ;;  %v3845_v55 = vadd.f32 %v10150_v62, %v2499_v51  ;;  %v2501_v60 = vpop.f32.mrb[229].mxu1  ;;  %2763 = vmatmul.mubr.f32.gmra.mrb[228].mxu1 %v684_v45  ;;  %6307 = vmatprep.mubr.msk.f32.mxu0 %vm1094_vm0, %v707_v47  ;;  %v704_v51 = vld [vmem:[%s12494_s0 + $0x1580] sm:$0xff]  ;;  %v727_v53 = vld [vmem:[%s12494_s0 + $0x1638] sm:$0xff] }
 0x2e0   :  { %v5811_v57 = vadd.f32 %v5810_v58, %v5809_v43  ;;  %2767 = vmatprep.mubr.f32.mxu1 %v689_v49  ;;  %v722_v49 = vld [vmem:[%s12494_s0 + $0x1610] sm:$0xff] }
 0x2e1   :  { %4668 = vst.msk [vmem:[%s12496_s2 + $0x390] sm:$0xff] %vm4553_vm1, %v3845_v55  ;;  %v5037_v62 = vsel %vm4553_vm1, %v3845_v55, 0.0  ;;  %v5443_v2 = vmul.f32 %v3845_v55, %v3845_v55  ;;  %v10260_v5 = vpop.f32.mrb[238].mxu0  ;;  %v709_v55 = vld [vmem:[%s12494_s0 + $0x15a8] sm:$0xff] }
 0x2e2   :  { %v5038_v0 = vadd.f32 %v5037_v62, %v5036_v50  ;;  %v2504_v1 = vpop.f32.mrb[230].mxu1  ;;  %v3871_v4 = vpop.f32.mrb[239].mxu0  ;;  %4133 = vmatmul.mubr.f32.gmra.mrb[88].mxu0 %v706_v56 }
 0x2e3   :  { %v5812_v6 = vsel %vm4553_vm1, %v5443_v2, 0.0  ;;  %v3850_v7 = vadd.f32 %v10172_v13, %v2504_v1  ;;  %v2506_v11 = vpop.f32.mrb[231].mxu1  ;;  %2768 = vmatmul.mubr.f32.gmra.mrb[230].mxu1 %v688_v59  ;;  %6308 = vmatprep.mubr.msk.f32.mxu0 %vm1094_vm0, %v711_v61  ;;  %v708_v1 = vld [vmem:[%s12494_s0 + $0x15a0] sm:$0xff]  ;;  %v731_v4 = vld [vmem:[%s12494_s0 + $0x1658] sm:$0xff] }
 0x2e4   :  { %v5813_v9 = vadd.f32 %v5812_v6, %v5811_v57  ;;  %2772 = vmatprep.mubr.f32.mxu1 %v693_v63  ;;  %v726_v63 = vld [vmem:[%s12494_s0 + $0x1630] sm:$0xff] }
 0x2e5   :  { %4669 = vst.msk [vmem:[%s12496_s2 + $0x398] sm:$0xff] %vm4553_vm1, %v3850_v7  ;;  %v5039_v13 = vsel %vm4553_vm1, %v3850_v7, 0.0  ;;  %v5444_v17 = vmul.f32 %v3850_v7, %v3850_v7  ;;  %v10282_v20 = vpop.f32.mrb[240].mxu0  ;;  %v713_v7 = vld [vmem:[%s12494_s0 + $0x15c8] sm:$0xff] }
 0x2e6   :  { %v5040_v15 = vadd.f32 %v5039_v13, %v5038_v0  ;;  %v2509_v16 = vpop.f32.mrb[232].mxu1  ;;  %v3876_v18 = vpop.f32.mrb[241].mxu0  ;;  %4138 = vmatmul.mubr.f32.gmra.mrb[90].mxu0 %v710_v8 }
 0x2e7   :  { %v5814_v19 = vsel %vm4553_vm1, %v5444_v17, 0.0  ;;  %v3855_v21 = vadd.f32 %v10194_v27, %v2509_v16  ;;  %v2511_v25 = vpop.f32.mrb[233].mxu1  ;;  %2773 = vmatmul.mubr.f32.gmra.mrb[232].mxu1 %v692_v10  ;;  %6309 = vmatprep.mubr.msk.f32.mxu0 %vm1094_vm0, %v715_v12  ;;  %v712_v16 = vld [vmem:[%s12494_s0 + $0x15c0] sm:$0xff]  ;;  %v735_v18 = vld [vmem:[%s12494_s0 + $0x1678] sm:$0xff] }
 0x2e8   :  { %v5815_v23 = vadd.f32 %v5814_v19, %v5813_v9  ;;  %2777 = vmatprep.mubr.f32.mxu1 %v697_v14  ;;  %v730_v14 = vld [vmem:[%s12494_s0 + $0x1650] sm:$0xff] }
 0x2e9   :  { %4670 = vst.msk [vmem:[%s12496_s2 + $0x3a0] sm:$0xff] %vm4553_vm1, %v3855_v21  ;;  %v5041_v27 = vsel %vm4553_vm1, %v3855_v21, 0.0  ;;  %v5445_v31 = vmul.f32 %v3855_v21, %v3855_v21  ;;  %v10304_v32 = vpop.f32.mrb[242].mxu0  ;;  %v717_v21 = vld [vmem:[%s12494_s0 + $0x15e8] sm:$0xff] }
 0x2ea   :  { %v5042_v29 = vadd.f32 %v5041_v27, %v5040_v15  ;;  %v2514_v30 = vpop.f32.mrb[234].mxu1  ;;  %v3881_v3 = vpop.f32.mrb[243].mxu0  ;;  %4143 = vmatmul.mubr.f32.gmra.mrb[92].mxu0 %v714_v22 }
 0x2eb   :  { %v5816_v33 = vsel %vm4553_vm1, %v5445_v31, 0.0  ;;  %v3860_v34 = vadd.f32 %v10216_v40, %v2514_v30  ;;  %v2516_v38 = vpop.f32.mrb[235].mxu1  ;;  %2778 = vmatmul.mubr.f32.gmra.mrb[234].mxu1 %v696_v24  ;;  %6310 = vmatprep.mubr.msk.f32.mxu0 %vm1094_vm0, %v719_v26  ;;  %v716_v30 = vld [vmem:[%s12494_s0 + $0x15e0] sm:$0xff]  ;;  %v739_v3 = vld [vmem:[%s12494_s0 + $0x1698] sm:$0xff] }
 0x2ec   :  { %v5817_v36 = vadd.f32 %v5816_v33, %v5815_v23  ;;  %2782 = vmatprep.mubr.f32.mxu1 %v701_v28  ;;  %v734_v28 = vld [vmem:[%s12494_s0 + $0x1670] sm:$0xff] }
 0x2ed   :  { %4671 = vst.msk [vmem:[%s12496_s2 + $0x3a8] sm:$0xff] %vm4553_vm1, %v3860_v34  ;;  %v5043_v40 = vsel %vm4553_vm1, %v3860_v34, 0.0  ;;  %v5446_v44 = vmul.f32 %v3860_v34, %v3860_v34  ;;  %v10326_v46 = vpop.f32.mrb[244].mxu0  ;;  %v721_v34 = vld [vmem:[%s12494_s0 + $0x1608] sm:$0xff] }
 0x2ee   :  { %v5044_v42 = vadd.f32 %v5043_v40, %v5042_v29  ;;  %v2519_v43 = vpop.f32.mrb[236].mxu1  ;;  %v3886_v45 = vpop.f32.mrb[245].mxu0  ;;  %4148 = vmatmul.mubr.f32.gmra.mrb[94].mxu0 %v718_v35 }
 0x2ef   :  { %v5818_v47 = vsel %vm4553_vm1, %v5446_v44, 0.0  ;;  %v3865_v48 = vadd.f32 %v10238_v54, %v2519_v43  ;;  %v2521_v52 = vpop.f32.mrb[237].mxu1  ;;  %2783 = vmatmul.mubr.f32.gmra.mrb[236].mxu1 %v700_v37  ;;  %6311 = vmatprep.mubr.msk.f32.mxu0 %vm1094_vm0, %v723_v39  ;;  %v720_v43 = vld [vmem:[%s12494_s0 + $0x1600] sm:$0xff]  ;;  %v743_v45 = vld [vmem:[%s12494_s0 + $0x16b8] sm:$0xff] }
 0x2f0   :  { %v5819_v50 = vadd.f32 %v5818_v47, %v5817_v36  ;;  %2787 = vmatprep.mubr.f32.mxu1 %v705_v41  ;;  %v738_v41 = vld [vmem:[%s12494_s0 + $0x1690] sm:$0xff] }
 0x2f1   :  { %4672 = vst.msk [vmem:[%s12496_s2 + $0x3b0] sm:$0xff] %vm4553_vm1, %v3865_v48  ;;  %v5045_v54 = vsel %vm4553_vm1, %v3865_v48, 0.0  ;;  %v5447_v58 = vmul.f32 %v3865_v48, %v3865_v48  ;;  %v10348_v60 = vpop.f32.mrb[246].mxu0  ;;  %v725_v48 = vld [vmem:[%s12494_s0 + $0x1628] sm:$0xff] }
 0x2f2   :  { %v5046_v56 = vadd.f32 %v5045_v54, %v5044_v42  ;;  %v2524_v57 = vpop.f32.mrb[238].mxu1  ;;  %v3891_v59 = vpop.f32.mrb[247].mxu0  ;;  %4153 = vmatmul.mubr.f32.gmra.mrb[96].mxu0 %v722_v49 }
 0x2f3   :  { %v5820_v61 = vsel %vm4553_vm1, %v5447_v58, 0.0  ;;  %v3870_v62 = vadd.f32 %v10260_v5, %v2524_v57  ;;  %v2526_v2 = vpop.f32.mrb[239].mxu1  ;;  %2788 = vmatmul.mubr.f32.gmra.mrb[238].mxu1 %v704_v51  ;;  %6312 = vmatprep.mubr.msk.f32.mxu0 %vm1094_vm0, %v727_v53  ;;  %v724_v57 = vld [vmem:[%s12494_s0 + $0x1620] sm:$0xff]  ;;  %v747_v59 = vld [vmem:[%s12494_s0 + $0x16d8] sm:$0xff] }
 0x2f4   :  { %v5821_v0 = vadd.f32 %v5820_v61, %v5819_v50  ;;  %2792 = vmatprep.mubr.f32.mxu1 %v709_v55  ;;  %v742_v55 = vld [vmem:[%s12494_s0 + $0x16b0] sm:$0xff] }
 0x2f5   :  { %4673 = vst.msk [vmem:[%s12496_s2 + $0x3b8] sm:$0xff] %vm4553_vm1, %v3870_v62  ;;  %v5047_v5 = vsel %vm4553_vm1, %v3870_v62, 0.0  ;;  %v5448_v6 = vmul.f32 %v3870_v62, %v3870_v62  ;;  %v10370_v11 = vpop.f32.mrb[248].mxu0  ;;  %v729_v62 = vld [vmem:[%s12494_s0 + $0x1648] sm:$0xff] }
 0x2f6   :  { %v5048_v8 = vadd.f32 %v5047_v5, %v5046_v56  ;;  %v2529_v9 = vpop.f32.mrb[240].mxu1  ;;  %v3896_v10 = vpop.f32.mrb[249].mxu0  ;;  %4158 = vmatmul.mubr.f32.gmra.mrb[98].mxu0 %v726_v63 }
 0x2f7   :  { %v5822_v12 = vsel %vm4553_vm1, %v5448_v6, 0.0  ;;  %v3875_v13 = vadd.f32 %v10282_v20, %v2529_v9  ;;  %v2531_v17 = vpop.f32.mrb[241].mxu1  ;;  %2793 = vmatmul.mubr.f32.gmra.mrb[240].mxu1 %v708_v1  ;;  %6313 = vmatprep.mubr.msk.f32.mxu0 %vm1094_vm0, %v731_v4  ;;  %v728_v9 = vld [vmem:[%s12494_s0 + $0x1640] sm:$0xff]  ;;  %v751_v10 = vld [vmem:[%s12494_s0 + $0x16f8] sm:$0xff] }
 0x2f8   :  { %v5823_v15 = vadd.f32 %v5822_v12, %v5821_v0  ;;  %2797 = vmatprep.mubr.f32.mxu1 %v713_v7  ;;  %v746_v7 = vld [vmem:[%s12494_s0 + $0x16d0] sm:$0xff] }
 0x2f9   :  { %4674 = vst.msk [vmem:[%s12496_s2 + $0x3c0] sm:$0xff] %vm4553_vm1, %v3875_v13  ;;  %v5049_v20 = vsel %vm4553_vm1, %v3875_v13, 0.0  ;;  %v5449_v19 = vmul.f32 %v3875_v13, %v3875_v13  ;;  %v10392_v25 = vpop.f32.mrb[250].mxu0  ;;  %v733_v13 = vld [vmem:[%s12494_s0 + $0x1668] sm:$0xff] }
 0x2fa   :  { %v5050_v22 = vadd.f32 %v5049_v20, %v5048_v8  ;;  %v2534_v23 = vpop.f32.mrb[242].mxu1  ;;  %v3901_v24 = vpop.f32.mrb[251].mxu0  ;;  %4163 = vmatmul.mubr.f32.gmra.mrb[100].mxu0 %v730_v14 }
 0x2fb   :  { %v5824_v26 = vsel %vm4553_vm1, %v5449_v19, 0.0  ;;  %v3880_v27 = vadd.f32 %v10304_v32, %v2534_v23  ;;  %v2536_v31 = vpop.f32.mrb[243].mxu1  ;;  %2798 = vmatmul.mubr.f32.gmra.mrb[242].mxu1 %v712_v16  ;;  %6314 = vmatprep.mubr.msk.f32.mxu0 %vm1094_vm0, %v735_v18  ;;  %v732_v23 = vld [vmem:[%s12494_s0 + $0x1660] sm:$0xff]  ;;  %v755_v24 = vld [vmem:[%s12494_s0 + $0x1718] sm:$0xff] }
 0x2fc   :  { %v5825_v29 = vadd.f32 %v5824_v26, %v5823_v15  ;;  %2802 = vmatprep.mubr.f32.mxu1 %v717_v21  ;;  %v750_v21 = vld [vmem:[%s12494_s0 + $0x16f0] sm:$0xff] }
 0x2fd   :  { %4675 = vst.msk [vmem:[%s12496_s2 + $0x3c8] sm:$0xff] %vm4553_vm1, %v3880_v27  ;;  %v5051_v32 = vsel %vm4553_vm1, %v3880_v27, 0.0  ;;  %v5450_v33 = vmul.f32 %v3880_v27, %v3880_v27  ;;  %v10414_v38 = vpop.f32.mrb[252].mxu0  ;;  %v737_v27 = vld [vmem:[%s12494_s0 + $0x1688] sm:$0xff] }
 0x2fe   :  { %v5052_v35 = vadd.f32 %v5051_v32, %v5050_v22  ;;  %v2539_v36 = vpop.f32.mrb[244].mxu1  ;;  %v3906_v37 = vpop.f32.mrb[253].mxu0  ;;  %4168 = vmatmul.mubr.f32.gmra.mrb[102].mxu0 %v734_v28 }
 0x2ff   :  { %v5826_v39 = vsel %vm4553_vm1, %v5450_v33, 0.0  ;;  %v3885_v40 = vadd.f32 %v10326_v46, %v2539_v36  ;;  %v2541_v44 = vpop.f32.mrb[245].mxu1  ;;  %2803 = vmatmul.mubr.f32.gmra.mrb[244].mxu1 %v716_v30  ;;  %6315 = vmatprep.mubr.msk.f32.mxu0 %vm1094_vm0, %v739_v3  ;;  %v736_v36 = vld [vmem:[%s12494_s0 + $0x1680] sm:$0xff]  ;;  %v759_v37 = vld [vmem:[%s12494_s0 + $0x1738] sm:$0xff] }
 0x300   :  { %v5827_v42 = vadd.f32 %v5826_v39, %v5825_v29  ;;  %2807 = vmatprep.mubr.f32.mxu1 %v721_v34  ;;  %v754_v34 = vld [vmem:[%s12494_s0 + $0x1710] sm:$0xff] }
 0x301   :  { %4676 = vst.msk [vmem:[%s12496_s2 + $0x3d0] sm:$0xff] %vm4553_vm1, %v3885_v40  ;;  %v5053_v46 = vsel %vm4553_vm1, %v3885_v40, 0.0  ;;  %v5451_v47 = vmul.f32 %v3885_v40, %v3885_v40  ;;  %v10436_v52 = vpop.f32.mrb[254].mxu0  ;;  %v741_v40 = vld [vmem:[%s12494_s0 + $0x16a8] sm:$0xff] }
 0x302   :  { %v5054_v49 = vadd.f32 %v5053_v46, %v5052_v35  ;;  %v2544_v50 = vpop.f32.mrb[246].mxu1  ;;  %v3911_v51 = vpop.f32.mrb[255].mxu0  ;;  %4173 = vmatmul.mubr.f32.gmra.mrb[104].mxu0 %v738_v41 }
 0x303   :  { %v5828_v53 = vsel %vm4553_vm1, %v5451_v47, 0.0  ;;  %v3890_v54 = vadd.f32 %v10348_v60, %v2544_v50  ;;  %v2546_v58 = vpop.f32.mrb[247].mxu1  ;;  %2808 = vmatmul.mubr.f32.gmra.mrb[246].mxu1 %v720_v43  ;;  %6316 = vmatprep.mubr.msk.f32.mxu0 %vm1094_vm0, %v743_v45  ;;  %v740_v50 = vld [vmem:[%s12494_s0 + $0x16a0] sm:$0xff]  ;;  %v763_v51 = vld [vmem:[%s12494_s0 + $0x1758] sm:$0xff] }
 0x304   :  { %v5829_v56 = vadd.f32 %v5828_v53, %v5827_v42  ;;  %2812 = vmatprep.mubr.f32.mxu1 %v725_v48  ;;  %v758_v48 = vld [vmem:[%s12494_s0 + $0x1730] sm:$0xff] }
 0x305   :  { %4677 = vst.msk [vmem:[%s12496_s2 + $0x3d8] sm:$0xff] %vm4553_vm1, %v3890_v54  ;;  %v5055_v60 = vsel %vm4553_vm1, %v3890_v54, 0.0  ;;  %v5452_v61 = vmul.f32 %v3890_v54, %v3890_v54  ;;  %v10458_v2 = vpop.f32.mrb[0].mxu0  ;;  %v745_v54 = vld [vmem:[%s12494_s0 + $0x16c8] sm:$0xff] }
 0x306   :  { %v5056_v63 = vadd.f32 %v5055_v60, %v5054_v49  ;;  %v2549_v0 = vpop.f32.mrb[248].mxu1  ;;  %v3916_v1 = vpop.f32.mrb[1].mxu0  ;;  %4178 = vmatmul.mubr.f32.gmra.mrb[106].mxu0 %v742_v55 }
 0x307   :  { %v5830_v4 = vsel %vm4553_vm1, %v5452_v61, 0.0  ;;  %v3895_v5 = vadd.f32 %v10370_v11, %v2549_v0  ;;  %v2551_v6 = vpop.f32.mrb[249].mxu1  ;;  %2813 = vmatmul.mubr.f32.gmra.mrb[248].mxu1 %v724_v57  ;;  %6317 = vmatprep.mubr.msk.f32.mxu0 %vm1094_vm0, %v747_v59  ;;  %v744_v0 = vld [vmem:[%s12494_s0 + $0x16c0] sm:$0xff]  ;;  %v767_v1 = vld [vmem:[%s12494_s0 + $0x1778] sm:$0xff] }
 0x308   :  { %v5831_v8 = vadd.f32 %v5830_v4, %v5829_v56  ;;  %2817 = vmatprep.mubr.f32.mxu1 %v729_v62  ;;  %v762_v62 = vld [vmem:[%s12494_s0 + $0x1750] sm:$0xff] }
 0x309   :  { %4678 = vst.msk [vmem:[%s12496_s2 + $0x3e0] sm:$0xff] %vm4553_vm1, %v3895_v5  ;;  %v5057_v11 = vsel %vm4553_vm1, %v3895_v5, 0.0  ;;  %v5453_v12 = vmul.f32 %v3895_v5, %v3895_v5  ;;  %v10480_v17 = vpop.f32.mrb[2].mxu0  ;;  %v749_v5 = vld [vmem:[%s12494_s0 + $0x16e8] sm:$0xff] }
 0x30a   :  { %v5058_v14 = vadd.f32 %v5057_v11, %v5056_v63  ;;  %v2554_v15 = vpop.f32.mrb[250].mxu1  ;;  %v3921_v16 = vpop.f32.mrb[3].mxu0  ;;  %4183 = vmatmul.mubr.f32.gmra.mrb[108].mxu0 %v746_v7 }
 0x30b   :  { %v5832_v18 = vsel %vm4553_vm1, %v5453_v12, 0.0  ;;  %v3900_v20 = vadd.f32 %v10392_v25, %v2554_v15  ;;  %v2556_v19 = vpop.f32.mrb[251].mxu1  ;;  %2818 = vmatmul.mubr.f32.gmra.mrb[250].mxu1 %v728_v9  ;;  %6318 = vmatprep.mubr.msk.f32.mxu0 %vm1094_vm0, %v751_v10  ;;  %v748_v15 = vld [vmem:[%s12494_s0 + $0x16e0] sm:$0xff]  ;;  %v771_v16 = vld [vmem:[%s12494_s0 + $0x1798] sm:$0xff] }
 0x30c   :  { %v5833_v22 = vadd.f32 %v5832_v18, %v5831_v8  ;;  %2822 = vmatprep.mubr.f32.mxu1 %v733_v13  ;;  %v766_v13 = vld [vmem:[%s12494_s0 + $0x1770] sm:$0xff] }
 0x30d   :  { %4679 = vst.msk [vmem:[%s12496_s2 + $0x3e8] sm:$0xff] %vm4553_vm1, %v3900_v20  ;;  %v5059_v25 = vsel %vm4553_vm1, %v3900_v20, 0.0  ;;  %v5454_v26 = vmul.f32 %v3900_v20, %v3900_v20  ;;  %v10502_v31 = vpop.f32.mrb[4].mxu0  ;;  %v753_v20 = vld [vmem:[%s12494_s0 + $0x1708] sm:$0xff] }
 0x30e   :  { %v5060_v28 = vadd.f32 %v5059_v25, %v5058_v14  ;;  %v2559_v29 = vpop.f32.mrb[252].mxu1  ;;  %v3926_v30 = vpop.f32.mrb[5].mxu0  ;;  %4188 = vmatmul.mubr.f32.gmra.mrb[110].mxu0 %v750_v21 }
 0x30f   :  { %v5834_v3 = vsel %vm4553_vm1, %v5454_v26, 0.0  ;;  %v3905_v32 = vadd.f32 %v10414_v38, %v2559_v29  ;;  %v2561_v33 = vpop.f32.mrb[253].mxu1  ;;  %2823 = vmatmul.mubr.f32.gmra.mrb[252].mxu1 %v732_v23  ;;  %6319 = vmatprep.mubr.msk.f32.mxu0 %vm1094_vm0, %v755_v24  ;;  %v752_v29 = vld [vmem:[%s12494_s0 + $0x1700] sm:$0xff]  ;;  %v775_v30 = vld [vmem:[%s12494_s0 + $0x17b8] sm:$0xff] }
 0x310   :  { %v5835_v35 = vadd.f32 %v5834_v3, %v5833_v22  ;;  %2827 = vmatprep.mubr.f32.mxu1 %v737_v27  ;;  %v770_v27 = vld [vmem:[%s12494_s0 + $0x1790] sm:$0xff] }
 0x311   :  { %4680 = vst.msk [vmem:[%s12496_s2 + $0x3f0] sm:$0xff] %vm4553_vm1, %v3905_v32  ;;  %v5061_v38 = vsel %vm4553_vm1, %v3905_v32, 0.0  ;;  %v5455_v39 = vmul.f32 %v3905_v32, %v3905_v32  ;;  %v10524_v44 = vpop.f32.mrb[6].mxu0  ;;  %v757_v32 = vld [vmem:[%s12494_s0 + $0x1728] sm:$0xff] }
 0x312   :  { %v5062_v41 = vadd.f32 %v5061_v38, %v5060_v28  ;;  %v2564_v42 = vpop.f32.mrb[254].mxu1  ;;  %v3931_v43 = vpop.f32.mrb[7].mxu0  ;;  %4193 = vmatmul.mubr.f32.gmra.mrb[112].mxu0 %v754_v34 }
 0x313   :  { %v5836_v45 = vsel %vm4553_vm1, %v5455_v39, 0.0  ;;  %v3910_v46 = vadd.f32 %v10436_v52, %v2564_v42  ;;  %v2566_v47 = vpop.f32.mrb[255].mxu1  ;;  %2828 = vmatmul.mubr.f32.gmra.mrb[254].mxu1 %v736_v36  ;;  %6320 = vmatprep.mubr.msk.f32.mxu0 %vm1094_vm0, %v759_v37  ;;  %v756_v42 = vld [vmem:[%s12494_s0 + $0x1720] sm:$0xff]  ;;  %v779_v43 = vld [vmem:[%s12494_s0 + $0x17d8] sm:$0xff] }
 0x314   :  { %v5837_v49 = vadd.f32 %v5836_v45, %v5835_v35  ;;  %2832 = vmatprep.mubr.f32.mxu1 %v741_v40  ;;  %v774_v40 = vld [vmem:[%s12494_s0 + $0x17b0] sm:$0xff] }
 0x315   :  { %4681 = vst.msk [vmem:[%s12496_s2 + $0x3f8] sm:$0xff] %vm4553_vm1, %v3910_v46  ;;  %v5063_v52 = vsel %vm4553_vm1, %v3910_v46, 0.0  ;;  %v5456_v53 = vmul.f32 %v3910_v46, %v3910_v46  ;;  %v10546_v58 = vpop.f32.mrb[8].mxu0  ;;  %v761_v46 = vld [vmem:[%s12494_s0 + $0x1748] sm:$0xff] }
 0x316   :  { %v5064_v55 = vadd.f32 %v5063_v52, %v5062_v41  ;;  %v2569_v56 = vpop.f32.mrb[150].mxu1  ;;  %v3936_v57 = vpop.f32.mrb[9].mxu0  ;;  %4198 = vmatmul.mubr.f32.gmra.mrb[114].mxu0 %v758_v48 }
 0x317   :  { %v5838_v59 = vsel %vm4553_vm1, %v5456_v53, 0.0  ;;  %v3915_v60 = vadd.f32 %v10458_v2, %v2569_v56  ;;  %v2571_v61 = vpop.f32.mrb[151].mxu1  ;;  %2833 = vmatmul.mubr.f32.gmra.mrb[150].mxu1 %v740_v50  ;;  %6321 = vmatprep.mubr.msk.f32.mxu0 %vm1094_vm0, %v763_v51  ;;  %v760_v56 = vld [vmem:[%s12494_s0 + $0x1740] sm:$0xff]  ;;  %v783_v57 = vld [vmem:[%s12494_s0 + $0x17f8] sm:$0xff] }
 0x318   :  { %v5839_v63 = vadd.f32 %v5838_v59, %v5837_v49  ;;  %2837 = vmatprep.mubr.f32.mxu1 %v745_v54  ;;  %v778_v54 = vld [vmem:[%s12494_s0 + $0x17d0] sm:$0xff] }
 0x319   :  { %4682 = vst.msk [vmem:[%s12496_s2 + $0x400] sm:$0xff] %vm4553_vm1, %v3915_v60  ;;  %v5065_v2 = vsel %vm4553_vm1, %v3915_v60, 0.0  ;;  %v5457_v4 = vmul.f32 %v3915_v60, %v3915_v60  ;;  %v10568_v6 = vpop.f32.mrb[10].mxu0  ;;  %v765_v60 = vld [vmem:[%s12494_s0 + $0x1768] sm:$0xff] }
 0x31a   :  { %v5066_v7 = vadd.f32 %v5065_v2, %v5064_v55  ;;  %v2574_v8 = vpop.f32.mrb[152].mxu1  ;;  %v3941_v9 = vpop.f32.mrb[11].mxu0  ;;  %4203 = vmatmul.mubr.f32.gmra.mrb[116].mxu0 %v762_v62 }
 0x31b   :  { %v5840_v10 = vsel %vm4553_vm1, %v5457_v4, 0.0  ;;  %v3920_v11 = vadd.f32 %v10480_v17, %v2574_v8  ;;  %v2576_v12 = vpop.f32.mrb[153].mxu1  ;;  %2838 = vmatmul.mubr.f32.gmra.mrb[152].mxu1 %v744_v0  ;;  %6322 = vmatprep.mubr.msk.f32.mxu0 %vm1094_vm0, %v767_v1  ;;  %v764_v8 = vld [vmem:[%s12494_s0 + $0x1760] sm:$0xff]  ;;  %v787_v9 = vld [vmem:[%s12494_s0 + $0x1818] sm:$0xff] }
 0x31c   :  { %v5841_v14 = vadd.f32 %v5840_v10, %v5839_v63  ;;  %2842 = vmatprep.mubr.f32.mxu1 %v749_v5  ;;  %v782_v5 = vld [vmem:[%s12494_s0 + $0x17f0] sm:$0xff] }
 0x31d   :  { %4683 = vst.msk [vmem:[%s12496_s2 + $0x408] sm:$0xff] %vm4553_vm1, %v3920_v11  ;;  %v5067_v17 = vsel %vm4553_vm1, %v3920_v11, 0.0  ;;  %v5458_v18 = vmul.f32 %v3920_v11, %v3920_v11  ;;  %v10590_v19 = vpop.f32.mrb[12].mxu0  ;;  %v769_v11 = vld [vmem:[%s12494_s0 + $0x1788] sm:$0xff] }
 0x31e   :  { %v5068_v21 = vadd.f32 %v5067_v17, %v5066_v7  ;;  %v2579_v22 = vpop.f32.mrb[154].mxu1  ;;  %v3946_v23 = vpop.f32.mrb[13].mxu0  ;;  %4208 = vmatmul.mubr.f32.gmra.mrb[118].mxu0 %v766_v13 }
 0x31f   :  { %v5842_v24 = vsel %vm4553_vm1, %v5458_v18, 0.0  ;;  %v3925_v25 = vadd.f32 %v10502_v31, %v2579_v22  ;;  %v2581_v26 = vpop.f32.mrb[155].mxu1  ;;  %2843 = vmatmul.mubr.f32.gmra.mrb[154].mxu1 %v748_v15  ;;  %6323 = vmatprep.mubr.msk.f32.mxu0 %vm1094_vm0, %v771_v16  ;;  %v768_v22 = vld [vmem:[%s12494_s0 + $0x1780] sm:$0xff]  ;;  %v791_v23 = vld [vmem:[%s12494_s0 + $0x1838] sm:$0xff] }
 0x320   :  { %v5843_v28 = vadd.f32 %v5842_v24, %v5841_v14  ;;  %2847 = vmatprep.mubr.f32.mxu1 %v753_v20  ;;  %v786_v20 = vld [vmem:[%s12494_s0 + $0x1810] sm:$0xff] }
 0x321   :  { %4684 = vst.msk [vmem:[%s12496_s2 + $0x410] sm:$0xff] %vm4553_vm1, %v3925_v25  ;;  %v5069_v31 = vsel %vm4553_vm1, %v3925_v25, 0.0  ;;  %v5459_v3 = vmul.f32 %v3925_v25, %v3925_v25  ;;  %v10612_v33 = vpop.f32.mrb[14].mxu0  ;;  %v773_v25 = vld [vmem:[%s12494_s0 + $0x17a8] sm:$0xff] }
 0x322   :  { %v5070_v34 = vadd.f32 %v5069_v31, %v5068_v21  ;;  %v2584_v35 = vpop.f32.mrb[156].mxu1  ;;  %v3951_v36 = vpop.f32.mrb[15].mxu0  ;;  %4213 = vmatmul.mubr.f32.gmra.mrb[120].mxu0 %v770_v27 }
 0x323   :  { %v5844_v37 = vsel %vm4553_vm1, %v5459_v3, 0.0  ;;  %v3930_v38 = vadd.f32 %v10524_v44, %v2584_v35  ;;  %v2586_v39 = vpop.f32.mrb[157].mxu1  ;;  %2848 = vmatmul.mubr.f32.gmra.mrb[156].mxu1 %v752_v29  ;;  %6324 = vmatprep.mubr.msk.f32.mxu0 %vm1094_vm0, %v775_v30  ;;  %v772_v35 = vld [vmem:[%s12494_s0 + $0x17a0] sm:$0xff]  ;;  %v795_v36 = vld [vmem:[%s12494_s0 + $0x1858] sm:$0xff] }
 0x324   :  { %v5845_v41 = vadd.f32 %v5844_v37, %v5843_v28  ;;  %2852 = vmatprep.mubr.f32.mxu1 %v757_v32  ;;  %v790_v32 = vld [vmem:[%s12494_s0 + $0x1830] sm:$0xff] }
 0x325   :  { %4685 = vst.msk [vmem:[%s12496_s2 + $0x418] sm:$0xff] %vm4553_vm1, %v3930_v38  ;;  %v5071_v44 = vsel %vm4553_vm1, %v3930_v38, 0.0  ;;  %v5460_v45 = vmul.f32 %v3930_v38, %v3930_v38  ;;  %v10634_v47 = vpop.f32.mrb[16].mxu0  ;;  %v777_v38 = vld [vmem:[%s12494_s0 + $0x17c8] sm:$0xff] }
 0x326   :  { %v5072_v48 = vadd.f32 %v5071_v44, %v5070_v34  ;;  %v2589_v49 = vpop.f32.mrb[158].mxu1  ;;  %v3956_v50 = vpop.f32.mrb[17].mxu0  ;;  %4218 = vmatmul.mubr.f32.gmra.mrb[122].mxu0 %v774_v40 }
 0x327   :  { %v5846_v51 = vsel %vm4553_vm1, %v5460_v45, 0.0  ;;  %v3935_v52 = vadd.f32 %v10546_v58, %v2589_v49  ;;  %v2591_v53 = vpop.f32.mrb[159].mxu1  ;;  %2853 = vmatmul.mubr.f32.gmra.mrb[158].mxu1 %v756_v42  ;;  %6325 = vmatprep.mubr.msk.f32.mxu0 %vm1094_vm0, %v779_v43  ;;  %v776_v49 = vld [vmem:[%s12494_s0 + $0x17c0] sm:$0xff]  ;;  %v799_v50 = vld [vmem:[%s12494_s0 + $0x1878] sm:$0xff] }
 0x328   :  { %v5847_v55 = vadd.f32 %v5846_v51, %v5845_v41  ;;  %2857 = vmatprep.mubr.f32.mxu1 %v761_v46  ;;  %v794_v46 = vld [vmem:[%s12494_s0 + $0x1850] sm:$0xff] }
 0x329   :  { %4686 = vst.msk [vmem:[%s12496_s2 + $0x420] sm:$0xff] %vm4553_vm1, %v3935_v52  ;;  %v5073_v58 = vsel %vm4553_vm1, %v3935_v52, 0.0  ;;  %v5461_v59 = vmul.f32 %v3935_v52, %v3935_v52  ;;  %v10656_v61 = vpop.f32.mrb[18].mxu0  ;;  %v781_v52 = vld [vmem:[%s12494_s0 + $0x17e8] sm:$0xff] }
 0x32a   :  { %v5074_v62 = vadd.f32 %v5073_v58, %v5072_v48  ;;  %v2594_v63 = vpop.f32.mrb[160].mxu1  ;;  %v3961_v0 = vpop.f32.mrb[19].mxu0  ;;  %4223 = vmatmul.mubr.f32.gmra.mrb[124].mxu0 %v778_v54 }
 0x32b   :  { %v5848_v1 = vsel %vm4553_vm1, %v5461_v59, 0.0  ;;  %v3940_v2 = vadd.f32 %v10568_v6, %v2594_v63  ;;  %v2596_v4 = vpop.f32.mrb[161].mxu1  ;;  %2858 = vmatmul.mubr.f32.gmra.mrb[160].mxu1 %v760_v56  ;;  %6326 = vmatprep.mubr.msk.f32.mxu0 %vm1094_vm0, %v783_v57  ;;  %v780_v63 = vld [vmem:[%s12494_s0 + $0x17e0] sm:$0xff]  ;;  %v803_v0 = vld [vmem:[%s12494_s0 + $0x1898] sm:$0xff] }
 0x32c   :  { %v5849_v7 = vadd.f32 %v5848_v1, %v5847_v55  ;;  %2862 = vmatprep.mubr.f32.mxu1 %v765_v60  ;;  %v798_v60 = vld [vmem:[%s12494_s0 + $0x1870] sm:$0xff] }
 0x32d   :  { %4687 = vst.msk [vmem:[%s12496_s2 + $0x428] sm:$0xff] %vm4553_vm1, %v3940_v2  ;;  %v5075_v6 = vsel %vm4553_vm1, %v3940_v2, 0.0  ;;  %v5462_v10 = vmul.f32 %v3940_v2, %v3940_v2  ;;  %v10678_v12 = vpop.f32.mrb[20].mxu0  ;;  %v785_v2 = vld [vmem:[%s12494_s0 + $0x1808] sm:$0xff] }
 0x32e   :  { %v5076_v13 = vadd.f32 %v5075_v6, %v5074_v62  ;;  %v2599_v14 = vpop.f32.mrb[162].mxu1  ;;  %v3966_v15 = vpop.f32.mrb[21].mxu0  ;;  %4228 = vmatmul.mubr.f32.gmra.mrb[126].mxu0 %v782_v5 }
 0x32f   :  { %v5850_v16 = vsel %vm4553_vm1, %v5462_v10, 0.0  ;;  %v3945_v17 = vadd.f32 %v10590_v19, %v2599_v14  ;;  %v2601_v18 = vpop.f32.mrb[163].mxu1  ;;  %2863 = vmatmul.mubr.f32.gmra.mrb[162].mxu1 %v764_v8  ;;  %6327 = vmatprep.mubr.msk.f32.mxu0 %vm1094_vm0, %v787_v9  ;;  %v784_v14 = vld [vmem:[%s12494_s0 + $0x1800] sm:$0xff]  ;;  %v807_v15 = vld [vmem:[%s12494_s0 + $0x18b8] sm:$0xff] }
 0x330   :  { %v5851_v21 = vadd.f32 %v5850_v16, %v5849_v7  ;;  %2867 = vmatprep.mubr.f32.mxu1 %v769_v11  ;;  %v802_v11 = vld [vmem:[%s12494_s0 + $0x1890] sm:$0xff] }
 0x331   :  { %4688 = vst.msk [vmem:[%s12496_s2 + $0x430] sm:$0xff] %vm4553_vm1, %v3945_v17  ;;  %v5077_v19 = vsel %vm4553_vm1, %v3945_v17, 0.0  ;;  %v5463_v24 = vmul.f32 %v3945_v17, %v3945_v17  ;;  %v10700_v26 = vpop.f32.mrb[22].mxu0  ;;  %v789_v17 = vld [vmem:[%s12494_s0 + $0x1828] sm:$0xff] }
 0x332   :  { %v5078_v27 = vadd.f32 %v5077_v19, %v5076_v13  ;;  %v2604_v28 = vpop.f32.mrb[164].mxu1  ;;  %v3971_v29 = vpop.f32.mrb[23].mxu0  ;;  %4233 = vmatmul.mubr.f32.gmra.mrb[128].mxu0 %v786_v20 }
 0x333   :  { %v5852_v30 = vsel %vm4553_vm1, %v5463_v24, 0.0  ;;  %v3950_v31 = vadd.f32 %v10612_v33, %v2604_v28  ;;  %v2606_v3 = vpop.f32.mrb[165].mxu1  ;;  %2868 = vmatmul.mubr.f32.gmra.mrb[164].mxu1 %v768_v22  ;;  %6328 = vmatprep.mubr.msk.f32.mxu0 %vm1094_vm0, %v791_v23  ;;  %v788_v28 = vld [vmem:[%s12494_s0 + $0x1820] sm:$0xff]  ;;  %v811_v29 = vld [vmem:[%s12494_s0 + $0x18d8] sm:$0xff] }
 0x334   :  { %v5853_v34 = vadd.f32 %v5852_v30, %v5851_v21  ;;  %2872 = vmatprep.mubr.f32.mxu1 %v773_v25  ;;  %v806_v25 = vld [vmem:[%s12494_s0 + $0x18b0] sm:$0xff] }
 0x335   :  { %4689 = vst.msk [vmem:[%s12496_s2 + $0x438] sm:$0xff] %vm4553_vm1, %v3950_v31  ;;  %v5079_v33 = vsel %vm4553_vm1, %v3950_v31, 0.0  ;;  %v5464_v37 = vmul.f32 %v3950_v31, %v3950_v31  ;;  %v10722_v39 = vpop.f32.mrb[24].mxu0  ;;  %v793_v31 = vld [vmem:[%s12494_s0 + $0x1848] sm:$0xff] }
 0x336   :  { %v5080_v40 = vadd.f32 %v5079_v33, %v5078_v27  ;;  %v2609_v41 = vpop.f32.mrb[166].mxu1  ;;  %v3976_v42 = vpop.f32.mrb[25].mxu0  ;;  %4238 = vmatmul.mubr.f32.gmra.mrb[130].mxu0 %v790_v32 }
 0x337   :  { %v5854_v43 = vsel %vm4553_vm1, %v5464_v37, 0.0  ;;  %v3955_v44 = vadd.f32 %v10634_v47, %v2609_v41  ;;  %v2611_v45 = vpop.f32.mrb[167].mxu1  ;;  %2873 = vmatmul.mubr.f32.gmra.mrb[166].mxu1 %v772_v35  ;;  %6329 = vmatprep.mubr.msk.f32.mxu0 %vm1094_vm0, %v795_v36  ;;  %v792_v41 = vld [vmem:[%s12494_s0 + $0x1840] sm:$0xff]  ;;  %v815_v42 = vld [vmem:[%s12494_s0 + $0x18f8] sm:$0xff] }
 0x338   :  { %v5855_v48 = vadd.f32 %v5854_v43, %v5853_v34  ;;  %2877 = vmatprep.mubr.f32.mxu1 %v777_v38  ;;  %v810_v38 = vld [vmem:[%s12494_s0 + $0x18d0] sm:$0xff] }
 0x339   :  { %4690 = vst.msk [vmem:[%s12496_s2 + $0x440] sm:$0xff] %vm4553_vm1, %v3955_v44  ;;  %v5081_v47 = vsel %vm4553_vm1, %v3955_v44, 0.0  ;;  %v5465_v51 = vmul.f32 %v3955_v44, %v3955_v44  ;;  %v10744_v53 = vpop.f32.mrb[26].mxu0  ;;  %v797_v44 = vld [vmem:[%s12494_s0 + $0x1868] sm:$0xff] }
 0x33a   :  { %v5082_v54 = vadd.f32 %v5081_v47, %v5080_v40  ;;  %v2614_v55 = vpop.f32.mrb[168].mxu1  ;;  %v3981_v56 = vpop.f32.mrb[27].mxu0  ;;  %4243 = vmatmul.mubr.f32.gmra.mrb[132].mxu0 %v794_v46 }
 0x33b   :  { %v5856_v57 = vsel %vm4553_vm1, %v5465_v51, 0.0  ;;  %v3960_v58 = vadd.f32 %v10656_v61, %v2614_v55  ;;  %v2616_v59 = vpop.f32.mrb[169].mxu1  ;;  %2878 = vmatmul.mubr.f32.gmra.mrb[168].mxu1 %v776_v49  ;;  %6330 = vmatprep.mubr.msk.f32.mxu0 %vm1094_vm0, %v799_v50  ;;  %v796_v55 = vld [vmem:[%s12494_s0 + $0x1860] sm:$0xff]  ;;  %v819_v56 = vld [vmem:[%s12494_s0 + $0x1918] sm:$0xff] }
 0x33c   :  { %v5857_v62 = vadd.f32 %v5856_v57, %v5855_v48  ;;  %2882 = vmatprep.mubr.f32.mxu1 %v781_v52  ;;  %v814_v52 = vld [vmem:[%s12494_s0 + $0x18f0] sm:$0xff] }
 0x33d   :  { %4691 = vst.msk [vmem:[%s12496_s2 + $0x448] sm:$0xff] %vm4553_vm1, %v3960_v58  ;;  %v5083_v61 = vsel %vm4553_vm1, %v3960_v58, 0.0  ;;  %v5466_v1 = vmul.f32 %v3960_v58, %v3960_v58  ;;  %v10766_v4 = vpop.f32.mrb[28].mxu0  ;;  %v801_v58 = vld [vmem:[%s12494_s0 + $0x1888] sm:$0xff] }
 0x33e   :  { %v5084_v5 = vadd.f32 %v5083_v61, %v5082_v54  ;;  %v2619_v7 = vpop.f32.mrb[170].mxu1  ;;  %v3986_v8 = vpop.f32.mrb[29].mxu0  ;;  %4248 = vmatmul.mubr.f32.gmra.mrb[134].mxu0 %v798_v60 }
 0x33f   :  { %v5858_v9 = vsel %vm4553_vm1, %v5466_v1, 0.0  ;;  %v3965_v6 = vadd.f32 %v10678_v12, %v2619_v7  ;;  %v2621_v10 = vpop.f32.mrb[171].mxu1  ;;  %2883 = vmatmul.mubr.f32.gmra.mrb[170].mxu1 %v780_v63  ;;  %6331 = vmatprep.mubr.msk.f32.mxu0 %vm1094_vm0, %v803_v0  ;;  %v800_v7 = vld [vmem:[%s12494_s0 + $0x1880] sm:$0xff]  ;;  %v823_v8 = vld [vmem:[%s12494_s0 + $0x1938] sm:$0xff] }
 0x340   :  { %v5859_v13 = vadd.f32 %v5858_v9, %v5857_v62  ;;  %2887 = vmatprep.mubr.f32.mxu1 %v785_v2  ;;  %v818_v2 = vld [vmem:[%s12494_s0 + $0x1910] sm:$0xff] }
 0x341   :  { %4692 = vst.msk [vmem:[%s12496_s2 + $0x450] sm:$0xff] %vm4553_vm1, %v3965_v6  ;;  %v5085_v12 = vsel %vm4553_vm1, %v3965_v6, 0.0  ;;  %v5467_v16 = vmul.f32 %v3965_v6, %v3965_v6  ;;  %v10788_v18 = vpop.f32.mrb[30].mxu0  ;;  %v805_v6 = vld [vmem:[%s12494_s0 + $0x18a8] sm:$0xff] }
 0x342   :  { %v5086_v20 = vadd.f32 %v5085_v12, %v5084_v5  ;;  %v2624_v21 = vpop.f32.mrb[172].mxu1  ;;  %v3991_v22 = vpop.f32.mrb[31].mxu0  ;;  %4253 = vmatmul.mubr.f32.gmra.mrb[136].mxu0 %v802_v11 }
 0x343   :  { %v5860_v23 = vsel %vm4553_vm1, %v5467_v16, 0.0  ;;  %v3970_v19 = vadd.f32 %v10700_v26, %v2624_v21  ;;  %v2626_v24 = vpop.f32.mrb[173].mxu1  ;;  %2888 = vmatmul.mubr.f32.gmra.mrb[172].mxu1 %v784_v14  ;;  %6332 = vmatprep.mubr.msk.f32.mxu0 %vm1094_vm0, %v807_v15  ;;  %v804_v21 = vld [vmem:[%s12494_s0 + $0x18a0] sm:$0xff]  ;;  %v827_v22 = vld [vmem:[%s12494_s0 + $0x1958] sm:$0xff] }
 0x344   :  { %v5861_v27 = vadd.f32 %v5860_v23, %v5859_v13  ;;  %2892 = vmatprep.mubr.f32.mxu1 %v789_v17  ;;  %v822_v17 = vld [vmem:[%s12494_s0 + $0x1930] sm:$0xff] }
 0x345   :  { %4693 = vst.msk [vmem:[%s12496_s2 + $0x458] sm:$0xff] %vm4553_vm1, %v3970_v19  ;;  %v5087_v26 = vsel %vm4553_vm1, %v3970_v19, 0.0  ;;  %v5468_v30 = vmul.f32 %v3970_v19, %v3970_v19  ;;  %v10810_v3 = vpop.f32.mrb[32].mxu0  ;;  %v809_v19 = vld [vmem:[%s12494_s0 + $0x18c8] sm:$0xff] }
 0x346   :  { %v5088_v32 = vadd.f32 %v5087_v26, %v5086_v20  ;;  %v2629_v34 = vpop.f32.mrb[174].mxu1  ;;  %v3996_v35 = vpop.f32.mrb[33].mxu0  ;;  %4258 = vmatmul.mubr.f32.gmra.mrb[138].mxu0 %v806_v25 }
 0x347   :  { %v5862_v36 = vsel %vm4553_vm1, %v5468_v30, 0.0  ;;  %v3975_v33 = vadd.f32 %v10722_v39, %v2629_v34  ;;  %v2631_v37 = vpop.f32.mrb[175].mxu1  ;;  %2893 = vmatmul.mubr.f32.gmra.mrb[174].mxu1 %v788_v28  ;;  %6333 = vmatprep.mubr.msk.f32.mxu0 %vm1094_vm0, %v811_v29  ;;  %v808_v34 = vld [vmem:[%s12494_s0 + $0x18c0] sm:$0xff]  ;;  %v831_v35 = vld [vmem:[%s12494_s0 + $0x1978] sm:$0xff] }
 0x348   :  { %v5863_v40 = vadd.f32 %v5862_v36, %v5861_v27  ;;  %2897 = vmatprep.mubr.f32.mxu1 %v793_v31  ;;  %v826_v31 = vld [vmem:[%s12494_s0 + $0x1950] sm:$0xff] }
 0x349   :  { %4694 = vst.msk [vmem:[%s12496_s2 + $0x460] sm:$0xff] %vm4553_vm1, %v3975_v33  ;;  %v5089_v39 = vsel %vm4553_vm1, %v3975_v33, 0.0  ;;  %v5469_v43 = vmul.f32 %v3975_v33, %v3975_v33  ;;  %v10832_v45 = vpop.f32.mrb[34].mxu0  ;;  %v813_v33 = vld [vmem:[%s12494_s0 + $0x18e8] sm:$0xff] }
 0x34a   :  { %v5090_v46 = vadd.f32 %v5089_v39, %v5088_v32  ;;  %v2634_v48 = vpop.f32.mrb[176].mxu1  ;;  %v4001_v49 = vpop.f32.mrb[35].mxu0  ;;  %4263 = vmatmul.mubr.f32.gmra.mrb[140].mxu0 %v810_v38 }
 0x34b   :  { %v5864_v50 = vsel %vm4553_vm1, %v5469_v43, 0.0  ;;  %v3980_v47 = vadd.f32 %v10744_v53, %v2634_v48  ;;  %v2636_v51 = vpop.f32.mrb[177].mxu1  ;;  %2898 = vmatmul.mubr.f32.gmra.mrb[176].mxu1 %v792_v41  ;;  %6334 = vmatprep.mubr.msk.f32.mxu0 %vm1094_vm0, %v815_v42  ;;  %v812_v48 = vld [vmem:[%s12494_s0 + $0x18e0] sm:$0xff]  ;;  %v835_v49 = vld [vmem:[%s12494_s0 + $0x1998] sm:$0xff] }
 0x34c   :  { %v5865_v54 = vadd.f32 %v5864_v50, %v5863_v40  ;;  %2902 = vmatprep.mubr.f32.mxu1 %v797_v44  ;;  %v830_v44 = vld [vmem:[%s12494_s0 + $0x1970] sm:$0xff] }
 0x34d   :  { %4695 = vst.msk [vmem:[%s12496_s2 + $0x468] sm:$0xff] %vm4553_vm1, %v3980_v47  ;;  %v5091_v53 = vsel %vm4553_vm1, %v3980_v47, 0.0  ;;  %v5470_v57 = vmul.f32 %v3980_v47, %v3980_v47  ;;  %v10854_v59 = vpop.f32.mrb[36].mxu0  ;;  %v817_v47 = vld [vmem:[%s12494_s0 + $0x1908] sm:$0xff] }
 0x34e   :  { %v5092_v60 = vadd.f32 %v5091_v53, %v5090_v46  ;;  %v2639_v62 = vpop.f32.mrb[178].mxu1  ;;  %v4006_v63 = vpop.f32.mrb[37].mxu0  ;;  %4268 = vmatmul.mubr.f32.gmra.mrb[142].mxu0 %v814_v52 }
 0x34f   :  { %v5866_v0 = vsel %vm4553_vm1, %v5470_v57, 0.0  ;;  %v3985_v61 = vadd.f32 %v10766_v4, %v2639_v62  ;;  %v2641_v1 = vpop.f32.mrb[179].mxu1  ;;  %2903 = vmatmul.mubr.f32.gmra.mrb[178].mxu1 %v796_v55  ;;  %6335 = vmatprep.mubr.msk.f32.mxu0 %vm1094_vm0, %v819_v56  ;;  %v816_v62 = vld [vmem:[%s12494_s0 + $0x1900] sm:$0xff]  ;;  %v839_v63 = vld [vmem:[%s12494_s0 + $0x19b8] sm:$0xff] }
 0x350   :  { %v5867_v5 = vadd.f32 %v5866_v0, %v5865_v54  ;;  %2907 = vmatprep.mubr.f32.mxu1 %v801_v58  ;;  %v834_v58 = vld [vmem:[%s12494_s0 + $0x1990] sm:$0xff] }
 0x351   :  { %4696 = vst.msk [vmem:[%s12496_s2 + $0x470] sm:$0xff] %vm4553_vm1, %v3985_v61  ;;  %v5093_v4 = vsel %vm4553_vm1, %v3985_v61, 0.0  ;;  %v5471_v9 = vmul.f32 %v3985_v61, %v3985_v61  ;;  %v10876_v10 = vpop.f32.mrb[38].mxu0  ;;  %v821_v61 = vld [vmem:[%s12494_s0 + $0x1928] sm:$0xff] }
 0x352   :  { %v5094_v11 = vadd.f32 %v5093_v4, %v5092_v60  ;;  %v2644_v13 = vpop.f32.mrb[180].mxu1  ;;  %v4011_v14 = vpop.f32.mrb[39].mxu0  ;;  %4273 = vmatmul.mubr.f32.gmra.mrb[144].mxu0 %v818_v2 }
 0x353   :  { %v5868_v15 = vsel %vm4553_vm1, %v5471_v9, 0.0  ;;  %v3990_v12 = vadd.f32 %v10788_v18, %v2644_v13  ;;  %v2646_v16 = vpop.f32.mrb[181].mxu1  ;;  %2908 = vmatmul.mubr.f32.gmra.mrb[180].mxu1 %v800_v7  ;;  %6336 = vmatprep.mubr.msk.f32.mxu0 %vm1094_vm0, %v823_v8  ;;  %v820_v13 = vld [vmem:[%s12494_s0 + $0x1920] sm:$0xff]  ;;  %v843_v14 = vld [vmem:[%s12494_s0 + $0x19d8] sm:$0xff] }
 0x354   :  { %v5869_v20 = vadd.f32 %v5868_v15, %v5867_v5  ;;  %2912 = vmatprep.mubr.f32.mxu1 %v805_v6  ;;  %v838_v6 = vld [vmem:[%s12494_s0 + $0x19b0] sm:$0xff] }
 0x355   :  { %4697 = vst.msk [vmem:[%s12496_s2 + $0x478] sm:$0xff] %vm4553_vm1, %v3990_v12  ;;  %v5095_v18 = vsel %vm4553_vm1, %v3990_v12, 0.0  ;;  %v5472_v23 = vmul.f32 %v3990_v12, %v3990_v12  ;;  %v10898_v24 = vpop.f32.mrb[40].mxu0  ;;  %v825_v12 = vld [vmem:[%s12494_s0 + $0x1948] sm:$0xff] }
 0x356   :  { %v5096_v25 = vadd.f32 %v5095_v18, %v5094_v11  ;;  %v2649_v27 = vpop.f32.mrb[182].mxu1  ;;  %v4016_v28 = vpop.f32.mrb[41].mxu0  ;;  %4278 = vmatmul.mubr.f32.gmra.mrb[146].mxu0 %v822_v17 }
 0x357   :  { %v5870_v29 = vsel %vm4553_vm1, %v5472_v23, 0.0  ;;  %v3995_v26 = vadd.f32 %v10810_v3, %v2649_v27  ;;  %v2651_v30 = vpop.f32.mrb[183].mxu1  ;;  %2913 = vmatmul.mubr.f32.gmra.mrb[182].mxu1 %v804_v21  ;;  %6337 = vmatprep.mubr.msk.f32.mxu0 %vm1094_vm0, %v827_v22  ;;  %v824_v27 = vld [vmem:[%s12494_s0 + $0x1940] sm:$0xff]  ;;  %v847_v28 = vld [vmem:[%s12494_s0 + $0x19f8] sm:$0xff] }
 0x358   :  { %v5871_v32 = vadd.f32 %v5870_v29, %v5869_v20  ;;  %2917 = vmatprep.mubr.f32.mxu1 %v809_v19  ;;  %v842_v19 = vld [vmem:[%s12494_s0 + $0x19d0] sm:$0xff] }
 0x359   :  { %4698 = vst.msk [vmem:[%s12496_s2 + $0x480] sm:$0xff] %vm4553_vm1, %v3995_v26  ;;  %v5097_v3 = vsel %vm4553_vm1, %v3995_v26, 0.0  ;;  %v5473_v36 = vmul.f32 %v3995_v26, %v3995_v26  ;;  %v10920_v37 = vpop.f32.mrb[42].mxu0  ;;  %v829_v26 = vld [vmem:[%s12494_s0 + $0x1968] sm:$0xff] }
 0x35a   :  { %v5098_v38 = vadd.f32 %v5097_v3, %v5096_v25  ;;  %v2654_v40 = vpop.f32.mrb[184].mxu1  ;;  %v4021_v41 = vpop.f32.mrb[43].mxu0  ;;  %4283 = vmatmul.mubr.f32.gmra.mrb[148].mxu0 %v826_v31 }
 0x35b   :  { %v5872_v42 = vsel %vm4553_vm1, %v5473_v36, 0.0  ;;  %v4000_v39 = vadd.f32 %v10832_v45, %v2654_v40  ;;  %v2656_v43 = vpop.f32.mrb[185].mxu1  ;;  %2918 = vmatmul.mubr.f32.gmra.mrb[184].mxu1 %v808_v34  ;;  %6338 = vmatprep.mubr.msk.f32.mxu0 %vm1094_vm0, %v831_v35  ;;  %v828_v40 = vld [vmem:[%s12494_s0 + $0x1960] sm:$0xff]  ;;  %v851_v41 = vld [vmem:[%s12494_s0 + $0x1a18] sm:$0xff] }
 0x35c   :  { %v5873_v46 = vadd.f32 %v5872_v42, %v5871_v32  ;;  %2922 = vmatprep.mubr.f32.mxu1 %v813_v33  ;;  %v846_v33 = vld [vmem:[%s12494_s0 + $0x19f0] sm:$0xff] }
 0x35d   :  { %4699 = vst.msk [vmem:[%s12496_s2 + $0x488] sm:$0xff] %vm4553_vm1, %v4000_v39  ;;  %v5099_v45 = vsel %vm4553_vm1, %v4000_v39, 0.0  ;;  %v5474_v50 = vmul.f32 %v4000_v39, %v4000_v39  ;;  %v10942_v51 = vpop.f32.mrb[44].mxu0  ;;  %v833_v39 = vld [vmem:[%s12494_s0 + $0x1988] sm:$0xff] }
 0x35e   :  { %v5100_v52 = vadd.f32 %v5099_v45, %v5098_v38  ;;  %v2659_v54 = vpop.f32.mrb[186].mxu1  ;;  %v4026_v55 = vpop.f32.mrb[45].mxu0  ;;  %4288 = vmatmul.mubr.f32.gmra.mrb[150].mxu0 %v830_v44 }
 0x35f   :  { %v5874_v56 = vsel %vm4553_vm1, %v5474_v50, 0.0  ;;  %v4005_v53 = vadd.f32 %v10854_v59, %v2659_v54  ;;  %v2661_v57 = vpop.f32.mrb[187].mxu1  ;;  %2923 = vmatmul.mubr.f32.gmra.mrb[186].mxu1 %v812_v48  ;;  %6339 = vmatprep.mubr.msk.f32.mxu0 %vm1094_vm0, %v835_v49  ;;  %v832_v54 = vld [vmem:[%s12494_s0 + $0x1980] sm:$0xff]  ;;  %v855_v55 = vld [vmem:[%s12494_s0 + $0x1a38] sm:$0xff] }
 0x360   :  { %v5875_v60 = vadd.f32 %v5874_v56, %v5873_v46  ;;  %2927 = vmatprep.mubr.f32.mxu1 %v817_v47  ;;  %v850_v47 = vld [vmem:[%s12494_s0 + $0x1a10] sm:$0xff] }
 0x361   :  { %4700 = vst.msk [vmem:[%s12496_s2 + $0x490] sm:$0xff] %vm4553_vm1, %v4005_v53  ;;  %v5101_v59 = vsel %vm4553_vm1, %v4005_v53, 0.0  ;;  %v5475_v0 = vmul.f32 %v4005_v53, %v4005_v53  ;;  %v10964_v1 = vpop.f32.mrb[46].mxu0  ;;  %v837_v53 = vld [vmem:[%s12494_s0 + $0x19a8] sm:$0xff] }
 0x362   :  { %v5102_v2 = vadd.f32 %v5101_v59, %v5100_v52  ;;  %v2664_v5 = vpop.f32.mrb[188].mxu1  ;;  %v4031_v7 = vpop.f32.mrb[47].mxu0  ;;  %4293 = vmatmul.mubr.f32.gmra.mrb[152].mxu0 %v834_v58 }
 0x363   :  { %v5876_v8 = vsel %vm4553_vm1, %v5475_v0, 0.0  ;;  %v4010_v4 = vadd.f32 %v10876_v10, %v2664_v5  ;;  %v2666_v9 = vpop.f32.mrb[189].mxu1  ;;  %2928 = vmatmul.mubr.f32.gmra.mrb[188].mxu1 %v816_v62  ;;  %6340 = vmatprep.mubr.msk.f32.mxu0 %vm1094_vm0, %v839_v63  ;;  %v836_v5 = vld [vmem:[%s12494_s0 + $0x19a0] sm:$0xff]  ;;  %v859_v7 = vld [vmem:[%s12494_s0 + $0x1a58] sm:$0xff] }
 0x364   :  { %v5877_v11 = vadd.f32 %v5876_v8, %v5875_v60  ;;  %2932 = vmatprep.mubr.f32.mxu1 %v821_v61  ;;  %v854_v61 = vld [vmem:[%s12494_s0 + $0x1a30] sm:$0xff] }
 0x365   :  { %4701 = vst.msk [vmem:[%s12496_s2 + $0x498] sm:$0xff] %vm4553_vm1, %v4010_v4  ;;  %v5103_v10 = vsel %vm4553_vm1, %v4010_v4, 0.0  ;;  %v5476_v15 = vmul.f32 %v4010_v4, %v4010_v4  ;;  %v10986_v16 = vpop.f32.mrb[48].mxu0  ;;  %v841_v4 = vld [vmem:[%s12494_s0 + $0x19c8] sm:$0xff] }
 0x366   :  { %v5104_v17 = vadd.f32 %v5103_v10, %v5102_v2  ;;  %v2669_v20 = vpop.f32.mrb[190].mxu1  ;;  %v4036_v21 = vpop.f32.mrb[49].mxu0  ;;  %4298 = vmatmul.mubr.f32.gmra.mrb[154].mxu0 %v838_v6 }
 0x367   :  { %v5878_v22 = vsel %vm4553_vm1, %v5476_v15, 0.0  ;;  %v4015_v18 = vadd.f32 %v10898_v24, %v2669_v20  ;;  %v2671_v23 = vpop.f32.mrb[191].mxu1  ;;  %2933 = vmatmul.mubr.f32.gmra.mrb[190].mxu1 %v820_v13  ;;  %6341 = vmatprep.mubr.msk.f32.mxu0 %vm1094_vm0, %v843_v14  ;;  %v840_v20 = vld [vmem:[%s12494_s0 + $0x19c0] sm:$0xff]  ;;  %v863_v21 = vld [vmem:[%s12494_s0 + $0x1a78] sm:$0xff] }
 0x368   :  { %v5879_v25 = vadd.f32 %v5878_v22, %v5877_v11  ;;  %2937 = vmatprep.mubr.f32.mxu1 %v825_v12  ;;  %v858_v12 = vld [vmem:[%s12494_s0 + $0x1a50] sm:$0xff] }
 0x369   :  { %4702 = vst.msk [vmem:[%s12496_s2 + $0x4a0] sm:$0xff] %vm4553_vm1, %v4015_v18  ;;  %v5105_v24 = vsel %vm4553_vm1, %v4015_v18, 0.0  ;;  %v5477_v29 = vmul.f32 %v4015_v18, %v4015_v18  ;;  %v11008_v30 = vpop.f32.mrb[50].mxu0  ;;  %v845_v18 = vld [vmem:[%s12494_s0 + $0x19e8] sm:$0xff] }
 0x36a   :  { %v5106_v31 = vadd.f32 %v5105_v24, %v5104_v17  ;;  %v2674_v32 = vpop.f32.mrb[192].mxu1  ;;  %v4041_v34 = vpop.f32.mrb[51].mxu0  ;;  %4303 = vmatmul.mubr.f32.gmra.mrb[156].mxu0 %v842_v19 }
 0x36b   :  { %v5880_v35 = vsel %vm4553_vm1, %v5477_v29, 0.0  ;;  %v4020_v3 = vadd.f32 %v10920_v37, %v2674_v32  ;;  %v2676_v36 = vpop.f32.mrb[193].mxu1  ;;  %2938 = vmatmul.mubr.f32.gmra.mrb[192].mxu1 %v824_v27  ;;  %6342 = vmatprep.mubr.msk.f32.mxu0 %vm1094_vm0, %v847_v28  ;;  %v844_v32 = vld [vmem:[%s12494_s0 + $0x19e0] sm:$0xff]  ;;  %v867_v34 = vld [vmem:[%s12494_s0 + $0x1a98] sm:$0xff] }
 0x36c   :  { %v5881_v38 = vadd.f32 %v5880_v35, %v5879_v25  ;;  %2942 = vmatprep.mubr.f32.mxu1 %v829_v26  ;;  %v862_v26 = vld [vmem:[%s12494_s0 + $0x1a70] sm:$0xff] }
 0x36d   :  { %4703 = vst.msk [vmem:[%s12496_s2 + $0x4a8] sm:$0xff] %vm4553_vm1, %v4020_v3  ;;  %v5107_v37 = vsel %vm4553_vm1, %v4020_v3, 0.0  ;;  %v5478_v42 = vmul.f32 %v4020_v3, %v4020_v3  ;;  %v11030_v43 = vpop.f32.mrb[52].mxu0  ;;  %v849_v3 = vld [vmem:[%s12494_s0 + $0x1a08] sm:$0xff] }
 0x36e   :  { %v5108_v44 = vadd.f32 %v5107_v37, %v5106_v31  ;;  %v2679_v46 = vpop.f32.mrb[194].mxu1  ;;  %v4046_v48 = vpop.f32.mrb[53].mxu0  ;;  %4308 = vmatmul.mubr.f32.gmra.mrb[158].mxu0 %v846_v33 }
 0x36f   :  { %v5882_v49 = vsel %vm4553_vm1, %v5478_v42, 0.0  ;;  %v4025_v45 = vadd.f32 %v10942_v51, %v2679_v46  ;;  %v2681_v50 = vpop.f32.mrb[195].mxu1  ;;  %2943 = vmatmul.mubr.f32.gmra.mrb[194].mxu1 %v828_v40  ;;  %6343 = vmatprep.mubr.msk.f32.mxu0 %vm1094_vm0, %v851_v41  ;;  %v848_v46 = vld [vmem:[%s12494_s0 + $0x1a00] sm:$0xff]  ;;  %v871_v48 = vld [vmem:[%s12494_s0 + $0x1ab8] sm:$0xff] }
 0x370   :  { %v5883_v52 = vadd.f32 %v5882_v49, %v5881_v38  ;;  %2947 = vmatprep.mubr.f32.mxu1 %v833_v39  ;;  %v866_v39 = vld [vmem:[%s12494_s0 + $0x1a90] sm:$0xff] }
 0x371   :  { %4704 = vst.msk [vmem:[%s12496_s2 + $0x4b0] sm:$0xff] %vm4553_vm1, %v4025_v45  ;;  %v5109_v51 = vsel %vm4553_vm1, %v4025_v45, 0.0  ;;  %v5479_v56 = vmul.f32 %v4025_v45, %v4025_v45  ;;  %v11052_v57 = vpop.f32.mrb[54].mxu0  ;;  %v853_v45 = vld [vmem:[%s12494_s0 + $0x1a28] sm:$0xff] }
 0x372   :  { %v5110_v58 = vadd.f32 %v5109_v51, %v5108_v44  ;;  %v2684_v60 = vpop.f32.mrb[196].mxu1  ;;  %v4051_v62 = vpop.f32.mrb[55].mxu0  ;;  %4313 = vmatmul.mubr.f32.gmra.mrb[160].mxu0 %v850_v47 }
 0x373   :  { %v5884_v63 = vsel %vm4553_vm1, %v5479_v56, 0.0  ;;  %v4030_v59 = vadd.f32 %v10964_v1, %v2684_v60  ;;  %v2686_v0 = vpop.f32.mrb[197].mxu1  ;;  %2948 = vmatmul.mubr.f32.gmra.mrb[196].mxu1 %v832_v54  ;;  %6344 = vmatprep.mubr.msk.f32.mxu0 %vm1094_vm0, %v855_v55  ;;  %v852_v60 = vld [vmem:[%s12494_s0 + $0x1a20] sm:$0xff]  ;;  %v875_v62 = vld [vmem:[%s12494_s0 + $0x1ad8] sm:$0xff] }
 0x374   :  { %v5885_v2 = vadd.f32 %v5884_v63, %v5883_v52  ;;  %2952 = vmatprep.mubr.f32.mxu1 %v837_v53  ;;  %v870_v53 = vld [vmem:[%s12494_s0 + $0x1ab0] sm:$0xff] }
 0x375   :  { %4705 = vst.msk [vmem:[%s12496_s2 + $0x4b8] sm:$0xff] %vm4553_vm1, %v4030_v59  ;;  %v5111_v1 = vsel %vm4553_vm1, %v4030_v59, 0.0  ;;  %v5480_v8 = vmul.f32 %v4030_v59, %v4030_v59  ;;  %v11074_v9 = vpop.f32.mrb[56].mxu0  ;;  %v857_v59 = vld [vmem:[%s12494_s0 + $0x1a48] sm:$0xff] }
 0x376   :  { %v5112_v6 = vadd.f32 %v5111_v1, %v5110_v58  ;;  %v2689_v11 = vpop.f32.mrb[198].mxu1  ;;  %v4056_v13 = vpop.f32.mrb[57].mxu0  ;;  %4318 = vmatmul.mubr.f32.gmra.mrb[162].mxu0 %v854_v61 }
 0x377   :  { %v5886_v14 = vsel %vm4553_vm1, %v5480_v8, 0.0  ;;  %v4035_v10 = vadd.f32 %v10986_v16, %v2689_v11  ;;  %v2691_v15 = vpop.f32.mrb[199].mxu1  ;;  %2953 = vmatmul.mubr.f32.gmra.mrb[198].mxu1 %v836_v5  ;;  %6345 = vmatprep.mubr.msk.f32.mxu0 %vm1094_vm0, %v859_v7  ;;  %v856_v11 = vld [vmem:[%s12494_s0 + $0x1a40] sm:$0xff]  ;;  %v879_v13 = vld [vmem:[%s12494_s0 + $0x1af8] sm:$0xff] }
 0x378   :  { %v5887_v17 = vadd.f32 %v5886_v14, %v5885_v2  ;;  %2957 = vmatprep.mubr.f32.mxu1 %v841_v4  ;;  %v874_v4 = vld [vmem:[%s12494_s0 + $0x1ad0] sm:$0xff] }
 0x379   :  { %4706 = vst.msk [vmem:[%s12496_s2 + $0x4c0] sm:$0xff] %vm4553_vm1, %v4035_v10  ;;  %v5113_v16 = vsel %vm4553_vm1, %v4035_v10, 0.0  ;;  %v5481_v22 = vmul.f32 %v4035_v10, %v4035_v10  ;;  %v11096_v23 = vpop.f32.mrb[58].mxu0  ;;  %v861_v10 = vld [vmem:[%s12494_s0 + $0x1a68] sm:$0xff] }
 0x37a   :  { %v5114_v19 = vadd.f32 %v5113_v16, %v5112_v6  ;;  %v2694_v25 = vpop.f32.mrb[200].mxu1  ;;  %v4061_v27 = vpop.f32.mrb[59].mxu0  ;;  %4323 = vmatmul.mubr.f32.gmra.mrb[164].mxu0 %v858_v12 }
 0x37b   :  { %v5888_v28 = vsel %vm4553_vm1, %v5481_v22, 0.0  ;;  %v4040_v24 = vadd.f32 %v11008_v30, %v2694_v25  ;;  %v2696_v29 = vpop.f32.mrb[201].mxu1  ;;  %2958 = vmatmul.mubr.f32.gmra.mrb[200].mxu1 %v840_v20  ;;  %6346 = vmatprep.mubr.msk.f32.mxu0 %vm1094_vm0, %v863_v21  ;;  %v860_v25 = vld [vmem:[%s12494_s0 + $0x1a60] sm:$0xff]  ;;  %v883_v27 = vld [vmem:[%s12494_s0 + $0x1b18] sm:$0xff] }
 0x37c   :  { %v5889_v31 = vadd.f32 %v5888_v28, %v5887_v17  ;;  %2962 = vmatprep.mubr.f32.mxu1 %v845_v18  ;;  %v878_v18 = vld [vmem:[%s12494_s0 + $0x1af0] sm:$0xff] }
 0x37d   :  { %4707 = vst.msk [vmem:[%s12496_s2 + $0x4c8] sm:$0xff] %vm4553_vm1, %v4040_v24  ;;  %v5115_v30 = vsel %vm4553_vm1, %v4040_v24, 0.0  ;;  %v5482_v35 = vmul.f32 %v4040_v24, %v4040_v24  ;;  %v11118_v36 = vpop.f32.mrb[60].mxu0  ;;  %v865_v24 = vld [vmem:[%s12494_s0 + $0x1a88] sm:$0xff] }
 0x37e   :  { %v5116_v33 = vadd.f32 %v5115_v30, %v5114_v19  ;;  %v2699_v38 = vpop.f32.mrb[202].mxu1  ;;  %v4066_v40 = vpop.f32.mrb[61].mxu0  ;;  %4328 = vmatmul.mubr.f32.gmra.mrb[166].mxu0 %v862_v26 }
 0x37f   :  { %v5890_v41 = vsel %vm4553_vm1, %v5482_v35, 0.0  ;;  %v4045_v37 = vadd.f32 %v11030_v43, %v2699_v38  ;;  %v2701_v42 = vpop.f32.mrb[203].mxu1  ;;  %2963 = vmatmul.mubr.f32.gmra.mrb[202].mxu1 %v844_v32  ;;  %6347 = vmatprep.mubr.msk.f32.mxu0 %vm1094_vm0, %v867_v34  ;;  %v864_v38 = vld [vmem:[%s12494_s0 + $0x1a80] sm:$0xff]  ;;  %v887_v40 = vld [vmem:[%s12494_s0 + $0x1b38] sm:$0xff] }
 0x380   :  { %v5891_v44 = vadd.f32 %v5890_v41, %v5889_v31  ;;  %2967 = vmatprep.mubr.f32.mxu1 %v849_v3  ;;  %v882_v3 = vld [vmem:[%s12494_s0 + $0x1b10] sm:$0xff] }
 0x381   :  { %4708 = vst.msk [vmem:[%s12496_s2 + $0x4d0] sm:$0xff] %vm4553_vm1, %v4045_v37  ;;  %v5117_v43 = vsel %vm4553_vm1, %v4045_v37, 0.0  ;;  %v5483_v49 = vmul.f32 %v4045_v37, %v4045_v37  ;;  %v11140_v50 = vpop.f32.mrb[62].mxu0  ;;  %v869_v37 = vld [vmem:[%s12494_s0 + $0x1aa8] sm:$0xff] }
 0x382   :  { %v5118_v47 = vadd.f32 %v5117_v43, %v5116_v33  ;;  %v2704_v52 = vpop.f32.mrb[204].mxu1  ;;  %v4071_v54 = vpop.f32.mrb[63].mxu0  ;;  %4333 = vmatmul.mubr.f32.gmra.mrb[168].mxu0 %v866_v39 }
 0x383   :  { %v5892_v55 = vsel %vm4553_vm1, %v5483_v49, 0.0  ;;  %v4050_v51 = vadd.f32 %v11052_v57, %v2704_v52  ;;  %v2706_v56 = vpop.f32.mrb[205].mxu1  ;;  %2968 = vmatmul.mubr.f32.gmra.mrb[204].mxu1 %v848_v46  ;;  %6348 = vmatprep.mubr.msk.f32.mxu0 %vm1094_vm0, %v871_v48  ;;  %v868_v52 = vld [vmem:[%s12494_s0 + $0x1aa0] sm:$0xff]  ;;  %v891_v54 = vld [vmem:[%s12494_s0 + $0x1b58] sm:$0xff] }
 0x384   :  { %v5893_v58 = vadd.f32 %v5892_v55, %v5891_v44  ;;  %2972 = vmatprep.mubr.f32.mxu1 %v853_v45  ;;  %v886_v45 = vld [vmem:[%s12494_s0 + $0x1b30] sm:$0xff] }
 0x385   :  { %4709 = vst.msk [vmem:[%s12496_s2 + $0x4d8] sm:$0xff] %vm4553_vm1, %v4050_v51  ;;  %v5119_v57 = vsel %vm4553_vm1, %v4050_v51, 0.0  ;;  %v5484_v63 = vmul.f32 %v4050_v51, %v4050_v51  ;;  %v11162_v0 = vpop.f32.mrb[64].mxu0  ;;  %v873_v51 = vld [vmem:[%s12494_s0 + $0x1ac8] sm:$0xff] }
 0x386   :  { %v5120_v61 = vadd.f32 %v5119_v57, %v5118_v47  ;;  %v2709_v2 = vpop.f32.mrb[206].mxu1  ;;  %v4076_v5 = vpop.f32.mrb[65].mxu0  ;;  %4338 = vmatmul.mubr.f32.gmra.mrb[170].mxu0 %v870_v53 }
 0x387   :  { %v5894_v7 = vsel %vm4553_vm1, %v5484_v63, 0.0  ;;  %v4055_v1 = vadd.f32 %v11074_v9, %v2709_v2  ;;  %v2711_v8 = vpop.f32.mrb[207].mxu1  ;;  %2973 = vmatmul.mubr.f32.gmra.mrb[206].mxu1 %v852_v60  ;;  %6349 = vmatprep.mubr.msk.f32.mxu0 %vm1094_vm0, %v875_v62  ;;  %v872_v2 = vld [vmem:[%s12494_s0 + $0x1ac0] sm:$0xff]  ;;  %v895_v5 = vld [vmem:[%s12494_s0 + $0x1b78] sm:$0xff] }
 0x388   :  { %v5895_v6 = vadd.f32 %v5894_v7, %v5893_v58  ;;  %2977 = vmatprep.mubr.f32.mxu1 %v857_v59  ;;  %v890_v59 = vld [vmem:[%s12494_s0 + $0x1b50] sm:$0xff] }
 0x389   :  { %4710 = vst.msk [vmem:[%s12496_s2 + $0x4e0] sm:$0xff] %vm4553_vm1, %v4055_v1  ;;  %v5121_v9 = vsel %vm4553_vm1, %v4055_v1, 0.0  ;;  %v5485_v14 = vmul.f32 %v4055_v1, %v4055_v1  ;;  %v11184_v15 = vpop.f32.mrb[66].mxu0  ;;  %v877_v1 = vld [vmem:[%s12494_s0 + $0x1ae8] sm:$0xff] }
 0x38a   :  { %v5122_v12 = vadd.f32 %v5121_v9, %v5120_v61  ;;  %v2714_v17 = vpop.f32.mrb[208].mxu1  ;;  %v4081_v20 = vpop.f32.mrb[67].mxu0  ;;  %4343 = vmatmul.mubr.f32.gmra.mrb[172].mxu0 %v874_v4 }
 0x38b   :  { %v5896_v21 = vsel %vm4553_vm1, %v5485_v14, 0.0  ;;  %v4060_v16 = vadd.f32 %v11096_v23, %v2714_v17  ;;  %v2716_v22 = vpop.f32.mrb[209].mxu1  ;;  %2978 = vmatmul.mubr.f32.gmra.mrb[208].mxu1 %v856_v11  ;;  %6350 = vmatprep.mubr.msk.f32.mxu0 %vm1094_vm0, %v879_v13  ;;  %v876_v17 = vld [vmem:[%s12494_s0 + $0x1ae0] sm:$0xff]  ;;  %v899_v20 = vld [vmem:[%s12494_s0 + $0x1b98] sm:$0xff] }
 0x38c   :  { %v5897_v19 = vadd.f32 %v5896_v21, %v5895_v6  ;;  %2982 = vmatprep.mubr.f32.mxu1 %v861_v10  ;;  %v894_v10 = vld [vmem:[%s12494_s0 + $0x1b70] sm:$0xff] }
 0x38d   :  { %4711 = vst.msk [vmem:[%s12496_s2 + $0x4e8] sm:$0xff] %vm4553_vm1, %v4060_v16  ;;  %v5123_v23 = vsel %vm4553_vm1, %v4060_v16, 0.0  ;;  %v5486_v28 = vmul.f32 %v4060_v16, %v4060_v16  ;;  %v11206_v29 = vpop.f32.mrb[68].mxu0  ;;  %v881_v16 = vld [vmem:[%s12494_s0 + $0x1b08] sm:$0xff] }
 0x38e   :  { %v5124_v26 = vadd.f32 %v5123_v23, %v5122_v12  ;;  %v2719_v31 = vpop.f32.mrb[210].mxu1  ;;  %v4086_v32 = vpop.f32.mrb[69].mxu0  ;;  %4348 = vmatmul.mubr.f32.gmra.mrb[174].mxu0 %v878_v18 }
 0x38f   :  { %v5898_v34 = vsel %vm4553_vm1, %v5486_v28, 0.0  ;;  %v4065_v30 = vadd.f32 %v11118_v36, %v2719_v31  ;;  %v2721_v35 = vpop.f32.mrb[211].mxu1  ;;  %2983 = vmatmul.mubr.f32.gmra.mrb[210].mxu1 %v860_v25  ;;  %6351 = vmatprep.mubr.msk.f32.mxu0 %vm1094_vm0, %v883_v27  ;;  %v880_v31 = vld [vmem:[%s12494_s0 + $0x1b00] sm:$0xff]  ;;  %v903_v32 = vld [vmem:[%s12494_s0 + $0x1bb8] sm:$0xff] }
 0x390   :  { %v5899_v33 = vadd.f32 %v5898_v34, %v5897_v19  ;;  %2987 = vmatprep.mubr.f32.mxu1 %v865_v24  ;;  %v898_v24 = vld [vmem:[%s12494_s0 + $0x1b90] sm:$0xff] }
 0x391   :  { %4712 = vst.msk [vmem:[%s12496_s2 + $0x4f0] sm:$0xff] %vm4553_vm1, %v4065_v30  ;;  %v5125_v36 = vsel %vm4553_vm1, %v4065_v30, 0.0  ;;  %v5487_v41 = vmul.f32 %v4065_v30, %v4065_v30  ;;  %v11228_v42 = vpop.f32.mrb[70].mxu0  ;;  %v885_v30 = vld [vmem:[%s12494_s0 + $0x1b28] sm:$0xff] }
 0x392   :  { %v5126_v39 = vadd.f32 %v5125_v36, %v5124_v26  ;;  %v2724_v44 = vpop.f32.mrb[212].mxu1  ;;  %v4091_v46 = vpop.f32.mrb[71].mxu0  ;;  %4353 = vmatmul.mubr.f32.gmra.mrb[176].mxu0 %v882_v3 }
 0x393   :  { %v5900_v48 = vsel %vm4553_vm1, %v5487_v41, 0.0  ;;  %v4070_v43 = vadd.f32 %v11140_v50, %v2724_v44  ;;  %v2726_v49 = vpop.f32.mrb[213].mxu1  ;;  %2988 = vmatmul.mubr.f32.gmra.mrb[212].mxu1 %v864_v38  ;;  %6352 = vmatprep.mubr.msk.f32.mxu0 %vm1094_vm0, %v887_v40  ;;  %v884_v44 = vld [vmem:[%s12494_s0 + $0x1b20] sm:$0xff]  ;;  %v907_v46 = vld [vmem:[%s12494_s0 + $0x1bd8] sm:$0xff] }
 0x394   :  { %v5901_v47 = vadd.f32 %v5900_v48, %v5899_v33  ;;  %2992 = vmatprep.mubr.f32.mxu1 %v869_v37  ;;  %v902_v37 = vld [vmem:[%s12494_s0 + $0x1bb0] sm:$0xff] }
 0x395   :  { %4713 = vst.msk [vmem:[%s12496_s2 + $0x4f8] sm:$0xff] %vm4553_vm1, %v4070_v43  ;;  %v5127_v50 = vsel %vm4553_vm1, %v4070_v43, 0.0  ;;  %v5488_v55 = vmul.f32 %v4070_v43, %v4070_v43  ;;  %v11250_v56 = vpop.f32.mrb[72].mxu0  ;;  %v889_v43 = vld [vmem:[%s12494_s0 + $0x1b48] sm:$0xff] }
 0x396   :  { %v5128_v53 = vadd.f32 %v5127_v50, %v5126_v39  ;;  %v2729_v58 = vpop.f32.mrb[214].mxu1  ;;  %v4096_v60 = vpop.f32.mrb[73].mxu0  ;;  %4358 = vmatmul.mubr.f32.gmra.mrb[178].mxu0 %v886_v45 }
 0x397   :  { %v5902_v62 = vsel %vm4553_vm1, %v5488_v55, 0.0  ;;  %v4075_v57 = vadd.f32 %v11162_v0, %v2729_v58  ;;  %v2731_v63 = vpop.f32.mrb[215].mxu1  ;;  %2993 = vmatmul.mubr.f32.gmra.mrb[214].mxu1 %v868_v52  ;;  %6353 = vmatprep.mubr.msk.f32.mxu0 %vm1094_vm0, %v891_v54  ;;  %v888_v58 = vld [vmem:[%s12494_s0 + $0x1b40] sm:$0xff]  ;;  %v911_v60 = vld [vmem:[%s12494_s0 + $0x1bf8] sm:$0xff] }
 0x398   :  { %v5903_v61 = vadd.f32 %v5902_v62, %v5901_v47  ;;  %2997 = vmatprep.mubr.f32.mxu1 %v873_v51  ;;  %v906_v51 = vld [vmem:[%s12494_s0 + $0x1bd0] sm:$0xff] }
 0x399   :  { %4714 = vst.msk [vmem:[%s12496_s2 + $0x500] sm:$0xff] %vm4553_vm1, %v4075_v57  ;;  %v5129_v0 = vsel %vm4553_vm1, %v4075_v57, 0.0  ;;  %v5489_v7 = vmul.f32 %v4075_v57, %v4075_v57  ;;  %v11272_v8 = vpop.f32.mrb[74].mxu0  ;;  %v893_v57 = vld [vmem:[%s12494_s0 + $0x1b68] sm:$0xff] }
 0x39a   :  { %v5130_v4 = vadd.f32 %v5129_v0, %v5128_v53  ;;  %v2734_v6 = vpop.f32.mrb[216].mxu1  ;;  %v4101_v11 = vpop.f32.mrb[75].mxu0  ;;  %4363 = vmatmul.mubr.f32.gmra.mrb[180].mxu0 %v890_v59 }
 0x39b   :  { %v5904_v13 = vsel %vm4553_vm1, %v5489_v7, 0.0  ;;  %v4080_v9 = vadd.f32 %v11184_v15, %v2734_v6  ;;  %v2736_v14 = vpop.f32.mrb[217].mxu1  ;;  %2998 = vmatmul.mubr.f32.gmra.mrb[216].mxu1 %v872_v2  ;;  %6354 = vmatprep.mubr.msk.f32.mxu0 %vm1094_vm0, %v895_v5  ;;  %v892_v6 = vld [vmem:[%s12494_s0 + $0x1b60] sm:$0xff]  ;;  %v915_v11 = vld [vmem:[%s12494_s0 + $0x1c18] sm:$0xff] }
 0x39c   :  { %v5905_v12 = vadd.f32 %v5904_v13, %v5903_v61  ;;  %3002 = vmatprep.mubr.f32.mxu1 %v877_v1  ;;  %v910_v1 = vld [vmem:[%s12494_s0 + $0x1bf0] sm:$0xff] }
 0x39d   :  { %4715 = vst.msk [vmem:[%s12496_s2 + $0x508] sm:$0xff] %vm4553_vm1, %v4080_v9  ;;  %v5131_v15 = vsel %vm4553_vm1, %v4080_v9, 0.0  ;;  %v5490_v21 = vmul.f32 %v4080_v9, %v4080_v9  ;;  %v11294_v22 = vpop.f32.mrb[76].mxu0  ;;  %v897_v9 = vld [vmem:[%s12494_s0 + $0x1b88] sm:$0xff] }
 0x39e   :  { %v5132_v18 = vadd.f32 %v5131_v15, %v5130_v4  ;;  %v2739_v19 = vpop.f32.mrb[218].mxu1  ;;  %v4106_v25 = vpop.f32.mrb[77].mxu0  ;;  %4368 = vmatmul.mubr.f32.gmra.mrb[182].mxu0 %v894_v10 }
 0x39f   :  { %v5906_v27 = vsel %vm4553_vm1, %v5490_v21, 0.0  ;;  %v4085_v23 = vadd.f32 %v11206_v29, %v2739_v19  ;;  %v2741_v28 = vpop.f32.mrb[219].mxu1  ;;  %3003 = vmatmul.mubr.f32.gmra.mrb[218].mxu1 %v876_v17  ;;  %6355 = vmatprep.mubr.msk.f32.mxu0 %vm1094_vm0, %v899_v20  ;;  %v896_v19 = vld [vmem:[%s12494_s0 + $0x1b80] sm:$0xff]  ;;  %v919_v25 = vld [vmem:[%s12494_s0 + $0x1c38] sm:$0xff] }
 0x3a0   :  { %v5907_v26 = vadd.f32 %v5906_v27, %v5905_v12  ;;  %3007 = vmatprep.mubr.f32.mxu1 %v881_v16  ;;  %v914_v16 = vld [vmem:[%s12494_s0 + $0x1c10] sm:$0xff] }
 0x3a1   :  { %4716 = vst.msk [vmem:[%s12496_s2 + $0x510] sm:$0xff] %vm4553_vm1, %v4085_v23  ;;  %v5133_v29 = vsel %vm4553_vm1, %v4085_v23, 0.0  ;;  %v5491_v34 = vmul.f32 %v4085_v23, %v4085_v23  ;;  %v11316_v35 = vpop.f32.mrb[78].mxu0  ;;  %v901_v23 = vld [vmem:[%s12494_s0 + $0x1ba8] sm:$0xff] }
 0x3a2   :  { %v5134_v3 = vadd.f32 %v5133_v29, %v5132_v18  ;;  %v2744_v33 = vpop.f32.mrb[220].mxu1  ;;  %v4111_v38 = vpop.f32.mrb[79].mxu0  ;;  %4373 = vmatmul.mubr.f32.gmra.mrb[184].mxu0 %v898_v24 }
 0x3a3   :  { %v5908_v40 = vsel %vm4553_vm1, %v5491_v34, 0.0  ;;  %v4090_v36 = vadd.f32 %v11228_v42, %v2744_v33  ;;  %v2746_v41 = vpop.f32.mrb[221].mxu1  ;;  %3008 = vmatmul.mubr.f32.gmra.mrb[220].mxu1 %v880_v31  ;;  %6356 = vmatprep.mubr.msk.f32.mxu0 %vm1094_vm0, %v903_v32  ;;  %v900_v33 = vld [vmem:[%s12494_s0 + $0x1ba0] sm:$0xff]  ;;  %v923_v38 = vld [vmem:[%s12494_s0 + $0x1c58] sm:$0xff] }
 0x3a4   :  { %v5909_v39 = vadd.f32 %v5908_v40, %v5907_v26  ;;  %3012 = vmatprep.mubr.f32.mxu1 %v885_v30  ;;  %v918_v30 = vld [vmem:[%s12494_s0 + $0x1c30] sm:$0xff] }
 0x3a5   :  { %4717 = vst.msk [vmem:[%s12496_s2 + $0x518] sm:$0xff] %vm4553_vm1, %v4090_v36  ;;  %v5135_v42 = vsel %vm4553_vm1, %v4090_v36, 0.0  ;;  %v5492_v48 = vmul.f32 %v4090_v36, %v4090_v36  ;;  %v11338_v49 = vpop.f32.mrb[80].mxu0  ;;  %v905_v36 = vld [vmem:[%s12494_s0 + $0x1bc8] sm:$0xff] }
 0x3a6   :  { %v5136_v45 = vadd.f32 %v5135_v42, %v5134_v3  ;;  %v2749_v47 = vpop.f32.mrb[222].mxu1  ;;  %v4116_v52 = vpop.f32.mrb[81].mxu0  ;;  %4378 = vmatmul.mubr.f32.gmra.mrb[186].mxu0 %v902_v37 }
 0x3a7   :  { %v5910_v54 = vsel %vm4553_vm1, %v5492_v48, 0.0  ;;  %v4095_v50 = vadd.f32 %v11250_v56, %v2749_v47  ;;  %v2751_v55 = vpop.f32.mrb[223].mxu1  ;;  %3013 = vmatmul.mubr.f32.gmra.mrb[222].mxu1 %v884_v44  ;;  %6357 = vmatprep.mubr.msk.f32.mxu0 %vm1094_vm0, %v907_v46  ;;  %v904_v47 = vld [vmem:[%s12494_s0 + $0x1bc0] sm:$0xff]  ;;  %v927_v52 = vld [vmem:[%s12494_s0 + $0x1c78] sm:$0xff] }
 0x3a8   :  { %v5911_v53 = vadd.f32 %v5910_v54, %v5909_v39  ;;  %3017 = vmatprep.mubr.f32.mxu1 %v889_v43  ;;  %v922_v43 = vld [vmem:[%s12494_s0 + $0x1c50] sm:$0xff] }
 0x3a9   :  { %4718 = vst.msk [vmem:[%s12496_s2 + $0x520] sm:$0xff] %vm4553_vm1, %v4095_v50  ;;  %v5137_v56 = vsel %vm4553_vm1, %v4095_v50, 0.0  ;;  %v5493_v62 = vmul.f32 %v4095_v50, %v4095_v50  ;;  %v11360_v63 = vpop.f32.mrb[82].mxu0  ;;  %v909_v50 = vld [vmem:[%s12494_s0 + $0x1be8] sm:$0xff] }
 0x3aa   :  { %v5138_v59 = vadd.f32 %v5137_v56, %v5136_v45  ;;  %v2754_v61 = vpop.f32.mrb[224].mxu1  ;;  %v4121_v2 = vpop.f32.mrb[83].mxu0  ;;  %4383 = vmatmul.mubr.f32.gmra.mrb[188].mxu0 %v906_v51 }
 0x3ab   :  { %v5912_v5 = vsel %vm4553_vm1, %v5493_v62, 0.0  ;;  %v4100_v0 = vadd.f32 %v11272_v8, %v2754_v61  ;;  %v2756_v7 = vpop.f32.mrb[225].mxu1  ;;  %3018 = vmatmul.mubr.f32.gmra.mrb[224].mxu1 %v888_v58  ;;  %6358 = vmatprep.mubr.msk.f32.mxu0 %vm1094_vm0, %v911_v60  ;;  %v908_v61 = vld [vmem:[%s12494_s0 + $0x1be0] sm:$0xff]  ;;  %v931_v2 = vld [vmem:[%s12494_s0 + $0x1c98] sm:$0xff] }
 0x3ac   :  { %v5913_v4 = vadd.f32 %v5912_v5, %v5911_v53  ;;  %3022 = vmatprep.mubr.f32.mxu1 %v893_v57  ;;  %v926_v57 = vld [vmem:[%s12494_s0 + $0x1c70] sm:$0xff] }
 0x3ad   :  { %4719 = vst.msk [vmem:[%s12496_s2 + $0x528] sm:$0xff] %vm4553_vm1, %v4100_v0  ;;  %v5139_v8 = vsel %vm4553_vm1, %v4100_v0, 0.0  ;;  %v5494_v13 = vmul.f32 %v4100_v0, %v4100_v0  ;;  %v11382_v14 = vpop.f32.mrb[84].mxu0  ;;  %v913_v0 = vld [vmem:[%s12494_s0 + $0x1c08] sm:$0xff] }
 0x3ae   :  { %v5140_v10 = vadd.f32 %v5139_v8, %v5138_v59  ;;  %v2759_v12 = vpop.f32.mrb[226].mxu1  ;;  %v4126_v17 = vpop.f32.mrb[85].mxu0  ;;  %4388 = vmatmul.mubr.f32.gmra.mrb[190].mxu0 %v910_v1 }
 0x3af   :  { %v5914_v20 = vsel %vm4553_vm1, %v5494_v13, 0.0  ;;  %v4105_v15 = vadd.f32 %v11294_v22, %v2759_v12  ;;  %v2761_v21 = vpop.f32.mrb[227].mxu1  ;;  %3023 = vmatmul.mubr.f32.gmra.mrb[226].mxu1 %v892_v6  ;;  %6359 = vmatprep.mubr.msk.f32.mxu0 %vm1094_vm0, %v915_v11  ;;  %v912_v12 = vld [vmem:[%s12494_s0 + $0x1c00] sm:$0xff]  ;;  %v935_v17 = vld [vmem:[%s12494_s0 + $0x1cb8] sm:$0xff] }
 0x3b0   :  { %v5915_v18 = vadd.f32 %v5914_v20, %v5913_v4  ;;  %3027 = vmatprep.mubr.f32.mxu1 %v897_v9  ;;  %v930_v9 = vld [vmem:[%s12494_s0 + $0x1c90] sm:$0xff] }
 0x3b1   :  { %4720 = vst.msk [vmem:[%s12496_s2 + $0x530] sm:$0xff] %vm4553_vm1, %v4105_v15  ;;  %v5141_v22 = vsel %vm4553_vm1, %v4105_v15, 0.0  ;;  %v5495_v27 = vmul.f32 %v4105_v15, %v4105_v15  ;;  %v11404_v28 = vpop.f32.mrb[86].mxu0  ;;  %v917_v15 = vld [vmem:[%s12494_s0 + $0x1c28] sm:$0xff] }
 0x3b2   :  { %v5142_v24 = vadd.f32 %v5141_v22, %v5140_v10  ;;  %v2764_v26 = vpop.f32.mrb[228].mxu1  ;;  %v4131_v31 = vpop.f32.mrb[87].mxu0  ;;  %4393 = vmatmul.mubr.f32.gmra.mrb[192].mxu0 %v914_v16 }
 0x3b3   :  { %v5916_v32 = vsel %vm4553_vm1, %v5495_v27, 0.0  ;;  %v4110_v29 = vadd.f32 %v11316_v35, %v2764_v26  ;;  %v2766_v34 = vpop.f32.mrb[229].mxu1  ;;  %3028 = vmatmul.mubr.f32.gmra.mrb[228].mxu1 %v896_v19  ;;  %6360 = vmatprep.mubr.msk.f32.mxu0 %vm1094_vm0, %v919_v25  ;;  %v916_v26 = vld [vmem:[%s12494_s0 + $0x1c20] sm:$0xff]  ;;  %v939_v31 = vld [vmem:[%s12494_s0 + $0x1cd8] sm:$0xff] }
 0x3b4   :  { %v5917_v3 = vadd.f32 %v5916_v32, %v5915_v18  ;;  %3032 = vmatprep.mubr.f32.mxu1 %v901_v23  ;;  %v934_v23 = vld [vmem:[%s12494_s0 + $0x1cb0] sm:$0xff] }
 0x3b5   :  { %4721 = vst.msk [vmem:[%s12496_s2 + $0x538] sm:$0xff] %vm4553_vm1, %v4110_v29  ;;  %v5143_v35 = vsel %vm4553_vm1, %v4110_v29, 0.0  ;;  %v5496_v40 = vmul.f32 %v4110_v29, %v4110_v29  ;;  %v11426_v41 = vpop.f32.mrb[88].mxu0  ;;  %v921_v29 = vld [vmem:[%s12494_s0 + $0x1c48] sm:$0xff] }
 0x3b6   :  { %v5144_v37 = vadd.f32 %v5143_v35, %v5142_v24  ;;  %v2769_v39 = vpop.f32.mrb[230].mxu1  ;;  %v4136_v44 = vpop.f32.mrb[89].mxu0  ;;  %4398 = vmatmul.mubr.f32.gmra.mrb[194].mxu0 %v918_v30 }
 0x3b7   :  { %v5918_v46 = vsel %vm4553_vm1, %v5496_v40, 0.0  ;;  %v4115_v42 = vadd.f32 %v11338_v49, %v2769_v39  ;;  %v2771_v48 = vpop.f32.mrb[231].mxu1  ;;  %3033 = vmatmul.mubr.f32.gmra.mrb[230].mxu1 %v900_v33  ;;  %6361 = vmatprep.mubr.msk.f32.mxu0 %vm1094_vm0, %v923_v38  ;;  %v920_v39 = vld [vmem:[%s12494_s0 + $0x1c40] sm:$0xff]  ;;  %v943_v44 = vld [vmem:[%s12494_s0 + $0x1cf8] sm:$0xff] }
 0x3b8   :  { %v5919_v45 = vadd.f32 %v5918_v46, %v5917_v3  ;;  %3037 = vmatprep.mubr.f32.mxu1 %v905_v36  ;;  %v938_v36 = vld [vmem:[%s12494_s0 + $0x1cd0] sm:$0xff] }
 0x3b9   :  { %4722 = vst.msk [vmem:[%s12496_s2 + $0x540] sm:$0xff] %vm4553_vm1, %v4115_v42  ;;  %v5145_v49 = vsel %vm4553_vm1, %v4115_v42, 0.0  ;;  %v5497_v54 = vmul.f32 %v4115_v42, %v4115_v42  ;;  %v11448_v55 = vpop.f32.mrb[90].mxu0  ;;  %v925_v42 = vld [vmem:[%s12494_s0 + $0x1c68] sm:$0xff] }
 0x3ba   :  { %v5146_v51 = vadd.f32 %v5145_v49, %v5144_v37  ;;  %v2774_v53 = vpop.f32.mrb[232].mxu1  ;;  %v4141_v58 = vpop.f32.mrb[91].mxu0  ;;  %4403 = vmatmul.mubr.f32.gmra.mrb[196].mxu0 %v922_v43 }
 0x3bb   :  { %v5920_v60 = vsel %vm4553_vm1, %v5497_v54, 0.0  ;;  %v4120_v56 = vadd.f32 %v11360_v63, %v2774_v53  ;;  %v2776_v62 = vpop.f32.mrb[233].mxu1  ;;  %3038 = vmatmul.mubr.f32.gmra.mrb[232].mxu1 %v904_v47  ;;  %6362 = vmatprep.mubr.msk.f32.mxu0 %vm1094_vm0, %v927_v52  ;;  %v924_v53 = vld [vmem:[%s12494_s0 + $0x1c60] sm:$0xff]  ;;  %v947_v58 = vld [vmem:[%s12494_s0 + $0x1d18] sm:$0xff] }
 0x3bc   :  { %v5921_v59 = vadd.f32 %v5920_v60, %v5919_v45  ;;  %3042 = vmatprep.mubr.f32.mxu1 %v909_v50  ;;  %v942_v50 = vld [vmem:[%s12494_s0 + $0x1cf0] sm:$0xff] }
 0x3bd   :  { %4723 = vst.msk [vmem:[%s12496_s2 + $0x548] sm:$0xff] %vm4553_vm1, %v4120_v56  ;;  %v5147_v63 = vsel %vm4553_vm1, %v4120_v56, 0.0  ;;  %v5498_v5 = vmul.f32 %v4120_v56, %v4120_v56  ;;  %v11470_v7 = vpop.f32.mrb[92].mxu0  ;;  %v929_v56 = vld [vmem:[%s12494_s0 + $0x1c88] sm:$0xff] }
 0x3be   :  { %v5148_v1 = vadd.f32 %v5147_v63, %v5146_v51  ;;  %v2779_v4 = vpop.f32.mrb[234].mxu1  ;;  %v4146_v6 = vpop.f32.mrb[93].mxu0  ;;  %4408 = vmatmul.mubr.f32.gmra.mrb[198].mxu0 %v926_v57 }
 0x3bf   :  { %v5922_v11 = vsel %vm4553_vm1, %v5498_v5, 0.0  ;;  %v4125_v8 = vadd.f32 %v11382_v14, %v2779_v4  ;;  %v2781_v13 = vpop.f32.mrb[235].mxu1  ;;  %3043 = vmatmul.mubr.f32.gmra.mrb[234].mxu1 %v908_v61  ;;  %6363 = vmatprep.mubr.msk.f32.mxu0 %vm1094_vm0, %v931_v2  ;;  %v928_v4 = vld [vmem:[%s12494_s0 + $0x1c80] sm:$0xff]  ;;  %v951_v6 = vld [vmem:[%s12494_s0 + $0x1d38] sm:$0xff] }
 0x3c0   :  { %v5923_v10 = vadd.f32 %v5922_v11, %v5921_v59  ;;  %3047 = vmatprep.mubr.f32.mxu1 %v913_v0  ;;  %v946_v0 = vld [vmem:[%s12494_s0 + $0x1d10] sm:$0xff] }
 0x3c1   :  { %4724 = vst.msk [vmem:[%s12496_s2 + $0x550] sm:$0xff] %vm4553_vm1, %v4125_v8  ;;  %v5149_v14 = vsel %vm4553_vm1, %v4125_v8, 0.0  ;;  %v5499_v20 = vmul.f32 %v4125_v8, %v4125_v8  ;;  %v11492_v21 = vpop.f32.mrb[94].mxu0  ;;  %v933_v8 = vld [vmem:[%s12494_s0 + $0x1ca8] sm:$0xff] }
 0x3c2   :  { %v5150_v16 = vadd.f32 %v5149_v14, %v5148_v1  ;;  %v2784_v18 = vpop.f32.mrb[236].mxu1  ;;  %v4151_v19 = vpop.f32.mrb[95].mxu0  ;;  %4413 = vmatmul.mubr.f32.gmra.mrb[200].mxu0 %v930_v9 }
 0x3c3   :  { %v5924_v25 = vsel %vm4553_vm1, %v5499_v20, 0.0  ;;  %v4130_v22 = vadd.f32 %v11404_v28, %v2784_v18  ;;  %v2786_v27 = vpop.f32.mrb[237].mxu1  ;;  %3048 = vmatmul.mubr.f32.gmra.mrb[236].mxu1 %v912_v12  ;;  %6364 = vmatprep.mubr.msk.f32.mxu0 %vm1094_vm0, %v935_v17  ;;  %v932_v18 = vld [vmem:[%s12494_s0 + $0x1ca0] sm:$0xff]  ;;  %v955_v19 = vld [vmem:[%s12494_s0 + $0x1d58] sm:$0xff] }
 0x3c4   :  { %v5925_v24 = vadd.f32 %v5924_v25, %v5923_v10  ;;  %3052 = vmatprep.mubr.f32.mxu1 %v917_v15  ;;  %v950_v15 = vld [vmem:[%s12494_s0 + $0x1d30] sm:$0xff] }
 0x3c5   :  { %4725 = vst.msk [vmem:[%s12496_s2 + $0x558] sm:$0xff] %vm4553_vm1, %v4130_v22  ;;  %v5151_v28 = vsel %vm4553_vm1, %v4130_v22, 0.0  ;;  %v5500_v32 = vmul.f32 %v4130_v22, %v4130_v22  ;;  %v11514_v34 = vpop.f32.mrb[96].mxu0  ;;  %v937_v22 = vld [vmem:[%s12494_s0 + $0x1cc8] sm:$0xff] }
 0x3c6   :  { %v5152_v30 = vadd.f32 %v5151_v28, %v5150_v16  ;;  %v2789_v3 = vpop.f32.mrb[238].mxu1  ;;  %v4156_v33 = vpop.f32.mrb[97].mxu0  ;;  %4418 = vmatmul.mubr.f32.gmra.mrb[202].mxu0 %v934_v23 }
 0x3c7   :  { %v5926_v38 = vsel %vm4553_vm1, %v5500_v32, 0.0  ;;  %v4135_v35 = vadd.f32 %v11426_v41, %v2789_v3  ;;  %v2791_v40 = vpop.f32.mrb[239].mxu1  ;;  %3053 = vmatmul.mubr.f32.gmra.mrb[238].mxu1 %v916_v26  ;;  %6365 = vmatprep.mubr.msk.f32.mxu0 %vm1094_vm0, %v939_v31  ;;  %v936_v3 = vld [vmem:[%s12494_s0 + $0x1cc0] sm:$0xff]  ;;  %v959_v33 = vld [vmem:[%s12494_s0 + $0x1d78] sm:$0xff] }
 0x3c8   :  { %v5927_v37 = vadd.f32 %v5926_v38, %v5925_v24  ;;  %3057 = vmatprep.mubr.f32.mxu1 %v921_v29  ;;  %v954_v29 = vld [vmem:[%s12494_s0 + $0x1d50] sm:$0xff] }
 0x3c9   :  { %4726 = vst.msk [vmem:[%s12496_s2 + $0x560] sm:$0xff] %vm4553_vm1, %v4135_v35  ;;  %v5153_v41 = vsel %vm4553_vm1, %v4135_v35, 0.0  ;;  %v5501_v46 = vmul.f32 %v4135_v35, %v4135_v35  ;;  %v11536_v48 = vpop.f32.mrb[98].mxu0  ;;  %v941_v35 = vld [vmem:[%s12494_s0 + $0x1ce8] sm:$0xff] }
 0x3ca   :  { %v5154_v43 = vadd.f32 %v5153_v41, %v5152_v30  ;;  %v2794_v45 = vpop.f32.mrb[240].mxu1  ;;  %v4161_v47 = vpop.f32.mrb[99].mxu0  ;;  %4423 = vmatmul.mubr.f32.gmra.mrb[204].mxu0 %v938_v36 }
 0x3cb   :  { %v5928_v52 = vsel %vm4553_vm1, %v5501_v46, 0.0  ;;  %v4140_v49 = vadd.f32 %v11448_v55, %v2794_v45  ;;  %v2796_v54 = vpop.f32.mrb[241].mxu1  ;;  %3058 = vmatmul.mubr.f32.gmra.mrb[240].mxu1 %v920_v39  ;;  %6366 = vmatprep.mubr.msk.f32.mxu0 %vm1094_vm0, %v943_v44  ;;  %v940_v45 = vld [vmem:[%s12494_s0 + $0x1ce0] sm:$0xff]  ;;  %v963_v47 = vld [vmem:[%s12494_s0 + $0x1d98] sm:$0xff] }
 0x3cc   :  { %v5929_v51 = vadd.f32 %v5928_v52, %v5927_v37  ;;  %3062 = vmatprep.mubr.f32.mxu1 %v925_v42  ;;  %v958_v42 = vld [vmem:[%s12494_s0 + $0x1d70] sm:$0xff] }
 0x3cd   :  { %4727 = vst.msk [vmem:[%s12496_s2 + $0x568] sm:$0xff] %vm4553_vm1, %v4140_v49  ;;  %v5155_v55 = vsel %vm4553_vm1, %v4140_v49, 0.0  ;;  %v5502_v60 = vmul.f32 %v4140_v49, %v4140_v49  ;;  %v11558_v62 = vpop.f32.mrb[100].mxu0  ;;  %v945_v49 = vld [vmem:[%s12494_s0 + $0x1d08] sm:$0xff] }
 0x3ce   :  { %v5156_v57 = vadd.f32 %v5155_v55, %v5154_v43  ;;  %v2799_v59 = vpop.f32.mrb[242].mxu1  ;;  %v4166_v61 = vpop.f32.mrb[101].mxu0  ;;  %4428 = vmatmul.mubr.f32.gmra.mrb[206].mxu0 %v942_v50 }
 0x3cf   :  { %v5930_v2 = vsel %vm4553_vm1, %v5502_v60, 0.0  ;;  %v4145_v63 = vadd.f32 %v11470_v7, %v2799_v59  ;;  %v2801_v5 = vpop.f32.mrb[243].mxu1  ;;  %3063 = vmatmul.mubr.f32.gmra.mrb[242].mxu1 %v924_v53  ;;  %6367 = vmatprep.mubr.msk.f32.mxu0 %vm1094_vm0, %v947_v58  ;;  %v944_v59 = vld [vmem:[%s12494_s0 + $0x1d00] sm:$0xff]  ;;  %v967_v61 = vld [vmem:[%s12494_s0 + $0x1db8] sm:$0xff] }
 0x3d0   :  { %v5931_v1 = vadd.f32 %v5930_v2, %v5929_v51  ;;  %3067 = vmatprep.mubr.f32.mxu1 %v929_v56  ;;  %v962_v56 = vld [vmem:[%s12494_s0 + $0x1d90] sm:$0xff] }
 0x3d1   :  { %4728 = vst.msk [vmem:[%s12496_s2 + $0x570] sm:$0xff] %vm4553_vm1, %v4145_v63  ;;  %v5157_v7 = vsel %vm4553_vm1, %v4145_v63, 0.0  ;;  %v5503_v11 = vmul.f32 %v4145_v63, %v4145_v63  ;;  %v11580_v13 = vpop.f32.mrb[102].mxu0  ;;  %v949_v63 = vld [vmem:[%s12494_s0 + $0x1d28] sm:$0xff] }
 0x3d2   :  { %v5158_v9 = vadd.f32 %v5157_v7, %v5156_v57  ;;  %v2804_v10 = vpop.f32.mrb[244].mxu1  ;;  %v4171_v12 = vpop.f32.mrb[103].mxu0  ;;  %4433 = vmatmul.mubr.f32.gmra.mrb[208].mxu0 %v946_v0 }
 0x3d3   :  { %v5932_v17 = vsel %vm4553_vm1, %v5503_v11, 0.0  ;;  %v4150_v14 = vadd.f32 %v11492_v21, %v2804_v10  ;;  %v2806_v20 = vpop.f32.mrb[245].mxu1  ;;  %3068 = vmatmul.mubr.f32.gmra.mrb[244].mxu1 %v928_v4  ;;  %6368 = vmatprep.mubr.msk.f32.mxu0 %vm1094_vm0, %v951_v6  ;;  %v948_v10 = vld [vmem:[%s12494_s0 + $0x1d20] sm:$0xff]  ;;  %v971_v12 = vld [vmem:[%s12494_s0 + $0x1dd8] sm:$0xff] }
 0x3d4   :  { %v5933_v16 = vadd.f32 %v5932_v17, %v5931_v1  ;;  %3072 = vmatprep.mubr.f32.mxu1 %v933_v8  ;;  %v966_v8 = vld [vmem:[%s12494_s0 + $0x1db0] sm:$0xff] }
 0x3d5   :  { %4729 = vst.msk [vmem:[%s12496_s2 + $0x578] sm:$0xff] %vm4553_vm1, %v4150_v14  ;;  %v5159_v21 = vsel %vm4553_vm1, %v4150_v14, 0.0  ;;  %v5504_v25 = vmul.f32 %v4150_v14, %v4150_v14  ;;  %v11602_v27 = vpop.f32.mrb[104].mxu0  ;;  %v953_v14 = vld [vmem:[%s12494_s0 + $0x1d48] sm:$0xff] }
 0x3d6   :  { %v5160_v23 = vadd.f32 %v5159_v21, %v5158_v9  ;;  %v2809_v24 = vpop.f32.mrb[246].mxu1  ;;  %v4176_v26 = vpop.f32.mrb[105].mxu0  ;;  %4438 = vmatmul.mubr.f32.gmra.mrb[210].mxu0 %v950_v15 }
 0x3d7   :  { %v5934_v31 = vsel %vm4553_vm1, %v5504_v25, 0.0  ;;  %v4155_v28 = vadd.f32 %v11514_v34, %v2809_v24  ;;  %v2811_v32 = vpop.f32.mrb[247].mxu1  ;;  %3073 = vmatmul.mubr.f32.gmra.mrb[246].mxu1 %v932_v18  ;;  %6369 = vmatprep.mubr.msk.f32.mxu0 %vm1094_vm0, %v955_v19  ;;  %v952_v24 = vld [vmem:[%s12494_s0 + $0x1d40] sm:$0xff]  ;;  %v975_v26 = vld [vmem:[%s12494_s0 + $0x1df8] sm:$0xff] }
 0x3d8   :  { %v5935_v30 = vadd.f32 %v5934_v31, %v5933_v16  ;;  %3077 = vmatprep.mubr.f32.mxu1 %v937_v22  ;;  %v970_v22 = vld [vmem:[%s12494_s0 + $0x1dd0] sm:$0xff] }
 0x3d9   :  { %4730 = vst.msk [vmem:[%s12496_s2 + $0x580] sm:$0xff] %vm4553_vm1, %v4155_v28  ;;  %v5161_v34 = vsel %vm4553_vm1, %v4155_v28, 0.0  ;;  %v5505_v38 = vmul.f32 %v4155_v28, %v4155_v28  ;;  %v11624_v40 = vpop.f32.mrb[106].mxu0  ;;  %v957_v28 = vld [vmem:[%s12494_s0 + $0x1d68] sm:$0xff] }
 0x3da   :  { %v5162_v36 = vadd.f32 %v5161_v34, %v5160_v23  ;;  %v2814_v37 = vpop.f32.mrb[248].mxu1  ;;  %v4181_v39 = vpop.f32.mrb[107].mxu0  ;;  %4443 = vmatmul.mubr.f32.gmra.mrb[212].mxu0 %v954_v29 }
 0x3db   :  { %v5936_v44 = vsel %vm4553_vm1, %v5505_v38, 0.0  ;;  %v4160_v41 = vadd.f32 %v11536_v48, %v2814_v37  ;;  %v2816_v46 = vpop.f32.mrb[249].mxu1  ;;  %3078 = vmatmul.mubr.f32.gmra.mrb[248].mxu1 %v936_v3  ;;  %6370 = vmatprep.mubr.msk.f32.mxu0 %vm1094_vm0, %v959_v33  ;;  %v956_v37 = vld [vmem:[%s12494_s0 + $0x1d60] sm:$0xff]  ;;  %v979_v39 = vld [vmem:[%s12494_s0 + $0x1e18] sm:$0xff] }
 0x3dc   :  { %v5937_v43 = vadd.f32 %v5936_v44, %v5935_v30  ;;  %3082 = vmatprep.mubr.f32.mxu1 %v941_v35  ;;  %v974_v35 = vld [vmem:[%s12494_s0 + $0x1df0] sm:$0xff] }
 0x3dd   :  { %4731 = vst.msk [vmem:[%s12496_s2 + $0x588] sm:$0xff] %vm4553_vm1, %v4160_v41  ;;  %v5163_v48 = vsel %vm4553_vm1, %v4160_v41, 0.0  ;;  %v5506_v52 = vmul.f32 %v4160_v41, %v4160_v41  ;;  %v11646_v54 = vpop.f32.mrb[108].mxu0  ;;  %v961_v41 = vld [vmem:[%s12494_s0 + $0x1d88] sm:$0xff] }
 0x3de   :  { %v5164_v50 = vadd.f32 %v5163_v48, %v5162_v36  ;;  %v2819_v51 = vpop.f32.mrb[250].mxu1  ;;  %v4186_v53 = vpop.f32.mrb[109].mxu0  ;;  %4448 = vmatmul.mubr.f32.gmra.mrb[214].mxu0 %v958_v42 }
 0x3df   :  { %v5938_v58 = vsel %vm4553_vm1, %v5506_v52, 0.0  ;;  %v4165_v55 = vadd.f32 %v11558_v62, %v2819_v51  ;;  %v2821_v60 = vpop.f32.mrb[251].mxu1  ;;  %3083 = vmatmul.mubr.f32.gmra.mrb[250].mxu1 %v940_v45  ;;  %6371 = vmatprep.mubr.msk.f32.mxu0 %vm1094_vm0, %v963_v47  ;;  %v960_v51 = vld [vmem:[%s12494_s0 + $0x1d80] sm:$0xff]  ;;  %v983_v53 = vld [vmem:[%s12494_s0 + $0x1e38] sm:$0xff] }
 0x3e0   :  { %v5939_v57 = vadd.f32 %v5938_v58, %v5937_v43  ;;  %3087 = vmatprep.mubr.f32.mxu1 %v945_v49  ;;  %v978_v49 = vld [vmem:[%s12494_s0 + $0x1e10] sm:$0xff] }
 0x3e1   :  { %4732 = vst.msk [vmem:[%s12496_s2 + $0x590] sm:$0xff] %vm4553_vm1, %v4165_v55  ;;  %v5165_v62 = vsel %vm4553_vm1, %v4165_v55, 0.0  ;;  %v5507_v2 = vmul.f32 %v4165_v55, %v4165_v55  ;;  %v11668_v5 = vpop.f32.mrb[110].mxu0  ;;  %v965_v55 = vld [vmem:[%s12494_s0 + $0x1da8] sm:$0xff] }
 0x3e2   :  { %v5166_v0 = vadd.f32 %v5165_v62, %v5164_v50  ;;  %v2824_v1 = vpop.f32.mrb[252].mxu1  ;;  %v4191_v4 = vpop.f32.mrb[111].mxu0  ;;  %4453 = vmatmul.mubr.f32.gmra.mrb[216].mxu0 %v962_v56 }
 0x3e3   :  { %v5940_v6 = vsel %vm4553_vm1, %v5507_v2, 0.0  ;;  %v4170_v7 = vadd.f32 %v11580_v13, %v2824_v1  ;;  %v2826_v11 = vpop.f32.mrb[253].mxu1  ;;  %3088 = vmatmul.mubr.f32.gmra.mrb[252].mxu1 %v944_v59  ;;  %6372 = vmatprep.mubr.msk.f32.mxu0 %vm1094_vm0, %v967_v61  ;;  %v964_v1 = vld [vmem:[%s12494_s0 + $0x1da0] sm:$0xff]  ;;  %v987_v4 = vld [vmem:[%s12494_s0 + $0x1e58] sm:$0xff] }
 0x3e4   :  { %v5941_v9 = vadd.f32 %v5940_v6, %v5939_v57  ;;  %3092 = vmatprep.mubr.f32.mxu1 %v949_v63  ;;  %v982_v63 = vld [vmem:[%s12494_s0 + $0x1e30] sm:$0xff] }
 0x3e5   :  { %4733 = vst.msk [vmem:[%s12496_s2 + $0x598] sm:$0xff] %vm4553_vm1, %v4170_v7  ;;  %v5167_v13 = vsel %vm4553_vm1, %v4170_v7, 0.0  ;;  %v5508_v17 = vmul.f32 %v4170_v7, %v4170_v7  ;;  %v11690_v20 = vpop.f32.mrb[112].mxu0  ;;  %v969_v7 = vld [vmem:[%s12494_s0 + $0x1dc8] sm:$0xff] }
 0x3e6   :  { %v5168_v15 = vadd.f32 %v5167_v13, %v5166_v0  ;;  %v2829_v16 = vpop.f32.mrb[254].mxu1  ;;  %v4196_v18 = vpop.f32.mrb[113].mxu0  ;;  %4458 = vmatmul.mubr.f32.gmra.mrb[218].mxu0 %v966_v8 }
 0x3e7   :  { %v5942_v19 = vsel %vm4553_vm1, %v5508_v17, 0.0  ;;  %v4175_v21 = vadd.f32 %v11602_v27, %v2829_v16  ;;  %v2831_v25 = vpop.f32.mrb[255].mxu1  ;;  %3093 = vmatmul.mubr.f32.gmra.mrb[254].mxu1 %v948_v10  ;;  %6373 = vmatprep.mubr.msk.f32.mxu0 %vm1094_vm0, %v971_v12  ;;  %v968_v16 = vld [vmem:[%s12494_s0 + $0x1dc0] sm:$0xff]  ;;  %v991_v18 = vld [vmem:[%s12494_s0 + $0x1e78] sm:$0xff] }
 0x3e8   :  { %v5943_v23 = vadd.f32 %v5942_v19, %v5941_v9  ;;  %3097 = vmatprep.mubr.f32.mxu1 %v953_v14  ;;  %v986_v14 = vld [vmem:[%s12494_s0 + $0x1e50] sm:$0xff] }
 0x3e9   :  { %4734 = vst.msk [vmem:[%s12496_s2 + $0x5a0] sm:$0xff] %vm4553_vm1, %v4175_v21  ;;  %v5169_v27 = vsel %vm4553_vm1, %v4175_v21, 0.0  ;;  %v5509_v31 = vmul.f32 %v4175_v21, %v4175_v21  ;;  %v11712_v32 = vpop.f32.mrb[114].mxu0  ;;  %v973_v21 = vld [vmem:[%s12494_s0 + $0x1de8] sm:$0xff] }
 0x3ea   :  { %v5170_v29 = vadd.f32 %v5169_v27, %v5168_v15  ;;  %v2834_v30 = vpop.f32.mrb[150].mxu1  ;;  %v4201_v3 = vpop.f32.mrb[115].mxu0  ;;  %4463 = vmatmul.mubr.f32.gmra.mrb[220].mxu0 %v970_v22 }
 0x3eb   :  { %v5944_v33 = vsel %vm4553_vm1, %v5509_v31, 0.0  ;;  %v4180_v34 = vadd.f32 %v11624_v40, %v2834_v30  ;;  %v2836_v38 = vpop.f32.mrb[151].mxu1  ;;  %3098 = vmatmul.mubr.f32.gmra.mrb[150].mxu1 %v952_v24  ;;  %6374 = vmatprep.mubr.msk.f32.mxu0 %vm1094_vm0, %v975_v26  ;;  %v972_v30 = vld [vmem:[%s12494_s0 + $0x1de0] sm:$0xff]  ;;  %v995_v3 = vld [vmem:[%s12494_s0 + $0x1e98] sm:$0xff] }
 0x3ec   :  { %v5945_v36 = vadd.f32 %v5944_v33, %v5943_v23  ;;  %3102 = vmatprep.mubr.f32.mxu1 %v957_v28  ;;  %v990_v28 = vld [vmem:[%s12494_s0 + $0x1e70] sm:$0xff] }
 0x3ed   :  { %4735 = vst.msk [vmem:[%s12496_s2 + $0x5a8] sm:$0xff] %vm4553_vm1, %v4180_v34  ;;  %v5171_v40 = vsel %vm4553_vm1, %v4180_v34, 0.0  ;;  %v5510_v44 = vmul.f32 %v4180_v34, %v4180_v34  ;;  %v11734_v46 = vpop.f32.mrb[116].mxu0  ;;  %v977_v34 = vld [vmem:[%s12494_s0 + $0x1e08] sm:$0xff] }
 0x3ee   :  { %v5172_v42 = vadd.f32 %v5171_v40, %v5170_v29  ;;  %v2839_v43 = vpop.f32.mrb[152].mxu1  ;;  %v4206_v45 = vpop.f32.mrb[117].mxu0  ;;  %4468 = vmatmul.mubr.f32.gmra.mrb[222].mxu0 %v974_v35 }
 0x3ef   :  { %v5946_v47 = vsel %vm4553_vm1, %v5510_v44, 0.0  ;;  %v4185_v48 = vadd.f32 %v11646_v54, %v2839_v43  ;;  %v2841_v52 = vpop.f32.mrb[153].mxu1  ;;  %3103 = vmatmul.mubr.f32.gmra.mrb[152].mxu1 %v956_v37  ;;  %6375 = vmatprep.mubr.msk.f32.mxu0 %vm1094_vm0, %v979_v39  ;;  %v976_v43 = vld [vmem:[%s12494_s0 + $0x1e00] sm:$0xff]  ;;  %v999_v45 = vld [vmem:[%s12494_s0 + $0x1eb8] sm:$0xff] }
 0x3f0   :  { %v5947_v50 = vadd.f32 %v5946_v47, %v5945_v36  ;;  %3107 = vmatprep.mubr.f32.mxu1 %v961_v41  ;;  %v994_v41 = vld [vmem:[%s12494_s0 + $0x1e90] sm:$0xff] }
 0x3f1   :  { %4736 = vst.msk [vmem:[%s12496_s2 + $0x5b0] sm:$0xff] %vm4553_vm1, %v4185_v48  ;;  %v5173_v54 = vsel %vm4553_vm1, %v4185_v48, 0.0  ;;  %v5511_v58 = vmul.f32 %v4185_v48, %v4185_v48  ;;  %v11756_v60 = vpop.f32.mrb[118].mxu0  ;;  %v981_v48 = vld [vmem:[%s12494_s0 + $0x1e28] sm:$0xff] }
 0x3f2   :  { %v5174_v56 = vadd.f32 %v5173_v54, %v5172_v42  ;;  %v2844_v57 = vpop.f32.mrb[154].mxu1  ;;  %v4211_v59 = vpop.f32.mrb[119].mxu0  ;;  %4473 = vmatmul.mubr.f32.gmra.mrb[224].mxu0 %v978_v49 }
 0x3f3   :  { %v5948_v61 = vsel %vm4553_vm1, %v5511_v58, 0.0  ;;  %v4190_v62 = vadd.f32 %v11668_v5, %v2844_v57  ;;  %v2846_v2 = vpop.f32.mrb[155].mxu1  ;;  %3108 = vmatmul.mubr.f32.gmra.mrb[154].mxu1 %v960_v51  ;;  %6376 = vmatprep.mubr.msk.f32.mxu0 %vm1094_vm0, %v983_v53  ;;  %v980_v57 = vld [vmem:[%s12494_s0 + $0x1e20] sm:$0xff]  ;;  %v1003_v59 = vld [vmem:[%s12494_s0 + $0x1ed8] sm:$0xff] }
 0x3f4   :  { %v5949_v0 = vadd.f32 %v5948_v61, %v5947_v50  ;;  %3112 = vmatprep.mubr.f32.mxu1 %v965_v55  ;;  %v998_v55 = vld [vmem:[%s12494_s0 + $0x1eb0] sm:$0xff] }
 0x3f5   :  { %4737 = vst.msk [vmem:[%s12496_s2 + $0x5b8] sm:$0xff] %vm4553_vm1, %v4190_v62  ;;  %v5175_v5 = vsel %vm4553_vm1, %v4190_v62, 0.0  ;;  %v5512_v6 = vmul.f32 %v4190_v62, %v4190_v62  ;;  %v11778_v11 = vpop.f32.mrb[120].mxu0  ;;  %v985_v62 = vld [vmem:[%s12494_s0 + $0x1e48] sm:$0xff] }
 0x3f6   :  { %v5176_v8 = vadd.f32 %v5175_v5, %v5174_v56  ;;  %v2849_v9 = vpop.f32.mrb[156].mxu1  ;;  %v4216_v10 = vpop.f32.mrb[121].mxu0  ;;  %4478 = vmatmul.mubr.f32.gmra.mrb[226].mxu0 %v982_v63 }
 0x3f7   :  { %v5950_v12 = vsel %vm4553_vm1, %v5512_v6, 0.0  ;;  %v4195_v13 = vadd.f32 %v11690_v20, %v2849_v9  ;;  %v2851_v17 = vpop.f32.mrb[157].mxu1  ;;  %3113 = vmatmul.mubr.f32.gmra.mrb[156].mxu1 %v964_v1  ;;  %6377 = vmatprep.mubr.msk.f32.mxu0 %vm1094_vm0, %v987_v4  ;;  %v984_v9 = vld [vmem:[%s12494_s0 + $0x1e40] sm:$0xff]  ;;  %v1007_v10 = vld [vmem:[%s12494_s0 + $0x1ef8] sm:$0xff] }
 0x3f8   :  { %v5951_v15 = vadd.f32 %v5950_v12, %v5949_v0  ;;  %3117 = vmatprep.mubr.f32.mxu1 %v969_v7  ;;  %v1002_v7 = vld [vmem:[%s12494_s0 + $0x1ed0] sm:$0xff] }
 0x3f9   :  { %4738 = vst.msk [vmem:[%s12496_s2 + $0x5c0] sm:$0xff] %vm4553_vm1, %v4195_v13  ;;  %v5177_v20 = vsel %vm4553_vm1, %v4195_v13, 0.0  ;;  %v5513_v19 = vmul.f32 %v4195_v13, %v4195_v13  ;;  %v11800_v25 = vpop.f32.mrb[122].mxu0  ;;  %v989_v13 = vld [vmem:[%s12494_s0 + $0x1e68] sm:$0xff] }
 0x3fa   :  { %v5178_v22 = vadd.f32 %v5177_v20, %v5176_v8  ;;  %v2854_v23 = vpop.f32.mrb[158].mxu1  ;;  %v4221_v24 = vpop.f32.mrb[123].mxu0  ;;  %4483 = vmatmul.mubr.f32.gmra.mrb[228].mxu0 %v986_v14 }
 0x3fb   :  { %v5952_v26 = vsel %vm4553_vm1, %v5513_v19, 0.0  ;;  %v4200_v27 = vadd.f32 %v11712_v32, %v2854_v23  ;;  %v2856_v31 = vpop.f32.mrb[159].mxu1  ;;  %3118 = vmatmul.mubr.f32.gmra.mrb[158].mxu1 %v968_v16  ;;  %6378 = vmatprep.mubr.msk.f32.mxu0 %vm1094_vm0, %v991_v18  ;;  %v988_v23 = vld [vmem:[%s12494_s0 + $0x1e60] sm:$0xff]  ;;  %v1011_v24 = vld [vmem:[%s12494_s0 + $0x1f18] sm:$0xff] }
 0x3fc   :  { %v5953_v29 = vadd.f32 %v5952_v26, %v5951_v15  ;;  %3122 = vmatprep.mubr.f32.mxu1 %v973_v21  ;;  %v1006_v21 = vld [vmem:[%s12494_s0 + $0x1ef0] sm:$0xff] }
 0x3fd   :  { %4739 = vst.msk [vmem:[%s12496_s2 + $0x5c8] sm:$0xff] %vm4553_vm1, %v4200_v27  ;;  %v5179_v32 = vsel %vm4553_vm1, %v4200_v27, 0.0  ;;  %v5514_v33 = vmul.f32 %v4200_v27, %v4200_v27  ;;  %v11822_v38 = vpop.f32.mrb[124].mxu0  ;;  %v993_v27 = vld [vmem:[%s12494_s0 + $0x1e88] sm:$0xff] }
 0x3fe   :  { %v5180_v35 = vadd.f32 %v5179_v32, %v5178_v22  ;;  %v2859_v36 = vpop.f32.mrb[160].mxu1  ;;  %v4226_v37 = vpop.f32.mrb[125].mxu0  ;;  %4488 = vmatmul.mubr.f32.gmra.mrb[230].mxu0 %v990_v28 }
 0x3ff   :  { %v5954_v39 = vsel %vm4553_vm1, %v5514_v33, 0.0  ;;  %v4205_v40 = vadd.f32 %v11734_v46, %v2859_v36  ;;  %v2861_v44 = vpop.f32.mrb[161].mxu1  ;;  %3123 = vmatmul.mubr.f32.gmra.mrb[160].mxu1 %v972_v30  ;;  %6379 = vmatprep.mubr.msk.f32.mxu0 %vm1094_vm0, %v995_v3  ;;  %v992_v36 = vld [vmem:[%s12494_s0 + $0x1e80] sm:$0xff]  ;;  %v1015_v37 = vld [vmem:[%s12494_s0 + $0x1f38] sm:$0xff] }
 0x400   :  { %v5955_v42 = vadd.f32 %v5954_v39, %v5953_v29  ;;  %3127 = vmatprep.mubr.f32.mxu1 %v977_v34  ;;  %v1010_v34 = vld [vmem:[%s12494_s0 + $0x1f10] sm:$0xff] }
 0x401   :  { %4740 = vst.msk [vmem:[%s12496_s2 + $0x5d0] sm:$0xff] %vm4553_vm1, %v4205_v40  ;;  %v5181_v46 = vsel %vm4553_vm1, %v4205_v40, 0.0  ;;  %v5515_v47 = vmul.f32 %v4205_v40, %v4205_v40  ;;  %v11844_v52 = vpop.f32.mrb[126].mxu0  ;;  %v997_v40 = vld [vmem:[%s12494_s0 + $0x1ea8] sm:$0xff] }
 0x402   :  { %v5182_v49 = vadd.f32 %v5181_v46, %v5180_v35  ;;  %v2864_v50 = vpop.f32.mrb[162].mxu1  ;;  %v4231_v51 = vpop.f32.mrb[127].mxu0  ;;  %4493 = vmatmul.mubr.f32.gmra.mrb[232].mxu0 %v994_v41 }
 0x403   :  { %v5956_v53 = vsel %vm4553_vm1, %v5515_v47, 0.0  ;;  %v4210_v54 = vadd.f32 %v11756_v60, %v2864_v50  ;;  %v2866_v58 = vpop.f32.mrb[163].mxu1  ;;  %3128 = vmatmul.mubr.f32.gmra.mrb[162].mxu1 %v976_v43  ;;  %6380 = vmatprep.mubr.msk.f32.mxu0 %vm1094_vm0, %v999_v45  ;;  %v996_v50 = vld [vmem:[%s12494_s0 + $0x1ea0] sm:$0xff]  ;;  %v1019_v51 = vld [vmem:[%s12494_s0 + $0x1f58] sm:$0xff] }
 0x404   :  { %v5957_v56 = vadd.f32 %v5956_v53, %v5955_v42  ;;  %3132 = vmatprep.mubr.f32.mxu1 %v981_v48  ;;  %v1014_v48 = vld [vmem:[%s12494_s0 + $0x1f30] sm:$0xff] }
 0x405   :  { %4741 = vst.msk [vmem:[%s12496_s2 + $0x5d8] sm:$0xff] %vm4553_vm1, %v4210_v54  ;;  %v5183_v60 = vsel %vm4553_vm1, %v4210_v54, 0.0  ;;  %v5516_v61 = vmul.f32 %v4210_v54, %v4210_v54  ;;  %v11866_v2 = vpop.f32.mrb[128].mxu0  ;;  %v1001_v54 = vld [vmem:[%s12494_s0 + $0x1ec8] sm:$0xff] }
 0x406   :  { %v5184_v63 = vadd.f32 %v5183_v60, %v5182_v49  ;;  %v2869_v0 = vpop.f32.mrb[164].mxu1  ;;  %v4236_v1 = vpop.f32.mrb[129].mxu0  ;;  %4498 = vmatmul.mubr.f32.gmra.mrb[234].mxu0 %v998_v55 }
 0x407   :  { %v5958_v4 = vsel %vm4553_vm1, %v5516_v61, 0.0  ;;  %v4215_v5 = vadd.f32 %v11778_v11, %v2869_v0  ;;  %v2871_v6 = vpop.f32.mrb[165].mxu1  ;;  %3133 = vmatmul.mubr.f32.gmra.mrb[164].mxu1 %v980_v57  ;;  %6381 = vmatprep.mubr.msk.f32.mxu0 %vm1094_vm0, %v1003_v59  ;;  %v1000_v0 = vld [vmem:[%s12494_s0 + $0x1ec0] sm:$0xff]  ;;  %v1023_v1 = vld [vmem:[%s12494_s0 + $0x1f78] sm:$0xff] }
 0x408   :  { %v5959_v8 = vadd.f32 %v5958_v4, %v5957_v56  ;;  %3137 = vmatprep.mubr.f32.mxu1 %v985_v62  ;;  %v1018_v62 = vld [vmem:[%s12494_s0 + $0x1f50] sm:$0xff] }
 0x409   :  { %4742 = vst.msk [vmem:[%s12496_s2 + $0x5e0] sm:$0xff] %vm4553_vm1, %v4215_v5  ;;  %v5185_v11 = vsel %vm4553_vm1, %v4215_v5, 0.0  ;;  %v5517_v12 = vmul.f32 %v4215_v5, %v4215_v5  ;;  %v11888_v17 = vpop.f32.mrb[130].mxu0  ;;  %v1005_v5 = vld [vmem:[%s12494_s0 + $0x1ee8] sm:$0xff] }
 0x40a   :  { %v5186_v14 = vadd.f32 %v5185_v11, %v5184_v63  ;;  %v2874_v15 = vpop.f32.mrb[166].mxu1  ;;  %v4241_v16 = vpop.f32.mrb[131].mxu0  ;;  %4503 = vmatmul.mubr.f32.gmra.mrb[236].mxu0 %v1002_v7 }
 0x40b   :  { %v5960_v18 = vsel %vm4553_vm1, %v5517_v12, 0.0  ;;  %v4220_v20 = vadd.f32 %v11800_v25, %v2874_v15  ;;  %v2876_v19 = vpop.f32.mrb[167].mxu1  ;;  %3138 = vmatmul.mubr.f32.gmra.mrb[166].mxu1 %v984_v9  ;;  %6382 = vmatprep.mubr.msk.f32.mxu0 %vm1094_vm0, %v1007_v10  ;;  %v1004_v15 = vld [vmem:[%s12494_s0 + $0x1ee0] sm:$0xff]  ;;  %v1027_v16 = vld [vmem:[%s12494_s0 + $0x1f98] sm:$0xff] }
 0x40c   :  { %v5961_v22 = vadd.f32 %v5960_v18, %v5959_v8  ;;  %3142 = vmatprep.mubr.f32.mxu1 %v989_v13  ;;  %v1022_v13 = vld [vmem:[%s12494_s0 + $0x1f70] sm:$0xff] }
 0x40d   :  { %4743 = vst.msk [vmem:[%s12496_s2 + $0x5e8] sm:$0xff] %vm4553_vm1, %v4220_v20  ;;  %v5187_v25 = vsel %vm4553_vm1, %v4220_v20, 0.0  ;;  %v5518_v26 = vmul.f32 %v4220_v20, %v4220_v20  ;;  %v11910_v31 = vpop.f32.mrb[132].mxu0  ;;  %v1009_v20 = vld [vmem:[%s12494_s0 + $0x1f08] sm:$0xff] }
 0x40e   :  { %v5188_v28 = vadd.f32 %v5187_v25, %v5186_v14  ;;  %v2879_v29 = vpop.f32.mrb[168].mxu1  ;;  %v4246_v30 = vpop.f32.mrb[133].mxu0  ;;  %4508 = vmatmul.mubr.f32.gmra.mrb[238].mxu0 %v1006_v21 }
 0x40f   :  { %v5962_v3 = vsel %vm4553_vm1, %v5518_v26, 0.0  ;;  %v4225_v32 = vadd.f32 %v11822_v38, %v2879_v29  ;;  %v2881_v33 = vpop.f32.mrb[169].mxu1  ;;  %3143 = vmatmul.mubr.f32.gmra.mrb[168].mxu1 %v988_v23  ;;  %6383 = vmatprep.mubr.msk.f32.mxu0 %vm1094_vm0, %v1011_v24  ;;  %v1008_v29 = vld [vmem:[%s12494_s0 + $0x1f00] sm:$0xff]  ;;  %v1031_v30 = vld [vmem:[%s12494_s0 + $0x1fb8] sm:$0xff] }
 0x410   :  { %v5963_v35 = vadd.f32 %v5962_v3, %v5961_v22  ;;  %3147 = vmatprep.mubr.f32.mxu1 %v993_v27  ;;  %v1026_v27 = vld [vmem:[%s12494_s0 + $0x1f90] sm:$0xff] }
 0x411   :  { %4744 = vst.msk [vmem:[%s12496_s2 + $0x5f0] sm:$0xff] %vm4553_vm1, %v4225_v32  ;;  %v5189_v38 = vsel %vm4553_vm1, %v4225_v32, 0.0  ;;  %v5519_v39 = vmul.f32 %v4225_v32, %v4225_v32  ;;  %v11932_v44 = vpop.f32.mrb[134].mxu0  ;;  %v1013_v32 = vld [vmem:[%s12494_s0 + $0x1f28] sm:$0xff] }
 0x412   :  { %v5190_v41 = vadd.f32 %v5189_v38, %v5188_v28  ;;  %v2884_v42 = vpop.f32.mrb[170].mxu1  ;;  %v4251_v43 = vpop.f32.mrb[135].mxu0  ;;  %4513 = vmatmul.mubr.f32.gmra.mrb[240].mxu0 %v1010_v34 }
 0x413   :  { %v5964_v45 = vsel %vm4553_vm1, %v5519_v39, 0.0  ;;  %v4230_v46 = vadd.f32 %v11844_v52, %v2884_v42  ;;  %v2886_v47 = vpop.f32.mrb[171].mxu1  ;;  %3148 = vmatmul.mubr.f32.gmra.mrb[170].mxu1 %v992_v36  ;;  %6384 = vmatprep.mubr.msk.f32.mxu0 %vm1094_vm0, %v1015_v37  ;;  %v1012_v42 = vld [vmem:[%s12494_s0 + $0x1f20] sm:$0xff]  ;;  %v1035_v43 = vld [vmem:[%s12494_s0 + $0x1fd8] sm:$0xff] }
 0x414   :  { %v5965_v49 = vadd.f32 %v5964_v45, %v5963_v35  ;;  %3152 = vmatprep.mubr.f32.mxu1 %v997_v40  ;;  %v1030_v40 = vld [vmem:[%s12494_s0 + $0x1fb0] sm:$0xff] }
 0x415   :  { %4745 = vst.msk [vmem:[%s12496_s2 + $0x5f8] sm:$0xff] %vm4553_vm1, %v4230_v46  ;;  %v5191_v52 = vsel %vm4553_vm1, %v4230_v46, 0.0  ;;  %v5520_v53 = vmul.f32 %v4230_v46, %v4230_v46  ;;  %v11954_v58 = vpop.f32.mrb[136].mxu0  ;;  %v1017_v46 = vld [vmem:[%s12494_s0 + $0x1f48] sm:$0xff] }
 0x416   :  { %v5192_v55 = vadd.f32 %v5191_v52, %v5190_v41  ;;  %v2889_v56 = vpop.f32.mrb[172].mxu1  ;;  %v4256_v57 = vpop.f32.mrb[137].mxu0  ;;  %4518 = vmatmul.mubr.f32.gmra.mrb[242].mxu0 %v1014_v48 }
 0x417   :  { %v5966_v59 = vsel %vm4553_vm1, %v5520_v53, 0.0  ;;  %v4235_v60 = vadd.f32 %v11866_v2, %v2889_v56  ;;  %v2891_v61 = vpop.f32.mrb[173].mxu1  ;;  %3153 = vmatmul.mubr.f32.gmra.mrb[172].mxu1 %v996_v50  ;;  %6385 = vmatprep.mubr.msk.f32.mxu0 %vm1094_vm0, %v1019_v51  ;;  %v1016_v56 = vld [vmem:[%s12494_s0 + $0x1f40] sm:$0xff]  ;;  %v1039_v57 = vld [vmem:[%s12494_s0 + $0x1ff8] sm:$0xff] }
 0x418   :  { %v5967_v63 = vadd.f32 %v5966_v59, %v5965_v49  ;;  %3157 = vmatprep.mubr.f32.mxu1 %v1001_v54  ;;  %v1034_v54 = vld [vmem:[%s12494_s0 + $0x1fd0] sm:$0xff] }
 0x419   :  { %4746 = vst.msk [vmem:[%s12496_s2 + $0x600] sm:$0xff] %vm4553_vm1, %v4235_v60  ;;  %v5193_v2 = vsel %vm4553_vm1, %v4235_v60, 0.0  ;;  %v5521_v4 = vmul.f32 %v4235_v60, %v4235_v60  ;;  %v11976_v6 = vpop.f32.mrb[138].mxu0  ;;  %v1021_v60 = vld [vmem:[%s12494_s0 + $0x1f68] sm:$0xff] }
 0x41a   :  { %v5194_v7 = vadd.f32 %v5193_v2, %v5192_v55  ;;  %v2894_v8 = vpop.f32.mrb[174].mxu1  ;;  %v4261_v9 = vpop.f32.mrb[139].mxu0  ;;  %4523 = vmatmul.mubr.f32.gmra.mrb[244].mxu0 %v1018_v62 }
 0x41b   :  { %v5968_v10 = vsel %vm4553_vm1, %v5521_v4, 0.0  ;;  %v4240_v11 = vadd.f32 %v11888_v17, %v2894_v8  ;;  %v2896_v12 = vpop.f32.mrb[175].mxu1  ;;  %3158 = vmatmul.mubr.f32.gmra.mrb[174].mxu1 %v1000_v0  ;;  %6386 = vmatprep.mubr.msk.f32.mxu0 %vm1094_vm0, %v1023_v1  ;;  %v1020_v8 = vld [vmem:[%s12494_s0 + $0x1f60] sm:$0xff] }
 0x41c   :  { %v5969_v14 = vadd.f32 %v5968_v10, %v5967_v63  ;;  %3162 = vmatprep.mubr.f32.mxu1 %v1005_v5  ;;  %v1038_v5 = vld [vmem:[%s12494_s0 + $0x1ff0] sm:$0xff]  ;;  %v1025_v10 = vld [vmem:[%s12494_s0 + $0x1f88] sm:$0xff] }
 0x41d   :  { %4747 = vst.msk [vmem:[%s12496_s2 + $0x608] sm:$0xff] %vm4553_vm1, %v4240_v11  ;;  %v5195_v17 = vsel %vm4553_vm1, %v4240_v11, 0.0  ;;  %v5522_v18 = vmul.f32 %v4240_v11, %v4240_v11  ;;  %v11998_v19 = vpop.f32.mrb[140].mxu0 }
 0x41e   :  { %v5196_v21 = vadd.f32 %v5195_v17, %v5194_v7  ;;  %v2899_v22 = vpop.f32.mrb[176].mxu1  ;;  %v4266_v23 = vpop.f32.mrb[141].mxu0  ;;  %4528 = vmatmul.mubr.f32.gmra.mrb[246].mxu0 %v1022_v13 }
 0x41f   :  { %v5970_v24 = vsel %vm4553_vm1, %v5522_v18, 0.0  ;;  %v4245_v25 = vadd.f32 %v11910_v31, %v2899_v22  ;;  %v2901_v26 = vpop.f32.mrb[177].mxu1  ;;  %3163 = vmatmul.mubr.f32.gmra.mrb[176].mxu1 %v1004_v15  ;;  %6387 = vmatprep.mubr.msk.f32.mxu0 %vm1094_vm0, %v1027_v16 }
 0x420   :  { %v5971_v28 = vadd.f32 %v5970_v24, %v5969_v14  ;;  %3167 = vmatprep.mubr.f32.mxu1 %v1009_v20  ;;  %v1024_v20 = vld [vmem:[%s12494_s0 + $0x1f80] sm:$0xff] }
 0x421   :  { %4748 = vst.msk [vmem:[%s12496_s2 + $0x610] sm:$0xff] %vm4553_vm1, %v4245_v25  ;;  %v5197_v31 = vsel %vm4553_vm1, %v4245_v25, 0.0  ;;  %v5523_v3 = vmul.f32 %v4245_v25, %v4245_v25  ;;  %v12020_v33 = vpop.f32.mrb[142].mxu0 }
 0x422   :  { %v5198_v34 = vadd.f32 %v5197_v31, %v5196_v21  ;;  %v2904_v35 = vpop.f32.mrb[178].mxu1  ;;  %v4271_v36 = vpop.f32.mrb[143].mxu0  ;;  %4533 = vmatmul.mubr.f32.gmra.mrb[248].mxu0 %v1026_v27  ;;  %v1028_v31 = vld [vmem:[%s12494_s0 + $0x1fa0] sm:$0xff] }
 0x423   :  { %v5972_v37 = vsel %vm4553_vm1, %v5523_v3, 0.0  ;;  %v4250_v38 = vadd.f32 %v11932_v44, %v2904_v35  ;;  %v2906_v39 = vpop.f32.mrb[179].mxu1  ;;  %3168 = vmatmul.mubr.f32.gmra.mrb[178].mxu1 %v1008_v29  ;;  %6388 = vmatprep.mubr.msk.f32.mxu0 %vm1094_vm0, %v1031_v30 }
 0x424   :  { %v5973_v41 = vadd.f32 %v5972_v37, %v5971_v28  ;;  %3172 = vmatprep.mubr.f32.mxu1 %v1013_v32 }
 0x425   :  { %4749 = vst.msk [vmem:[%s12496_s2 + $0x618] sm:$0xff] %vm4553_vm1, %v4250_v38  ;;  %v5199_v44 = vsel %vm4553_vm1, %v4250_v38, 0.0  ;;  %v5524_v45 = vmul.f32 %v4250_v38, %v4250_v38  ;;  %v12042_v47 = vpop.f32.mrb[144].mxu0 }
 0x426   :  { %v5200_v48 = vadd.f32 %v5199_v44, %v5198_v34  ;;  %v2909_v49 = vpop.f32.mrb[180].mxu1  ;;  %v4276_v50 = vpop.f32.mrb[145].mxu0  ;;  %4538 = vmatmul.mubr.f32.gmra.mrb[250].mxu0 %v1030_v40 }
 0x427   :  { %v5974_v51 = vsel %vm4553_vm1, %v5524_v45, 0.0  ;;  %v4255_v52 = vadd.f32 %v11954_v58, %v2909_v49  ;;  %v2911_v53 = vpop.f32.mrb[181].mxu1  ;;  %3173 = vmatmul.mubr.f32.gmra.mrb[180].mxu1 %v1012_v42  ;;  %6389 = vmatprep.mubr.msk.f32.mxu0 %vm1094_vm0, %v1035_v43  ;;  %v1032_v42 = vld [vmem:[%s12494_s0 + $0x1fc0] sm:$0xff]  ;;  %v1037_v45 = vld [vmem:[%s12494_s0 + $0x1fe8] sm:$0xff] }
 0x428   :  { %v5975_v55 = vadd.f32 %v5974_v51, %v5973_v41  ;;  %3177 = vmatprep.mubr.f32.mxu1 %v1017_v46 }
 0x429   :  { %4750 = vst.msk [vmem:[%s12496_s2 + $0x620] sm:$0xff] %vm4553_vm1, %v4255_v52  ;;  %v5201_v58 = vsel %vm4553_vm1, %v4255_v52, 0.0  ;;  %v5525_v59 = vmul.f32 %v4255_v52, %v4255_v52  ;;  %v12064_v61 = vpop.f32.mrb[146].mxu0 }
 0x42a   :  { %v5202_v62 = vadd.f32 %v5201_v58, %v5200_v48  ;;  %v2914_v63 = vpop.f32.mrb[182].mxu1  ;;  %v4281_v0 = vpop.f32.mrb[147].mxu0  ;;  %4543 = vmatmul.mubr.f32.gmra.mrb[252].mxu0 %v1034_v54  ;;  %v1036_v54 = vld [vmem:[%s12494_s0 + $0x1fe0] sm:$0xff] }
 0x42b   :  { %v5976_v1 = vsel %vm4553_vm1, %v5525_v59, 0.0  ;;  %v4260_v2 = vadd.f32 %v11976_v6, %v2914_v63  ;;  %v2916_v4 = vpop.f32.mrb[183].mxu1  ;;  %3178 = vmatmul.mubr.f32.gmra.mrb[182].mxu1 %v1016_v56  ;;  %6390 = vmatprep.mubr.msk.f32.mxu0 %vm1094_vm0, %v1039_v57 }
 0x42c   :  { %v5977_v7 = vadd.f32 %v5976_v1, %v5975_v55  ;;  %3182 = vmatprep.mubr.f32.mxu1 %v1021_v60 }
 0x42d   :  { %4751 = vst.msk [vmem:[%s12496_s2 + $0x628] sm:$0xff] %vm4553_vm1, %v4260_v2  ;;  %v5203_v6 = vsel %vm4553_vm1, %v4260_v2, 0.0  ;;  %v5526_v9 = vmul.f32 %v4260_v2, %v4260_v2  ;;  %v12083_v11 = vpop.f32.mrb[148].mxu0 }
 0x42e   :  { %v5204_v12 = vadd.f32 %v5203_v6, %v5202_v62  ;;  %v2919_v13 = vpop.f32.mrb[184].mxu1  ;;  %v4286_v14 = vpop.f32.mrb[149].mxu0  ;;  %4548 = vmatmul.mubr.f32.gmra.mrb[254].mxu0 %v1038_v5 }
 0x42f   :  { %v5978_v15 = vsel %vm4553_vm1, %v5526_v9, 0.0  ;;  %v4265_v16 = vadd.f32 %v11998_v19, %v2919_v13  ;;  %v2921_v17 = vpop.f32.mrb[185].mxu1  ;;  %3183 = vmatmul.mubr.f32.gmra.mrb[184].mxu1 %v1020_v8  ;;  %v1029_v19 = vld [vmem:[%s12494_s0 + $0x1fa8] sm:$0xff] }
 0x430   :  { %v5979_v18 = vadd.f32 %v5978_v15, %v5977_v7  ;;  %3187 = vmatprep.mubr.f32.mxu1 %v1025_v10 }
 0x431   :  { %4752 = vst.msk [vmem:[%s12496_s2 + $0x630] sm:$0xff] %vm4553_vm1, %v4265_v16  ;;  %v5205_v21 = vsel %vm4553_vm1, %v4265_v16, 0.0  ;;  %v5527_v22 = vmul.f32 %v4265_v16, %v4265_v16  ;;  %v4289_v23 = vpop.f32.mrb[150].mxu0 }
 0x432   :  { %v5206_v24 = vadd.f32 %v5205_v21, %v5204_v12  ;;  %v2924_v25 = vpop.f32.mrb[186].mxu1  ;;  %v4291_v26 = vpop.f32.mrb[151].mxu0 }
 0x433   :  { %v5980_v27 = vsel %vm4553_vm1, %v5527_v22, 0.0  ;;  %v4270_v28 = vadd.f32 %v12020_v33, %v2924_v25  ;;  %v2926_v29 = vpop.f32.mrb[187].mxu1  ;;  %3188 = vmatmul.mubr.f32.gmra.mrb[186].mxu1 %v1024_v20  ;;  %v1033_v33 = vld [vmem:[%s12494_s0 + $0x1fc8] sm:$0xff]  ;;  %s6735_s0 = scalar_lea.vmem %s6112_s12, 32 }
 0x434   :  { %v5981_v30 = vadd.f32 %v5980_v27, %v5979_v18  ;;  %3192 = vmatprep.mubr.f32.mxu1 %v1029_v19  ;;  %p6737_p2 = scmp.lt.s32.totalorder %s6735_s0, %s6731_s13 }
 0x435   :  { %4753 = vst.msk [vmem:[%s12496_s2 + $0x638] sm:$0xff] %vm4553_vm1, %v4270_v28  ;;  %v5207_v3 = vsel %vm4553_vm1, %v4270_v28, 0.0  ;;  %v5528_v32 = vmul.f32 %v4270_v28, %v4270_v28  ;;  %v4294_v34 = vpop.f32.mrb[152].mxu0 }
 0x436   :  { %v5208_v35 = vadd.f32 %v5207_v3, %v5206_v24  ;;  %v2929_v36 = vpop.f32.mrb[188].mxu1  ;;  %v4296_v37 = vpop.f32.mrb[153].mxu0  ;;  %p6738_p3 = por %p6737_p2, %p6736_p1 }
 0x437   :  { %v5982_v38 = vsel %vm4553_vm1, %v5528_v32, 0.0  ;;  %v4275_v39 = vadd.f32 %v12042_v47, %v2929_v36  ;;  %v2931_v40 = vpop.f32.mrb[189].mxu1  ;;  %3193 = vmatmul.mubr.f32.gmra.mrb[188].mxu1 %v1028_v31 }
 0x438   :  { %v5983_v41 = vadd.f32 %v5982_v38, %v5981_v30  ;;  %3197 = vmatprep.mubr.f32.mxu1 %v1033_v33  ;;  %p6739_p4 = pnand %p6738_p3, %p6732_p0 }
 0x439   :  { %4754 = vst.msk [vmem:[%s12496_s2 + $0x640] sm:$0xff] %vm4553_vm1, %v4275_v39  ;;  %v5209_v43 = vsel %vm4553_vm1, %v4275_v39, 0.0  ;;  %v5529_v44 = vmul.f32 %v4275_v39, %v4275_v39  ;;  %v4299_v46 = vpop.f32.mrb[154].mxu0 }
 0x43a   :  { %v5210_v47 = vadd.f32 %v5209_v43, %v5208_v35  ;;  %v2934_v48 = vpop.f32.mrb[190].mxu1  ;;  %v4301_v49 = vpop.f32.mrb[155].mxu0 }
 0x43b   :  { %v5984_v50 = vsel %vm4553_vm1, %v5529_v44, 0.0  ;;  %v4280_v51 = vadd.f32 %v12064_v61, %v2934_v48  ;;  %v2936_v52 = vpop.f32.mrb[191].mxu1  ;;  %3198 = vmatmul.mubr.f32.gmra.mrb[190].mxu1 %v1032_v42 }
 0x43c   :  { %v5985_v53 = vadd.f32 %v5984_v50, %v5983_v41  ;;  %3202 = vmatprep.mubr.f32.mxu1 %v1037_v45 }
 0x43d   :  { %4755 = vst.msk [vmem:[%s12496_s2 + $0x648] sm:$0xff] %vm4553_vm1, %v4280_v51  ;;  %v5211_v55 = vsel %vm4553_vm1, %v4280_v51, 0.0  ;;  %v5530_v56 = vmul.f32 %v4280_v51, %v4280_v51  ;;  %v4304_v57 = vpop.f32.mrb[156].mxu0 }
 0x43e   :  { %v5212_v58 = vadd.f32 %v5211_v55, %v5210_v47  ;;  %v2939_v59 = vpop.f32.mrb[192].mxu1  ;;  %v4306_v60 = vpop.f32.mrb[157].mxu0 }
 0x43f   :  { %v5986_v61 = vsel %vm4553_vm1, %v5530_v56, 0.0  ;;  %v4285_v62 = vadd.f32 %v12083_v11, %v2939_v59  ;;  %v2941_v63 = vpop.f32.mrb[193].mxu1  ;;  %3203 = vmatmul.mubr.f32.gmra.mrb[192].mxu1 %v1036_v54 }
 0x440   :  { %v5987_v0 = vadd.f32 %v5986_v61, %v5985_v53 }
 0x441   :  { %4756 = vst.msk [vmem:[%s12496_s2 + $0x650] sm:$0xff] %vm4553_vm1, %v4285_v62  ;;  %v5213_v1 = vsel %vm4553_vm1, %v4285_v62, 0.0  ;;  %v5531_v2 = vmul.f32 %v4285_v62, %v4285_v62  ;;  %v4309_v4 = vpop.f32.mrb[158].mxu0 }
 0x442   :  { %v5214_v5 = vadd.f32 %v5213_v1, %v5212_v58  ;;  %v2944_v7 = vpop.f32.mrb[194].mxu1  ;;  %v4311_v8 = vpop.f32.mrb[159].mxu0 }
 0x443   :  { %v5988_v6 = vsel %vm4553_vm1, %v5531_v2, 0.0  ;;  %v4290_v9 = vadd.f32 %v4289_v23, %v2944_v7  ;;  %v2946_v10 = vpop.f32.mrb[195].mxu1 }
 0x444   :  { %v5989_v11 = vadd.f32 %v5988_v6, %v5987_v0 }
 0x445   :  { %4757 = vst.msk [vmem:[%s12496_s2 + $0x658] sm:$0xff] %vm4553_vm1, %v4290_v9  ;;  %v5215_v12 = vsel %vm4553_vm1, %v4290_v9, 0.0  ;;  %v5532_v13 = vmul.f32 %v4290_v9, %v4290_v9  ;;  %v4314_v14 = vpop.f32.mrb[160].mxu0 }
 0x446   :  { %v5216_v15 = vadd.f32 %v5215_v12, %v5214_v5  ;;  %v2949_v16 = vpop.f32.mrb[196].mxu1  ;;  %v4316_v17 = vpop.f32.mrb[161].mxu0 }
 0x447   :  { %v5990_v18 = vsel %vm4553_vm1, %v5532_v13, 0.0  ;;  %v4295_v20 = vadd.f32 %v4294_v34, %v2949_v16  ;;  %v2951_v21 = vpop.f32.mrb[197].mxu1 }
 0x448   :  { %v5991_v22 = vadd.f32 %v5990_v18, %v5989_v11 }
 0x449   :  { %4758 = vst.msk [vmem:[%s12496_s2 + $0x660] sm:$0xff] %vm4553_vm1, %v4295_v20  ;;  %v5217_v19 = vsel %vm4553_vm1, %v4295_v20, 0.0  ;;  %v5533_v23 = vmul.f32 %v4295_v20, %v4295_v20  ;;  %v4319_v24 = vpop.f32.mrb[162].mxu0 }
 0x44a   :  { %v5218_v25 = vadd.f32 %v5217_v19, %v5216_v15  ;;  %v2954_v26 = vpop.f32.mrb[198].mxu1  ;;  %v4321_v27 = vpop.f32.mrb[163].mxu0 }
 0x44b   :  { %v5992_v28 = vsel %vm4553_vm1, %v5533_v23, 0.0  ;;  %v4300_v29 = vadd.f32 %v4299_v46, %v2954_v26  ;;  %v2956_v30 = vpop.f32.mrb[199].mxu1 }
 0x44c   :  { %v5993_v31 = vadd.f32 %v5992_v28, %v5991_v22 }
 0x44d   :  { %4759 = vst.msk [vmem:[%s12496_s2 + $0x668] sm:$0xff] %vm4553_vm1, %v4300_v29  ;;  %v5219_v3 = vsel %vm4553_vm1, %v4300_v29, 0.0  ;;  %v5534_v32 = vmul.f32 %v4300_v29, %v4300_v29  ;;  %v4324_v33 = vpop.f32.mrb[164].mxu0 }
 0x44e   :  { %v5220_v34 = vadd.f32 %v5219_v3, %v5218_v25  ;;  %v2959_v35 = vpop.f32.mrb[200].mxu1  ;;  %v4326_v36 = vpop.f32.mrb[165].mxu0 }
 0x44f   :  { %v5994_v37 = vsel %vm4553_vm1, %v5534_v32, 0.0  ;;  %v4305_v38 = vadd.f32 %v4304_v57, %v2959_v35  ;;  %v2961_v39 = vpop.f32.mrb[201].mxu1 }
 0x450   :  { %v5995_v40 = vadd.f32 %v5994_v37, %v5993_v31 }
 0x451   :  { %4760 = vst.msk [vmem:[%s12496_s2 + $0x670] sm:$0xff] %vm4553_vm1, %v4305_v38  ;;  %v5221_v41 = vsel %vm4553_vm1, %v4305_v38, 0.0  ;;  %v5535_v42 = vmul.f32 %v4305_v38, %v4305_v38  ;;  %v4329_v43 = vpop.f32.mrb[166].mxu0 }
 0x452   :  { %v5222_v44 = vadd.f32 %v5221_v41, %v5220_v34  ;;  %v2964_v45 = vpop.f32.mrb[202].mxu1  ;;  %v4331_v46 = vpop.f32.mrb[167].mxu0 }
 0x453   :  { %v5996_v47 = vsel %vm4553_vm1, %v5535_v42, 0.0  ;;  %v4310_v48 = vadd.f32 %v4309_v4, %v2964_v45  ;;  %v2966_v49 = vpop.f32.mrb[203].mxu1 }
 0x454   :  { %v5997_v50 = vadd.f32 %v5996_v47, %v5995_v40 }
 0x455   :  { %4761 = vst.msk [vmem:[%s12496_s2 + $0x678] sm:$0xff] %vm4553_vm1, %v4310_v48  ;;  %v5223_v51 = vsel %vm4553_vm1, %v4310_v48, 0.0  ;;  %v5536_v52 = vmul.f32 %v4310_v48, %v4310_v48  ;;  %v4334_v53 = vpop.f32.mrb[168].mxu0 }
 0x456   :  { %v5224_v54 = vadd.f32 %v5223_v51, %v5222_v44  ;;  %v2969_v55 = vpop.f32.mrb[204].mxu1  ;;  %v4336_v56 = vpop.f32.mrb[169].mxu0 }
 0x457   :  { %v5998_v57 = vsel %vm4553_vm1, %v5536_v52, 0.0  ;;  %v4315_v58 = vadd.f32 %v4314_v14, %v2969_v55  ;;  %v2971_v59 = vpop.f32.mrb[205].mxu1 }
 0x458   :  { %v5999_v60 = vadd.f32 %v5998_v57, %v5997_v50 }
 0x459   :  { %4762 = vst.msk [vmem:[%s12496_s2 + $0x680] sm:$0xff] %vm4553_vm1, %v4315_v58  ;;  %v5225_v61 = vsel %vm4553_vm1, %v4315_v58, 0.0  ;;  %v5537_v62 = vmul.f32 %v4315_v58, %v4315_v58  ;;  %v4339_v63 = vpop.f32.mrb[170].mxu0 }
 0x45a   :  { %v5226_v0 = vadd.f32 %v5225_v61, %v5224_v54  ;;  %v2974_v1 = vpop.f32.mrb[206].mxu1  ;;  %v4341_v2 = vpop.f32.mrb[171].mxu0 }
 0x45b   :  { %v6000_v4 = vsel %vm4553_vm1, %v5537_v62, 0.0  ;;  %v4320_v5 = vadd.f32 %v4319_v24, %v2974_v1  ;;  %v2976_v7 = vpop.f32.mrb[207].mxu1 }
 0x45c   :  { %v6001_v8 = vadd.f32 %v6000_v4, %v5999_v60 }
 0x45d   :  { %4763 = vst.msk [vmem:[%s12496_s2 + $0x688] sm:$0xff] %vm4553_vm1, %v4320_v5  ;;  %v5227_v6 = vsel %vm4553_vm1, %v4320_v5, 0.0  ;;  %v5538_v9 = vmul.f32 %v4320_v5, %v4320_v5  ;;  %v4344_v10 = vpop.f32.mrb[172].mxu0 }
 0x45e   :  { %v5228_v11 = vadd.f32 %v5227_v6, %v5226_v0  ;;  %v2979_v12 = vpop.f32.mrb[208].mxu1  ;;  %v4346_v13 = vpop.f32.mrb[173].mxu0 }
 0x45f   :  { %v6002_v14 = vsel %vm4553_vm1, %v5538_v9, 0.0  ;;  %v4325_v15 = vadd.f32 %v4324_v33, %v2979_v12  ;;  %v2981_v16 = vpop.f32.mrb[209].mxu1 }
 0x460   :  { %v6003_v17 = vadd.f32 %v6002_v14, %v6001_v8 }
 0x461   :  { %4764 = vst.msk [vmem:[%s12496_s2 + $0x690] sm:$0xff] %vm4553_vm1, %v4325_v15  ;;  %v5229_v18 = vsel %vm4553_vm1, %v4325_v15, 0.0  ;;  %v5539_v20 = vmul.f32 %v4325_v15, %v4325_v15  ;;  %v4349_v21 = vpop.f32.mrb[174].mxu0 }
 0x462   :  { %v5230_v22 = vadd.f32 %v5229_v18, %v5228_v11  ;;  %v2984_v19 = vpop.f32.mrb[210].mxu1  ;;  %v4351_v23 = vpop.f32.mrb[175].mxu0 }
 0x463   :  { %v6004_v24 = vsel %vm4553_vm1, %v5539_v20, 0.0  ;;  %v4330_v25 = vadd.f32 %v4329_v43, %v2984_v19  ;;  %v2986_v26 = vpop.f32.mrb[211].mxu1 }
 0x464   :  { %v6005_v27 = vadd.f32 %v6004_v24, %v6003_v17 }
 0x465   :  { %4765 = vst.msk [vmem:[%s12496_s2 + $0x698] sm:$0xff] %vm4553_vm1, %v4330_v25  ;;  %v5231_v28 = vsel %vm4553_vm1, %v4330_v25, 0.0  ;;  %v5540_v29 = vmul.f32 %v4330_v25, %v4330_v25  ;;  %v4354_v30 = vpop.f32.mrb[176].mxu0 }
 0x466   :  { %v5232_v31 = vadd.f32 %v5231_v28, %v5230_v22  ;;  %v2989_v3 = vpop.f32.mrb[212].mxu1  ;;  %v4356_v32 = vpop.f32.mrb[177].mxu0 }
 0x467   :  { %v6006_v33 = vsel %vm4553_vm1, %v5540_v29, 0.0  ;;  %v4335_v34 = vadd.f32 %v4334_v53, %v2989_v3  ;;  %v2991_v35 = vpop.f32.mrb[213].mxu1 }
 0x468   :  { %v6007_v36 = vadd.f32 %v6006_v33, %v6005_v27 }
 0x469   :  { %4766 = vst.msk [vmem:[%s12496_s2 + $0x6a0] sm:$0xff] %vm4553_vm1, %v4335_v34  ;;  %v5233_v37 = vsel %vm4553_vm1, %v4335_v34, 0.0  ;;  %v5541_v38 = vmul.f32 %v4335_v34, %v4335_v34  ;;  %v4359_v39 = vpop.f32.mrb[178].mxu0 }
 0x46a   :  { %v5234_v40 = vadd.f32 %v5233_v37, %v5232_v31  ;;  %v2994_v41 = vpop.f32.mrb[214].mxu1  ;;  %v4361_v42 = vpop.f32.mrb[179].mxu0 }
 0x46b   :  { %v6008_v43 = vsel %vm4553_vm1, %v5541_v38, 0.0  ;;  %v4340_v44 = vadd.f32 %v4339_v63, %v2994_v41  ;;  %v2996_v45 = vpop.f32.mrb[215].mxu1 }
 0x46c   :  { %v6009_v46 = vadd.f32 %v6008_v43, %v6007_v36 }
 0x46d   :  { %4767 = vst.msk [vmem:[%s12496_s2 + $0x6a8] sm:$0xff] %vm4553_vm1, %v4340_v44  ;;  %v5235_v47 = vsel %vm4553_vm1, %v4340_v44, 0.0  ;;  %v5542_v48 = vmul.f32 %v4340_v44, %v4340_v44  ;;  %v4364_v49 = vpop.f32.mrb[180].mxu0 }
 0x46e   :  { %v5236_v50 = vadd.f32 %v5235_v47, %v5234_v40  ;;  %v2999_v51 = vpop.f32.mrb[216].mxu1  ;;  %v4366_v52 = vpop.f32.mrb[181].mxu0 }
 0x46f   :  { %v6010_v53 = vsel %vm4553_vm1, %v5542_v48, 0.0  ;;  %v4345_v54 = vadd.f32 %v4344_v10, %v2999_v51  ;;  %v3001_v55 = vpop.f32.mrb[217].mxu1 }
 0x470   :  { %v6011_v56 = vadd.f32 %v6010_v53, %v6009_v46 }
 0x471   :  { %4768 = vst.msk [vmem:[%s12496_s2 + $0x6b0] sm:$0xff] %vm4553_vm1, %v4345_v54  ;;  %v5237_v57 = vsel %vm4553_vm1, %v4345_v54, 0.0  ;;  %v5543_v58 = vmul.f32 %v4345_v54, %v4345_v54  ;;  %v4369_v59 = vpop.f32.mrb[182].mxu0 }
 0x472   :  { %v5238_v60 = vadd.f32 %v5237_v57, %v5236_v50  ;;  %v3004_v61 = vpop.f32.mrb[218].mxu1  ;;  %v4371_v62 = vpop.f32.mrb[183].mxu0 }
 0x473   :  { %v6012_v63 = vsel %vm4553_vm1, %v5543_v58, 0.0  ;;  %v4350_v0 = vadd.f32 %v4349_v21, %v3004_v61  ;;  %v3006_v1 = vpop.f32.mrb[219].mxu1 }
 0x474   :  { %v6013_v2 = vadd.f32 %v6012_v63, %v6011_v56 }
 0x475   :  { %4769 = vst.msk [vmem:[%s12496_s2 + $0x6b8] sm:$0xff] %vm4553_vm1, %v4350_v0  ;;  %v5239_v4 = vsel %vm4553_vm1, %v4350_v0, 0.0  ;;  %v5544_v5 = vmul.f32 %v4350_v0, %v4350_v0  ;;  %v4374_v7 = vpop.f32.mrb[184].mxu0 }
 0x476   :  { %v5240_v8 = vadd.f32 %v5239_v4, %v5238_v60  ;;  %v3009_v6 = vpop.f32.mrb[220].mxu1  ;;  %v4376_v9 = vpop.f32.mrb[185].mxu0 }
 0x477   :  { %v6014_v10 = vsel %vm4553_vm1, %v5544_v5, 0.0  ;;  %v4355_v11 = vadd.f32 %v4354_v30, %v3009_v6  ;;  %v3011_v12 = vpop.f32.mrb[221].mxu1 }
 0x478   :  { %v6015_v13 = vadd.f32 %v6014_v10, %v6013_v2 }
 0x479   :  { %4770 = vst.msk [vmem:[%s12496_s2 + $0x6c0] sm:$0xff] %vm4553_vm1, %v4355_v11  ;;  %v5241_v14 = vsel %vm4553_vm1, %v4355_v11, 0.0  ;;  %v5545_v15 = vmul.f32 %v4355_v11, %v4355_v11  ;;  %v4379_v16 = vpop.f32.mrb[186].mxu0 }
 0x47a   :  { %v5242_v17 = vadd.f32 %v5241_v14, %v5240_v8  ;;  %v3014_v18 = vpop.f32.mrb[222].mxu1  ;;  %v4381_v20 = vpop.f32.mrb[187].mxu0 }
 0x47b   :  { %v6016_v21 = vsel %vm4553_vm1, %v5545_v15, 0.0  ;;  %v4360_v22 = vadd.f32 %v4359_v39, %v3014_v18  ;;  %v3016_v19 = vpop.f32.mrb[223].mxu1 }
 0x47c   :  { %v6017_v23 = vadd.f32 %v6016_v21, %v6015_v13 }
 0x47d   :  { %4771 = vst.msk [vmem:[%s12496_s2 + $0x6c8] sm:$0xff] %vm4553_vm1, %v4360_v22  ;;  %v5243_v24 = vsel %vm4553_vm1, %v4360_v22, 0.0  ;;  %v5546_v25 = vmul.f32 %v4360_v22, %v4360_v22  ;;  %v4384_v26 = vpop.f32.mrb[188].mxu0 }
 0x47e   :  { %v5244_v27 = vadd.f32 %v5243_v24, %v5242_v17  ;;  %v3019_v28 = vpop.f32.mrb[224].mxu1  ;;  %v4386_v29 = vpop.f32.mrb[189].mxu0 }
 0x47f   :  { %v6018_v30 = vsel %vm4553_vm1, %v5546_v25, 0.0  ;;  %v4365_v31 = vadd.f32 %v4364_v49, %v3019_v28  ;;  %v3021_v3 = vpop.f32.mrb[225].mxu1 }
 0x480   :  { %v6019_v32 = vadd.f32 %v6018_v30, %v6017_v23 }
 0x481   :  { %4772 = vst.msk [vmem:[%s12496_s2 + $0x6d0] sm:$0xff] %vm4553_vm1, %v4365_v31  ;;  %v5245_v33 = vsel %vm4553_vm1, %v4365_v31, 0.0  ;;  %v5547_v34 = vmul.f32 %v4365_v31, %v4365_v31  ;;  %v4389_v35 = vpop.f32.mrb[190].mxu0 }
 0x482   :  { %v5246_v36 = vadd.f32 %v5245_v33, %v5244_v27  ;;  %v3024_v37 = vpop.f32.mrb[226].mxu1  ;;  %v4391_v38 = vpop.f32.mrb[191].mxu0 }
 0x483   :  { %v6020_v39 = vsel %vm4553_vm1, %v5547_v34, 0.0  ;;  %v4370_v40 = vadd.f32 %v4369_v59, %v3024_v37  ;;  %v3026_v41 = vpop.f32.mrb[227].mxu1 }
 0x484   :  { %v6021_v42 = vadd.f32 %v6020_v39, %v6019_v32 }
 0x485   :  { %4773 = vst.msk [vmem:[%s12496_s2 + $0x6d8] sm:$0xff] %vm4553_vm1, %v4370_v40  ;;  %v5247_v43 = vsel %vm4553_vm1, %v4370_v40, 0.0  ;;  %v5548_v44 = vmul.f32 %v4370_v40, %v4370_v40  ;;  %v4394_v45 = vpop.f32.mrb[192].mxu0 }
 0x486   :  { %v5248_v46 = vadd.f32 %v5247_v43, %v5246_v36  ;;  %v3029_v47 = vpop.f32.mrb[228].mxu1  ;;  %v4396_v48 = vpop.f32.mrb[193].mxu0 }
 0x487   :  { %v6022_v49 = vsel %vm4553_vm1, %v5548_v44, 0.0  ;;  %v4375_v50 = vadd.f32 %v4374_v7, %v3029_v47  ;;  %v3031_v51 = vpop.f32.mrb[229].mxu1 }
 0x488   :  { %v6023_v52 = vadd.f32 %v6022_v49, %v6021_v42 }
 0x489   :  { %4774 = vst.msk [vmem:[%s12496_s2 + $0x6e0] sm:$0xff] %vm4553_vm1, %v4375_v50  ;;  %v5249_v53 = vsel %vm4553_vm1, %v4375_v50, 0.0  ;;  %v5549_v54 = vmul.f32 %v4375_v50, %v4375_v50  ;;  %v4399_v55 = vpop.f32.mrb[194].mxu0 }
 0x48a   :  { %v5250_v56 = vadd.f32 %v5249_v53, %v5248_v46  ;;  %v3034_v57 = vpop.f32.mrb[230].mxu1  ;;  %v4401_v58 = vpop.f32.mrb[195].mxu0 }
 0x48b   :  { %v6024_v59 = vsel %vm4553_vm1, %v5549_v54, 0.0  ;;  %v4380_v60 = vadd.f32 %v4379_v16, %v3034_v57  ;;  %v3036_v61 = vpop.f32.mrb[231].mxu1 }
 0x48c   :  { %v6025_v62 = vadd.f32 %v6024_v59, %v6023_v52 }
 0x48d   :  { %4775 = vst.msk [vmem:[%s12496_s2 + $0x6e8] sm:$0xff] %vm4553_vm1, %v4380_v60  ;;  %v5251_v63 = vsel %vm4553_vm1, %v4380_v60, 0.0  ;;  %v5550_v0 = vmul.f32 %v4380_v60, %v4380_v60  ;;  %v4404_v1 = vpop.f32.mrb[196].mxu0 }
 0x48e   :  { %v5252_v2 = vadd.f32 %v5251_v63, %v5250_v56  ;;  %v3039_v4 = vpop.f32.mrb[232].mxu1  ;;  %v4406_v5 = vpop.f32.mrb[197].mxu0 }
 0x48f   :  { %v6026_v7 = vsel %vm4553_vm1, %v5550_v0, 0.0  ;;  %v4385_v8 = vadd.f32 %v4384_v26, %v3039_v4  ;;  %v3041_v6 = vpop.f32.mrb[233].mxu1 }
 0x490   :  { %v6027_v9 = vadd.f32 %v6026_v7, %v6025_v62 }
 0x491   :  { %4776 = vst.msk [vmem:[%s12496_s2 + $0x6f0] sm:$0xff] %vm4553_vm1, %v4385_v8  ;;  %v5253_v10 = vsel %vm4553_vm1, %v4385_v8, 0.0  ;;  %v5551_v11 = vmul.f32 %v4385_v8, %v4385_v8  ;;  %v4409_v12 = vpop.f32.mrb[198].mxu0 }
 0x492   :  { %v5254_v13 = vadd.f32 %v5253_v10, %v5252_v2  ;;  %v3044_v14 = vpop.f32.mrb[234].mxu1  ;;  %v4411_v15 = vpop.f32.mrb[199].mxu0 }
 0x493   :  { %v6028_v16 = vsel %vm4553_vm1, %v5551_v11, 0.0  ;;  %v4390_v17 = vadd.f32 %v4389_v35, %v3044_v14  ;;  %v3046_v18 = vpop.f32.mrb[235].mxu1 }
 0x494   :  { %v6029_v20 = vadd.f32 %v6028_v16, %v6027_v9 }
 0x495   :  { %4777 = vst.msk [vmem:[%s12496_s2 + $0x6f8] sm:$0xff] %vm4553_vm1, %v4390_v17  ;;  %v5255_v21 = vsel %vm4553_vm1, %v4390_v17, 0.0  ;;  %v5552_v22 = vmul.f32 %v4390_v17, %v4390_v17  ;;  %v4414_v19 = vpop.f32.mrb[200].mxu0 }
 0x496   :  { %v5256_v23 = vadd.f32 %v5255_v21, %v5254_v13  ;;  %v3049_v24 = vpop.f32.mrb[236].mxu1  ;;  %v4416_v25 = vpop.f32.mrb[201].mxu0 }
 0x497   :  { %v6030_v26 = vsel %vm4553_vm1, %v5552_v22, 0.0  ;;  %v4395_v27 = vadd.f32 %v4394_v45, %v3049_v24  ;;  %v3051_v28 = vpop.f32.mrb[237].mxu1 }
 0x498   :  { %v6031_v29 = vadd.f32 %v6030_v26, %v6029_v20 }
 0x499   :  { %4778 = vst.msk [vmem:[%s12496_s2 + $0x700] sm:$0xff] %vm4553_vm1, %v4395_v27  ;;  %v5257_v30 = vsel %vm4553_vm1, %v4395_v27, 0.0  ;;  %v5553_v31 = vmul.f32 %v4395_v27, %v4395_v27  ;;  %v4419_v3 = vpop.f32.mrb[202].mxu0 }
 0x49a   :  { %v5258_v32 = vadd.f32 %v5257_v30, %v5256_v23  ;;  %v3054_v33 = vpop.f32.mrb[238].mxu1  ;;  %v4421_v34 = vpop.f32.mrb[203].mxu0 }
 0x49b   :  { %v6032_v35 = vsel %vm4553_vm1, %v5553_v31, 0.0  ;;  %v4400_v36 = vadd.f32 %v4399_v55, %v3054_v33  ;;  %v3056_v37 = vpop.f32.mrb[239].mxu1 }
 0x49c   :  { %v6033_v38 = vadd.f32 %v6032_v35, %v6031_v29 }
 0x49d   :  { %4779 = vst.msk [vmem:[%s12496_s2 + $0x708] sm:$0xff] %vm4553_vm1, %v4400_v36  ;;  %v5259_v39 = vsel %vm4553_vm1, %v4400_v36, 0.0  ;;  %v5554_v40 = vmul.f32 %v4400_v36, %v4400_v36  ;;  %v4424_v41 = vpop.f32.mrb[204].mxu0 }
 0x49e   :  { %v5260_v42 = vadd.f32 %v5259_v39, %v5258_v32  ;;  %v3059_v43 = vpop.f32.mrb[240].mxu1  ;;  %v4426_v44 = vpop.f32.mrb[205].mxu0 }
 0x49f   :  { %v6034_v45 = vsel %vm4553_vm1, %v5554_v40, 0.0  ;;  %v4405_v46 = vadd.f32 %v4404_v1, %v3059_v43  ;;  %v3061_v47 = vpop.f32.mrb[241].mxu1 }
 0x4a0   :  { %v6035_v48 = vadd.f32 %v6034_v45, %v6033_v38 }
 0x4a1   :  { %4780 = vst.msk [vmem:[%s12496_s2 + $0x710] sm:$0xff] %vm4553_vm1, %v4405_v46  ;;  %v5261_v49 = vsel %vm4553_vm1, %v4405_v46, 0.0  ;;  %v5555_v50 = vmul.f32 %v4405_v46, %v4405_v46  ;;  %v4429_v51 = vpop.f32.mrb[206].mxu0 }
 0x4a2   :  { %v5262_v52 = vadd.f32 %v5261_v49, %v5260_v42  ;;  %v3064_v53 = vpop.f32.mrb[242].mxu1  ;;  %v4431_v54 = vpop.f32.mrb[207].mxu0 }
 0x4a3   :  { %v6036_v55 = vsel %vm4553_vm1, %v5555_v50, 0.0  ;;  %v4410_v56 = vadd.f32 %v4409_v12, %v3064_v53  ;;  %v3066_v57 = vpop.f32.mrb[243].mxu1 }
 0x4a4   :  { %v6037_v58 = vadd.f32 %v6036_v55, %v6035_v48 }
 0x4a5   :  { %4781 = vst.msk [vmem:[%s12496_s2 + $0x718] sm:$0xff] %vm4553_vm1, %v4410_v56  ;;  %v5263_v59 = vsel %vm4553_vm1, %v4410_v56, 0.0  ;;  %v5556_v60 = vmul.f32 %v4410_v56, %v4410_v56  ;;  %v4434_v61 = vpop.f32.mrb[208].mxu0 }
 0x4a6   :  { %v5264_v62 = vadd.f32 %v5263_v59, %v5262_v52  ;;  %v3069_v63 = vpop.f32.mrb[244].mxu1  ;;  %v4436_v0 = vpop.f32.mrb[209].mxu0 }
 0x4a7   :  { %v6038_v1 = vsel %vm4553_vm1, %v5556_v60, 0.0  ;;  %v4415_v2 = vadd.f32 %v4414_v19, %v3069_v63  ;;  %v3071_v4 = vpop.f32.mrb[245].mxu1 }
 0x4a8   :  { %v6039_v5 = vadd.f32 %v6038_v1, %v6037_v58 }
 0x4a9   :  { %4782 = vst.msk [vmem:[%s12496_s2 + $0x720] sm:$0xff] %vm4553_vm1, %v4415_v2  ;;  %v5265_v7 = vsel %vm4553_vm1, %v4415_v2, 0.0  ;;  %v5557_v8 = vmul.f32 %v4415_v2, %v4415_v2  ;;  %v4439_v6 = vpop.f32.mrb[210].mxu0 }
 0x4aa   :  { %v5266_v9 = vadd.f32 %v5265_v7, %v5264_v62  ;;  %v3074_v10 = vpop.f32.mrb[246].mxu1  ;;  %v4441_v11 = vpop.f32.mrb[211].mxu0 }
 0x4ab   :  { %v6040_v12 = vsel %vm4553_vm1, %v5557_v8, 0.0  ;;  %v4420_v13 = vadd.f32 %v4419_v3, %v3074_v10  ;;  %v3076_v14 = vpop.f32.mrb[247].mxu1 }
 0x4ac   :  { %v6041_v15 = vadd.f32 %v6040_v12, %v6039_v5 }
 0x4ad   :  { %4783 = vst.msk [vmem:[%s12496_s2 + $0x728] sm:$0xff] %vm4553_vm1, %v4420_v13  ;;  %v5267_v16 = vsel %vm4553_vm1, %v4420_v13, 0.0  ;;  %v5558_v17 = vmul.f32 %v4420_v13, %v4420_v13  ;;  %v4444_v18 = vpop.f32.mrb[212].mxu0 }
 0x4ae   :  { %v5268_v20 = vadd.f32 %v5267_v16, %v5266_v9  ;;  %v3079_v21 = vpop.f32.mrb[248].mxu1  ;;  %v4446_v22 = vpop.f32.mrb[213].mxu0 }
 0x4af   :  { %v6042_v19 = vsel %vm4553_vm1, %v5558_v17, 0.0  ;;  %v4425_v23 = vadd.f32 %v4424_v41, %v3079_v21  ;;  %v3081_v24 = vpop.f32.mrb[249].mxu1 }
 0x4b0   :  { %v6043_v25 = vadd.f32 %v6042_v19, %v6041_v15 }
 0x4b1   :  { %4784 = vst.msk [vmem:[%s12496_s2 + $0x730] sm:$0xff] %vm4553_vm1, %v4425_v23  ;;  %v5269_v26 = vsel %vm4553_vm1, %v4425_v23, 0.0  ;;  %v5559_v27 = vmul.f32 %v4425_v23, %v4425_v23  ;;  %v4449_v28 = vpop.f32.mrb[214].mxu0 }
 0x4b2   :  { %v5270_v29 = vadd.f32 %v5269_v26, %v5268_v20  ;;  %v3084_v30 = vpop.f32.mrb[250].mxu1  ;;  %v4451_v31 = vpop.f32.mrb[215].mxu0 }
 0x4b3   :  { %v6044_v3 = vsel %vm4553_vm1, %v5559_v27, 0.0  ;;  %v4430_v32 = vadd.f32 %v4429_v51, %v3084_v30  ;;  %v3086_v33 = vpop.f32.mrb[251].mxu1 }
 0x4b4   :  { %v6045_v34 = vadd.f32 %v6044_v3, %v6043_v25 }
 0x4b5   :  { %4785 = vst.msk [vmem:[%s12496_s2 + $0x738] sm:$0xff] %vm4553_vm1, %v4430_v32  ;;  %v5271_v35 = vsel %vm4553_vm1, %v4430_v32, 0.0  ;;  %v5560_v36 = vmul.f32 %v4430_v32, %v4430_v32  ;;  %v4454_v37 = vpop.f32.mrb[216].mxu0 }
 0x4b6   :  { %v5272_v38 = vadd.f32 %v5271_v35, %v5270_v29  ;;  %v3089_v39 = vpop.f32.mrb[252].mxu1  ;;  %v4456_v40 = vpop.f32.mrb[217].mxu0 }
 0x4b7   :  { %v6046_v41 = vsel %vm4553_vm1, %v5560_v36, 0.0  ;;  %v4435_v42 = vadd.f32 %v4434_v61, %v3089_v39  ;;  %v3091_v43 = vpop.f32.mrb[253].mxu1 }
 0x4b8   :  { %v6047_v44 = vadd.f32 %v6046_v41, %v6045_v34 }
 0x4b9   :  { %4786 = vst.msk [vmem:[%s12496_s2 + $0x740] sm:$0xff] %vm4553_vm1, %v4435_v42  ;;  %v5273_v45 = vsel %vm4553_vm1, %v4435_v42, 0.0  ;;  %v5561_v46 = vmul.f32 %v4435_v42, %v4435_v42  ;;  %v4459_v47 = vpop.f32.mrb[218].mxu0 }
 0x4ba   :  { %v5274_v48 = vadd.f32 %v5273_v45, %v5272_v38  ;;  %v3094_v49 = vpop.f32.mrb[254].mxu1  ;;  %v4461_v50 = vpop.f32.mrb[219].mxu0 }
 0x4bb   :  { %v6048_v51 = vsel %vm4553_vm1, %v5561_v46, 0.0  ;;  %v4440_v52 = vadd.f32 %v4439_v6, %v3094_v49  ;;  %v3096_v53 = vpop.f32.mrb[255].mxu1 }
 0x4bc   :  { %v6049_v54 = vadd.f32 %v6048_v51, %v6047_v44 }
 0x4bd   :  { %4787 = vst.msk [vmem:[%s12496_s2 + $0x748] sm:$0xff] %vm4553_vm1, %v4440_v52  ;;  %v5275_v55 = vsel %vm4553_vm1, %v4440_v52, 0.0  ;;  %v5562_v56 = vmul.f32 %v4440_v52, %v4440_v52  ;;  %v4464_v57 = vpop.f32.mrb[220].mxu0 }
 0x4be   :  { %v5276_v58 = vadd.f32 %v5275_v55, %v5274_v48  ;;  %v3099_v59 = vpop.f32.mrb[150].mxu1  ;;  %v4466_v60 = vpop.f32.mrb[221].mxu0 }
 0x4bf   :  { %v6050_v61 = vsel %vm4553_vm1, %v5562_v56, 0.0  ;;  %v4445_v62 = vadd.f32 %v4444_v18, %v3099_v59  ;;  %v3101_v63 = vpop.f32.mrb[151].mxu1 }
 0x4c0   :  { %v6051_v0 = vadd.f32 %v6050_v61, %v6049_v54 }
 0x4c1   :  { %4788 = vst.msk [vmem:[%s12496_s2 + $0x750] sm:$0xff] %vm4553_vm1, %v4445_v62  ;;  %v5277_v1 = vsel %vm4553_vm1, %v4445_v62, 0.0  ;;  %v5563_v2 = vmul.f32 %v4445_v62, %v4445_v62  ;;  %v4469_v4 = vpop.f32.mrb[222].mxu0 }
 0x4c2   :  { %v5278_v5 = vadd.f32 %v5277_v1, %v5276_v58  ;;  %v3104_v7 = vpop.f32.mrb[152].mxu1  ;;  %v4471_v8 = vpop.f32.mrb[223].mxu0 }
 0x4c3   :  { %v6052_v6 = vsel %vm4553_vm1, %v5563_v2, 0.0  ;;  %v4450_v9 = vadd.f32 %v4449_v28, %v3104_v7  ;;  %v3106_v10 = vpop.f32.mrb[153].mxu1 }
 0x4c4   :  { %v6053_v11 = vadd.f32 %v6052_v6, %v6051_v0 }
 0x4c5   :  { %4789 = vst.msk [vmem:[%s12496_s2 + $0x758] sm:$0xff] %vm4553_vm1, %v4450_v9  ;;  %v5279_v12 = vsel %vm4553_vm1, %v4450_v9, 0.0  ;;  %v5564_v13 = vmul.f32 %v4450_v9, %v4450_v9  ;;  %v4474_v14 = vpop.f32.mrb[224].mxu0 }
 0x4c6   :  { %v5280_v15 = vadd.f32 %v5279_v12, %v5278_v5  ;;  %v3109_v16 = vpop.f32.mrb[154].mxu1  ;;  %v4476_v17 = vpop.f32.mrb[225].mxu0 }
 0x4c7   :  { %v6054_v18 = vsel %vm4553_vm1, %v5564_v13, 0.0  ;;  %v4455_v20 = vadd.f32 %v4454_v37, %v3109_v16  ;;  %v3111_v21 = vpop.f32.mrb[155].mxu1 }
 0x4c8   :  { %v6055_v22 = vadd.f32 %v6054_v18, %v6053_v11 }
 0x4c9   :  { %4790 = vst.msk [vmem:[%s12496_s2 + $0x760] sm:$0xff] %vm4553_vm1, %v4455_v20  ;;  %v5281_v19 = vsel %vm4553_vm1, %v4455_v20, 0.0  ;;  %v5565_v23 = vmul.f32 %v4455_v20, %v4455_v20  ;;  %v4479_v24 = vpop.f32.mrb[226].mxu0 }
 0x4ca   :  { %v5282_v25 = vadd.f32 %v5281_v19, %v5280_v15  ;;  %v3114_v26 = vpop.f32.mrb[156].mxu1  ;;  %v4481_v27 = vpop.f32.mrb[227].mxu0 }
 0x4cb   :  { %v6056_v28 = vsel %vm4553_vm1, %v5565_v23, 0.0  ;;  %v4460_v29 = vadd.f32 %v4459_v47, %v3114_v26  ;;  %v3116_v30 = vpop.f32.mrb[157].mxu1 }
 0x4cc   :  { %v6057_v31 = vadd.f32 %v6056_v28, %v6055_v22 }
 0x4cd   :  { %4791 = vst.msk [vmem:[%s12496_s2 + $0x768] sm:$0xff] %vm4553_vm1, %v4460_v29  ;;  %v5283_v3 = vsel %vm4553_vm1, %v4460_v29, 0.0  ;;  %v5566_v32 = vmul.f32 %v4460_v29, %v4460_v29  ;;  %v4484_v33 = vpop.f32.mrb[228].mxu0 }
 0x4ce   :  { %v5284_v34 = vadd.f32 %v5283_v3, %v5282_v25  ;;  %v3119_v35 = vpop.f32.mrb[158].mxu1  ;;  %v4486_v36 = vpop.f32.mrb[229].mxu0 }
 0x4cf   :  { %v6058_v37 = vsel %vm4553_vm1, %v5566_v32, 0.0  ;;  %v4465_v38 = vadd.f32 %v4464_v57, %v3119_v35  ;;  %v3121_v39 = vpop.f32.mrb[159].mxu1 }
 0x4d0   :  { %v6059_v40 = vadd.f32 %v6058_v37, %v6057_v31 }
 0x4d1   :  { %4792 = vst.msk [vmem:[%s12496_s2 + $0x770] sm:$0xff] %vm4553_vm1, %v4465_v38  ;;  %v5285_v41 = vsel %vm4553_vm1, %v4465_v38, 0.0  ;;  %v5567_v42 = vmul.f32 %v4465_v38, %v4465_v38  ;;  %v4489_v43 = vpop.f32.mrb[230].mxu0 }
 0x4d2   :  { %v5286_v44 = vadd.f32 %v5285_v41, %v5284_v34  ;;  %v3124_v45 = vpop.f32.mrb[160].mxu1  ;;  %v4491_v46 = vpop.f32.mrb[231].mxu0 }
 0x4d3   :  { %v6060_v47 = vsel %vm4553_vm1, %v5567_v42, 0.0  ;;  %v4470_v48 = vadd.f32 %v4469_v4, %v3124_v45  ;;  %v3126_v49 = vpop.f32.mrb[161].mxu1 }
 0x4d4   :  { %v6061_v50 = vadd.f32 %v6060_v47, %v6059_v40 }
 0x4d5   :  { %4793 = vst.msk [vmem:[%s12496_s2 + $0x778] sm:$0xff] %vm4553_vm1, %v4470_v48  ;;  %v5287_v51 = vsel %vm4553_vm1, %v4470_v48, 0.0  ;;  %v5568_v52 = vmul.f32 %v4470_v48, %v4470_v48  ;;  %v4494_v53 = vpop.f32.mrb[232].mxu0 }
 0x4d6   :  { %v5288_v54 = vadd.f32 %v5287_v51, %v5286_v44  ;;  %v3129_v55 = vpop.f32.mrb[162].mxu1  ;;  %v4496_v56 = vpop.f32.mrb[233].mxu0 }
 0x4d7   :  { %v6062_v57 = vsel %vm4553_vm1, %v5568_v52, 0.0  ;;  %v4475_v58 = vadd.f32 %v4474_v14, %v3129_v55  ;;  %v3131_v59 = vpop.f32.mrb[163].mxu1 }
 0x4d8   :  { %v6063_v60 = vadd.f32 %v6062_v57, %v6061_v50 }
 0x4d9   :  { %4794 = vst.msk [vmem:[%s12496_s2 + $0x780] sm:$0xff] %vm4553_vm1, %v4475_v58  ;;  %v5289_v61 = vsel %vm4553_vm1, %v4475_v58, 0.0  ;;  %v5569_v62 = vmul.f32 %v4475_v58, %v4475_v58  ;;  %v4499_v63 = vpop.f32.mrb[234].mxu0 }
 0x4da   :  { %v5290_v0 = vadd.f32 %v5289_v61, %v5288_v54  ;;  %v3134_v1 = vpop.f32.mrb[164].mxu1  ;;  %v4501_v2 = vpop.f32.mrb[235].mxu0 }
 0x4db   :  { %v6064_v4 = vsel %vm4553_vm1, %v5569_v62, 0.0  ;;  %v4480_v5 = vadd.f32 %v4479_v24, %v3134_v1  ;;  %v3136_v7 = vpop.f32.mrb[165].mxu1 }
 0x4dc   :  { %v6065_v8 = vadd.f32 %v6064_v4, %v6063_v60 }
 0x4dd   :  { %4795 = vst.msk [vmem:[%s12496_s2 + $0x788] sm:$0xff] %vm4553_vm1, %v4480_v5  ;;  %v5291_v6 = vsel %vm4553_vm1, %v4480_v5, 0.0  ;;  %v5570_v9 = vmul.f32 %v4480_v5, %v4480_v5  ;;  %v4504_v10 = vpop.f32.mrb[236].mxu0 }
 0x4de   :  { %v5292_v11 = vadd.f32 %v5291_v6, %v5290_v0  ;;  %v3139_v12 = vpop.f32.mrb[166].mxu1  ;;  %v4506_v13 = vpop.f32.mrb[237].mxu0 }
 0x4df   :  { %v6066_v14 = vsel %vm4553_vm1, %v5570_v9, 0.0  ;;  %v4485_v15 = vadd.f32 %v4484_v33, %v3139_v12  ;;  %v3141_v16 = vpop.f32.mrb[167].mxu1 }
 0x4e0   :  { %v6067_v17 = vadd.f32 %v6066_v14, %v6065_v8 }
 0x4e1   :  { %4796 = vst.msk [vmem:[%s12496_s2 + $0x790] sm:$0xff] %vm4553_vm1, %v4485_v15  ;;  %v5293_v18 = vsel %vm4553_vm1, %v4485_v15, 0.0  ;;  %v5571_v20 = vmul.f32 %v4485_v15, %v4485_v15  ;;  %v4509_v21 = vpop.f32.mrb[238].mxu0 }
 0x4e2   :  { %v5294_v22 = vadd.f32 %v5293_v18, %v5292_v11  ;;  %v3144_v19 = vpop.f32.mrb[168].mxu1  ;;  %v4511_v23 = vpop.f32.mrb[239].mxu0 }
 0x4e3   :  { %v6068_v24 = vsel %vm4553_vm1, %v5571_v20, 0.0  ;;  %v4490_v25 = vadd.f32 %v4489_v43, %v3144_v19  ;;  %v3146_v26 = vpop.f32.mrb[169].mxu1 }
 0x4e4   :  { %v6069_v27 = vadd.f32 %v6068_v24, %v6067_v17 }
 0x4e5   :  { %4797 = vst.msk [vmem:[%s12496_s2 + $0x798] sm:$0xff] %vm4553_vm1, %v4490_v25  ;;  %v5295_v28 = vsel %vm4553_vm1, %v4490_v25, 0.0  ;;  %v5572_v29 = vmul.f32 %v4490_v25, %v4490_v25  ;;  %v4514_v30 = vpop.f32.mrb[240].mxu0 }
 0x4e6   :  { %v5296_v31 = vadd.f32 %v5295_v28, %v5294_v22  ;;  %v3149_v3 = vpop.f32.mrb[170].mxu1  ;;  %v4516_v32 = vpop.f32.mrb[241].mxu0 }
 0x4e7   :  { %v6070_v33 = vsel %vm4553_vm1, %v5572_v29, 0.0  ;;  %v4495_v34 = vadd.f32 %v4494_v53, %v3149_v3  ;;  %v3151_v35 = vpop.f32.mrb[171].mxu1 }
 0x4e8   :  { %v6071_v36 = vadd.f32 %v6070_v33, %v6069_v27 }
 0x4e9   :  { %4798 = vst.msk [vmem:[%s12496_s2 + $0x7a0] sm:$0xff] %vm4553_vm1, %v4495_v34  ;;  %v5297_v37 = vsel %vm4553_vm1, %v4495_v34, 0.0  ;;  %v5573_v38 = vmul.f32 %v4495_v34, %v4495_v34  ;;  %v4519_v39 = vpop.f32.mrb[242].mxu0 }
 0x4ea   :  { %v5298_v40 = vadd.f32 %v5297_v37, %v5296_v31  ;;  %v3154_v41 = vpop.f32.mrb[172].mxu1  ;;  %v4521_v42 = vpop.f32.mrb[243].mxu0 }
 0x4eb   :  { %v6072_v43 = vsel %vm4553_vm1, %v5573_v38, 0.0  ;;  %v4500_v44 = vadd.f32 %v4499_v63, %v3154_v41  ;;  %v3156_v45 = vpop.f32.mrb[173].mxu1 }
 0x4ec   :  { %v6073_v46 = vadd.f32 %v6072_v43, %v6071_v36 }
 0x4ed   :  { %4799 = vst.msk [vmem:[%s12496_s2 + $0x7a8] sm:$0xff] %vm4553_vm1, %v4500_v44  ;;  %v5299_v47 = vsel %vm4553_vm1, %v4500_v44, 0.0  ;;  %v5574_v48 = vmul.f32 %v4500_v44, %v4500_v44  ;;  %v4524_v49 = vpop.f32.mrb[244].mxu0 }
 0x4ee   :  { %v5300_v50 = vadd.f32 %v5299_v47, %v5298_v40  ;;  %v3159_v51 = vpop.f32.mrb[174].mxu1  ;;  %v4526_v52 = vpop.f32.mrb[245].mxu0 }
 0x4ef   :  { %v6074_v53 = vsel %vm4553_vm1, %v5574_v48, 0.0  ;;  %v4505_v54 = vadd.f32 %v4504_v10, %v3159_v51  ;;  %v3161_v55 = vpop.f32.mrb[175].mxu1 }
 0x4f0   :  { %v6075_v56 = vadd.f32 %v6074_v53, %v6073_v46 }
 0x4f1   :  { %4800 = vst.msk [vmem:[%s12496_s2 + $0x7b0] sm:$0xff] %vm4553_vm1, %v4505_v54  ;;  %v5301_v57 = vsel %vm4553_vm1, %v4505_v54, 0.0  ;;  %v5575_v58 = vmul.f32 %v4505_v54, %v4505_v54  ;;  %v4529_v59 = vpop.f32.mrb[246].mxu0 }
 0x4f2   :  { %v5302_v60 = vadd.f32 %v5301_v57, %v5300_v50  ;;  %v3164_v61 = vpop.f32.mrb[176].mxu1  ;;  %v4531_v62 = vpop.f32.mrb[247].mxu0 }
 0x4f3   :  { %v6076_v63 = vsel %vm4553_vm1, %v5575_v58, 0.0  ;;  %v4510_v0 = vadd.f32 %v4509_v21, %v3164_v61  ;;  %v3166_v1 = vpop.f32.mrb[177].mxu1 }
 0x4f4   :  { %v6077_v2 = vadd.f32 %v6076_v63, %v6075_v56 }
 0x4f5   :  { %4801 = vst.msk [vmem:[%s12496_s2 + $0x7b8] sm:$0xff] %vm4553_vm1, %v4510_v0  ;;  %v5303_v4 = vsel %vm4553_vm1, %v4510_v0, 0.0  ;;  %v5576_v5 = vmul.f32 %v4510_v0, %v4510_v0  ;;  %v4534_v7 = vpop.f32.mrb[248].mxu0 }
 0x4f6   :  { %v5304_v8 = vadd.f32 %v5303_v4, %v5302_v60  ;;  %v3169_v6 = vpop.f32.mrb[178].mxu1  ;;  %v4536_v9 = vpop.f32.mrb[249].mxu0 }
 0x4f7   :  { %v6078_v10 = vsel %vm4553_vm1, %v5576_v5, 0.0  ;;  %v4515_v11 = vadd.f32 %v4514_v30, %v3169_v6  ;;  %v3171_v12 = vpop.f32.mrb[179].mxu1 }
 0x4f8   :  { %v6079_v13 = vadd.f32 %v6078_v10, %v6077_v2 }
 0x4f9   :  { %4802 = vst.msk [vmem:[%s12496_s2 + $0x7c0] sm:$0xff] %vm4553_vm1, %v4515_v11  ;;  %v5305_v14 = vsel %vm4553_vm1, %v4515_v11, 0.0  ;;  %v5577_v15 = vmul.f32 %v4515_v11, %v4515_v11  ;;  %v4539_v16 = vpop.f32.mrb[250].mxu0 }
 0x4fa   :  { %v5306_v17 = vadd.f32 %v5305_v14, %v5304_v8  ;;  %v3174_v18 = vpop.f32.mrb[180].mxu1  ;;  %v4541_v20 = vpop.f32.mrb[251].mxu0 }
 0x4fb   :  { %v6080_v21 = vsel %vm4553_vm1, %v5577_v15, 0.0  ;;  %v4520_v22 = vadd.f32 %v4519_v39, %v3174_v18  ;;  %v3176_v19 = vpop.f32.mrb[181].mxu1 }
 0x4fc   :  { %v6081_v23 = vadd.f32 %v6080_v21, %v6079_v13 }
 0x4fd   :  { %4803 = vst.msk [vmem:[%s12496_s2 + $0x7c8] sm:$0xff] %vm4553_vm1, %v4520_v22  ;;  %v5307_v24 = vsel %vm4553_vm1, %v4520_v22, 0.0  ;;  %v5578_v25 = vmul.f32 %v4520_v22, %v4520_v22  ;;  %v4544_v26 = vpop.f32.mrb[252].mxu0 }
 0x4fe   :  { %v5308_v27 = vadd.f32 %v5307_v24, %v5306_v17  ;;  %v3179_v28 = vpop.f32.mrb[182].mxu1  ;;  %v4546_v29 = vpop.f32.mrb[253].mxu0 }
 0x4ff   :  { %v6082_v30 = vsel %vm4553_vm1, %v5578_v25, 0.0  ;;  %v4525_v31 = vadd.f32 %v4524_v49, %v3179_v28  ;;  %v3181_v3 = vpop.f32.mrb[183].mxu1 }
 0x500   :  { %v6083_v32 = vadd.f32 %v6082_v30, %v6081_v23 }
 0x501   :  { %4804 = vst.msk [vmem:[%s12496_s2 + $0x7d0] sm:$0xff] %vm4553_vm1, %v4525_v31  ;;  %v5309_v33 = vsel %vm4553_vm1, %v4525_v31, 0.0  ;;  %v5579_v34 = vmul.f32 %v4525_v31, %v4525_v31  ;;  %v4549_v35 = vpop.f32.mrb[254].mxu0 }
 0x502   :  { %v5310_v36 = vadd.f32 %v5309_v33, %v5308_v27  ;;  %v3184_v37 = vpop.f32.mrb[184].mxu1  ;;  %v4551_v38 = vpop.f32.mrb[255].mxu0 }
 0x503   :  { %v6084_v39 = vsel %vm4553_vm1, %v5579_v34, 0.0  ;;  %v4530_v40 = vadd.f32 %v4529_v59, %v3184_v37  ;;  %v3186_v41 = vpop.f32.mrb[185].mxu1 }
 0x504   :  { %v6085_v42 = vadd.f32 %v6084_v39, %v6083_v32 }
 0x505   :  { %4805 = vst.msk [vmem:[%s12496_s2 + $0x7d8] sm:$0xff] %vm4553_vm1, %v4530_v40  ;;  %v5311_v43 = vsel %vm4553_vm1, %v4530_v40, 0.0  ;;  %v5580_v44 = vmul.f32 %v4530_v40, %v4530_v40 }
 0x506   :  { %v5312_v45 = vadd.f32 %v5311_v43, %v5310_v36  ;;  %v3189_v46 = vpop.f32.mrb[186].mxu1 }
 0x507   :  { %v6086_v47 = vsel %vm4553_vm1, %v5580_v44, 0.0  ;;  %v4535_v48 = vadd.f32 %v4534_v7, %v3189_v46  ;;  %v3191_v49 = vpop.f32.mrb[187].mxu1 }
 0x508   :  { %v6087_v50 = vadd.f32 %v6086_v47, %v6085_v42 }
 0x509   :  { %4806 = vst.msk [vmem:[%s12496_s2 + $0x7e0] sm:$0xff] %vm4553_vm1, %v4535_v48  ;;  %v5313_v51 = vsel %vm4553_vm1, %v4535_v48, 0.0  ;;  %v5581_v52 = vmul.f32 %v4535_v48, %v4535_v48 }
 0x50a   :  { %v5314_v53 = vadd.f32 %v5313_v51, %v5312_v45  ;;  %v3194_v54 = vpop.f32.mrb[188].mxu1 }
 0x50b   :  { %v6088_v55 = vsel %vm4553_vm1, %v5581_v52, 0.0  ;;  %v4540_v56 = vadd.f32 %v4539_v16, %v3194_v54  ;;  %v3196_v57 = vpop.f32.mrb[189].mxu1 }
 0x50c   :  { %v6089_v58 = vadd.f32 %v6088_v55, %v6087_v50 }
 0x50d   :  { %4807 = vst.msk [vmem:[%s12496_s2 + $0x7e8] sm:$0xff] %vm4553_vm1, %v4540_v56  ;;  %v5315_v59 = vsel %vm4553_vm1, %v4540_v56, 0.0  ;;  %v5582_v60 = vmul.f32 %v4540_v56, %v4540_v56 }
 0x50e   :  { %v5316_v61 = vadd.f32 %v5315_v59, %v5314_v53  ;;  %v3199_v62 = vpop.f32.mrb[190].mxu1 }
 0x50f   :  { %v6090_v63 = vsel %vm4553_vm1, %v5582_v60, 0.0  ;;  %v4545_v0 = vadd.f32 %v4544_v26, %v3199_v62  ;;  %v3201_v1 = vpop.f32.mrb[191].mxu1 }
 0x510   :  { %v6091_v2 = vadd.f32 %v6090_v63, %v6089_v58 }
 0x511   :  { %4808 = vst.msk [vmem:[%s12496_s2 + $0x7f0] sm:$0xff] %vm4553_vm1, %v4545_v0  ;;  %v5317_v4 = vsel %vm4553_vm1, %v4545_v0, 0.0  ;;  %v5583_v5 = vmul.f32 %v4545_v0, %v4545_v0 }
 0x512   :  { %v5318_v7 = vadd.f32 %v5317_v4, %v5316_v61  ;;  %v3204_v8 = vpop.f32.mrb[192].mxu1 }
 0x513   :  { %v6092_v6 = vsel %vm4553_vm1, %v5583_v5, 0.0  ;;  %v4550_v9 = vadd.f32 %v4549_v35, %v3204_v8  ;;  %v3206_v10 = vpop.f32.mrb[193].mxu1 }
 0x514   :  { %v6093_v11 = vadd.f32 %v6092_v6, %v6091_v2 }
 0x515   :  { %4809 = vst.msk [vmem:[%s12496_s2 + $0x7f8] sm:$0xff] %vm4553_vm1, %v4550_v9  ;;  %v5319_v12 = vsel %vm4553_vm1, %v4550_v9, 0.0  ;;  %v5584_v13 = vmul.f32 %v4550_v9, %v4550_v9  ;;  %s6781_s2 = smov [#allocation4]  }
 0x516   :  { %v5320_v14 = vadd.f32 %v5319_v12, %v5318_v7  ;;  %s6121_s1 = sshll.u32 %s6781_s2, 4  ;;  %s12461_s1 = int_to_ptr.vmem [resolvable:$true] %s6121_s1 }
 0x517   :  { %v6094_v15 = vsel %vm4553_vm1, %v5584_v13, 0.0 }
 0x518   :  { %v5321_v16 = vrot.slane %v5320_v14, 4  ;;  %v6095_v17 = vadd.f32 %v6094_v15, %v6093_v11 }
 0x51a   :  { %v5322_v18 = vadd.f32 %v5321_v16, %v5320_v14  ;;  %v6096_v20 = vrot.slane %v6095_v17, 4 }
 0x51c   :  { %v5323_v21 = vrot.slane %v5322_v18, 2  ;;  %v6097_v22 = vadd.f32 %v6096_v20, %v6095_v17 }
 0x51e   :  { %v5324_v19 = vadd.f32 %v5323_v21, %v5322_v18  ;;  %v6098_v23 = vrot.slane %v6097_v22, 2 }
 0x520   :  { %v5325_v24 = vrot.slane %v5324_v19, 1  ;;  %v6099_v25 = vadd.f32 %v6098_v23, %v6097_v22 }
 0x522   :  { %v5326_v26 = vadd.f32 %v5325_v24, %v5324_v19  ;;  %v6100_v27 = vrot.slane %v6099_v25, 1 }
 0x524   :  { %5328 = vst.msk [vmem:[#allocation2] sm:$0x1] %vm5327_vm2, %v5326_v26  ;;  %v6101_v28 = vadd.f32 %v6100_v27, %v6099_v25 }
 0x525   :  { %6742 = shalt.err (!%p6739_p4)
}
 0x526   :  { %s6743_s16 = scalar_lea.hbm %s12497_s3, 16 }
 0x527   :  { %p6744_p5 = scmp.ne.s32.totalorder %s12497_s3, %s6743_s16  ;;  %p6747_p6 = scmp.lt.u32.totalorder %s6743_s16, %s12497_s3 }
 0x529   :  { %p6749_p7 = pnand %p6747_p6, %p6744_p5 }
 0x52b   :  { %6752 = shalt.err (!%p6749_p7)
}
 0x52c   :  { %6114 = dma.vmem_to_hbm [thread:$0]  %s6112_s12, 16, %s12497_s3, [#allocation3]   ;;  %6102 = vst.msk [vmem:[#allocation4] sm:$0x1] %vm5327_vm2, %v6101_v28 }
 0x52d   :  { %s6753_s23 = scalar_lea.vmem %s12461_s1, 16  ;;  %s6757_s24 = scalar_lea.vmem %s12461_s1, 32 }
 0x52e   :  { %p6754_p8 = scmp.ne.s32.totalorder %s12461_s1, %s6753_s23  ;;  %p6758_p9 = scmp.lt.s32.totalorder %s12461_s1, %s12461_s1 }
 0x52f   :  { %p6759_p10 = scmp.lt.s32.totalorder %s6757_s24, %s6753_s23 }
 0x531   :  { %p6760_p11 = por %p6759_p10, %p6758_p9 }
 0x533   :  { %p6761_p12 = pnand %p6760_p11, %p6754_p8 }
 0x535   :  { %6764 = shalt.err (!%p6761_p12)
}
 0x536   :  { %s6765_s27 = scalar_lea.hbm %s12498_s4, 16 }
 0x537   :  { %p6766_p13 = scmp.ne.s32.totalorder %s12498_s4, %s6765_s27  ;;  %p6769_p0 = scmp.lt.u32.totalorder %s6765_s27, %s12498_s4 }
 0x539   :  { %p6771_p1 = pnand %p6769_p0, %p6766_p13 }
 0x53b   :  { %6774 = shalt.err (!%p6771_p1)
}
 0x53c   :  { %6124 = dma.vmem_to_hbm [thread:$0]  %s12461_s1, 16, %s12498_s4, [#allocation5]  }
 0x53d   :  { %6775 = dma.done.wait [#allocation3], 16  }
 0x53e   :  { %6776 = vsyncadd [#allocation3], 4294967280 }
 0x53f   :  { %6777 = dma.done.wait [#allocation5], 16  }
 0x540   :  { %6778 = vsyncadd [#allocation5], 4294967280 }
 0x541   :  { %6133 = vsyncpa [#allocation3], 1 }
 0x542   :  { %6134 = vsyncpa [#allocation5], 1 }

</bundles_post_ra>
